<compile_context>
chip_gen: v7x
topology: tpu7x:2x2x1
jax: 0.10.0
libtpu: 0.0.40
codegen_flags: <defaults>
</compile_context>

<pallas_src>
import jax
import jax.numpy as jnp
import numpy as np
from jax.experimental import pallas as pl

# ----- hyperparameters (PaulingNet defaults, small synthetic problem size) -----
N_FEATURES = 128      # n_features
RESOLUTION = 20       # RadialBesselLayer resolution
N_INTERAX  = 3        # number of MessagePassing iterations
CUTOFF     = 5.0
SHELL_CUTOFF = 10.0
P_CUT      = 9        # PolynomialCutoff p
MEAN, STDEV = 0.0, 1.0  # normalizer -> ScaleShift(mean, stdev)

B   = 2               # batch
A   = 8               # atoms
NN  = A - 1           # real neighbors per atom (all other atoms)
NNP = 8               # neighbor axis padded to a full sublane group of 8
BA  = B * A           # 16  flattened atom rows
BAN = B * A * NNP     # 128 flattened (padded) pair rows


# ------------------------------ Pallas kernel ---------------------------------
def paulingnet_kernel(*refs):
    (a0_ref, rbfms_ref, dinv_ref, g_ref, am_ref) = refs[:5]
    params = refs[5:5 + 30]
    o_q, o_b, o_e = refs[5 + 30:]

    (Wa1, ba1, Wa2, ba2,
     Wq1, bq1, wq2, bq2,
     Wqm1, bqm1, Wqm2, bqm2,
     Wb1, bb1, wb2, bb2,
     Wbm1, bbm1, Wbm2, bbm2,
     We1, be1, We2, be2,
     Wp1, bp1, Wp2, bp2, wp3, bp3) = params

    f32, bf16 = jnp.float32, jnp.bfloat16

    a  = a0_ref[...]                       # [BA, F]   f32 atom state
    G  = g_ref[...]                        # [BAN, BA] bf16 one-hot neighbor gather
    am = am_ref[...]                       # [BA, 1]   atom mask
    # hoisted lane-broadcast of 1/D (zero for masked / padded pairs)
    d_inv_b = jnp.broadcast_to(dinv_ref[...], (BAN, N_FEATURES))

    def dense(x_bf, W, b, act):
        # bf16 operands on the MXU, f32 accumulate, f32 bias
        y = jnp.dot(x_bf, W, preferred_element_type=f32) + b
        return jax.nn.silu(y) if act else y

    def dense1(x, w_row, b):               # Dense(F, 1): VPU mul + cross-lane sum
        return jnp.sum(x * w_row, axis=-1, keepdims=True) + b

    q_dyn = jnp.zeros((BA, N_FEATURES), f32)
    q_lat = jnp.zeros((BA, 1), f32)
    b_dyn = jnp.zeros((BAN, N_FEATURES), f32)
    b_lat = jnp.zeros((BAN, 1), f32)

    for i in range(N_INTERAX):                                  # static unroll
        a_bf = a.astype(bf16)

        # ---- messages: msij = ai * aj * (phi_rbf(rbf) * fcut) ----
        a_ms = dense(dense(a_bf, Wa1[i], ba1[i], True).astype(bf16),
                     Wa2[i], ba2[i], False)                     # [BA, F]
        aj = jnp.dot(G, a_ms.astype(bf16),
                     preferred_element_type=f32)                # [BAN, F] gather
        tmp = (aj * rbfms_ref[i]).reshape(BA, NNP, N_FEATURES)
        # ai via sublane broadcast of a_ms over the 8-wide neighbor axis
        msij = (a_ms[:, None, :] * tmp).reshape(BAN, N_FEATURES)

        # ---- bonds (consume msij, then let it die) ----
        msij_bf = msij.astype(bf16)
        bij = dense1(dense(msij_bf, Wb1[i], bb1[i], True),
                     wb2[i], bb2[i])                            # [BAN, 1]
        b_lat = b_lat + bij
        b_dyn = b_dyn + bij * dense(
            dense(msij_bf, Wbm1[i], bbm1[i], True).astype(bf16),
            Wbm2[i], bbm2[i], False)

        # ---- charges ----
        q = dense1(dense(a_bf, Wq1[i], bq1[i], True), wq2[i], bq2[i])   # [BA, 1]
        q_lat = q_lat + q
        q_dyn = q_dyn + q * dense(
            dense(a_bf, Wqm1[i], bqm1[i], True).astype(bf16),
            Wqm2[i], bqm2[i], False)
        qj = jnp.dot(G, q_dyn.astype(bf16),
                     preferred_element_type=f32)                # [BAN, F] gather
        qiqj = (q_dyn[:, None, :] * qj.reshape(BA, NNP, N_FEATURES)
                ).reshape(BAN, N_FEATURES)

        # ---- electrostatic-like update: sum over the 8-wide neighbor axis ----
        contrib = d_inv_b * (qiqj - b_dyn)                      # [BAN, F]
        de = jnp.sum(contrib.reshape(BA, NNP, N_FEATURES), axis=1)   # [BA, F]
        de = dense(dense(a_bf, We1[i], be1[i], True).astype(bf16),
                   We2[i], be2[i], False) * de
        a = a + de

    # ---- AtomicProperty head: Dense(F,128,silu) -> Dense(128,64,silu) -> Dense(64,1) ----
    h = dense(a.astype(bf16), Wp1[...], bp1[...], True)         # [BA, 128]
    h = dense(h.astype(bf16), Wp2[...], bp2[...], True)         # [BA, 64]
    Ei = (jnp.sum(h * wp3[...], axis=-1, keepdims=True) + bp3[...]) * am   # [BA, 1]

    # per-batch energy (static B, tiny sublane reductions)
    e_rows = [jnp.sum(Ei[bi * A:(bi + 1) * A, :], axis=0, keepdims=True)
              for bi in range(B)]
    E = jnp.concatenate(e_rows, axis=0)                         # [B, 1]

    o_q[...] = q_lat * am                                       # q_latent * AM
    o_b[...] = b_lat                                            # b_latent (NM mask applied outside)
    o_e[...] = E * STDEV + MEAN                                 # ScaleShift


# ------------------------------ parameter init ---------------------------------
def init_params(key):
    keys = iter(jax.random.split(key, 256))
    f32, bf16 = jnp.float32, jnp.bfloat16

    def lin(fi, fo):
        w = jax.random.normal(next(keys), (fi, fo), f32) / jnp.sqrt(jnp.float32(fi))
        b = 0.01 * jax.random.normal(next(keys), (1, fo), f32)
        return w, b

    def stack_lin(fi, fo):     # per-iteration stacked Dense; weights in bf16
        ws, bs = zip(*[lin(fi, fo) for _ in range(N_INTERAX)])
        return jnp.stack(ws).astype(bf16), jnp.stack(bs)

    def stack_lin1(fi):        # Dense(fi, 1); weight stored transposed [1, fi], f32 (VPU path)
        ws, bs = [], []
        for _ in range(N_INTERAX):
            w, b = lin(fi, 1)
            ws.append(w.T)
            bs.append(b)
        return jnp.stack(ws), jnp.stack(bs)

    F_, R_ = N_FEATURES, RESOLUTION

    # phi_rbf weights stay f32: they are consumed by the XLA-side precompute
    Wrbf_l, brbf_l = zip(*[lin(R_, F_) for _ in range(N_INTERAX)])
    Wrbf, brbf = jnp.stack(Wrbf_l), jnp.stack(brbf_l)           # [3,R,F], [3,1,F]

    Wa1, ba1 = stack_lin(F_, F_); Wa2, ba2 = stack_lin(F_, F_)
    Wq1, bq1 = stack_lin(F_, F_); wq2, bq2 = stack_lin1(F_)
    Wqm1, bqm1 = stack_lin(F_, F_); Wqm2, bqm2 = stack_lin(F_, F_)
    Wb1, bb1 = stack_lin(F_, F_); wb2, bb2 = stack_lin1(F_)
    Wbm1, bbm1 = stack_lin(F_, F_); Wbm2, bbm2 = stack_lin(F_, F_)
    We1, be1 = stack_lin(F_, F_); We2, be2 = stack_lin(F_, F_)

    Wp1, bp1 = lin(F_, 128); Wp1 = Wp1.astype(bf16)
    Wp2, bp2 = lin(128, 64); Wp2 = Wp2.astype(bf16)
    w3, b3 = lin(64, 1)
    wp3, bp3 = w3.T, b3

    emb = 0.1 * jax.random.normal(next(keys), (10, N_FEATURES), f32)
    emb = emb.at[0].set(0.0)   # nn.Embedding(10, 128, padding_idx=0)

    plist = [Wa1, ba1, Wa2, ba2, Wq1, bq1, wq2, bq2,
             Wqm1, bqm1, Wqm2, bqm2, Wb1, bb1, wb2, bb2,
             Wbm1, bbm1, Wbm2, bbm2, We1, be1, We2, be2,
             Wp1, bp1, Wp2, bp2, wp3, bp3]
    return {'plist': plist, 'embedding': emb, 'rbf_w': (Wrbf, brbf)}


# ------------------------------ forward wrapper ---------------------------------
def run_paulingnet(data, params):
    R, Z, N, AM, NM = data['R'], data['Z'], data['N'], data['AM'], data['NM']
    emb = params['embedding']
    Wrbf, brbf = params['rbf_w']

    # ShellProvider (simplified): gather neighbor positions, distances, vectors.
    Rj = jax.vmap(lambda r, n: r[n])(R, N)                 # [B, A, NN, 3]
    V = Rj - R[:, :, None, :]
    D = jnp.sqrt(jnp.sum(V * V, axis=-1))
    nm = NM * (D <= SHELL_CUTOFF).astype(jnp.float32)
    D = D * nm
    V = V * nm[..., None]

    # pad the neighbor axis NN -> NNP (padded column fully masked: D=0 -> d_inv=0)
    pad = NNP - NN
    D_p = jnp.pad(D, ((0, 0), (0, 0), (0, pad)))           # [B, A, NNP]
    N_p = jnp.pad(N, ((0, 0), (0, 0), (0, pad)))           # [B, A, NNP] int32

    # RadialBesselLayer: sqrt(2/rc) * sin(n*pi*d/rc) / d   (safe limit at d=0)
    n_idx = jnp.arange(1, RESOLUTION + 1, dtype=jnp.float32)
    freqs = n_idx * jnp.pi / CUTOFF
    d_exp = D_p[..., None]
    norm = jnp.sqrt(2.0 / CUTOFF)
    safe_d = jnp.where(d_exp > 0, d_exp, 1.0)
    rbf = jnp.where(d_exp > 0, norm * jnp.sin(freqs * d_exp) / safe_d, norm * freqs)

    # PolynomialCutoff(cutoff, p=9)
    x = D_p / CUTOFF
    p = float(P_CUT)
    x9 = x ** P_CUT
    x10 = x9 * x
    x11 = x10 * x
    fcut = (1.0 - (p + 1.0) * (p + 2.0) / 2.0 * x9
            + p * (p + 2.0) * x10 - p * (p + 1.0) / 2.0 * x11)
    fcut = fcut * (D_p < CUTOFF).astype(jnp.float32)        # [B, A, NNP]

    # fold phi_rbf + cutoff into a per-iteration precomputed message basis
    rbf_flat = rbf.reshape(BAN, RESOLUTION)
    fcut_flat = fcut.reshape(BAN, 1)
    rbf_ms_all = jnp.einsum('kr,irf->ikf', rbf_flat, Wrbf) + brbf      # [3, BAN, F]
    rbf_ms_all = (rbf_ms_all * fcut_flat[None]).astype(jnp.float32)

    # torch.reciprocal(D) + nan_to_num(posinf=0.0); zero for masked/padded pairs
    d_inv = jnp.where(D_p > 0, 1.0 / jnp.maximum(D_p, 1e-12), 0.0).reshape(BAN, 1)

    # one-hot gather matrix for the data-dependent aj/qj lookup (batch-offset indices)
    glob_idx = (N_p + (jnp.arange(B, dtype=jnp.int32) * A)[:, None, None]).reshape(BAN)
    G = jax.nn.one_hot(glob_idx, BA, dtype=jnp.bfloat16)    # [BAN, BA]

    a0 = emb[Z].astype(jnp.float32).reshape(BA, N_FEATURES)  # [BA, F]
    am_flat = AM.astype(jnp.float32).reshape(BA, 1)

    inputs = [a0, rbf_ms_all, d_inv, G, am_flat] + params['plist']

    out_shapes = (
        jax.ShapeDtypeStruct((BA, 1), jnp.float32),     # q_latent (flat atoms)
        jax.ShapeDtypeStruct((BAN, 1), jnp.float32),    # b_latent (flat padded pairs)
        jax.ShapeDtypeStruct((B, 1), jnp.float32),      # E per batch element
    )

    # single invocation (no grid): whole arrays live in VMEM, weights DMA'd once
    q_out, b_out, e_out = pl.pallas_call(
        paulingnet_kernel,
        out_shape=out_shapes,
    )(*inputs)

    Q = q_out.reshape(B, A)                                                 # [B, A]
    B_pair = b_out.reshape(B, A, NNP)[:, :, :NN] * (nm != 0).astype(jnp.float32)
    E = e_out                                                               # [B, 1]

    # TODO(synk): F = -dE/dR requires autodiff through the Pallas kernel (no VJP registered); omitted.
    return {'R': R, 'Z': Z, 'N': N, 'NM': nm, 'D': D, 'V': V,
            'Q': Q, 'B': B_pair, 'E': E}


# ------------------------------------ main --------------------------------------
if __name__ == "__main__":
    key = jax.random.PRNGKey(0)
    k1, k2, k3 = jax.random.split(key, 3)
    params = init_params(k1)

    R = 3.0 * jax.random.uniform(k2, (B, A, 3), jnp.float32)
    Z = jax.random.randint(k3, (B, A), 1, 10)
    # neighbor list: every other atom
    idx = np.arange(A)
    N_single = np.stack([np.concatenate([idx[:i], idx[i + 1:]]) for i in range(A)])  # [A, NN]
    N = jnp.broadcast_to(jnp.asarray(N_single, jnp.int32), (B, A, NN))
    AM = jnp.ones((B, A), jnp.float32)
    NM = jnp.ones((B, A, NN), jnp.float32)

    data = {'R': R, 'Z': Z, 'N': N, 'AM': AM, 'NM': NM}
    out = run_paulingnet(data, params)
    jax.block_until_ready(out)
    print("KERNEL_OK")
</pallas_src>

<mosaic_0001>
module attributes {stable_mosaic.version = 11 : i64} {
  func.func @paulingnet_kernel(%arg0: memref<16x128xf32, #tpu.memory_space<vmem>>, %arg1: memref<3x128x128xf32, #tpu.memory_space<vmem>>, %arg2: memref<128x1xf32, #tpu.memory_space<vmem>>, %arg3: memref<128x16xbf16, #tpu.memory_space<vmem>>, %arg4: memref<16x1xf32, #tpu.memory_space<vmem>>, %arg5: memref<3x128x128xbf16, #tpu.memory_space<vmem>>, %arg6: memref<3x1x128xf32, #tpu.memory_space<vmem>>, %arg7: memref<3x128x128xbf16, #tpu.memory_space<vmem>>, %arg8: memref<3x1x128xf32, #tpu.memory_space<vmem>>, %arg9: memref<3x128x128xbf16, #tpu.memory_space<vmem>>, %arg10: memref<3x1x128xf32, #tpu.memory_space<vmem>>, %arg11: memref<3x1x128xf32, #tpu.memory_space<vmem>>, %arg12: memref<3x1x1xf32, #tpu.memory_space<vmem>>, %arg13: memref<3x128x128xbf16, #tpu.memory_space<vmem>>, %arg14: memref<3x1x128xf32, #tpu.memory_space<vmem>>, %arg15: memref<3x128x128xbf16, #tpu.memory_space<vmem>>, %arg16: memref<3x1x128xf32, #tpu.memory_space<vmem>>, %arg17: memref<3x128x128xbf16, #tpu.memory_space<vmem>>, %arg18: memref<3x1x128xf32, #tpu.memory_space<vmem>>, %arg19: memref<3x1x128xf32, #tpu.memory_space<vmem>>, %arg20: memref<3x1x1xf32, #tpu.memory_space<vmem>>, %arg21: memref<3x128x128xbf16, #tpu.memory_space<vmem>>, %arg22: memref<3x1x128xf32, #tpu.memory_space<vmem>>, %arg23: memref<3x128x128xbf16, #tpu.memory_space<vmem>>, %arg24: memref<3x1x128xf32, #tpu.memory_space<vmem>>, %arg25: memref<3x128x128xbf16, #tpu.memory_space<vmem>>, %arg26: memref<3x1x128xf32, #tpu.memory_space<vmem>>, %arg27: memref<3x128x128xbf16, #tpu.memory_space<vmem>>, %arg28: memref<3x1x128xf32, #tpu.memory_space<vmem>>, %arg29: memref<128x128xbf16, #tpu.memory_space<vmem>>, %arg30: memref<1x128xf32, #tpu.memory_space<vmem>>, %arg31: memref<128x64xbf16, #tpu.memory_space<vmem>>, %arg32: memref<1x64xf32, #tpu.memory_space<vmem>>, %arg33: memref<1x64xf32, #tpu.memory_space<vmem>>, %arg34: memref<1x1xf32, #tpu.memory_space<vmem>>, %arg35: memref<16x1xf32, #tpu.memory_space<vmem>>, %arg36: memref<128x1xf32, #tpu.memory_space<vmem>>, %arg37: memref<2x1xf32, #tpu.memory_space<vmem>>) attributes {dimension_semantics = [], scalar_prefetch = 0 : i64, scratch_operands = 0 : i64, tpu.core_type = #tpu.core_type<tc>} {
    %c0 = arith.constant 0 : index
    %c0_0 = arith.constant 0 : index
    %0 = vector.load %arg0[%c0, %c0_0] : memref<16x128xf32, #tpu.memory_space<vmem>>, vector<16x128xf32>
    %c0_1 = arith.constant 0 : index
    %c0_2 = arith.constant 0 : index
    %1 = vector.load %arg3[%c0_1, %c0_2] : memref<128x16xbf16, #tpu.memory_space<vmem>>, vector<128x16xbf16>
    %c0_3 = arith.constant 0 : index
    %c0_4 = arith.constant 0 : index
    %2 = vector.load %arg4[%c0_3, %c0_4] : memref<16x1xf32, #tpu.memory_space<vmem>>, vector<16x1xf32>
    %c0_5 = arith.constant 0 : index
    %c0_6 = arith.constant 0 : index
    %3 = vector.load %arg2[%c0_5, %c0_6] : memref<128x1xf32, #tpu.memory_space<vmem>>, vector<128x1xf32>
    %4 = vector.shape_cast %3 : vector<128x1xf32> to vector<128x1xf32>
    %5 = vector.broadcast %4 : vector<128x1xf32> to vector<128x128xf32>
    %cst = arith.constant 0.000000e+00 : f32
    %6 = vector.broadcast %cst : f32 to vector<16x128xf32>
    %cst_7 = arith.constant 0.000000e+00 : f32
    %7 = vector.broadcast %cst_7 : f32 to vector<16x1xf32>
    %cst_8 = arith.constant 0.000000e+00 : f32
    %8 = vector.broadcast %cst_8 : f32 to vector<128x128xf32>
    %cst_9 = arith.constant 0.000000e+00 : f32
    %9 = vector.broadcast %cst_9 : f32 to vector<128x1xf32>
    %10 = arith.truncf %0 : vector<16x128xf32> to vector<16x128xbf16>
    %c0_10 = arith.constant 0 : index
    %c0_11 = arith.constant 0 : index
    %c0_12 = arith.constant 0 : index
    %11 = vector.load %arg5[%c0_10, %c0_11, %c0_12] : memref<3x128x128xbf16, #tpu.memory_space<vmem>>, vector<1x128x128xbf16>
    %12 = vector.shape_cast %11 : vector<1x128x128xbf16> to vector<128x128xbf16>
    %c0_13 = arith.constant 0 : index
    %c0_14 = arith.constant 0 : index
    %c0_15 = arith.constant 0 : index
    %13 = vector.load %arg6[%c0_13, %c0_14, %c0_15] : memref<3x1x128xf32, #tpu.memory_space<vmem>>, vector<1x1x128xf32>
    %14 = vector.shape_cast %13 : vector<1x1x128xf32> to vector<1x128xf32>
    %cst_16 = arith.constant dense<0.000000e+00> : vector<16x128xf32>
    %15 = tpu.matmul %10, %12, %cst_16 {dimension_numbers = #tpu.dot_dimension_numbers<[1], [0], [0], [1], [0, 0, 1, 1], [], []>} : vector<16x128xbf16>, vector<128x128xbf16>, vector<16x128xf32> -> vector<16x128xf32>
    %16 = vector.broadcast %14 : vector<1x128xf32> to vector<16x128xf32>
    %17 = arith.addf %15, %16 : vector<16x128xf32>
    %18 = arith.negf %17 : vector<16x128xf32>
    %19 = math.exp %18 : vector<16x128xf32>
    %cst_17 = arith.constant 1.000000e+00 : f32
    %20 = vector.broadcast %cst_17 : f32 to vector<16x128xf32>
    %21 = arith.addf %20, %19 : vector<16x128xf32>
    %22 = arith.divf %20, %21 : vector<16x128xf32>
    %23 = arith.mulf %17, %22 : vector<16x128xf32>
    %24 = arith.truncf %23 : vector<16x128xf32> to vector<16x128xbf16>
    %c0_18 = arith.constant 0 : index
    %c0_19 = arith.constant 0 : index
    %c0_20 = arith.constant 0 : index
    %25 = vector.load %arg7[%c0_18, %c0_19, %c0_20] : memref<3x128x128xbf16, #tpu.memory_space<vmem>>, vector<1x128x128xbf16>
    %26 = vector.shape_cast %25 : vector<1x128x128xbf16> to vector<128x128xbf16>
    %c0_21 = arith.constant 0 : index
    %c0_22 = arith.constant 0 : index
    %c0_23 = arith.constant 0 : index
    %27 = vector.load %arg8[%c0_21, %c0_22, %c0_23] : memref<3x1x128xf32, #tpu.memory_space<vmem>>, vector<1x1x128xf32>
    %28 = vector.shape_cast %27 : vector<1x1x128xf32> to vector<1x128xf32>
    %cst_24 = arith.constant dense<0.000000e+00> : vector<16x128xf32>
    %29 = tpu.matmul %24, %26, %cst_24 {dimension_numbers = #tpu.dot_dimension_numbers<[1], [0], [0], [1], [0, 0, 1, 1], [], []>} : vector<16x128xbf16>, vector<128x128xbf16>, vector<16x128xf32> -> vector<16x128xf32>
    %30 = vector.broadcast %28 : vector<1x128xf32> to vector<16x128xf32>
    %31 = arith.addf %29, %30 : vector<16x128xf32>
    %32 = arith.truncf %31 : vector<16x128xf32> to vector<16x128xbf16>
    %cst_25 = arith.constant dense<0.000000e+00> : vector<128x128xf32>
    %33 = tpu.matmul %1, %32, %cst_25 {dimension_numbers = #tpu.dot_dimension_numbers<[1], [0], [0], [1], [0, 0, 1, 1], [], []>} : vector<128x16xbf16>, vector<16x128xbf16>, vector<128x128xf32> -> vector<128x128xf32>
    %c0_26 = arith.constant 0 : index
    %c0_27 = arith.constant 0 : index
    %c0_28 = arith.constant 0 : index
    %34 = vector.load %arg1[%c0_26, %c0_27, %c0_28] : memref<3x128x128xf32, #tpu.memory_space<vmem>>, vector<1x128x128xf32>
    %35 = vector.shape_cast %34 : vector<1x128x128xf32> to vector<128x128xf32>
    %36 = arith.mulf %33, %35 : vector<128x128xf32>
    %37 = vector.shape_cast %36 : vector<128x128xf32> to vector<16x8x128xf32>
    %38 = vector.shape_cast %31 : vector<16x128xf32> to vector<16x1x128xf32>
    %39 = vector.broadcast %38 : vector<16x1x128xf32> to vector<16x8x128xf32>
    %40 = arith.mulf %39, %37 : vector<16x8x128xf32>
    %41 = vector.shape_cast %40 : vector<16x8x128xf32> to vector<128x128xf32>
    %42 = arith.truncf %41 : vector<128x128xf32> to vector<128x128xbf16>
    %c0_29 = arith.constant 0 : index
    %c0_30 = arith.constant 0 : index
    %c0_31 = arith.constant 0 : index
    %43 = vector.load %arg17[%c0_29, %c0_30, %c0_31] : memref<3x128x128xbf16, #tpu.memory_space<vmem>>, vector<1x128x128xbf16>
    %44 = vector.shape_cast %43 : vector<1x128x128xbf16> to vector<128x128xbf16>
    %c0_32 = arith.constant 0 : index
    %c0_33 = arith.constant 0 : index
    %c0_34 = arith.constant 0 : index
    %45 = vector.load %arg18[%c0_32, %c0_33, %c0_34] : memref<3x1x128xf32, #tpu.memory_space<vmem>>, vector<1x1x128xf32>
    %46 = vector.shape_cast %45 : vector<1x1x128xf32> to vector<1x128xf32>
    %cst_35 = arith.constant dense<0.000000e+00> : vector<128x128xf32>
    %47 = tpu.matmul %42, %44, %cst_35 {dimension_numbers = #tpu.dot_dimension_numbers<[1], [0], [0], [1], [0, 0, 1, 1], [], []>} : vector<128x128xbf16>, vector<128x128xbf16>, vector<128x128xf32> -> vector<128x128xf32>
    %48 = vector.broadcast %46 : vector<1x128xf32> to vector<128x128xf32>
    %49 = arith.addf %47, %48 : vector<128x128xf32>
    %50 = arith.negf %49 : vector<128x128xf32>
    %51 = math.exp %50 : vector<128x128xf32>
    %cst_36 = arith.constant 1.000000e+00 : f32
    %52 = vector.broadcast %cst_36 : f32 to vector<128x128xf32>
    %53 = arith.addf %52, %51 : vector<128x128xf32>
    %54 = arith.divf %52, %53 : vector<128x128xf32>
    %55 = arith.mulf %49, %54 : vector<128x128xf32>
    %c0_37 = arith.constant 0 : index
    %c0_38 = arith.constant 0 : index
    %c0_39 = arith.constant 0 : index
    %56 = vector.load %arg19[%c0_37, %c0_38, %c0_39] : memref<3x1x128xf32, #tpu.memory_space<vmem>>, vector<1x1x128xf32>
    %57 = vector.shape_cast %56 : vector<1x1x128xf32> to vector<1x128xf32>
    %c0_40 = arith.constant 0 : index
    %c0_41 = arith.constant 0 : index
    %c0_42 = arith.constant 0 : index
    %58 = vector.load %arg20[%c0_40, %c0_41, %c0_42] : memref<3x1x1xf32, #tpu.memory_space<vmem>>, vector<1x1x1xf32>
    %59 = vector.shape_cast %58 : vector<1x1x1xf32> to vector<1x1xf32>
    %60 = vector.broadcast %57 : vector<1x128xf32> to vector<128x128xf32>
    %61 = arith.mulf %55, %60 : vector<128x128xf32>
    %cst_43 = arith.constant dense<0.000000e+00> : vector<128xf32>
    %62 = vector.multi_reduction <add>, %61, %cst_43 [1] : vector<128x128xf32> to vector<128xf32>
    %63 = vector.shape_cast %62 : vector<128xf32> to vector<128x1xf32>
    %64 = vector.broadcast %59 : vector<1x1xf32> to vector<128x1xf32>
    %65 = arith.addf %63, %64 : vector<128x1xf32>
    %66 = arith.addf %9, %65 : vector<128x1xf32>
    %c0_44 = arith.constant 0 : index
    %c0_45 = arith.constant 0 : index
    %c0_46 = arith.constant 0 : index
    %67 = vector.load %arg21[%c0_44, %c0_45, %c0_46] : memref<3x128x128xbf16, #tpu.memory_space<vmem>>, vector<1x128x128xbf16>
    %68 = vector.shape_cast %67 : vector<1x128x128xbf16> to vector<128x128xbf16>
    %c0_47 = arith.constant 0 : index
    %c0_48 = arith.constant 0 : index
    %c0_49 = arith.constant 0 : index
    %69 = vector.load %arg22[%c0_47, %c0_48, %c0_49] : memref<3x1x128xf32, #tpu.memory_space<vmem>>, vector<1x1x128xf32>
    %70 = vector.shape_cast %69 : vector<1x1x128xf32> to vector<1x128xf32>
    %cst_50 = arith.constant dense<0.000000e+00> : vector<128x128xf32>
    %71 = tpu.matmul %42, %68, %cst_50 {dimension_numbers = #tpu.dot_dimension_numbers<[1], [0], [0], [1], [0, 0, 1, 1], [], []>} : vector<128x128xbf16>, vector<128x128xbf16>, vector<128x128xf32> -> vector<128x128xf32>
    %72 = vector.broadcast %70 : vector<1x128xf32> to vector<128x128xf32>
    %73 = arith.addf %71, %72 : vector<128x128xf32>
    %74 = arith.negf %73 : vector<128x128xf32>
    %75 = math.exp %74 : vector<128x128xf32>
    %cst_51 = arith.constant 1.000000e+00 : f32
    %76 = vector.broadcast %cst_51 : f32 to vector<128x128xf32>
    %77 = arith.addf %76, %75 : vector<128x128xf32>
    %78 = arith.divf %76, %77 : vector<128x128xf32>
    %79 = arith.mulf %73, %78 : vector<128x128xf32>
    %80 = arith.truncf %79 : vector<128x128xf32> to vector<128x128xbf16>
    %c0_52 = arith.constant 0 : index
    %c0_53 = arith.constant 0 : index
    %c0_54 = arith.constant 0 : index
    %81 = vector.load %arg23[%c0_52, %c0_53, %c0_54] : memref<3x128x128xbf16, #tpu.memory_space<vmem>>, vector<1x128x128xbf16>
    %82 = vector.shape_cast %81 : vector<1x128x128xbf16> to vector<128x128xbf16>
    %c0_55 = arith.constant 0 : index
    %c0_56 = arith.constant 0 : index
    %c0_57 = arith.constant 0 : index
    %83 = vector.load %arg24[%c0_55, %c0_56, %c0_57] : memref<3x1x128xf32, #tpu.memory_space<vmem>>, vector<1x1x128xf32>
    %84 = vector.shape_cast %83 : vector<1x1x128xf32> to vector<1x128xf32>
    %cst_58 = arith.constant dense<0.000000e+00> : vector<128x128xf32>
    %85 = tpu.matmul %80, %82, %cst_58 {dimension_numbers = #tpu.dot_dimension_numbers<[1], [0], [0], [1], [0, 0, 1, 1], [], []>} : vector<128x128xbf16>, vector<128x128xbf16>, vector<128x128xf32> -> vector<128x128xf32>
    %86 = vector.broadcast %84 : vector<1x128xf32> to vector<128x128xf32>
    %87 = arith.addf %85, %86 : vector<128x128xf32>
    %88 = vector.broadcast %65 : vector<128x1xf32> to vector<128x128xf32>
    %89 = arith.mulf %88, %87 : vector<128x128xf32>
    %90 = arith.addf %8, %89 : vector<128x128xf32>
    %c0_59 = arith.constant 0 : index
    %c0_60 = arith.constant 0 : index
    %c0_61 = arith.constant 0 : index
    %91 = vector.load %arg9[%c0_59, %c0_60, %c0_61] : memref<3x128x128xbf16, #tpu.memory_space<vmem>>, vector<1x128x128xbf16>
    %92 = vector.shape_cast %91 : vector<1x128x128xbf16> to vector<128x128xbf16>
    %c0_62 = arith.constant 0 : index
    %c0_63 = arith.constant 0 : index
    %c0_64 = arith.constant 0 : index
    %93 = vector.load %arg10[%c0_62, %c0_63, %c0_64] : memref<3x1x128xf32, #tpu.memory_space<vmem>>, vector<1x1x128xf32>
    %94 = vector.shape_cast %93 : vector<1x1x128xf32> to vector<1x128xf32>
    %cst_65 = arith.constant dense<0.000000e+00> : vector<16x128xf32>
    %95 = tpu.matmul %10, %92, %cst_65 {dimension_numbers = #tpu.dot_dimension_numbers<[1], [0], [0], [1], [0, 0, 1, 1], [], []>} : vector<16x128xbf16>, vector<128x128xbf16>, vector<16x128xf32> -> vector<16x128xf32>
    %96 = vector.broadcast %94 : vector<1x128xf32> to vector<16x128xf32>
    %97 = arith.addf %95, %96 : vector<16x128xf32>
    %98 = arith.negf %97 : vector<16x128xf32>
    %99 = math.exp %98 : vector<16x128xf32>
    %cst_66 = arith.constant 1.000000e+00 : f32
    %100 = vector.broadcast %cst_66 : f32 to vector<16x128xf32>
    %101 = arith.addf %100, %99 : vector<16x128xf32>
    %102 = arith.divf %100, %101 : vector<16x128xf32>
    %103 = arith.mulf %97, %102 : vector<16x128xf32>
    %c0_67 = arith.constant 0 : index
    %c0_68 = arith.constant 0 : index
    %c0_69 = arith.constant 0 : index
    %104 = vector.load %arg11[%c0_67, %c0_68, %c0_69] : memref<3x1x128xf32, #tpu.memory_space<vmem>>, vector<1x1x128xf32>
    %105 = vector.shape_cast %104 : vector<1x1x128xf32> to vector<1x128xf32>
    %c0_70 = arith.constant 0 : index
    %c0_71 = arith.constant 0 : index
    %c0_72 = arith.constant 0 : index
    %106 = vector.load %arg12[%c0_70, %c0_71, %c0_72] : memref<3x1x1xf32, #tpu.memory_space<vmem>>, vector<1x1x1xf32>
    %107 = vector.shape_cast %106 : vector<1x1x1xf32> to vector<1x1xf32>
    %108 = vector.broadcast %105 : vector<1x128xf32> to vector<16x128xf32>
    %109 = arith.mulf %103, %108 : vector<16x128xf32>
    %cst_73 = arith.constant dense<0.000000e+00> : vector<16xf32>
    %110 = vector.multi_reduction <add>, %109, %cst_73 [1] : vector<16x128xf32> to vector<16xf32>
    %111 = vector.shape_cast %110 : vector<16xf32> to vector<16x1xf32>
    %112 = vector.broadcast %107 : vector<1x1xf32> to vector<16x1xf32>
    %113 = arith.addf %111, %112 : vector<16x1xf32>
    %114 = arith.addf %7, %113 : vector<16x1xf32>
    %c0_74 = arith.constant 0 : index
    %c0_75 = arith.constant 0 : index
    %c0_76 = arith.constant 0 : index
    %115 = vector.load %arg13[%c0_74, %c0_75, %c0_76] : memref<3x128x128xbf16, #tpu.memory_space<vmem>>, vector<1x128x128xbf16>
    %116 = vector.shape_cast %115 : vector<1x128x128xbf16> to vector<128x128xbf16>
    %c0_77 = arith.constant 0 : index
    %c0_78 = arith.constant 0 : index
    %c0_79 = arith.constant 0 : index
    %117 = vector.load %arg14[%c0_77, %c0_78, %c0_79] : memref<3x1x128xf32, #tpu.memory_space<vmem>>, vector<1x1x128xf32>
    %118 = vector.shape_cast %117 : vector<1x1x128xf32> to vector<1x128xf32>
    %cst_80 = arith.constant dense<0.000000e+00> : vector<16x128xf32>
    %119 = tpu.matmul %10, %116, %cst_80 {dimension_numbers = #tpu.dot_dimension_numbers<[1], [0], [0], [1], [0, 0, 1, 1], [], []>} : vector<16x128xbf16>, vector<128x128xbf16>, vector<16x128xf32> -> vector<16x128xf32>
    %120 = vector.broadcast %118 : vector<1x128xf32> to vector<16x128xf32>
    %121 = arith.addf %119, %120 : vector<16x128xf32>
    %122 = arith.negf %121 : vector<16x128xf32>
    %123 = math.exp %122 : vector<16x128xf32>
    %cst_81 = arith.constant 1.000000e+00 : f32
    %124 = vector.broadcast %cst_81 : f32 to vector<16x128xf32>
    %125 = arith.addf %124, %123 : vector<16x128xf32>
    %126 = arith.divf %124, %125 : vector<16x128xf32>
    %127 = arith.mulf %121, %126 : vector<16x128xf32>
    %128 = arith.truncf %127 : vector<16x128xf32> to vector<16x128xbf16>
    %c0_82 = arith.constant 0 : index
    %c0_83 = arith.constant 0 : index
    %c0_84 = arith.constant 0 : index
    %129 = vector.load %arg15[%c0_82, %c0_83, %c0_84] : memref<3x128x128xbf16, #tpu.memory_space<vmem>>, vector<1x128x128xbf16>
    %130 = vector.shape_cast %129 : vector<1x128x128xbf16> to vector<128x128xbf16>
    %c0_85 = arith.constant 0 : index
    %c0_86 = arith.constant 0 : index
    %c0_87 = arith.constant 0 : index
    %131 = vector.load %arg16[%c0_85, %c0_86, %c0_87] : memref<3x1x128xf32, #tpu.memory_space<vmem>>, vector<1x1x128xf32>
    %132 = vector.shape_cast %131 : vector<1x1x128xf32> to vector<1x128xf32>
    %cst_88 = arith.constant dense<0.000000e+00> : vector<16x128xf32>
    %133 = tpu.matmul %128, %130, %cst_88 {dimension_numbers = #tpu.dot_dimension_numbers<[1], [0], [0], [1], [0, 0, 1, 1], [], []>} : vector<16x128xbf16>, vector<128x128xbf16>, vector<16x128xf32> -> vector<16x128xf32>
    %134 = vector.broadcast %132 : vector<1x128xf32> to vector<16x128xf32>
    %135 = arith.addf %133, %134 : vector<16x128xf32>
    %136 = vector.broadcast %113 : vector<16x1xf32> to vector<16x128xf32>
    %137 = arith.mulf %136, %135 : vector<16x128xf32>
    %138 = arith.addf %6, %137 : vector<16x128xf32>
    %139 = arith.truncf %138 : vector<16x128xf32> to vector<16x128xbf16>
    %cst_89 = arith.constant dense<0.000000e+00> : vector<128x128xf32>
    %140 = tpu.matmul %1, %139, %cst_89 {dimension_numbers = #tpu.dot_dimension_numbers<[1], [0], [0], [1], [0, 0, 1, 1], [], []>} : vector<128x16xbf16>, vector<16x128xbf16>, vector<128x128xf32> -> vector<128x128xf32>
    %141 = vector.shape_cast %138 : vector<16x128xf32> to vector<16x1x128xf32>
    %142 = vector.shape_cast %140 : vector<128x128xf32> to vector<16x8x128xf32>
    %143 = vector.broadcast %141 : vector<16x1x128xf32> to vector<16x8x128xf32>
    %144 = arith.mulf %143, %142 : vector<16x8x128xf32>
    %145 = vector.shape_cast %144 : vector<16x8x128xf32> to vector<128x128xf32>
    %146 = arith.subf %145, %90 : vector<128x128xf32>
    %147 = arith.mulf %5, %146 : vector<128x128xf32>
    %148 = vector.shape_cast %147 : vector<128x128xf32> to vector<16x8x128xf32>
    %cst_90 = arith.constant dense<0.000000e+00> : vector<16x128xf32>
    %149 = vector.multi_reduction <add>, %148, %cst_90 [1] : vector<16x8x128xf32> to vector<16x128xf32>
    %c0_91 = arith.constant 0 : index
    %c0_92 = arith.constant 0 : index
    %c0_93 = arith.constant 0 : index
    %150 = vector.load %arg25[%c0_91, %c0_92, %c0_93] : memref<3x128x128xbf16, #tpu.memory_space<vmem>>, vector<1x128x128xbf16>
    %151 = vector.shape_cast %150 : vector<1x128x128xbf16> to vector<128x128xbf16>
    %c0_94 = arith.constant 0 : index
    %c0_95 = arith.constant 0 : index
    %c0_96 = arith.constant 0 : index
    %152 = vector.load %arg26[%c0_94, %c0_95, %c0_96] : memref<3x1x128xf32, #tpu.memory_space<vmem>>, vector<1x1x128xf32>
    %153 = vector.shape_cast %152 : vector<1x1x128xf32> to vector<1x128xf32>
    %cst_97 = arith.constant dense<0.000000e+00> : vector<16x128xf32>
    %154 = tpu.matmul %10, %151, %cst_97 {dimension_numbers = #tpu.dot_dimension_numbers<[1], [0], [0], [1], [0, 0, 1, 1], [], []>} : vector<16x128xbf16>, vector<128x128xbf16>, vector<16x128xf32> -> vector<16x128xf32>
    %155 = vector.broadcast %153 : vector<1x128xf32> to vector<16x128xf32>
    %156 = arith.addf %154, %155 : vector<16x128xf32>
    %157 = arith.negf %156 : vector<16x128xf32>
    %158 = math.exp %157 : vector<16x128xf32>
    %cst_98 = arith.constant 1.000000e+00 : f32
    %159 = vector.broadcast %cst_98 : f32 to vector<16x128xf32>
    %160 = arith.addf %159, %158 : vector<16x128xf32>
    %161 = arith.divf %159, %160 : vector<16x128xf32>
    %162 = arith.mulf %156, %161 : vector<16x128xf32>
    %163 = arith.truncf %162 : vector<16x128xf32> to vector<16x128xbf16>
    %c0_99 = arith.constant 0 : index
    %c0_100 = arith.constant 0 : index
    %c0_101 = arith.constant 0 : index
    %164 = vector.load %arg27[%c0_99, %c0_100, %c0_101] : memref<3x128x128xbf16, #tpu.memory_space<vmem>>, vector<1x128x128xbf16>
    %165 = vector.shape_cast %164 : vector<1x128x128xbf16> to vector<128x128xbf16>
    %c0_102 = arith.constant 0 : index
    %c0_103 = arith.constant 0 : index
    %c0_104 = arith.constant 0 : index
    %166 = vector.load %arg28[%c0_102, %c0_103, %c0_104] : memref<3x1x128xf32, #tpu.memory_space<vmem>>, vector<1x1x128xf32>
    %167 = vector.shape_cast %166 : vector<1x1x128xf32> to vector<1x128xf32>
    %cst_105 = arith.constant dense<0.000000e+00> : vector<16x128xf32>
    %168 = tpu.matmul %163, %165, %cst_105 {dimension_numbers = #tpu.dot_dimension_numbers<[1], [0], [0], [1], [0, 0, 1, 1], [], []>} : vector<16x128xbf16>, vector<128x128xbf16>, vector<16x128xf32> -> vector<16x128xf32>
    %169 = vector.broadcast %167 : vector<1x128xf32> to vector<16x128xf32>
    %170 = arith.addf %168, %169 : vector<16x128xf32>
    %171 = arith.mulf %170, %149 : vector<16x128xf32>
    %172 = arith.addf %0, %171 : vector<16x128xf32>
    %173 = arith.truncf %172 : vector<16x128xf32> to vector<16x128xbf16>
    %c1 = arith.constant 1 : index
    %c0_106 = arith.constant 0 : index
    %c0_107 = arith.constant 0 : index
    %174 = vector.load %arg5[%c1, %c0_106, %c0_107] : memref<3x128x128xbf16, #tpu.memory_space<vmem>>, vector<1x128x128xbf16>
    %175 = vector.shape_cast %174 : vector<1x128x128xbf16> to vector<128x128xbf16>
    %c1_108 = arith.constant 1 : index
    %c0_109 = arith.constant 0 : index
    %c0_110 = arith.constant 0 : index
    %176 = vector.load %arg6[%c1_108, %c0_109, %c0_110] : memref<3x1x128xf32, #tpu.memory_space<vmem>>, vector<1x1x128xf32>
    %177 = vector.shape_cast %176 : vector<1x1x128xf32> to vector<1x128xf32>
    %cst_111 = arith.constant dense<0.000000e+00> : vector<16x128xf32>
    %178 = tpu.matmul %173, %175, %cst_111 {dimension_numbers = #tpu.dot_dimension_numbers<[1], [0], [0], [1], [0, 0, 1, 1], [], []>} : vector<16x128xbf16>, vector<128x128xbf16>, vector<16x128xf32> -> vector<16x128xf32>
    %179 = vector.broadcast %177 : vector<1x128xf32> to vector<16x128xf32>
    %180 = arith.addf %178, %179 : vector<16x128xf32>
    %181 = arith.negf %180 : vector<16x128xf32>
    %182 = math.exp %181 : vector<16x128xf32>
    %cst_112 = arith.constant 1.000000e+00 : f32
    %183 = vector.broadcast %cst_112 : f32 to vector<16x128xf32>
    %184 = arith.addf %183, %182 : vector<16x128xf32>
    %185 = arith.divf %183, %184 : vector<16x128xf32>
    %186 = arith.mulf %180, %185 : vector<16x128xf32>
    %187 = arith.truncf %186 : vector<16x128xf32> to vector<16x128xbf16>
    %c1_113 = arith.constant 1 : index
    %c0_114 = arith.constant 0 : index
    %c0_115 = arith.constant 0 : index
    %188 = vector.load %arg7[%c1_113, %c0_114, %c0_115] : memref<3x128x128xbf16, #tpu.memory_space<vmem>>, vector<1x128x128xbf16>
    %189 = vector.shape_cast %188 : vector<1x128x128xbf16> to vector<128x128xbf16>
    %c1_116 = arith.constant 1 : index
    %c0_117 = arith.constant 0 : index
    %c0_118 = arith.constant 0 : index
    %190 = vector.load %arg8[%c1_116, %c0_117, %c0_118] : memref<3x1x128xf32, #tpu.memory_space<vmem>>, vector<1x1x128xf32>
    %191 = vector.shape_cast %190 : vector<1x1x128xf32> to vector<1x128xf32>
    %cst_119 = arith.constant dense<0.000000e+00> : vector<16x128xf32>
    %192 = tpu.matmul %187, %189, %cst_119 {dimension_numbers = #tpu.dot_dimension_numbers<[1], [0], [0], [1], [0, 0, 1, 1], [], []>} : vector<16x128xbf16>, vector<128x128xbf16>, vector<16x128xf32> -> vector<16x128xf32>
    %193 = vector.broadcast %191 : vector<1x128xf32> to vector<16x128xf32>
    %194 = arith.addf %192, %193 : vector<16x128xf32>
    %195 = arith.truncf %194 : vector<16x128xf32> to vector<16x128xbf16>
    %cst_120 = arith.constant dense<0.000000e+00> : vector<128x128xf32>
    %196 = tpu.matmul %1, %195, %cst_120 {dimension_numbers = #tpu.dot_dimension_numbers<[1], [0], [0], [1], [0, 0, 1, 1], [], []>} : vector<128x16xbf16>, vector<16x128xbf16>, vector<128x128xf32> -> vector<128x128xf32>
    %c1_121 = arith.constant 1 : index
    %c0_122 = arith.constant 0 : index
    %c0_123 = arith.constant 0 : index
    %197 = vector.load %arg1[%c1_121, %c0_122, %c0_123] : memref<3x128x128xf32, #tpu.memory_space<vmem>>, vector<1x128x128xf32>
    %198 = vector.shape_cast %197 : vector<1x128x128xf32> to vector<128x128xf32>
    %199 = arith.mulf %196, %198 : vector<128x128xf32>
    %200 = vector.shape_cast %199 : vector<128x128xf32> to vector<16x8x128xf32>
    %201 = vector.shape_cast %194 : vector<16x128xf32> to vector<16x1x128xf32>
    %202 = vector.broadcast %201 : vector<16x1x128xf32> to vector<16x8x128xf32>
    %203 = arith.mulf %202, %200 : vector<16x8x128xf32>
    %204 = vector.shape_cast %203 : vector<16x8x128xf32> to vector<128x128xf32>
    %205 = arith.truncf %204 : vector<128x128xf32> to vector<128x128xbf16>
    %c1_124 = arith.constant 1 : index
    %c0_125 = arith.constant 0 : index
    %c0_126 = arith.constant 0 : index
    %206 = vector.load %arg17[%c1_124, %c0_125, %c0_126] : memref<3x128x128xbf16, #tpu.memory_space<vmem>>, vector<1x128x128xbf16>
    %207 = vector.shape_cast %206 : vector<1x128x128xbf16> to vector<128x128xbf16>
    %c1_127 = arith.constant 1 : index
    %c0_128 = arith.constant 0 : index
    %c0_129 = arith.constant 0 : index
    %208 = vector.load %arg18[%c1_127, %c0_128, %c0_129] : memref<3x1x128xf32, #tpu.memory_space<vmem>>, vector<1x1x128xf32>
    %209 = vector.shape_cast %208 : vector<1x1x128xf32> to vector<1x128xf32>
    %cst_130 = arith.constant dense<0.000000e+00> : vector<128x128xf32>
    %210 = tpu.matmul %205, %207, %cst_130 {dimension_numbers = #tpu.dot_dimension_numbers<[1], [0], [0], [1], [0, 0, 1, 1], [], []>} : vector<128x128xbf16>, vector<128x128xbf16>, vector<128x128xf32> -> vector<128x128xf32>
    %211 = vector.broadcast %209 : vector<1x128xf32> to vector<128x128xf32>
    %212 = arith.addf %210, %211 : vector<128x128xf32>
    %213 = arith.negf %212 : vector<128x128xf32>
    %214 = math.exp %213 : vector<128x128xf32>
    %cst_131 = arith.constant 1.000000e+00 : f32
    %215 = vector.broadcast %cst_131 : f32 to vector<128x128xf32>
    %216 = arith.addf %215, %214 : vector<128x128xf32>
    %217 = arith.divf %215, %216 : vector<128x128xf32>
    %218 = arith.mulf %212, %217 : vector<128x128xf32>
    %c1_132 = arith.constant 1 : index
    %c0_133 = arith.constant 0 : index
    %c0_134 = arith.constant 0 : index
    %219 = vector.load %arg19[%c1_132, %c0_133, %c0_134] : memref<3x1x128xf32, #tpu.memory_space<vmem>>, vector<1x1x128xf32>
    %220 = vector.shape_cast %219 : vector<1x1x128xf32> to vector<1x128xf32>
    %c1_135 = arith.constant 1 : index
    %c0_136 = arith.constant 0 : index
    %c0_137 = arith.constant 0 : index
    %221 = vector.load %arg20[%c1_135, %c0_136, %c0_137] : memref<3x1x1xf32, #tpu.memory_space<vmem>>, vector<1x1x1xf32>
    %222 = vector.shape_cast %221 : vector<1x1x1xf32> to vector<1x1xf32>
    %223 = vector.broadcast %220 : vector<1x128xf32> to vector<128x128xf32>
    %224 = arith.mulf %218, %223 : vector<128x128xf32>
    %cst_138 = arith.constant dense<0.000000e+00> : vector<128xf32>
    %225 = vector.multi_reduction <add>, %224, %cst_138 [1] : vector<128x128xf32> to vector<128xf32>
    %226 = vector.shape_cast %225 : vector<128xf32> to vector<128x1xf32>
    %227 = vector.broadcast %222 : vector<1x1xf32> to vector<128x1xf32>
    %228 = arith.addf %226, %227 : vector<128x1xf32>
    %229 = arith.addf %66, %228 : vector<128x1xf32>
    %c1_139 = arith.constant 1 : index
    %c0_140 = arith.constant 0 : index
    %c0_141 = arith.constant 0 : index
    %230 = vector.load %arg21[%c1_139, %c0_140, %c0_141] : memref<3x128x128xbf16, #tpu.memory_space<vmem>>, vector<1x128x128xbf16>
    %231 = vector.shape_cast %230 : vector<1x128x128xbf16> to vector<128x128xbf16>
    %c1_142 = arith.constant 1 : index
    %c0_143 = arith.constant 0 : index
    %c0_144 = arith.constant 0 : index
    %232 = vector.load %arg22[%c1_142, %c0_143, %c0_144] : memref<3x1x128xf32, #tpu.memory_space<vmem>>, vector<1x1x128xf32>
    %233 = vector.shape_cast %232 : vector<1x1x128xf32> to vector<1x128xf32>
    %cst_145 = arith.constant dense<0.000000e+00> : vector<128x128xf32>
    %234 = tpu.matmul %205, %231, %cst_145 {dimension_numbers = #tpu.dot_dimension_numbers<[1], [0], [0], [1], [0, 0, 1, 1], [], []>} : vector<128x128xbf16>, vector<128x128xbf16>, vector<128x128xf32> -> vector<128x128xf32>
    %235 = vector.broadcast %233 : vector<1x128xf32> to vector<128x128xf32>
    %236 = arith.addf %234, %235 : vector<128x128xf32>
    %237 = arith.negf %236 : vector<128x128xf32>
    %238 = math.exp %237 : vector<128x128xf32>
    %cst_146 = arith.constant 1.000000e+00 : f32
    %239 = vector.broadcast %cst_146 : f32 to vector<128x128xf32>
    %240 = arith.addf %239, %238 : vector<128x128xf32>
    %241 = arith.divf %239, %240 : vector<128x128xf32>
    %242 = arith.mulf %236, %241 : vector<128x128xf32>
    %243 = arith.truncf %242 : vector<128x128xf32> to vector<128x128xbf16>
    %c1_147 = arith.constant 1 : index
    %c0_148 = arith.constant 0 : index
    %c0_149 = arith.constant 0 : index
    %244 = vector.load %arg23[%c1_147, %c0_148, %c0_149] : memref<3x128x128xbf16, #tpu.memory_space<vmem>>, vector<1x128x128xbf16>
    %245 = vector.shape_cast %244 : vector<1x128x128xbf16> to vector<128x128xbf16>
    %c1_150 = arith.constant 1 : index
    %c0_151 = arith.constant 0 : index
    %c0_152 = arith.constant 0 : index
    %246 = vector.load %arg24[%c1_150, %c0_151, %c0_152] : memref<3x1x128xf32, #tpu.memory_space<vmem>>, vector<1x1x128xf32>
    %247 = vector.shape_cast %246 : vector<1x1x128xf32> to vector<1x128xf32>
    %cst_153 = arith.constant dense<0.000000e+00> : vector<128x128xf32>
    %248 = tpu.matmul %243, %245, %cst_153 {dimension_numbers = #tpu.dot_dimension_numbers<[1], [0], [0], [1], [0, 0, 1, 1], [], []>} : vector<128x128xbf16>, vector<128x128xbf16>, vector<128x128xf32> -> vector<128x128xf32>
    %249 = vector.broadcast %247 : vector<1x128xf32> to vector<128x128xf32>
    %250 = arith.addf %248, %249 : vector<128x128xf32>
    %251 = vector.broadcast %228 : vector<128x1xf32> to vector<128x128xf32>
    %252 = arith.mulf %251, %250 : vector<128x128xf32>
    %253 = arith.addf %90, %252 : vector<128x128xf32>
    %c1_154 = arith.constant 1 : index
    %c0_155 = arith.constant 0 : index
    %c0_156 = arith.constant 0 : index
    %254 = vector.load %arg9[%c1_154, %c0_155, %c0_156] : memref<3x128x128xbf16, #tpu.memory_space<vmem>>, vector<1x128x128xbf16>
    %255 = vector.shape_cast %254 : vector<1x128x128xbf16> to vector<128x128xbf16>
    %c1_157 = arith.constant 1 : index
    %c0_158 = arith.constant 0 : index
    %c0_159 = arith.constant 0 : index
    %256 = vector.load %arg10[%c1_157, %c0_158, %c0_159] : memref<3x1x128xf32, #tpu.memory_space<vmem>>, vector<1x1x128xf32>
    %257 = vector.shape_cast %256 : vector<1x1x128xf32> to vector<1x128xf32>
    %cst_160 = arith.constant dense<0.000000e+00> : vector<16x128xf32>
    %258 = tpu.matmul %173, %255, %cst_160 {dimension_numbers = #tpu.dot_dimension_numbers<[1], [0], [0], [1], [0, 0, 1, 1], [], []>} : vector<16x128xbf16>, vector<128x128xbf16>, vector<16x128xf32> -> vector<16x128xf32>
    %259 = vector.broadcast %257 : vector<1x128xf32> to vector<16x128xf32>
    %260 = arith.addf %258, %259 : vector<16x128xf32>
    %261 = arith.negf %260 : vector<16x128xf32>
    %262 = math.exp %261 : vector<16x128xf32>
    %cst_161 = arith.constant 1.000000e+00 : f32
    %263 = vector.broadcast %cst_161 : f32 to vector<16x128xf32>
    %264 = arith.addf %263, %262 : vector<16x128xf32>
    %265 = arith.divf %263, %264 : vector<16x128xf32>
    %266 = arith.mulf %260, %265 : vector<16x128xf32>
    %c1_162 = arith.constant 1 : index
    %c0_163 = arith.constant 0 : index
    %c0_164 = arith.constant 0 : index
    %267 = vector.load %arg11[%c1_162, %c0_163, %c0_164] : memref<3x1x128xf32, #tpu.memory_space<vmem>>, vector<1x1x128xf32>
    %268 = vector.shape_cast %267 : vector<1x1x128xf32> to vector<1x128xf32>
    %c1_165 = arith.constant 1 : index
    %c0_166 = arith.constant 0 : index
    %c0_167 = arith.constant 0 : index
    %269 = vector.load %arg12[%c1_165, %c0_166, %c0_167] : memref<3x1x1xf32, #tpu.memory_space<vmem>>, vector<1x1x1xf32>
    %270 = vector.shape_cast %269 : vector<1x1x1xf32> to vector<1x1xf32>
    %271 = vector.broadcast %268 : vector<1x128xf32> to vector<16x128xf32>
    %272 = arith.mulf %266, %271 : vector<16x128xf32>
    %cst_168 = arith.constant dense<0.000000e+00> : vector<16xf32>
    %273 = vector.multi_reduction <add>, %272, %cst_168 [1] : vector<16x128xf32> to vector<16xf32>
    %274 = vector.shape_cast %273 : vector<16xf32> to vector<16x1xf32>
    %275 = vector.broadcast %270 : vector<1x1xf32> to vector<16x1xf32>
    %276 = arith.addf %274, %275 : vector<16x1xf32>
    %277 = arith.addf %114, %276 : vector<16x1xf32>
    %c1_169 = arith.constant 1 : index
    %c0_170 = arith.constant 0 : index
    %c0_171 = arith.constant 0 : index
    %278 = vector.load %arg13[%c1_169, %c0_170, %c0_171] : memref<3x128x128xbf16, #tpu.memory_space<vmem>>, vector<1x128x128xbf16>
    %279 = vector.shape_cast %278 : vector<1x128x128xbf16> to vector<128x128xbf16>
    %c1_172 = arith.constant 1 : index
    %c0_173 = arith.constant 0 : index
    %c0_174 = arith.constant 0 : index
    %280 = vector.load %arg14[%c1_172, %c0_173, %c0_174] : memref<3x1x128xf32, #tpu.memory_space<vmem>>, vector<1x1x128xf32>
    %281 = vector.shape_cast %280 : vector<1x1x128xf32> to vector<1x128xf32>
    %cst_175 = arith.constant dense<0.000000e+00> : vector<16x128xf32>
    %282 = tpu.matmul %173, %279, %cst_175 {dimension_numbers = #tpu.dot_dimension_numbers<[1], [0], [0], [1], [0, 0, 1, 1], [], []>} : vector<16x128xbf16>, vector<128x128xbf16>, vector<16x128xf32> -> vector<16x128xf32>
    %283 = vector.broadcast %281 : vector<1x128xf32> to vector<16x128xf32>
    %284 = arith.addf %282, %283 : vector<16x128xf32>
    %285 = arith.negf %284 : vector<16x128xf32>
    %286 = math.exp %285 : vector<16x128xf32>
    %cst_176 = arith.constant 1.000000e+00 : f32
    %287 = vector.broadcast %cst_176 : f32 to vector<16x128xf32>
    %288 = arith.addf %287, %286 : vector<16x128xf32>
    %289 = arith.divf %287, %288 : vector<16x128xf32>
    %290 = arith.mulf %284, %289 : vector<16x128xf32>
    %291 = arith.truncf %290 : vector<16x128xf32> to vector<16x128xbf16>
    %c1_177 = arith.constant 1 : index
    %c0_178 = arith.constant 0 : index
    %c0_179 = arith.constant 0 : index
    %292 = vector.load %arg15[%c1_177, %c0_178, %c0_179] : memref<3x128x128xbf16, #tpu.memory_space<vmem>>, vector<1x128x128xbf16>
    %293 = vector.shape_cast %292 : vector<1x128x128xbf16> to vector<128x128xbf16>
    %c1_180 = arith.constant 1 : index
    %c0_181 = arith.constant 0 : index
    %c0_182 = arith.constant 0 : index
    %294 = vector.load %arg16[%c1_180, %c0_181, %c0_182] : memref<3x1x128xf32, #tpu.memory_space<vmem>>, vector<1x1x128xf32>
    %295 = vector.shape_cast %294 : vector<1x1x128xf32> to vector<1x128xf32>
    %cst_183 = arith.constant dense<0.000000e+00> : vector<16x128xf32>
    %296 = tpu.matmul %291, %293, %cst_183 {dimension_numbers = #tpu.dot_dimension_numbers<[1], [0], [0], [1], [0, 0, 1, 1], [], []>} : vector<16x128xbf16>, vector<128x128xbf16>, vector<16x128xf32> -> vector<16x128xf32>
    %297 = vector.broadcast %295 : vector<1x128xf32> to vector<16x128xf32>
    %298 = arith.addf %296, %297 : vector<16x128xf32>
    %299 = vector.broadcast %276 : vector<16x1xf32> to vector<16x128xf32>
    %300 = arith.mulf %299, %298 : vector<16x128xf32>
    %301 = arith.addf %138, %300 : vector<16x128xf32>
    %302 = arith.truncf %301 : vector<16x128xf32> to vector<16x128xbf16>
    %cst_184 = arith.constant dense<0.000000e+00> : vector<128x128xf32>
    %303 = tpu.matmul %1, %302, %cst_184 {dimension_numbers = #tpu.dot_dimension_numbers<[1], [0], [0], [1], [0, 0, 1, 1], [], []>} : vector<128x16xbf16>, vector<16x128xbf16>, vector<128x128xf32> -> vector<128x128xf32>
    %304 = vector.shape_cast %301 : vector<16x128xf32> to vector<16x1x128xf32>
    %305 = vector.shape_cast %303 : vector<128x128xf32> to vector<16x8x128xf32>
    %306 = vector.broadcast %304 : vector<16x1x128xf32> to vector<16x8x128xf32>
    %307 = arith.mulf %306, %305 : vector<16x8x128xf32>
    %308 = vector.shape_cast %307 : vector<16x8x128xf32> to vector<128x128xf32>
    %309 = arith.subf %308, %253 : vector<128x128xf32>
    %310 = arith.mulf %5, %309 : vector<128x128xf32>
    %311 = vector.shape_cast %310 : vector<128x128xf32> to vector<16x8x128xf32>
    %cst_185 = arith.constant dense<0.000000e+00> : vector<16x128xf32>
    %312 = vector.multi_reduction <add>, %311, %cst_185 [1] : vector<16x8x128xf32> to vector<16x128xf32>
    %c1_186 = arith.constant 1 : index
    %c0_187 = arith.constant 0 : index
    %c0_188 = arith.constant 0 : index
    %313 = vector.load %arg25[%c1_186, %c0_187, %c0_188] : memref<3x128x128xbf16, #tpu.memory_space<vmem>>, vector<1x128x128xbf16>
    %314 = vector.shape_cast %313 : vector<1x128x128xbf16> to vector<128x128xbf16>
    %c1_189 = arith.constant 1 : index
    %c0_190 = arith.constant 0 : index
    %c0_191 = arith.constant 0 : index
    %315 = vector.load %arg26[%c1_189, %c0_190, %c0_191] : memref<3x1x128xf32, #tpu.memory_space<vmem>>, vector<1x1x128xf32>
    %316 = vector.shape_cast %315 : vector<1x1x128xf32> to vector<1x128xf32>
    %cst_192 = arith.constant dense<0.000000e+00> : vector<16x128xf32>
    %317 = tpu.matmul %173, %314, %cst_192 {dimension_numbers = #tpu.dot_dimension_numbers<[1], [0], [0], [1], [0, 0, 1, 1], [], []>} : vector<16x128xbf16>, vector<128x128xbf16>, vector<16x128xf32> -> vector<16x128xf32>
    %318 = vector.broadcast %316 : vector<1x128xf32> to vector<16x128xf32>
    %319 = arith.addf %317, %318 : vector<16x128xf32>
    %320 = arith.negf %319 : vector<16x128xf32>
    %321 = math.exp %320 : vector<16x128xf32>
    %cst_193 = arith.constant 1.000000e+00 : f32
    %322 = vector.broadcast %cst_193 : f32 to vector<16x128xf32>
    %323 = arith.addf %322, %321 : vector<16x128xf32>
    %324 = arith.divf %322, %323 : vector<16x128xf32>
    %325 = arith.mulf %319, %324 : vector<16x128xf32>
    %326 = arith.truncf %325 : vector<16x128xf32> to vector<16x128xbf16>
    %c1_194 = arith.constant 1 : index
    %c0_195 = arith.constant 0 : index
    %c0_196 = arith.constant 0 : index
    %327 = vector.load %arg27[%c1_194, %c0_195, %c0_196] : memref<3x128x128xbf16, #tpu.memory_space<vmem>>, vector<1x128x128xbf16>
    %328 = vector.shape_cast %327 : vector<1x128x128xbf16> to vector<128x128xbf16>
    %c1_197 = arith.constant 1 : index
    %c0_198 = arith.constant 0 : index
    %c0_199 = arith.constant 0 : index
    %329 = vector.load %arg28[%c1_197, %c0_198, %c0_199] : memref<3x1x128xf32, #tpu.memory_space<vmem>>, vector<1x1x128xf32>
    %330 = vector.shape_cast %329 : vector<1x1x128xf32> to vector<1x128xf32>
    %cst_200 = arith.constant dense<0.000000e+00> : vector<16x128xf32>
    %331 = tpu.matmul %326, %328, %cst_200 {dimension_numbers = #tpu.dot_dimension_numbers<[1], [0], [0], [1], [0, 0, 1, 1], [], []>} : vector<16x128xbf16>, vector<128x128xbf16>, vector<16x128xf32> -> vector<16x128xf32>
    %332 = vector.broadcast %330 : vector<1x128xf32> to vector<16x128xf32>
    %333 = arith.addf %331, %332 : vector<16x128xf32>
    %334 = arith.mulf %333, %312 : vector<16x128xf32>
    %335 = arith.addf %172, %334 : vector<16x128xf32>
    %336 = arith.truncf %335 : vector<16x128xf32> to vector<16x128xbf16>
    %c2 = arith.constant 2 : index
    %c0_201 = arith.constant 0 : index
    %c0_202 = arith.constant 0 : index
    %337 = vector.load %arg5[%c2, %c0_201, %c0_202] : memref<3x128x128xbf16, #tpu.memory_space<vmem>>, vector<1x128x128xbf16>
    %338 = vector.shape_cast %337 : vector<1x128x128xbf16> to vector<128x128xbf16>
    %c2_203 = arith.constant 2 : index
    %c0_204 = arith.constant 0 : index
    %c0_205 = arith.constant 0 : index
    %339 = vector.load %arg6[%c2_203, %c0_204, %c0_205] : memref<3x1x128xf32, #tpu.memory_space<vmem>>, vector<1x1x128xf32>
    %340 = vector.shape_cast %339 : vector<1x1x128xf32> to vector<1x128xf32>
    %cst_206 = arith.constant dense<0.000000e+00> : vector<16x128xf32>
    %341 = tpu.matmul %336, %338, %cst_206 {dimension_numbers = #tpu.dot_dimension_numbers<[1], [0], [0], [1], [0, 0, 1, 1], [], []>} : vector<16x128xbf16>, vector<128x128xbf16>, vector<16x128xf32> -> vector<16x128xf32>
    %342 = vector.broadcast %340 : vector<1x128xf32> to vector<16x128xf32>
    %343 = arith.addf %341, %342 : vector<16x128xf32>
    %344 = arith.negf %343 : vector<16x128xf32>
    %345 = math.exp %344 : vector<16x128xf32>
    %cst_207 = arith.constant 1.000000e+00 : f32
    %346 = vector.broadcast %cst_207 : f32 to vector<16x128xf32>
    %347 = arith.addf %346, %345 : vector<16x128xf32>
    %348 = arith.divf %346, %347 : vector<16x128xf32>
    %349 = arith.mulf %343, %348 : vector<16x128xf32>
    %350 = arith.truncf %349 : vector<16x128xf32> to vector<16x128xbf16>
    %c2_208 = arith.constant 2 : index
    %c0_209 = arith.constant 0 : index
    %c0_210 = arith.constant 0 : index
    %351 = vector.load %arg7[%c2_208, %c0_209, %c0_210] : memref<3x128x128xbf16, #tpu.memory_space<vmem>>, vector<1x128x128xbf16>
    %352 = vector.shape_cast %351 : vector<1x128x128xbf16> to vector<128x128xbf16>
    %c2_211 = arith.constant 2 : index
    %c0_212 = arith.constant 0 : index
    %c0_213 = arith.constant 0 : index
    %353 = vector.load %arg8[%c2_211, %c0_212, %c0_213] : memref<3x1x128xf32, #tpu.memory_space<vmem>>, vector<1x1x128xf32>
    %354 = vector.shape_cast %353 : vector<1x1x128xf32> to vector<1x128xf32>
    %cst_214 = arith.constant dense<0.000000e+00> : vector<16x128xf32>
    %355 = tpu.matmul %350, %352, %cst_214 {dimension_numbers = #tpu.dot_dimension_numbers<[1], [0], [0], [1], [0, 0, 1, 1], [], []>} : vector<16x128xbf16>, vector<128x128xbf16>, vector<16x128xf32> -> vector<16x128xf32>
    %356 = vector.broadcast %354 : vector<1x128xf32> to vector<16x128xf32>
    %357 = arith.addf %355, %356 : vector<16x128xf32>
    %358 = arith.truncf %357 : vector<16x128xf32> to vector<16x128xbf16>
    %cst_215 = arith.constant dense<0.000000e+00> : vector<128x128xf32>
    %359 = tpu.matmul %1, %358, %cst_215 {dimension_numbers = #tpu.dot_dimension_numbers<[1], [0], [0], [1], [0, 0, 1, 1], [], []>} : vector<128x16xbf16>, vector<16x128xbf16>, vector<128x128xf32> -> vector<128x128xf32>
    %c2_216 = arith.constant 2 : index
    %c0_217 = arith.constant 0 : index
    %c0_218 = arith.constant 0 : index
    %360 = vector.load %arg1[%c2_216, %c0_217, %c0_218] : memref<3x128x128xf32, #tpu.memory_space<vmem>>, vector<1x128x128xf32>
    %361 = vector.shape_cast %360 : vector<1x128x128xf32> to vector<128x128xf32>
    %362 = arith.mulf %359, %361 : vector<128x128xf32>
    %363 = vector.shape_cast %362 : vector<128x128xf32> to vector<16x8x128xf32>
    %364 = vector.shape_cast %357 : vector<16x128xf32> to vector<16x1x128xf32>
    %365 = vector.broadcast %364 : vector<16x1x128xf32> to vector<16x8x128xf32>
    %366 = arith.mulf %365, %363 : vector<16x8x128xf32>
    %367 = vector.shape_cast %366 : vector<16x8x128xf32> to vector<128x128xf32>
    %368 = arith.truncf %367 : vector<128x128xf32> to vector<128x128xbf16>
    %c2_219 = arith.constant 2 : index
    %c0_220 = arith.constant 0 : index
    %c0_221 = arith.constant 0 : index
    %369 = vector.load %arg17[%c2_219, %c0_220, %c0_221] : memref<3x128x128xbf16, #tpu.memory_space<vmem>>, vector<1x128x128xbf16>
    %370 = vector.shape_cast %369 : vector<1x128x128xbf16> to vector<128x128xbf16>
    %c2_222 = arith.constant 2 : index
    %c0_223 = arith.constant 0 : index
    %c0_224 = arith.constant 0 : index
    %371 = vector.load %arg18[%c2_222, %c0_223, %c0_224] : memref<3x1x128xf32, #tpu.memory_space<vmem>>, vector<1x1x128xf32>
    %372 = vector.shape_cast %371 : vector<1x1x128xf32> to vector<1x128xf32>
    %cst_225 = arith.constant dense<0.000000e+00> : vector<128x128xf32>
    %373 = tpu.matmul %368, %370, %cst_225 {dimension_numbers = #tpu.dot_dimension_numbers<[1], [0], [0], [1], [0, 0, 1, 1], [], []>} : vector<128x128xbf16>, vector<128x128xbf16>, vector<128x128xf32> -> vector<128x128xf32>
    %374 = vector.broadcast %372 : vector<1x128xf32> to vector<128x128xf32>
    %375 = arith.addf %373, %374 : vector<128x128xf32>
    %376 = arith.negf %375 : vector<128x128xf32>
    %377 = math.exp %376 : vector<128x128xf32>
    %cst_226 = arith.constant 1.000000e+00 : f32
    %378 = vector.broadcast %cst_226 : f32 to vector<128x128xf32>
    %379 = arith.addf %378, %377 : vector<128x128xf32>
    %380 = arith.divf %378, %379 : vector<128x128xf32>
    %381 = arith.mulf %375, %380 : vector<128x128xf32>
    %c2_227 = arith.constant 2 : index
    %c0_228 = arith.constant 0 : index
    %c0_229 = arith.constant 0 : index
    %382 = vector.load %arg19[%c2_227, %c0_228, %c0_229] : memref<3x1x128xf32, #tpu.memory_space<vmem>>, vector<1x1x128xf32>
    %383 = vector.shape_cast %382 : vector<1x1x128xf32> to vector<1x128xf32>
    %c2_230 = arith.constant 2 : index
    %c0_231 = arith.constant 0 : index
    %c0_232 = arith.constant 0 : index
    %384 = vector.load %arg20[%c2_230, %c0_231, %c0_232] : memref<3x1x1xf32, #tpu.memory_space<vmem>>, vector<1x1x1xf32>
    %385 = vector.shape_cast %384 : vector<1x1x1xf32> to vector<1x1xf32>
    %386 = vector.broadcast %383 : vector<1x128xf32> to vector<128x128xf32>
    %387 = arith.mulf %381, %386 : vector<128x128xf32>
    %cst_233 = arith.constant dense<0.000000e+00> : vector<128xf32>
    %388 = vector.multi_reduction <add>, %387, %cst_233 [1] : vector<128x128xf32> to vector<128xf32>
    %389 = vector.shape_cast %388 : vector<128xf32> to vector<128x1xf32>
    %390 = vector.broadcast %385 : vector<1x1xf32> to vector<128x1xf32>
    %391 = arith.addf %389, %390 : vector<128x1xf32>
    %392 = arith.addf %229, %391 : vector<128x1xf32>
    %c2_234 = arith.constant 2 : index
    %c0_235 = arith.constant 0 : index
    %c0_236 = arith.constant 0 : index
    %393 = vector.load %arg21[%c2_234, %c0_235, %c0_236] : memref<3x128x128xbf16, #tpu.memory_space<vmem>>, vector<1x128x128xbf16>
    %394 = vector.shape_cast %393 : vector<1x128x128xbf16> to vector<128x128xbf16>
    %c2_237 = arith.constant 2 : index
    %c0_238 = arith.constant 0 : index
    %c0_239 = arith.constant 0 : index
    %395 = vector.load %arg22[%c2_237, %c0_238, %c0_239] : memref<3x1x128xf32, #tpu.memory_space<vmem>>, vector<1x1x128xf32>
    %396 = vector.shape_cast %395 : vector<1x1x128xf32> to vector<1x128xf32>
    %cst_240 = arith.constant dense<0.000000e+00> : vector<128x128xf32>
    %397 = tpu.matmul %368, %394, %cst_240 {dimension_numbers = #tpu.dot_dimension_numbers<[1], [0], [0], [1], [0, 0, 1, 1], [], []>} : vector<128x128xbf16>, vector<128x128xbf16>, vector<128x128xf32> -> vector<128x128xf32>
    %398 = vector.broadcast %396 : vector<1x128xf32> to vector<128x128xf32>
    %399 = arith.addf %397, %398 : vector<128x128xf32>
    %400 = arith.negf %399 : vector<128x128xf32>
    %401 = math.exp %400 : vector<128x128xf32>
    %cst_241 = arith.constant 1.000000e+00 : f32
    %402 = vector.broadcast %cst_241 : f32 to vector<128x128xf32>
    %403 = arith.addf %402, %401 : vector<128x128xf32>
    %404 = arith.divf %402, %403 : vector<128x128xf32>
    %405 = arith.mulf %399, %404 : vector<128x128xf32>
    %406 = arith.truncf %405 : vector<128x128xf32> to vector<128x128xbf16>
    %c2_242 = arith.constant 2 : index
    %c0_243 = arith.constant 0 : index
    %c0_244 = arith.constant 0 : index
    %407 = vector.load %arg23[%c2_242, %c0_243, %c0_244] : memref<3x128x128xbf16, #tpu.memory_space<vmem>>, vector<1x128x128xbf16>
    %408 = vector.shape_cast %407 : vector<1x128x128xbf16> to vector<128x128xbf16>
    %c2_245 = arith.constant 2 : index
    %c0_246 = arith.constant 0 : index
    %c0_247 = arith.constant 0 : index
    %409 = vector.load %arg24[%c2_245, %c0_246, %c0_247] : memref<3x1x128xf32, #tpu.memory_space<vmem>>, vector<1x1x128xf32>
    %410 = vector.shape_cast %409 : vector<1x1x128xf32> to vector<1x128xf32>
    %cst_248 = arith.constant dense<0.000000e+00> : vector<128x128xf32>
    %411 = tpu.matmul %406, %408, %cst_248 {dimension_numbers = #tpu.dot_dimension_numbers<[1], [0], [0], [1], [0, 0, 1, 1], [], []>} : vector<128x128xbf16>, vector<128x128xbf16>, vector<128x128xf32> -> vector<128x128xf32>
    %412 = vector.broadcast %410 : vector<1x128xf32> to vector<128x128xf32>
    %413 = arith.addf %411, %412 : vector<128x128xf32>
    %414 = vector.broadcast %391 : vector<128x1xf32> to vector<128x128xf32>
    %415 = arith.mulf %414, %413 : vector<128x128xf32>
    %416 = arith.addf %253, %415 : vector<128x128xf32>
    %c2_249 = arith.constant 2 : index
    %c0_250 = arith.constant 0 : index
    %c0_251 = arith.constant 0 : index
    %417 = vector.load %arg9[%c2_249, %c0_250, %c0_251] : memref<3x128x128xbf16, #tpu.memory_space<vmem>>, vector<1x128x128xbf16>
    %418 = vector.shape_cast %417 : vector<1x128x128xbf16> to vector<128x128xbf16>
    %c2_252 = arith.constant 2 : index
    %c0_253 = arith.constant 0 : index
    %c0_254 = arith.constant 0 : index
    %419 = vector.load %arg10[%c2_252, %c0_253, %c0_254] : memref<3x1x128xf32, #tpu.memory_space<vmem>>, vector<1x1x128xf32>
    %420 = vector.shape_cast %419 : vector<1x1x128xf32> to vector<1x128xf32>
    %cst_255 = arith.constant dense<0.000000e+00> : vector<16x128xf32>
    %421 = tpu.matmul %336, %418, %cst_255 {dimension_numbers = #tpu.dot_dimension_numbers<[1], [0], [0], [1], [0, 0, 1, 1], [], []>} : vector<16x128xbf16>, vector<128x128xbf16>, vector<16x128xf32> -> vector<16x128xf32>
    %422 = vector.broadcast %420 : vector<1x128xf32> to vector<16x128xf32>
    %423 = arith.addf %421, %422 : vector<16x128xf32>
    %424 = arith.negf %423 : vector<16x128xf32>
    %425 = math.exp %424 : vector<16x128xf32>
    %cst_256 = arith.constant 1.000000e+00 : f32
    %426 = vector.broadcast %cst_256 : f32 to vector<16x128xf32>
    %427 = arith.addf %426, %425 : vector<16x128xf32>
    %428 = arith.divf %426, %427 : vector<16x128xf32>
    %429 = arith.mulf %423, %428 : vector<16x128xf32>
    %c2_257 = arith.constant 2 : index
    %c0_258 = arith.constant 0 : index
    %c0_259 = arith.constant 0 : index
    %430 = vector.load %arg11[%c2_257, %c0_258, %c0_259] : memref<3x1x128xf32, #tpu.memory_space<vmem>>, vector<1x1x128xf32>
    %431 = vector.shape_cast %430 : vector<1x1x128xf32> to vector<1x128xf32>
    %c2_260 = arith.constant 2 : index
    %c0_261 = arith.constant 0 : index
    %c0_262 = arith.constant 0 : index
    %432 = vector.load %arg12[%c2_260, %c0_261, %c0_262] : memref<3x1x1xf32, #tpu.memory_space<vmem>>, vector<1x1x1xf32>
    %433 = vector.shape_cast %432 : vector<1x1x1xf32> to vector<1x1xf32>
    %434 = vector.broadcast %431 : vector<1x128xf32> to vector<16x128xf32>
    %435 = arith.mulf %429, %434 : vector<16x128xf32>
    %cst_263 = arith.constant dense<0.000000e+00> : vector<16xf32>
    %436 = vector.multi_reduction <add>, %435, %cst_263 [1] : vector<16x128xf32> to vector<16xf32>
    %437 = vector.shape_cast %436 : vector<16xf32> to vector<16x1xf32>
    %438 = vector.broadcast %433 : vector<1x1xf32> to vector<16x1xf32>
    %439 = arith.addf %437, %438 : vector<16x1xf32>
    %440 = arith.addf %277, %439 : vector<16x1xf32>
    %c2_264 = arith.constant 2 : index
    %c0_265 = arith.constant 0 : index
    %c0_266 = arith.constant 0 : index
    %441 = vector.load %arg13[%c2_264, %c0_265, %c0_266] : memref<3x128x128xbf16, #tpu.memory_space<vmem>>, vector<1x128x128xbf16>
    %442 = vector.shape_cast %441 : vector<1x128x128xbf16> to vector<128x128xbf16>
    %c2_267 = arith.constant 2 : index
    %c0_268 = arith.constant 0 : index
    %c0_269 = arith.constant 0 : index
    %443 = vector.load %arg14[%c2_267, %c0_268, %c0_269] : memref<3x1x128xf32, #tpu.memory_space<vmem>>, vector<1x1x128xf32>
    %444 = vector.shape_cast %443 : vector<1x1x128xf32> to vector<1x128xf32>
    %cst_270 = arith.constant dense<0.000000e+00> : vector<16x128xf32>
    %445 = tpu.matmul %336, %442, %cst_270 {dimension_numbers = #tpu.dot_dimension_numbers<[1], [0], [0], [1], [0, 0, 1, 1], [], []>} : vector<16x128xbf16>, vector<128x128xbf16>, vector<16x128xf32> -> vector<16x128xf32>
    %446 = vector.broadcast %444 : vector<1x128xf32> to vector<16x128xf32>
    %447 = arith.addf %445, %446 : vector<16x128xf32>
    %448 = arith.negf %447 : vector<16x128xf32>
    %449 = math.exp %448 : vector<16x128xf32>
    %cst_271 = arith.constant 1.000000e+00 : f32
    %450 = vector.broadcast %cst_271 : f32 to vector<16x128xf32>
    %451 = arith.addf %450, %449 : vector<16x128xf32>
    %452 = arith.divf %450, %451 : vector<16x128xf32>
    %453 = arith.mulf %447, %452 : vector<16x128xf32>
    %454 = arith.truncf %453 : vector<16x128xf32> to vector<16x128xbf16>
    %c2_272 = arith.constant 2 : index
    %c0_273 = arith.constant 0 : index
    %c0_274 = arith.constant 0 : index
    %455 = vector.load %arg15[%c2_272, %c0_273, %c0_274] : memref<3x128x128xbf16, #tpu.memory_space<vmem>>, vector<1x128x128xbf16>
    %456 = vector.shape_cast %455 : vector<1x128x128xbf16> to vector<128x128xbf16>
    %c2_275 = arith.constant 2 : index
    %c0_276 = arith.constant 0 : index
    %c0_277 = arith.constant 0 : index
    %457 = vector.load %arg16[%c2_275, %c0_276, %c0_277] : memref<3x1x128xf32, #tpu.memory_space<vmem>>, vector<1x1x128xf32>
    %458 = vector.shape_cast %457 : vector<1x1x128xf32> to vector<1x128xf32>
    %cst_278 = arith.constant dense<0.000000e+00> : vector<16x128xf32>
    %459 = tpu.matmul %454, %456, %cst_278 {dimension_numbers = #tpu.dot_dimension_numbers<[1], [0], [0], [1], [0, 0, 1, 1], [], []>} : vector<16x128xbf16>, vector<128x128xbf16>, vector<16x128xf32> -> vector<16x128xf32>
    %460 = vector.broadcast %458 : vector<1x128xf32> to vector<16x128xf32>
    %461 = arith.addf %459, %460 : vector<16x128xf32>
    %462 = vector.broadcast %439 : vector<16x1xf32> to vector<16x128xf32>
    %463 = arith.mulf %462, %461 : vector<16x128xf32>
    %464 = arith.addf %301, %463 : vector<16x128xf32>
    %465 = arith.truncf %464 : vector<16x128xf32> to vector<16x128xbf16>
    %cst_279 = arith.constant dense<0.000000e+00> : vector<128x128xf32>
    %466 = tpu.matmul %1, %465, %cst_279 {dimension_numbers = #tpu.dot_dimension_numbers<[1], [0], [0], [1], [0, 0, 1, 1], [], []>} : vector<128x16xbf16>, vector<16x128xbf16>, vector<128x128xf32> -> vector<128x128xf32>
    %467 = vector.shape_cast %464 : vector<16x128xf32> to vector<16x1x128xf32>
    %468 = vector.shape_cast %466 : vector<128x128xf32> to vector<16x8x128xf32>
    %469 = vector.broadcast %467 : vector<16x1x128xf32> to vector<16x8x128xf32>
    %470 = arith.mulf %469, %468 : vector<16x8x128xf32>
    %471 = vector.shape_cast %470 : vector<16x8x128xf32> to vector<128x128xf32>
    %472 = arith.subf %471, %416 : vector<128x128xf32>
    %473 = arith.mulf %5, %472 : vector<128x128xf32>
    %474 = vector.shape_cast %473 : vector<128x128xf32> to vector<16x8x128xf32>
    %cst_280 = arith.constant dense<0.000000e+00> : vector<16x128xf32>
    %475 = vector.multi_reduction <add>, %474, %cst_280 [1] : vector<16x8x128xf32> to vector<16x128xf32>
    %c2_281 = arith.constant 2 : index
    %c0_282 = arith.constant 0 : index
    %c0_283 = arith.constant 0 : index
    %476 = vector.load %arg25[%c2_281, %c0_282, %c0_283] : memref<3x128x128xbf16, #tpu.memory_space<vmem>>, vector<1x128x128xbf16>
    %477 = vector.shape_cast %476 : vector<1x128x128xbf16> to vector<128x128xbf16>
    %c2_284 = arith.constant 2 : index
    %c0_285 = arith.constant 0 : index
    %c0_286 = arith.constant 0 : index
    %478 = vector.load %arg26[%c2_284, %c0_285, %c0_286] : memref<3x1x128xf32, #tpu.memory_space<vmem>>, vector<1x1x128xf32>
    %479 = vector.shape_cast %478 : vector<1x1x128xf32> to vector<1x128xf32>
    %cst_287 = arith.constant dense<0.000000e+00> : vector<16x128xf32>
    %480 = tpu.matmul %336, %477, %cst_287 {dimension_numbers = #tpu.dot_dimension_numbers<[1], [0], [0], [1], [0, 0, 1, 1], [], []>} : vector<16x128xbf16>, vector<128x128xbf16>, vector<16x128xf32> -> vector<16x128xf32>
    %481 = vector.broadcast %479 : vector<1x128xf32> to vector<16x128xf32>
    %482 = arith.addf %480, %481 : vector<16x128xf32>
    %483 = arith.negf %482 : vector<16x128xf32>
    %484 = math.exp %483 : vector<16x128xf32>
    %cst_288 = arith.constant 1.000000e+00 : f32
    %485 = vector.broadcast %cst_288 : f32 to vector<16x128xf32>
    %486 = arith.addf %485, %484 : vector<16x128xf32>
    %487 = arith.divf %485, %486 : vector<16x128xf32>
    %488 = arith.mulf %482, %487 : vector<16x128xf32>
    %489 = arith.truncf %488 : vector<16x128xf32> to vector<16x128xbf16>
    %c2_289 = arith.constant 2 : index
    %c0_290 = arith.constant 0 : index
    %c0_291 = arith.constant 0 : index
    %490 = vector.load %arg27[%c2_289, %c0_290, %c0_291] : memref<3x128x128xbf16, #tpu.memory_space<vmem>>, vector<1x128x128xbf16>
    %491 = vector.shape_cast %490 : vector<1x128x128xbf16> to vector<128x128xbf16>
    %c2_292 = arith.constant 2 : index
    %c0_293 = arith.constant 0 : index
    %c0_294 = arith.constant 0 : index
    %492 = vector.load %arg28[%c2_292, %c0_293, %c0_294] : memref<3x1x128xf32, #tpu.memory_space<vmem>>, vector<1x1x128xf32>
    %493 = vector.shape_cast %492 : vector<1x1x128xf32> to vector<1x128xf32>
    %cst_295 = arith.constant dense<0.000000e+00> : vector<16x128xf32>
    %494 = tpu.matmul %489, %491, %cst_295 {dimension_numbers = #tpu.dot_dimension_numbers<[1], [0], [0], [1], [0, 0, 1, 1], [], []>} : vector<16x128xbf16>, vector<128x128xbf16>, vector<16x128xf32> -> vector<16x128xf32>
    %495 = vector.broadcast %493 : vector<1x128xf32> to vector<16x128xf32>
    %496 = arith.addf %494, %495 : vector<16x128xf32>
    %497 = arith.mulf %496, %475 : vector<16x128xf32>
    %498 = arith.addf %335, %497 : vector<16x128xf32>
    %499 = arith.truncf %498 : vector<16x128xf32> to vector<16x128xbf16>
    %c0_296 = arith.constant 0 : index
    %c0_297 = arith.constant 0 : index
    %500 = vector.load %arg29[%c0_296, %c0_297] : memref<128x128xbf16, #tpu.memory_space<vmem>>, vector<128x128xbf16>
    %c0_298 = arith.constant 0 : index
    %c0_299 = arith.constant 0 : index
    %501 = vector.load %arg30[%c0_298, %c0_299] : memref<1x128xf32, #tpu.memory_space<vmem>>, vector<1x128xf32>
    %cst_300 = arith.constant dense<0.000000e+00> : vector<16x128xf32>
    %502 = tpu.matmul %499, %500, %cst_300 {dimension_numbers = #tpu.dot_dimension_numbers<[1], [0], [0], [1], [0, 0, 1, 1], [], []>} : vector<16x128xbf16>, vector<128x128xbf16>, vector<16x128xf32> -> vector<16x128xf32>
    %503 = vector.broadcast %501 : vector<1x128xf32> to vector<16x128xf32>
    %504 = arith.addf %502, %503 : vector<16x128xf32>
    %505 = arith.negf %504 : vector<16x128xf32>
    %506 = math.exp %505 : vector<16x128xf32>
    %cst_301 = arith.constant 1.000000e+00 : f32
    %507 = vector.broadcast %cst_301 : f32 to vector<16x128xf32>
    %508 = arith.addf %507, %506 : vector<16x128xf32>
    %509 = arith.divf %507, %508 : vector<16x128xf32>
    %510 = arith.mulf %504, %509 : vector<16x128xf32>
    %511 = arith.truncf %510 : vector<16x128xf32> to vector<16x128xbf16>
    %c0_302 = arith.constant 0 : index
    %c0_303 = arith.constant 0 : index
    %512 = vector.load %arg31[%c0_302, %c0_303] : memref<128x64xbf16, #tpu.memory_space<vmem>>, vector<128x64xbf16>
    %c0_304 = arith.constant 0 : index
    %c0_305 = arith.constant 0 : index
    %513 = vector.load %arg32[%c0_304, %c0_305] : memref<1x64xf32, #tpu.memory_space<vmem>>, vector<1x64xf32>
    %cst_306 = arith.constant dense<0.000000e+00> : vector<16x64xf32>
    %514 = tpu.matmul %511, %512, %cst_306 {dimension_numbers = #tpu.dot_dimension_numbers<[1], [0], [0], [1], [0, 0, 1, 1], [], []>} : vector<16x128xbf16>, vector<128x64xbf16>, vector<16x64xf32> -> vector<16x64xf32>
    %515 = vector.broadcast %513 : vector<1x64xf32> to vector<16x64xf32>
    %516 = arith.addf %514, %515 : vector<16x64xf32>
    %517 = arith.negf %516 : vector<16x64xf32>
    %518 = math.exp %517 : vector<16x64xf32>
    %cst_307 = arith.constant 1.000000e+00 : f32
    %519 = vector.broadcast %cst_307 : f32 to vector<16x64xf32>
    %520 = arith.addf %519, %518 : vector<16x64xf32>
    %521 = arith.divf %519, %520 : vector<16x64xf32>
    %522 = arith.mulf %516, %521 : vector<16x64xf32>
    %c0_308 = arith.constant 0 : index
    %c0_309 = arith.constant 0 : index
    %523 = vector.load %arg33[%c0_308, %c0_309] : memref<1x64xf32, #tpu.memory_space<vmem>>, vector<1x64xf32>
    %524 = vector.broadcast %523 : vector<1x64xf32> to vector<16x64xf32>
    %525 = arith.mulf %522, %524 : vector<16x64xf32>
    %cst_310 = arith.constant dense<0.000000e+00> : vector<16xf32>
    %526 = vector.multi_reduction <add>, %525, %cst_310 [1] : vector<16x64xf32> to vector<16xf32>
    %527 = vector.shape_cast %526 : vector<16xf32> to vector<16x1xf32>
    %c0_311 = arith.constant 0 : index
    %c0_312 = arith.constant 0 : index
    %528 = vector.load %arg34[%c0_311, %c0_312] : memref<1x1xf32, #tpu.memory_space<vmem>>, vector<1x1xf32>
    %529 = vector.broadcast %528 : vector<1x1xf32> to vector<16x1xf32>
    %530 = arith.addf %527, %529 : vector<16x1xf32>
    %531 = arith.mulf %530, %2 : vector<16x1xf32>
    %532 = vector.extract_strided_slice %531 {offsets = [0, 0], sizes = [8, 1], strides = [1, 1]} : vector<16x1xf32> to vector<8x1xf32>
    %cst_313 = arith.constant dense<0.000000e+00> : vector<1xf32>
    %533 = vector.multi_reduction <add>, %532, %cst_313 [0] : vector<8x1xf32> to vector<1xf32>
    %534 = vector.shape_cast %533 : vector<1xf32> to vector<1x1xf32>
    %535 = vector.extract_strided_slice %531 {offsets = [8, 0], sizes = [8, 1], strides = [1, 1]} : vector<16x1xf32> to vector<8x1xf32>
    %cst_314 = arith.constant dense<0.000000e+00> : vector<1xf32>
    %536 = vector.multi_reduction <add>, %535, %cst_314 [0] : vector<8x1xf32> to vector<1xf32>
    %537 = vector.shape_cast %536 : vector<1xf32> to vector<1x1xf32>
    %538 = tpu.concatenate %534, %537 in 0 : vector<1x1xf32>, vector<1x1xf32> -> vector<2x1xf32>
    %539 = arith.mulf %440, %2 : vector<16x1xf32>
    %c0_315 = arith.constant 0 : index
    %c0_316 = arith.constant 0 : index
    %540 = vector.load %arg35[%c0_315, %c0_316] : memref<16x1xf32, #tpu.memory_space<vmem>>, vector<16x1xf32>
    tpu.vector_store %arg35[%c0_315, %c0_316], %539 {strides = array<i32>} : memref<16x1xf32, #tpu.memory_space<vmem>>, vector<16x1xf32>,
    %c0_317 = arith.constant 0 : index
    %c0_318 = arith.constant 0 : index
    %541 = vector.load %arg36[%c0_317, %c0_318] : memref<128x1xf32, #tpu.memory_space<vmem>>, vector<128x1xf32>
    tpu.vector_store %arg36[%c0_317, %c0_318], %392 {strides = array<i32>} : memref<128x1xf32, #tpu.memory_space<vmem>>, vector<128x1xf32>,
    %cst_319 = arith.constant 1.000000e+00 : f32
    %542 = vector.broadcast %cst_319 : f32 to vector<2x1xf32>
    %543 = arith.mulf %538, %542 : vector<2x1xf32>
    %cst_320 = arith.constant 0.000000e+00 : f32
    %544 = vector.broadcast %cst_320 : f32 to vector<2x1xf32>
    %545 = arith.addf %543, %544 : vector<2x1xf32>
    %c0_321 = arith.constant 0 : index
    %c0_322 = arith.constant 0 : index
    %546 = vector.load %arg37[%c0_321, %c0_322] : memref<2x1xf32, #tpu.memory_space<vmem>>, vector<2x1xf32>
    tpu.vector_store %arg37[%c0_321, %c0_322], %545 {strides = array<i32>} : memref<2x1xf32, #tpu.memory_space<vmem>>, vector<2x1xf32>,
    return
  }
}

</mosaic_0001>

<bundles_post_ra>
// kernel: tpu_custom_call.1
= control target key start
LH: loop header
LB: loop body
LE: loop exit
PB: predicated region body
PF: predicated region fallthrough
CT: control target
= control target key end

     0   :  { %s12064_s6 = smov 1   ;;  %s12065_s10 = smov 2   ;;  %s14862_s0 = inlined_call_operand.smem [shape: u32[38], index: -1, kind: input, shape index: {}] }
   0x1   :  { %s12140_s5 = sld [smem:[%s14862_s0]]   ;;  %s12066_s14 = smov 3  }
   0x2   :  { %s12145_s9 = sld [smem:[%s14862_s0 + %s12064_s6]]   ;;  %s12067_s18 = smov 4  }
   0x3   :  { %s12150_s13 = sld [smem:[%s14862_s0 + %s12065_s10]]   ;;  %s12068_s22 = smov 5  }
   0x4   :  { %s12155_s17 = sld [smem:[%s14862_s0 + %s12066_s14]]   ;;  %s12069_s26 = smov 6  }
   0x5   :  { %s12160_s21 = sld [smem:[%s14862_s0 + %s12067_s18]]   ;;  %s12070_s30 = smov 7  }
   0x6   :  { %s12165_s25 = sld [smem:[%s14862_s0 + %s12068_s22]]   ;;  %s12071_s4 = smov 8  }
   0x7   :  { %s12170_s29 = sld [smem:[%s14862_s0 + %s12069_s26]]   ;;  %s12072_s10 = smov 9  }
   0x8   :  { %s12175_s3 = sld [smem:[%s14862_s0 + %s12070_s30]]   ;;  %s12073_s15 = smov 10  }
   0x9   :  { %14977 = sst [smem:[#allocation46_spill]] %s12150_s13  ;;  %s12074_s20 = smov 11  }
   0xa   :  { %14978 = sst [smem:[#allocation47_spill]] %s12155_s17  ;;  %s12075_s26 = smov 12  }
   0xb   :  { %14979 = sst [smem:[#allocation48_spill]] %s12160_s21  ;;  %s12076_s1 = smov 13  }
   0xc   :  { %14980 = sst [smem:[#allocation49_spill]] %s12165_s25  ;;  %s12077_s7 = smov 14  }
   0xd   :  { %s12180_s8 = sld [smem:[%s14862_s0 + %s12071_s4]]   ;;  %s12079_s22 = smov 16  }
   0xe   :  { %s12185_s14 = sld [smem:[%s14862_s0 + %s12072_s10]]   ;;  %s12080_s28 = smov 17  }
   0xf   :  { %s12190_s19 = sld [smem:[%s14862_s0 + %s12073_s15]]   ;;  %s12078_s15 = smov 15  }
  0x10   :  { %s12195_s24 = sld [smem:[%s14862_s0 + %s12074_s20]]   ;;  %s12098_s16 = smov 35  }
  0x11   :  { %s12200_s30 = sld [smem:[%s14862_s0 + %s12075_s26]]   ;;  %s12099_s23 = smov 36  }
  0x12   :  { %s12205_s6 = sld [smem:[%s14862_s0 + %s12076_s1]]   ;;  %s12100_s1 = smov 37  }
  0x13   :  { %s12210_s12 = sld [smem:[%s14862_s0 + %s12077_s7]]   ;;  %s12081_s7 = smov 18  }
  0x14   :  { %s12215_s20 = sld [smem:[%s14862_s0 + %s12078_s15]]   ;;  %s12082_s15 = smov 19  }
  0x15   :  { %s12220_s27 = sld [smem:[%s14862_s0 + %s12079_s22]]   ;;  %s12083_s22 = smov 20  }
  0x16   :  { %s12225_s4 = sld [smem:[%s14862_s0 + %s12080_s28]]   ;;  %s12084_s28 = smov 21  }
  0x17   :  { %14981 = sst [smem:[#allocation50_spill]] %s12200_s30 }
  0x18   :  { %14982 = sst [smem:[#allocation51_spill]] %s12205_s6 }
  0x19   :  { %s12230_s21 = sld [smem:[%s14862_s0 + %s12081_s7]]   ;;  %s12085_s7 = smov 22  }
  0x1a   :  { %14983 = sst [smem:[#allocation52_spill]] %s12215_s20 }
  0x1b   :  { %s12235_s13 = sld [smem:[%s14862_s0 + %s12082_s15]]   ;;  %s12086_s15 = smov 23  }
  0x1c   :  { %14984 = sst [smem:[#allocation53_spill]] %s12225_s4 }
  0x1d   :  { %s12240_s30 = sld [smem:[%s14862_s0 + %s12083_s22]]   ;;  %s12087_s22 = smov 24  }
  0x1e   :  { %s12245_s4 = sld [smem:[%s14862_s0 + %s12084_s28]]   ;;  %s12088_s28 = smov 25  }
  0x1f   :  { %14985 = sst [smem:[#allocation54_spill]] %s12230_s21 }
  0x20   :  { %s12250_s17 = sld [smem:[%s14862_s0 + %s12085_s7]]   ;;  %s12089_s7 = smov 26  }
  0x21   :  { %s12255_s25 = sld [smem:[%s14862_s0 + %s12086_s15]]   ;;  %s12090_s15 = smov 27  }
  0x22   :  { %s12270_s21 = sld [smem:[%s14862_s0 + %s12089_s7]]   ;;  %s12093_s7 = smov 30  }
  0x23   :  { %14986 = sst [smem:[#allocation55_spill]] %s12240_s30 }
  0x24   :  { %14987 = sst [smem:[#allocation56_spill]] %s12245_s4 }
  0x25   :  { %s12260_s30 = sld [smem:[%s14862_s0 + %s12087_s22]]   ;;  %s12091_s22 = smov 28  }
  0x26   :  { %s12265_s4 = sld [smem:[%s14862_s0 + %s12088_s28]]   ;;  %s12092_s28 = smov 29  }
  0x27   :  { %14988 = sst [smem:[#allocation57_spill]] %s12255_s25 }
  0x28   :  { %14990 = sst [smem:[#allocation59_spill]] %s12270_s21 }
  0x29   :  { %s12275_s25 = sld [smem:[%s14862_s0 + %s12090_s15]]   ;;  %s12094_s15 = smov 31  }
  0x2a   :  { %s12280_s20 = sld [smem:[%s14862_s0 + %s12091_s22]]   ;;  %s12095_s22 = smov 32  }
  0x2b   :  { %s12290_s21 = sld [smem:[%s14862_s0 + %s12093_s7]]   ;;  %s12097_s7 = smov 34  }
  0x2c   :  { %14989 = sst [smem:[#allocation58_spill]] %s12265_s4 }
  0x2d   :  { %s12285_s4 = sld [smem:[%s14862_s0 + %s12092_s28]]   ;;  %s12096_s28 = smov 33  }
  0x2e   :  { %s12295_s6 = sld [smem:[%s14862_s0 + %s12094_s15]]  }
  0x30   :  { %14991 = sst [smem:[#allocation60_spill]] %s12280_s20 }
  0x31   :  { %14993 = sst [smem:[#allocation62_spill]] %s12290_s21 }
  0x32   :  { %s12300_s20 = sld [smem:[%s14862_s0 + %s12095_s22]]  }
  0x33   :  { %14992 = sst [smem:[#allocation61_spill]] %s12285_s4 }
  0x34   :  { %14994 = sst [smem:[#allocation63_spill]] %s12295_s6 }
  0x35   :  { %s12305_s4 = sld [smem:[%s14862_s0 + %s12096_s28]]  }
  0x36   :  { %s8901_s21 = sld [smem:[%s14862_s0 + %s12097_s7]]  }
  0x37   :  { %s12313_s6 = sld [smem:[%s14862_s0 + %s12098_s16]]  }
  0x38   :  { %14995 = sst [smem:[#allocation64_spill]] %s12300_s20 }
  0x39   :  { %s12318_s20 = sld [smem:[%s14862_s0 + %s12099_s23]]  }
  0x3b   :  { %14996 = sst [smem:[#allocation65_spill]] %s12305_s4 }
  0x3c   :  { %s12323_s4 = sld [smem:[%s14862_s0 + %s12100_s1]]   ;;  %v81_v0 = vstv %s8901_s21 }
  0x3d   :  { %82 = vst [vmem:[#allocation2] sm:$0x1] %v81_v0 }
  0x3e   :  { %83 = vsyncpa [#allocation4], 0 }
  0x3f   :  { %84 = vsyncpa [#allocation6], 0 }
  0x40   :  { %85 = vsyncpa [#allocation9], 0 }
  0x41   :  { %86 = vsyncpa [#allocation12], 0 }
  0x42   :  { %87 = vsyncpa [#allocation15], 0 }
  0x43   :  { %88 = vsyncpa [#allocation18], 0 }
  0x44   :  { %89 = vsyncpa [#allocation21], 0 }
  0x45   :  { %90 = vsyncpa [#allocation24], 0 }
  0x46   :  { %91 = vsyncpa [#allocation27], 0 }
  0x47   :  { %92 = vsyncpa [#allocation30], 0 }
  0x48   :  { %93 = vsyncpa [#allocation33], 0  ;;  %s12101_s7 = smov [#allocation5]   ;;  %s12102_s0 = smov [#allocation8]  }
  0x49   :  { %s111_s10 = sshll.u32 %s12101_s7, 4  ;;  %s143_s11 = sshll.u32 %s12102_s0, 4  ;;  %s112_s10 = int_to_ptr.vmem [resolvable:$true] %s111_s10  ;;  %s12325_s11 = int_to_ptr.vmem [resolvable:$true] %s143_s11 }
  0x4a   :  { %s11580_s21 = scalar_lea.hbm %s12145_s9, 6144 }
  0x4b   :  { %p11581_p0 = scmp.ne.s32.totalorder %s12145_s9, %s11580_s21  ;;  %p11584_p1 = scmp.lt.u32.totalorder %s11580_s21, %s12145_s9 }
  0x4d   :  { %p11586_p2 = pnand %p11584_p1, %p11581_p0 }
  0x4f   :  { %11589 = shalt.err (!%p11586_p2)
}
  0x50   :  { %s11590_s16 = scalar_lea.vmem %s112_s10, 6144  ;;  %p11595_p4 = scmp.lt.s32.totalorder %s112_s10, %s112_s10 }
  0x51   :  { %p11591_p3 = scmp.ne.s32.totalorder %s112_s10, %s11590_s16  ;;  %p11596_p5 = scmp.lt.s32.totalorder %s11590_s16, %s11590_s16 }
  0x53   :  { %p11597_p6 = por %p11596_p5, %p11595_p4 }
  0x55   :  { %p11598_p7 = pnand %p11597_p6, %p11591_p3 }
  0x57   :  { %11601 = shalt.err (!%p11598_p7)
}
  0x58   :  { %s12103_s15 = smov 128   ;;  %s12104_s18 = smov 8  }
  0x59   :  { %117 = dma.hbm_to_vmem [thread:$0]  %s12145_s9, 6144, %s112_s10, [#allocation6], %s12103_s15, %s12103_s15, %s12104_s18  }
  0x5a   :  { %s11602_s23 = scalar_lea.hbm %s12175_s3, 3072 }
  0x5b   :  { %p11603_p8 = scmp.ne.s32.totalorder %s12175_s3, %s11602_s23  ;;  %p11606_p9 = scmp.lt.u32.totalorder %s11602_s23, %s12175_s3 }
  0x5d   :  { %p11608_p10 = pnand %p11606_p9, %p11603_p8 }
  0x5f   :  { %11611 = shalt.err (!%p11608_p10)
}
  0x60   :  { %s11612_s22 = scalar_lea.vmem %s12325_s11, 3072  ;;  %p11617_p12 = scmp.lt.s32.totalorder %s12325_s11, %s12325_s11 }
  0x61   :  { %p11613_p11 = scmp.ne.s32.totalorder %s12325_s11, %s11612_s22  ;;  %p11618_p13 = scmp.lt.s32.totalorder %s11612_s22, %s11612_s22 }
  0x63   :  { %p11619_p0 = por %p11618_p13, %p11617_p12 }
  0x65   :  { %p11620_p1 = pnand %p11619_p0, %p11613_p11 }
  0x67   :  { %11623 = shalt.err (!%p11620_p1)
}
  0x68   :  { %s12105_s26 = smov 64   ;;  %s12106_s9 = smov 4  }
  0x69   :  { %149 = dma.hbm_to_vmem [thread:$0]  %s12175_s3, 3072, %s12325_s11, [#allocation9], %s12105_s26, %s12105_s26, %s12106_s9  }
  0x6a   :  { %s12107_s1 = smov [#allocation11]   ;;  %s11624_s2 = scalar_lea.hbm %s12185_s14, 3072 }
  0x6b   :  { %s167_s28 = sshll.u32 %s12107_s1, 4  ;;  %p11625_p2 = scmp.ne.s32.totalorder %s12185_s14, %s11624_s2  ;;  %s168_s28 = int_to_ptr.vmem [resolvable:$true] %s167_s28 }
  0x6c   :  { %p11628_p3 = scmp.lt.u32.totalorder %s11624_s2, %s12185_s14 }
  0x6e   :  { %p11630_p4 = pnand %p11628_p3, %p11625_p2 }
  0x70   :  { %11633 = shalt.err (!%p11630_p4)
}
  0x71   :  { %s11634_s7 = scalar_lea.vmem %s168_s28, 3072  ;;  %p11639_p6 = scmp.lt.s32.totalorder %s168_s28, %s168_s28 }
  0x72   :  { %p11635_p5 = scmp.ne.s32.totalorder %s168_s28, %s11634_s7  ;;  %p11640_p7 = scmp.lt.s32.totalorder %s11634_s7, %s11634_s7 }
  0x74   :  { %p11641_p8 = por %p11640_p7, %p11639_p6 }
  0x76   :  { %p11642_p9 = pnand %p11641_p8, %p11635_p5 }
  0x78   :  { %11645 = shalt.err (!%p11642_p9)
}
  0x79   :  { %173 = dma.hbm_to_vmem [thread:$0]  %s12185_s14, 3072, %s168_s28, [#allocation12], %s12105_s26, %s12105_s26, %s12106_s9  }
  0x7a   :  { %s12108_s3 = smov [#allocation14]   ;;  %s12109_s0 = smov [#allocation17]  }
  0x7b   :  { %s191_s10 = sshll.u32 %s12108_s3, 4  ;;  %s217_s11 = sshll.u32 %s12109_s0, 4  ;;  %s192_s10 = int_to_ptr.vmem [resolvable:$true] %s191_s10  ;;  %s218_s11 = int_to_ptr.vmem [resolvable:$true] %s217_s11 }
  0x7c   :  { %s11646_s21 = scalar_lea.hbm %s12195_s24, 48 }
  0x7d   :  { %p11647_p10 = scmp.ne.s32.totalorder %s12195_s24, %s11646_s21  ;;  %p11650_p11 = scmp.lt.u32.totalorder %s11646_s21, %s12195_s24 }
  0x7f   :  { %p11652_p12 = pnand %p11650_p11, %p11647_p10 }
  0x81   :  { %11655 = shalt.err (!%p11652_p12)
}
  0x82   :  { %s11656_s16 = scalar_lea.vmem %s192_s10, 48  ;;  %s11660_s23 = scalar_lea.vmem %s192_s10, 64 }
  0x83   :  { %p11657_p13 = scmp.ne.s32.totalorder %s192_s10, %s11656_s16  ;;  %p11661_p0 = scmp.lt.s32.totalorder %s192_s10, %s192_s10 }
  0x84   :  { %p11662_p1 = scmp.lt.s32.totalorder %s11660_s23, %s11656_s16 }
  0x86   :  { %p11663_p2 = por %p11662_p1, %p11661_p0 }
  0x88   :  { %p11664_p3 = pnand %p11663_p2, %p11657_p13 }
  0x8a   :  { %11667 = shalt.err (!%p11664_p3)
}
  0x8b   :  { %s12110_s22 = smov 16   ;;  %s12111_s14 = smov 1  }
  0x8c   :  { %197 = dma.hbm_to_vmem [thread:$0]  %s12195_s24, 48, %s192_s10, [#allocation15], %s12110_s22, %s12110_s22, %s12111_s14  }
  0x8d   :  { %s11668_s1 = scalar_lea.hbm %s12210_s12, 48 }
  0x8e   :  { %p11669_p4 = scmp.ne.s32.totalorder %s12210_s12, %s11668_s1  ;;  %p11672_p5 = scmp.lt.u32.totalorder %s11668_s1, %s12210_s12 }
  0x90   :  { %p11674_p6 = pnand %p11672_p5, %p11669_p4 }
  0x92   :  { %11677 = shalt.err (!%p11674_p6)
}
  0x93   :  { %s11678_s28 = scalar_lea.vmem %s218_s11, 48  ;;  %s11682_s2 = scalar_lea.vmem %s218_s11, 64 }
  0x94   :  { %p11679_p7 = scmp.ne.s32.totalorder %s218_s11, %s11678_s28  ;;  %p11683_p8 = scmp.lt.s32.totalorder %s218_s11, %s218_s11 }
  0x95   :  { %p11684_p9 = scmp.lt.s32.totalorder %s11682_s2, %s11678_s28 }
  0x97   :  { %p11685_p10 = por %p11684_p9, %p11683_p8 }
  0x99   :  { %p11686_p11 = pnand %p11685_p10, %p11679_p7 }
  0x9b   :  { %11689 = shalt.err (!%p11686_p11)
}
  0x9c   :  { %223 = dma.hbm_to_vmem [thread:$0]  %s12210_s12, 48, %s218_s11, [#allocation18], %s12110_s22, %s12110_s22, %s12111_s14  }
  0x9d   :  { %s12112_s24 = smov [#allocation20]   ;;  %s12113_s3 = smov [#allocation23]  }
  0x9e   :  { %s241_s7 = sshll.u32 %s12112_s24, 4  ;;  %s267_s10 = sshll.u32 %s12113_s3, 4  ;;  %s242_s7 = int_to_ptr.vmem [resolvable:$true] %s241_s7  ;;  %s268_s10 = int_to_ptr.vmem [resolvable:$true] %s267_s10 }
  0x9f   :  { %s11690_s0 = scalar_lea.hbm %s12220_s27, 48 }
  0xa0   :  { %p11691_p12 = scmp.ne.s32.totalorder %s12220_s27, %s11690_s0  ;;  %p11694_p13 = scmp.lt.u32.totalorder %s11690_s0, %s12220_s27 }
  0xa2   :  { %p11696_p0 = pnand %p11694_p13, %p11691_p12 }
  0xa4   :  { %11699 = shalt.err (!%p11696_p0)
}
  0xa5   :  { %s11700_s21 = scalar_lea.vmem %s242_s7, 48  ;;  %s11704_s16 = scalar_lea.vmem %s242_s7, 64 }
  0xa6   :  { %p11701_p1 = scmp.ne.s32.totalorder %s242_s7, %s11700_s21  ;;  %p11705_p2 = scmp.lt.s32.totalorder %s242_s7, %s242_s7 }
  0xa7   :  { %p11706_p3 = scmp.lt.s32.totalorder %s11704_s16, %s11700_s21 }
  0xa9   :  { %p11707_p4 = por %p11706_p3, %p11705_p2 }
  0xab   :  { %p11708_p5 = pnand %p11707_p4, %p11701_p1 }
  0xad   :  { %11711 = shalt.err (!%p11708_p5)
}
  0xae   :  { %247 = dma.hbm_to_vmem [thread:$0]  %s12220_s27, 48, %s242_s7, [#allocation21], %s12110_s22, %s12110_s22, %s12111_s14  }
  0xaf   :  { %s11712_s12 = scalar_lea.hbm %s12235_s13, 48 }
  0xb0   :  { %p11713_p6 = scmp.ne.s32.totalorder %s12235_s13, %s11712_s12  ;;  %p11716_p7 = scmp.lt.u32.totalorder %s11712_s12, %s12235_s13 }
  0xb2   :  { %p11718_p8 = pnand %p11716_p7, %p11713_p6 }
  0xb4   :  { %11721 = shalt.err (!%p11718_p8)
}
  0xb5   :  { %s11722_s11 = scalar_lea.vmem %s268_s10, 48  ;;  %s11726_s23 = scalar_lea.vmem %s268_s10, 64 }
  0xb6   :  { %p11723_p9 = scmp.ne.s32.totalorder %s268_s10, %s11722_s11  ;;  %p11727_p10 = scmp.lt.s32.totalorder %s268_s10, %s268_s10 }
  0xb7   :  { %p11728_p11 = scmp.lt.s32.totalorder %s11726_s23, %s11722_s11 }
  0xb9   :  { %p11729_p12 = por %p11728_p11, %p11727_p10 }
  0xbb   :  { %p11730_p13 = pnand %p11729_p12, %p11723_p9 }
  0xbd   :  { %11733 = shalt.err (!%p11730_p13)
}
  0xbe   :  { %273 = dma.hbm_to_vmem [thread:$0]  %s12235_s13, 48, %s268_s10, [#allocation24], %s12110_s22, %s12110_s22, %s12111_s14  }
  0xbf   :  { %s12114_s27 = smov [#allocation26]   ;;  %s12115_s28 = smov [#allocation29]  }
  0xc0   :  { %s293_s1 = sshll.u32 %s12114_s27, 4  ;;  %s317_s2 = sshll.u32 %s12115_s28, 4  ;;  %s294_s1 = int_to_ptr.vmem [resolvable:$true] %s293_s1  ;;  %s318_s2 = int_to_ptr.vmem [resolvable:$true] %s317_s2 }
  0xc1   :  { %s11734_s24 = scalar_lea.hbm %s12250_s17, 48 }
  0xc2   :  { %p11735_p0 = scmp.ne.s32.totalorder %s12250_s17, %s11734_s24  ;;  %p11738_p1 = scmp.lt.u32.totalorder %s11734_s24, %s12250_s17 }
  0xc4   :  { %p11740_p2 = pnand %p11738_p1, %p11735_p0 }
  0xc6   :  { %11743 = shalt.err (!%p11740_p2)
}
  0xc7   :  { %s11744_s7 = scalar_lea.vmem %s294_s1, 48  ;;  %s11748_s3 = scalar_lea.vmem %s294_s1, 64 }
  0xc8   :  { %p11745_p3 = scmp.ne.s32.totalorder %s294_s1, %s11744_s7  ;;  %p11749_p4 = scmp.lt.s32.totalorder %s294_s1, %s294_s1 }
  0xc9   :  { %p11750_p5 = scmp.lt.s32.totalorder %s11748_s3, %s11744_s7 }
  0xcb   :  { %p11751_p6 = por %p11750_p5, %p11749_p4 }
  0xcd   :  { %p11752_p7 = pnand %p11751_p6, %p11745_p3 }
  0xcf   :  { %11755 = shalt.err (!%p11752_p7)
}
  0xd0   :  { %299 = dma.hbm_to_vmem [thread:$0]  %s12250_s17, 48, %s294_s1, [#allocation27], %s12110_s22, %s12110_s22, %s12111_s14  }
  0xd1   :  { %s11756_s13 = scalar_lea.hbm %s12260_s30, 48 }
  0xd2   :  { %p11757_p8 = scmp.ne.s32.totalorder %s12260_s30, %s11756_s13  ;;  %p11760_p9 = scmp.lt.u32.totalorder %s11756_s13, %s12260_s30 }
  0xd4   :  { %p11762_p10 = pnand %p11760_p9, %p11757_p8 }
  0xd6   :  { %11765 = shalt.err (!%p11762_p10)
}
  0xd7   :  { %s11766_s10 = scalar_lea.vmem %s318_s2, 48  ;;  %s11770_s0 = scalar_lea.vmem %s318_s2, 64 }
  0xd8   :  { %p11767_p11 = scmp.ne.s32.totalorder %s318_s2, %s11766_s10  ;;  %p11771_p12 = scmp.lt.s32.totalorder %s318_s2, %s318_s2 }
  0xd9   :  { %p11772_p13 = scmp.lt.s32.totalorder %s11770_s0, %s11766_s10 }
  0xdb   :  { %p11773_p0 = por %p11772_p13, %p11771_p12 }
  0xdd   :  { %p11774_p1 = pnand %p11773_p0, %p11767_p11 }
  0xdf   :  { %11777 = shalt.err (!%p11774_p1)
}
  0xe0   :  { %323 = dma.hbm_to_vmem [thread:$0]  %s12260_s30, 48, %s318_s2, [#allocation30], %s12110_s22, %s12110_s22, %s12111_s14  }
  0xe1   :  { %s12116_s17 = smov [#allocation32]   ;;  %s12117_s16 = smov [#allocation3]  }
  0xe2   :  { %s343_s21 = sshll.u32 %s12116_s17, 4  ;;  %s99_s12 = sshll.u32 %s12117_s16, 4  ;;  %s344_s21 = int_to_ptr.vmem [resolvable:$true] %s343_s21  ;;  %s100_s12 = int_to_ptr.vmem [resolvable:$true] %s99_s12 }
  0xe3   :  { %s11778_s11 = scalar_lea.hbm %s12275_s25, 3072 }
  0xe4   :  { %p11779_p2 = scmp.ne.s32.totalorder %s12275_s25, %s11778_s11  ;;  %p11782_p3 = scmp.lt.u32.totalorder %s11778_s11, %s12275_s25 }
  0xe6   :  { %p11784_p4 = pnand %p11782_p3, %p11779_p2 }
  0xe8   :  { %11787 = shalt.err (!%p11784_p4)
}
  0xe9   :  { %s11788_s23 = scalar_lea.vmem %s344_s21, 3072  ;;  %p11793_p6 = scmp.lt.s32.totalorder %s344_s21, %s344_s21 }
  0xea   :  { %p11789_p5 = scmp.ne.s32.totalorder %s344_s21, %s11788_s23  ;;  %p11794_p7 = scmp.lt.s32.totalorder %s11788_s23, %s11788_s23 }
  0xec   :  { %p11795_p8 = por %p11794_p7, %p11793_p6 }
  0xee   :  { %p11796_p9 = pnand %p11795_p8, %p11789_p5 }
  0xf0   :  { %11799 = shalt.err (!%p11796_p9)
}
  0xf1   :  { %349 = dma.hbm_to_vmem [thread:$0]  %s12275_s25, 3072, %s344_s21, [#allocation33], %s12105_s26, %s12105_s26, %s12106_s9  }
  0xf2   :  { %s11800_s30 = scalar_lea.hbm %s12140_s5, 256 }
  0xf3   :  { %p11801_p10 = scmp.ne.s32.totalorder %s12140_s5, %s11800_s30  ;;  %p11804_p11 = scmp.lt.u32.totalorder %s11800_s30, %s12140_s5 }
  0xf5   :  { %p11806_p12 = pnand %p11804_p11, %p11801_p10 }
  0xf7   :  { %11809 = shalt.err (!%p11806_p12)
}
  0xf8   :  { %s11810_s27 = scalar_lea.vmem %s100_s12, 256  ;;  %p11815_p0 = scmp.lt.s32.totalorder %s100_s12, %s100_s12 }
  0xf9   :  { %p11811_p13 = scmp.ne.s32.totalorder %s100_s12, %s11810_s27  ;;  %p11816_p1 = scmp.lt.s32.totalorder %s11810_s27, %s11810_s27 }
  0xfb   :  { %p11817_p2 = por %p11816_p1, %p11815_p0 }
  0xfd   :  { %p11818_p3 = pnand %p11817_p2, %p11811_p13 }
  0xff   :  { %11821 = shalt.err (!%p11818_p3)
}
 0x100   :  { %105 = dma.hbm_to_vmem [thread:$0]  %s12140_s5, 256, %s100_s12, [#allocation4], %s12103_s15, %s12103_s15, %s12104_s18  }
 0x101   :  { %s12118_s25 = smov [#allocation7]   ;;  %s12119_s28 = smov [#allocation10]  }
 0x102   :  { %s131_s1 = sshll.u32 %s12118_s25, 4  ;;  %s155_s2 = sshll.u32 %s12119_s28, 4  ;;  %s132_s1 = int_to_ptr.vmem [resolvable:$true] %s131_s1  ;;  %s156_s2 = int_to_ptr.vmem [resolvable:$true] %s155_s2 }
 0x103   :  { %s11822_s24 = scalar_lea.hbm %s12170_s29, 48 }
 0x104   :  { %p11823_p4 = scmp.ne.s32.totalorder %s12170_s29, %s11822_s24  ;;  %p11826_p5 = scmp.lt.u32.totalorder %s11822_s24, %s12170_s29 }
 0x106   :  { %p11828_p6 = pnand %p11826_p5, %p11823_p4 }
 0x108   :  { %11831 = shalt.err (!%p11828_p6)
}
 0x109   :  { %s11832_s7 = scalar_lea.vmem %s132_s1, 48  ;;  %s11836_s3 = scalar_lea.vmem %s132_s1, 64 }
 0x10a   :  { %p11833_p7 = scmp.ne.s32.totalorder %s132_s1, %s11832_s7  ;;  %p11837_p8 = scmp.lt.s32.totalorder %s132_s1, %s132_s1 }
 0x10b   :  { %p11838_p9 = scmp.lt.s32.totalorder %s11836_s3, %s11832_s7 }
 0x10d   :  { %p11839_p10 = por %p11838_p9, %p11837_p8 }
 0x10f   :  { %p11840_p11 = pnand %p11839_p10, %p11833_p7 }
 0x111   :  { %11843 = shalt.err (!%p11840_p11)
}
 0x112   :  { %137 = dma.hbm_to_vmem [thread:$0]  %s12170_s29, 48, %s132_s1, [#allocation6], %s12110_s22, %s12110_s22, %s12111_s14  }
 0x113   :  { %s11844_s5 = scalar_lea.hbm %s12180_s8, 48 }
 0x114   :  { %p11845_p12 = scmp.ne.s32.totalorder %s12180_s8, %s11844_s5  ;;  %p11848_p13 = scmp.lt.u32.totalorder %s11844_s5, %s12180_s8 }
 0x116   :  { %p11850_p0 = pnand %p11848_p13, %p11845_p12 }
 0x118   :  { %11853 = shalt.err (!%p11850_p0)
}
 0x119   :  { %s11854_s15 = scalar_lea.vmem %s156_s2, 48  ;;  %s11858_s18 = scalar_lea.vmem %s156_s2, 64 }
 0x11a   :  { %p11855_p1 = scmp.ne.s32.totalorder %s156_s2, %s11854_s15  ;;  %p11859_p2 = scmp.lt.s32.totalorder %s156_s2, %s156_s2 }
 0x11b   :  { %p11860_p3 = scmp.lt.s32.totalorder %s11858_s18, %s11854_s15 }
 0x11d   :  { %p11861_p4 = por %p11860_p3, %p11859_p2 }
 0x11f   :  { %p11862_p5 = pnand %p11861_p4, %p11855_p1 }
 0x121   :  { %11865 = shalt.err (!%p11862_p5)
}
 0x122   :  { %161 = dma.hbm_to_vmem [thread:$0]  %s12180_s8, 48, %s156_s2, [#allocation9], %s12110_s22, %s12110_s22, %s12111_s14  }
 0x123   :  { %s12120_s29 = smov [#allocation13]   ;;  %s12121_s10 = smov [#allocation16]  }
 0x124   :  { %s179_s13 = sshll.u32 %s12120_s29, 4  ;;  %s205_s0 = sshll.u32 %s12121_s10, 4  ;;  %s180_s13 = int_to_ptr.vmem [resolvable:$true] %s179_s13  ;;  %s206_s0 = int_to_ptr.vmem [resolvable:$true] %s205_s0 }
 0x125   :  { %s11866_s17 = scalar_lea.hbm %s12190_s19, 48 }
 0x126   :  { %p11867_p6 = scmp.ne.s32.totalorder %s12190_s19, %s11866_s17  ;;  %p11870_p7 = scmp.lt.u32.totalorder %s11866_s17, %s12190_s19 }
 0x128   :  { %p11872_p8 = pnand %p11870_p7, %p11867_p6 }
 0x12a   :  { %11875 = shalt.err (!%p11872_p8)
}
 0x12b   :  { %s11876_s21 = scalar_lea.vmem %s180_s13, 48  ;;  %s11880_s16 = scalar_lea.vmem %s180_s13, 64 }
 0x12c   :  { %p11877_p9 = scmp.ne.s32.totalorder %s180_s13, %s11876_s21  ;;  %p11881_p10 = scmp.lt.s32.totalorder %s180_s13, %s180_s13 }
 0x12d   :  { %p11882_p11 = scmp.lt.s32.totalorder %s11880_s16, %s11876_s21 }
 0x12f   :  { %p11883_p12 = por %p11882_p11, %p11881_p10 }
 0x131   :  { %p11884_p13 = pnand %p11883_p12, %p11877_p9 }
 0x133   :  { %11887 = shalt.err (!%p11884_p13)
}
 0x134   :  { %s14997_s8 = sld [smem:[#allocation51_spill]] }
 0x135   :  { %185 = dma.hbm_to_vmem [thread:$0]  %s12190_s19, 48, %s180_s13, [#allocation12], %s12110_s22, %s12110_s22, %s12111_s14  }
 0x13a   :  { %s11888_s12 = scalar_lea.hbm %s14997_s8, 3072 }
 0x13b   :  { %p11889_p0 = scmp.ne.s32.totalorder %s14997_s8, %s11888_s12  ;;  %p11892_p1 = scmp.lt.u32.totalorder %s11888_s12, %s14997_s8 }
 0x13d   :  { %p11894_p2 = pnand %p11892_p1, %p11889_p0 }
 0x13f   :  { %11897 = shalt.err (!%p11894_p2)
}
 0x140   :  { %s11898_s11 = scalar_lea.vmem %s206_s0, 3072  ;;  %p11903_p4 = scmp.lt.s32.totalorder %s206_s0, %s206_s0 }
 0x141   :  { %p11899_p3 = scmp.ne.s32.totalorder %s206_s0, %s11898_s11  ;;  %p11904_p5 = scmp.lt.s32.totalorder %s11898_s11, %s11898_s11 }
 0x143   :  { %p11905_p6 = por %p11904_p5, %p11903_p4 }
 0x145   :  { %p11906_p7 = pnand %p11905_p6, %p11899_p3 }
 0x147   :  { %11909 = shalt.err (!%p11906_p7)
}
 0x148   :  { %s14998_s23 = sld [smem:[#allocation52_spill]]  ;;  %s12122_s19 = smov [#allocation19]  }
 0x149   :  { %211 = dma.hbm_to_vmem [thread:$0]  %s14997_s8, 3072, %s206_s0, [#allocation15], %s12105_s26, %s12105_s26, %s12106_s9  }
 0x14a   :  { %s229_s30 = sshll.u32 %s12122_s19, 4  ;;  %s12123_s27 = smov [#allocation22]   ;;  %s230_s30 = int_to_ptr.vmem [resolvable:$true] %s229_s30 }
 0x14b   :  { %s255_s25 = sshll.u32 %s12123_s27, 4  ;;  %s256_s25 = int_to_ptr.vmem [resolvable:$true] %s255_s25 }
 0x14e   :  { %s11910_s1 = scalar_lea.hbm %s14998_s23, 3072 }
 0x14f   :  { %p11911_p8 = scmp.ne.s32.totalorder %s14998_s23, %s11910_s1  ;;  %p11914_p9 = scmp.lt.u32.totalorder %s11910_s1, %s14998_s23 }
 0x151   :  { %p11916_p10 = pnand %p11914_p9, %p11911_p8 }
 0x153   :  { %11919 = shalt.err (!%p11916_p10)
}
 0x154   :  { %s11920_s28 = scalar_lea.vmem %s230_s30, 3072  ;;  %p11925_p12 = scmp.lt.s32.totalorder %s230_s30, %s230_s30 }
 0x155   :  { %p11921_p11 = scmp.ne.s32.totalorder %s230_s30, %s11920_s28  ;;  %p11926_p13 = scmp.lt.s32.totalorder %s11920_s28, %s11920_s28 }
 0x157   :  { %p11927_p0 = por %p11926_p13, %p11925_p12 }
 0x159   :  { %p11928_p1 = pnand %p11927_p0, %p11921_p11 }
 0x15b   :  { %11931 = shalt.err (!%p11928_p1)
}
 0x15c   :  { %s14999_s2 = sld [smem:[#allocation54_spill]] }
 0x15d   :  { %235 = dma.hbm_to_vmem [thread:$0]  %s14998_s23, 3072, %s230_s30, [#allocation18], %s12105_s26, %s12105_s26, %s12106_s9  }
 0x162   :  { %s11932_s24 = scalar_lea.hbm %s14999_s2, 48 }
 0x163   :  { %p11933_p2 = scmp.ne.s32.totalorder %s14999_s2, %s11932_s24  ;;  %p11936_p3 = scmp.lt.u32.totalorder %s11932_s24, %s14999_s2 }
 0x165   :  { %p11938_p4 = pnand %p11936_p3, %p11933_p2 }
 0x167   :  { %11941 = shalt.err (!%p11938_p4)
}
 0x168   :  { %s11942_s7 = scalar_lea.vmem %s256_s25, 48  ;;  %s11946_s3 = scalar_lea.vmem %s256_s25, 64 }
 0x169   :  { %p11943_p5 = scmp.ne.s32.totalorder %s256_s25, %s11942_s7  ;;  %p11947_p6 = scmp.lt.s32.totalorder %s256_s25, %s256_s25 }
 0x16a   :  { %p11948_p7 = scmp.lt.s32.totalorder %s11946_s3, %s11942_s7 }
 0x16c   :  { %p11949_p8 = por %p11948_p7, %p11947_p6 }
 0x16e   :  { %p11950_p9 = pnand %p11949_p8, %p11943_p5 }
 0x170   :  { %11953 = shalt.err (!%p11950_p9)
}
 0x171   :  { %s15000_s5 = sld [smem:[#allocation56_spill]]  ;;  %s12124_s15 = smov [#allocation25]  }
 0x172   :  { %261 = dma.hbm_to_vmem [thread:$0]  %s14999_s2, 48, %s256_s25, [#allocation21], %s12110_s22, %s12110_s22, %s12111_s14  }
 0x173   :  { %s281_s18 = sshll.u32 %s12124_s15, 4  ;;  %s12125_s29 = smov [#allocation28]   ;;  %s282_s18 = int_to_ptr.vmem [resolvable:$true] %s281_s18 }
 0x174   :  { %s305_s13 = sshll.u32 %s12125_s29, 4  ;;  %s306_s13 = int_to_ptr.vmem [resolvable:$true] %s305_s13 }
 0x177   :  { %s11954_s10 = scalar_lea.hbm %s15000_s5, 3072 }
 0x178   :  { %p11955_p10 = scmp.ne.s32.totalorder %s15000_s5, %s11954_s10  ;;  %p11958_p11 = scmp.lt.u32.totalorder %s11954_s10, %s15000_s5 }
 0x17a   :  { %p11960_p12 = pnand %p11958_p11, %p11955_p10 }
 0x17c   :  { %11963 = shalt.err (!%p11960_p12)
}
 0x17d   :  { %s11964_s0 = scalar_lea.vmem %s282_s18, 3072  ;;  %p11969_p0 = scmp.lt.s32.totalorder %s282_s18, %s282_s18 }
 0x17e   :  { %p11965_p13 = scmp.ne.s32.totalorder %s282_s18, %s11964_s0  ;;  %p11970_p1 = scmp.lt.s32.totalorder %s11964_s0, %s11964_s0 }
 0x180   :  { %p11971_p2 = por %p11970_p1, %p11969_p0 }
 0x182   :  { %p11972_p3 = pnand %p11971_p2, %p11965_p13 }
 0x184   :  { %11975 = shalt.err (!%p11972_p3)
}
 0x185   :  { %s15001_s22 = sld [smem:[#allocation57_spill]] }
 0x186   :  { %287 = dma.hbm_to_vmem [thread:$0]  %s15000_s5, 3072, %s282_s18, [#allocation24], %s12105_s26, %s12105_s26, %s12106_s9  }
 0x18b   :  { %s11976_s14 = scalar_lea.hbm %s15001_s22, 3072 }
 0x18c   :  { %p11977_p4 = scmp.ne.s32.totalorder %s15001_s22, %s11976_s14  ;;  %p11980_p5 = scmp.lt.u32.totalorder %s11976_s14, %s15001_s22 }
 0x18e   :  { %p11982_p6 = pnand %p11980_p5, %p11977_p4 }
 0x190   :  { %11985 = shalt.err (!%p11982_p6)
}
 0x191   :  { %s11986_s17 = scalar_lea.vmem %s306_s13, 3072  ;;  %p11991_p8 = scmp.lt.s32.totalorder %s306_s13, %s306_s13 }
 0x192   :  { %p11987_p7 = scmp.ne.s32.totalorder %s306_s13, %s11986_s17  ;;  %p11992_p9 = scmp.lt.s32.totalorder %s11986_s17, %s11986_s17 }
 0x194   :  { %p11993_p10 = por %p11992_p9, %p11991_p8 }
 0x196   :  { %p11994_p11 = pnand %p11993_p10, %p11987_p7 }
 0x198   :  { %11997 = shalt.err (!%p11994_p11)
}
 0x199   :  { %s15002_s21 = sld [smem:[#allocation58_spill]]  ;;  %s12126_s16 = smov [#allocation31]  }
 0x19a   :  { %311 = dma.hbm_to_vmem [thread:$0]  %s15001_s22, 3072, %s306_s13, [#allocation27], %s12105_s26, %s12105_s26, %s12106_s9  }
 0x19b   :  { %s329_s8 = sshll.u32 %s12126_s16, 4  ;;  %s12127_s12 = smov [#allocation34]   ;;  %s330_s8 = int_to_ptr.vmem [resolvable:$true] %s329_s8 }
 0x19c   :  { %s357_s11 = sshll.u32 %s12127_s12, 4  ;;  %s358_s11 = int_to_ptr.vmem [resolvable:$true] %s357_s11 }
 0x19f   :  { %s11998_s23 = scalar_lea.hbm %s15002_s21, 3072 }
 0x1a0   :  { %p11999_p12 = scmp.ne.s32.totalorder %s15002_s21, %s11998_s23  ;;  %p12002_p13 = scmp.lt.u32.totalorder %s11998_s23, %s15002_s21 }
 0x1a2   :  { %p12004_p0 = pnand %p12002_p13, %p11999_p12 }
 0x1a4   :  { %12007 = shalt.err (!%p12004_p0)
}
 0x1a5   :  { %s12008_s19 = scalar_lea.vmem %s330_s8, 3072  ;;  %p12013_p2 = scmp.lt.s32.totalorder %s330_s8, %s330_s8 }
 0x1a6   :  { %p12009_p1 = scmp.ne.s32.totalorder %s330_s8, %s12008_s19  ;;  %p12014_p3 = scmp.lt.s32.totalorder %s12008_s19, %s12008_s19 }
 0x1a8   :  { %p12015_p4 = por %p12014_p3, %p12013_p2 }
 0x1aa   :  { %p12016_p5 = pnand %p12015_p4, %p12009_p1 }
 0x1ac   :  { %12019 = shalt.err (!%p12016_p5)
}
 0x1ad   :  { %s15003_s30 = sld [smem:[#allocation61_spill]] }
 0x1ae   :  { %335 = dma.hbm_to_vmem [thread:$0]  %s15002_s21, 3072, %s330_s8, [#allocation30], %s12105_s26, %s12105_s26, %s12106_s9  }
 0x1b3   :  { %s12020_s27 = scalar_lea.hbm %s15003_s30, 1024 }
 0x1b4   :  { %p12021_p6 = scmp.ne.s32.totalorder %s15003_s30, %s12020_s27  ;;  %p12024_p7 = scmp.lt.u32.totalorder %s12020_s27, %s15003_s30 }
 0x1b6   :  { %p12026_p8 = pnand %p12024_p7, %p12021_p6 }
 0x1b8   :  { %12029 = shalt.err (!%p12026_p8)
}
 0x1b9   :  { %s12030_s25 = scalar_lea.vmem %s358_s11, 1024  ;;  %p12035_p10 = scmp.lt.s32.totalorder %s358_s11, %s358_s11 }
 0x1ba   :  { %p12031_p9 = scmp.ne.s32.totalorder %s358_s11, %s12030_s25  ;;  %p12036_p11 = scmp.lt.s32.totalorder %s12030_s25, %s12030_s25 }
 0x1bc   :  { %p12037_p12 = por %p12036_p11, %p12035_p10 }
 0x1be   :  { %p12038_p13 = pnand %p12037_p12, %p12031_p9 }
 0x1c0   :  { %12041 = shalt.err (!%p12038_p13)
}
 0x1c1   :  { %363 = dma.hbm_to_vmem [thread:$0]  %s15003_s30, 1024, %s358_s11, [#allocation33], %s12105_s26, %s12105_s26, %s12106_s9  }
 0x1c2   :  { %12042 = dma.done.wait [#allocation4], 256  }
 0x1c3   :  { %12043 = vsyncadd [#allocation4], 4294967040 }
 0x1c4   :  { %12044 = dma.done.wait [#allocation6], 6192  }
 0x1c5   :  { %12045 = vsyncadd [#allocation6], 4294961104 }
 0x1c6   :  { %12046 = dma.done.wait [#allocation9], 3120  }
 0x1c7   :  { %12047 = vsyncadd [#allocation9], 4294964176 }
 0x1c8   :  { %12048 = dma.done.wait [#allocation12], 3120  }
 0x1c9   :  { %12049 = vsyncadd [#allocation12], 4294964176 }
 0x1ca   :  { %12050 = dma.done.wait [#allocation15], 3120  }
 0x1cb   :  { %12051 = vsyncadd [#allocation15], 4294964176 }
 0x1cc   :  { %12052 = dma.done.wait [#allocation18], 3120  }
 0x1cd   :  { %12053 = vsyncadd [#allocation18], 4294964176 }
 0x1ce   :  { %12054 = dma.done.wait [#allocation21], 96  }
 0x1cf   :  { %12055 = vsyncadd [#allocation21], 4294967200 }
 0x1d0   :  { %12056 = dma.done.wait [#allocation24], 3120  }
 0x1d1   :  { %12057 = vsyncadd [#allocation24], 4294964176 }
 0x1d2   :  { %12058 = dma.done.wait [#allocation27], 3120  }
 0x1d3   :  { %12059 = vsyncadd [#allocation27], 4294964176 }
 0x1d4   :  { %12060 = dma.done.wait [#allocation30], 3120  }
 0x1d5   :  { %12061 = vsyncadd [#allocation30], 4294964176 }
 0x1d6   :  { %12062 = dma.done.wait [#allocation33], 4096  }
 0x1d7   :  { %12063 = vsyncadd [#allocation33], 4294963200  ;;  %s15004_s26 = sld [smem:[#allocation49_spill]]  ;;  %v14880_v1 = vmov 0.0   ;;  %vm12129_vm0 = vmmov 0   ;;  %v438_v10 = vld [vmem:[#allocation3] sm:$0xff] }
 0x1d8   :  { %9864 = vmatprep.subr.bf16.mxu0 %v14880_v1  ;;  %9880 = vmatprep.mubr.msk.bf16.mxu0 %vm12129_vm0, %v14880_v1  ;;  %v439_v11 = vld [vmem:[#allocation3 + $0x8] sm:$0xff]  ;;  %v10798_v13 = vld [vmem:[#allocation8] sm:$0xff]   ;;  %v10799_v14 = vld [vmem:[#allocation8 + $0x8] sm:$0xff]   ;;  %s15005_s9 = sld [smem:[#allocation47_spill]]  ;;  %s15006_s1 = sld [smem:[#allocation53_spill]]  ;;  %vm835_vm1 = vcmask 130048  }
 0x1d9   :  { %9884 = vmatprep.subr.bf16.mxu1 %v14880_v1  ;;  %9900 = vmatprep.mubr.msk.bf16.mxu1 %vm12129_vm0, %v14880_v1  ;;  %v12500_v12 = vpack.c.bf16 %v439_v11, %v438_v10  ;;  %v10800_v15 = vld [vmem:[#allocation8 + $0x10] sm:$0xff]   ;;  %v10801_v16 = vld [vmem:[#allocation8 + $0x18] sm:$0xff]   ;;  %v10802_v17 = vld [vmem:[#allocation8 + $0x20] sm:$0xff]   ;;  %v995_v10 = vlaneseq  ;;  %s15008_s28 = sld [smem:[#allocation50_spill]]  ;;  %s15009_s2 = sld [smem:[#allocation55_spill]]  ;;  %vm3215_vm2 = vcmask 1041409  }
 0x1da   :  { %9885 = vmatpush3.bf16.msra.mxu1 %v10798_v13  ;;  %v10803_v18 = vld [vmem:[#allocation8 + $0x28] sm:$0xff]   ;;  %v10804_v19 = vld [vmem:[#allocation8 + $0x30] sm:$0xff]   ;;  %v10805_v20 = vld [vmem:[#allocation8 + $0x38] sm:$0xff]   ;;  %s15013_s24 = sld [smem:[#allocation46_spill]]  ;;  %s15031_s7 = sld [smem:[#allocation59_spill]]  ;;  %vm3217_vm3 = vcmask 1042434  }
 0x1db   :  { %9886 = vmatprep.subr.bf16.mxu1 %v14880_v1  ;;  %v8905_v21 = vld [vmem:[#allocation7] ss:$0 sm:$0xff]  ;;  %v8916_v47 = vld [vmem:[#allocation10] ss:$0 sm:$0xff]  ;;  %v10817_v57 = vld [vmem:[#allocation25 + $0x8] sm:$0xff]   ;;  %v996_v13 = vshrl.u32 %v995_v10, 7 }
 0x1dc   :  { %v10815_v54 = vld [vmem:[#allocation25] sm:$0xff]   ;;  %v10819_v58 = vld [vmem:[#allocation25 + $0x10] sm:$0xff]   ;;  %v10821_v61 = vld [vmem:[#allocation25 + $0x18] sm:$0xff]   ;;  %vm3219_vm4 = vcmask 1043459   ;;  %vm3221_vm5 = vcmask 1044484   ;;  %vm3223_vm6 = vcmask 1045509  }
 0x1dd   :  { %v10790_v2 = vld [vmem:[%s15004_s26] sm:$0xff]   ;;  %v10791_v3 = vld [vmem:[%s15004_s26 + $0x8] sm:$0xff]   ;;  %v10792_v4 = vld [vmem:[%s15004_s26 + $0x10] sm:$0xff]   ;;  %vm3225_vm7 = vcmask 1046534   ;;  %vm3227_vm8 = vcmask 1047559   ;;  %s15060_s3 = sld [smem:[#allocation60_spill]] }
 0x1de   :  { %9865 = vmatpush3.bf16.msra.mxu0 %v10790_v2  ;;  %v10793_v5 = vld [vmem:[%s15004_s26 + $0x18] sm:$0xff]   ;;  %v10794_v6 = vld [vmem:[%s15004_s26 + $0x20] sm:$0xff]   ;;  %v10795_v7 = vld [vmem:[%s15004_s26 + $0x28] sm:$0xff]   ;;  %9887 = vmatpush3.bf16.msra.mxu1 %v10799_v14  ;;  %s15126_s5 = sld [smem:[#allocation48_spill]]  ;;  %vm8805_vm9 = vcmask 7168   ;;  %s15194_s18 = sld [smem:[#allocation65_spill]] }
 0x1df   :  { %9866 = vmatprep.subr.bf16.mxu0 %v14880_v1  ;;  %v10796_v8 = vld [vmem:[%s15004_s26 + $0x30] sm:$0xff]   ;;  %v10797_v9 = vld [vmem:[%s15004_s26 + $0x38] sm:$0xff]   ;;  %9888 = vmatprep.subr.bf16.mxu1 %v14880_v1  ;;  %v10806_v39 = vld [vmem:[%s15005_s9] sm:$0xff]   ;;  %s15193_s15 = sld [smem:[#allocation64_spill]]  ;;  %vm8787_vm10 = vcmask 523264   ;;  %vm8820_vm11 = vcmask 1040384  }
 0x1e0   :  { %v10814_v40 = vld [vmem:[%s15006_s1] sm:$0xff]   ;;  %v10816_v41 = vld [vmem:[%s15006_s1 + $0x8] sm:$0xff]   ;;  %v10818_v42 = vld [vmem:[%s15006_s1 + $0x10] sm:$0xff]   ;;  %vm8843_vm12 = vcmask 1024  }
 0x1e1   :  { %v10820_v43 = vld [vmem:[%s15006_s1 + $0x18] sm:$0xff]   ;;  %v10822_v44 = vld [vmem:[%s15006_s1 + $0x20] sm:$0xff]   ;;  %v10824_v45 = vld [vmem:[%s15006_s1 + $0x28] sm:$0xff]  }
 0x1e2   :  { %9867 = vmatpush3.bf16.msra.mxu0 %v10791_v3  ;;  %9889 = vmatpush3.bf16.msra.mxu1 %v10800_v15  ;;  %v10807_v55 = vld [vmem:[%s15005_s9 + $0x8] sm:$0xff]   ;;  %v10808_v56 = vld [vmem:[%s15005_s9 + $0x10] sm:$0xff]   ;;  %v10809_v59 = vld [vmem:[%s15005_s9 + $0x18] sm:$0xff]  }
 0x1e3   :  { %9868 = vmatprep.subr.bf16.mxu0 %v14880_v1  ;;  %9890 = vmatprep.subr.bf16.mxu1 %v14880_v1  ;;  %v10810_v60 = vld [vmem:[%s15005_s9 + $0x20] sm:$0xff]   ;;  %v10823_v62 = vld [vmem:[#allocation25 + $0x20] sm:$0xff]   ;;  %v10811_v63 = vld [vmem:[%s15005_s9 + $0x28] sm:$0xff]  }
 0x1e4   :  { %v10812_v0 = vld [vmem:[%s15005_s9 + $0x30] sm:$0xff]   ;;  %v10825_v2 = vld [vmem:[#allocation25 + $0x28] sm:$0xff]  }
 0x1e5   :  { %v10813_v3 = vld [vmem:[%s15005_s9 + $0x38] sm:$0xff]  }
 0x1e6   :  { %9869 = vmatpush3.bf16.msra.mxu0 %v10792_v4  ;;  %9891 = vmatpush3.bf16.msra.mxu1 %v10801_v16  ;;  %v10826_v4 = vld [vmem:[%s15006_s1 + $0x30] sm:$0xff]  }
 0x1e7   :  { %9870 = vmatprep.subr.bf16.mxu0 %v14880_v1  ;;  %9892 = vmatprep.subr.bf16.mxu1 %v14880_v1 }
 0x1ea   :  { %9871 = vmatpush3.bf16.msra.mxu0 %v10793_v5  ;;  %9893 = vmatpush3.bf16.msra.mxu1 %v10802_v17  ;;  %v10827_v5 = vld [vmem:[#allocation25 + $0x30] sm:$0xff]  }
 0x1eb   :  { %9872 = vmatprep.subr.bf16.mxu0 %v14880_v1  ;;  %9894 = vmatprep.subr.bf16.mxu1 %v14880_v1 }
 0x1ee   :  { %9873 = vmatpush3.bf16.msra.mxu0 %v10794_v6  ;;  %9895 = vmatpush3.bf16.msra.mxu1 %v10803_v18  ;;  %v10828_v6 = vld [vmem:[%s15006_s1 + $0x38] sm:$0xff]  }
 0x1ef   :  { %9874 = vmatprep.subr.bf16.mxu0 %v14880_v1  ;;  %9896 = vmatprep.subr.bf16.mxu1 %v14880_v1 }
 0x1f2   :  { %9875 = vmatpush3.bf16.msra.mxu0 %v10795_v7  ;;  %9897 = vmatpush3.bf16.msra.mxu1 %v10804_v19  ;;  %v10829_v7 = vld [vmem:[#allocation25 + $0x38] sm:$0xff]  }
 0x1f3   :  { %9876 = vmatprep.subr.bf16.mxu0 %v14880_v1  ;;  %9898 = vmatprep.subr.bf16.mxu1 %v14880_v1 }
 0x1f6   :  { %9877 = vmatpush3.bf16.msra.mxu0 %v10796_v8  ;;  %9899 = vmatpush3.bf16.msra.mxu1 %v10805_v20  ;;  %v12130_v8 = vmov 1966171168  }
 0x1f7   :  { %9878 = vmatprep.subr.bf16.mxu0 %v14880_v1  ;;  %9922 = vmatprep.subr.bf16.mxu1 %v10814_v40 }
 0x1fa   :  { %9879 = vmatpush3.bf16.msra.mxu0 %v10797_v9  ;;  %v993_v9 = vunpack.c.l.s4 %v12130_v8 }
 0x1fc   :  { %v994_v11 = vunpack.c.0.s8 %v993_v9 }
 0x1fd   :  { %9881 = vmatmul.mubr.bf16.vlgmr.msra.gmra.mrb[0].mxu0 %v12500_v12 }
 0x1fe   :  { %9906 = vmatprep.mubr.msk.bf16.mxu0 %vm835_vm1, %v10806_v39  ;;  %v12538_v14 = vsub.s32 %v994_v11, %v996_v13 }
 0x2d0   :  { %v660_v22 = vpop.f32.mrb[0].mxu0 }
 0x2d1   :  { %v661_v23 = vadd.f32 %v8905_v21, %v660_v22  ;;  %v9882_v24 = vpop.f32.mrb[1].mxu0  ;;  %v959_v22 = vld [vmem:[#allocation5 + $0x10] sm:$0xff] }
 0x2d2   :  { %v663_v25 = vpop.f32.mrb[2].mxu0 }
 0x2d3   :  { %v8914_v26 = vmul.f32 -1.442695, %v661_v23  ;;  %v664_v27 = vadd.f32 %v8905_v21, %v663_v25  ;;  %v9883_v28 = vpop.f32.mrb[3].mxu0  ;;  %v957_v25 = vld [vmem:[#allocation5] sm:$0xff] }
 0x2d4   :  { %v960_v28 = vld [vmem:[#allocation5 + $0x18] sm:$0xff] }
 0x2d5   :  { %11054 = vpow2.f32 %v8914_v26  ;;  %v8915_v29 = vmul.f32 -1.442695, %v664_v27 }
 0x2d7   :  { %11056 = vpow2.f32 %v8915_v29 }
 0x2df   :  { %v11055_v30 = vpop.eup %11054 }
 0x2e0   :  { %v673_v31 = vadd.f32 1.0, %v11055_v30 }
 0x2e1   :  { %v11057_v32 = vpop.eup %11056 }
 0x2e2   :  { %11058 = vrcp.f32 %v673_v31  ;;  %v674_v33 = vadd.f32 1.0, %v11057_v32  ;;  %v958_v32 = vld [vmem:[#allocation5 + $0x8] sm:$0xff] }
 0x2e4   :  { %11060 = vrcp.f32 %v674_v33 }
 0x2ec   :  { %v11059_v34 = vpop.eup %11058 }
 0x2ed   :  { %v679_v36 = vmul.f32 %v11059_v34, %v661_v23  ;;  %v12544_v23 = vsub.s32 0, %v996_v13 }
 0x2ee   :  { %v11061_v35 = vpop.eup %11060 }
 0x2ef   :  { %v680_v37 = vmul.f32 %v11061_v35, %v664_v27  ;;  %15007 = vst [vmem:[#allocation66_spill] sm:$0xff] %v12544_v23 }
 0x2f1   :  { %v681_v38 = vpack.c.bf16 %v680_v37, %v679_v36 }
 0x2f3   :  { %9901 = vmatmul.mubr.bf16.vlgmr.msra.gmra.mrb[0].mxu1 %v681_v38 }
 0x2f4   :  { %9923 = vmatpush3.bf16.msra.mxu1 %v10814_v40 }
 0x2f5   :  { %9924 = vmatprep.subr.bf16.mxu1 %v10816_v41 }
 0x2f8   :  { %9925 = vmatpush3.bf16.msra.mxu1 %v10816_v41 }
 0x2f9   :  { %9926 = vmatprep.subr.bf16.mxu1 %v10818_v42 }
 0x2fc   :  { %9927 = vmatpush3.bf16.msra.mxu1 %v10818_v42 }
 0x2fd   :  { %9928 = vmatprep.subr.bf16.mxu1 %v10820_v43 }
 0x300   :  { %9929 = vmatpush3.bf16.msra.mxu1 %v10820_v43 }
 0x301   :  { %9930 = vmatprep.subr.bf16.mxu1 %v10822_v44 }
 0x304   :  { %9931 = vmatpush3.bf16.msra.mxu1 %v10822_v44 }
 0x305   :  { %9932 = vmatprep.subr.bf16.mxu1 %v10824_v45 }
 0x308   :  { %9933 = vmatpush3.bf16.msra.mxu1 %v10824_v45 }
 0x309   :  { %9934 = vmatprep.subr.bf16.mxu1 %v10826_v4 }
 0x30c   :  { %9935 = vmatpush3.bf16.msra.mxu1 %v10826_v4 }
 0x30d   :  { %9936 = vmatprep.subr.bf16.mxu1 %v10828_v6 }
 0x310   :  { %9937 = vmatpush3.bf16.msra.mxu1 %v10828_v6 }
 0x3c6   :  { %v787_v46 = vpop.f32.mrb[0].mxu1 }
 0x3c7   :  { %v9902_v48 = vpop.f32.mrb[1].mxu1  ;;  %v788_v52 = vadd.f32 %v8916_v47, %v787_v46 }
 0x3c8   :  { %v790_v49 = vpop.f32.mrb[2].mxu1 }
 0x3c9   :  { %v12518_v50 = vadd.f32 %v8916_v47, %v790_v49  ;;  %v9903_v51 = vpop.f32.mrb[3].mxu1  ;;  %v998_v15 = vrot.slane %v788_v52, %v12538_v14  ;;  %v991_v16 = vcombine.high %v788_v52, %v788_v52 }
 0x3cb   :  { %v794_v53 = vpack.c.bf16 %v12518_v50, %v788_v52  ;;  %v1006_v17 = vcombine.high %v998_v15, %v998_v15  ;;  %v1014_v18 = vrot.slane %v998_v15, %v12538_v14  ;;  %v1005_v19 = vrot.slane %v991_v16, %v12538_v14  ;;  %v963_v52 = vld [vmem:[#allocation5 + $0x30] sm:$0xff] }
 0x3cc   :  { %v1047_v34 = vrot.slane %v12518_v50, %v12538_v14  ;;  %v1040_v46 = vcombine.high %v12518_v50, %v12518_v50  ;;  %v10831_v15 = vld [vmem:[#allocation11 + $0x8] sm:$0xff]  }
 0x3cd   :  { %9904 = vmatprep.subr.bf16.mxu0 %v794_v53  ;;  %v1028_v20 = vrot.slane %v1006_v17, %v12538_v14  ;;  %v1036_v21 = vcombine.high %v1014_v18, %v1014_v18  ;;  %v1007_v24 = vcombine.high %v1005_v19, %v1005_v19  ;;  %v1021_v33 = vrot.slane %v1005_v19, %v12538_v14 }
 0x3ce   :  { %9905 = vmatpush3.bf16.msra.mxu0 %v794_v53  ;;  %v1092_v36 = vrot.slane %v1014_v18, %v12544_v23  ;;  %v1055_v49 = vcombine.high %v1047_v34, %v1047_v34 }
 0x3cf   :  { %9954 = vmatprep.subr.bf16.mxu0 %v10815_v54  ;;  %v1038_v26 = vcombine.high %v1028_v20, %v1028_v20  ;;  %v1100_v30 = vrot.slane %v1036_v21, %v12544_v23  ;;  %v1035_v42 = vrot.slane %v1007_v24, %v12538_v14  ;;  %v1096_v45 = vrot.slane %v1028_v20, %v12544_v23  ;;  %v967_v20 = vld [vmem:[#allocation5 + $0x50] sm:$0xff]  ;;  %v965_v21 = vld [vmem:[#allocation5 + $0x40] sm:$0xff] }
 0x3d0   :  { %v1037_v48 = vcombine.high %v1021_v33, %v1021_v33 }
 0x3d1   :  { %9907 = vmatmul.mubr.msk.bf16.vlgmr.msra.gmra.mrb[4].mxu0 %vm835_vm1, %v10807_v55  ;;  %v1104_v40 = vrot.slane %v1038_v26, %v12544_v23  ;;  %v1039_v55 = vcombine.high %v1035_v42, %v1035_v42  ;;  %v1112_v13 = vrot.slane %v1035_v42, %v12544_v23  ;;  %v968_v26 = vld [vmem:[#allocation5 + $0x58] sm:$0xff] }
 0x3d2   :  { %9910 = vmatprep.mubr.msk.bf16.mxu0 %vm835_vm1, %v10808_v56  ;;  %9955 = vmatpush3.bf16.msra.mxu0 %v10815_v54  ;;  %v961_v54 = vld [vmem:[#allocation5 + $0x20] sm:$0xff] }
 0x3d3   :  { %9956 = vmatprep.subr.bf16.mxu0 %v10817_v57  ;;  %v1120_v8 = vrot.slane %v1039_v55, %v12544_v23  ;;  %v972_v55 = vld [vmem:[#allocation5 + $0x78] sm:$0xff] }
 0x3d6   :  { %9957 = vmatpush3.bf16.msra.mxu0 %v10817_v57  ;;  %v964_v57 = vld [vmem:[#allocation5 + $0x38] sm:$0xff] }
 0x3d7   :  { %9958 = vmatprep.subr.bf16.mxu0 %v10819_v58 }
 0x3d9   :  { %9911 = vmatmul.mubr.msk.bf16.gmra.mrb[8].mxu0 %vm835_vm1, %v10809_v59  ;;  %v10830_v59 = vld [vmem:[#allocation11] sm:$0xff]  }
 0x3da   :  { %9914 = vmatprep.mubr.msk.bf16.mxu0 %vm835_vm1, %v10810_v60  ;;  %9959 = vmatpush3.bf16.msra.mxu0 %v10819_v58  ;;  %v1054_v60 = vrot.slane %v1040_v46, %v12538_v14 }
 0x3db   :  { %9960 = vmatprep.subr.bf16.mxu0 %v10821_v61 }
 0x3dc   :  { %v1056_v18 = vcombine.high %v1054_v60, %v1054_v60 }
 0x3de   :  { %9961 = vmatpush3.bf16.msra.mxu0 %v10821_v61  ;;  %v1063_v61 = vrot.slane %v1047_v34, %v12538_v14 }
 0x3df   :  { %9962 = vmatprep.subr.bf16.mxu0 %v10823_v62 }
 0x3e0   :  { %v1085_v17 = vcombine.high %v1063_v61, %v1063_v61 }
 0x3e1   :  { %9915 = vmatmul.mubr.msk.bf16.gmra.mrb[12].mxu0 %vm835_vm1, %v10811_v63  ;;  %v1116_v63 = vrot.slane %v1037_v48, %v12544_v23 }
 0x3e2   :  { %9918 = vmatprep.mubr.msk.bf16.mxu0 %vm835_vm1, %v10812_v0  ;;  %9963 = vmatpush3.bf16.msra.mxu0 %v10823_v62  ;;  %v962_v0 = vld [vmem:[#allocation5 + $0x28] sm:$0xff] }
 0x3e3   :  { %9964 = vmatprep.subr.bf16.mxu0 %v10825_v2 }
 0x3e6   :  { %9965 = vmatpush3.bf16.msra.mxu0 %v10825_v2 }
 0x3e7   :  { %9966 = vmatprep.subr.bf16.mxu0 %v10827_v5 }
 0x3e9   :  { %9919 = vmatmul.mubr.msk.bf16.gmra.mrb[16].mxu0 %vm835_vm1, %v10813_v3  ;;  %v1108_v3 = vrot.slane %v1021_v33, %v12544_v23  ;;  %v1070_v33 = vrot.slane %v1054_v60, %v12538_v14 }
 0x3ea   :  { %9967 = vmatpush3.bf16.msra.mxu0 %v10827_v5  ;;  %v1077_v5 = vrot.slane %v1055_v49, %v12538_v14  ;;  %v971_v49 = vld [vmem:[#allocation5 + $0x70] sm:$0xff] }
 0x3eb   :  { %9968 = vmatprep.subr.bf16.mxu0 %v10829_v7 }
 0x3ee   :  { %9969 = vmatpush3.bf16.msra.mxu0 %v10829_v7 }
 0x3ef   :  { %10018 = vmatprep.subr.bf16.mxu0 %v14880_v1 }
 0x4a4   :  { %v9908_v27 = vpop.f32.mrb[4].mxu0 }
 0x4a5   :  { %v975_v29 = vmul.f32 %v9908_v27, %v959_v22  ;;  %v894_v31 = vpop.f32.mrb[5].mxu0  ;;  %v1087_v22 = vcombine.high %v1077_v5, %v1077_v5 }
 0x4a6   :  { %v973_v35 = vmul.f32 %v957_v25, %v894_v31  ;;  %v9909_v37 = vpop.f32.mrb[6].mxu0 }
 0x4a7   :  { %v1171_v38 = vmul.f32 %v1100_v30, %v975_v29  ;;  %v976_v39 = vmul.f32 %v9909_v37, %v960_v28  ;;  %v897_v41 = vpop.f32.mrb[7].mxu0  ;;  %v10832_v28 = vld [vmem:[#allocation11 + $0x10] sm:$0xff]   ;;  %v1132_v30 = vrot.slane %v1085_v17, %v12544_v23  ;;  %v1084_v37 = vrot.slane %v1056_v18, %v12538_v14  ;;  %v10838_v17 = vld [vmem:[#allocation28] sm:$0xff]   ;;  %v10839_v18 = vld [vmem:[#allocation28 + $0x8] sm:$0xff]  }
 0x4a8   :  { %v1169_v43 = vmul.f32 %v1092_v36, %v973_v35  ;;  %v974_v44 = vmul.f32 %v958_v32, %v897_v41  ;;  %v966_v32 = vld [vmem:[#allocation5 + $0x48] sm:$0xff]  ;;  %v1124_v35 = vrot.slane %v1063_v61, %v12544_v23  ;;  %9986 = vmatprep.subr.bf16.mxu1 %v10838_v17 }
 0x4a9   :  { %v1172_v47 = vmul.f32 %v1104_v40, %v976_v39  ;;  %v1136_v40 = vrot.slane %v1087_v22, %v12544_v23  ;;  %v970_v61 = vld [vmem:[#allocation5 + $0x68] sm:$0xff] }
 0x4aa   :  { %v1170_v51 = vmul.f32 %v1096_v45, %v974_v44  ;;  %v1128_v44 = vrot.slane %v1077_v5, %v12544_v23  ;;  %v10833_v45 = vld [vmem:[#allocation11 + $0x18] sm:$0xff]   ;;  %v10843_v22 = vld [vmem:[#allocation28 + $0x28] sm:$0xff]  }
 0x4ab   :  { %v1186_v53 = vpack.c.bf16 %v1172_v47, %v1171_v38  ;;  %v1086_v47 = vcombine.high %v1070_v33, %v1070_v33 }
 0x4ac   :  { %v9912_v56 = vpop.f32.mrb[8].mxu0  ;;  %v1185_v58 = vpack.c.bf16 %v1170_v51, %v1169_v43  ;;  %v969_v51 = vld [vmem:[#allocation5 + $0x60] sm:$0xff] }
 0x4ad   :  { %v979_v62 = vmul.f32 %v9912_v56, %v963_v52  ;;  %v910_v50 = vpop.f32.mrb[9].mxu0  ;;  %v1088_v52 = vcombine.high %v1084_v37, %v1084_v37 }
 0x4ae   :  { %v977_v2 = vmul.f32 %v961_v54, %v910_v50  ;;  %v9913_v4 = vpop.f32.mrb[10].mxu0  ;;  %9938 = vmatprep.mubr.bf16.mxu1 %v1185_v58  ;;  %9970 = vmatprep.mubr.bf16.mxu0 %v1185_v58 }
 0x4af   :  { %v1175_v6 = vmul.f32 %v1116_v63, %v979_v62  ;;  %v980_v7 = vmul.f32 %v9913_v4, %v964_v57  ;;  %v913_v9 = vpop.f32.mrb[11].mxu0  ;;  %9939 = vmatmul.mubr.bf16.vlgmr.msra.gmra.mrb[4].mxu1 %v1186_v53  ;;  %9971 = vmatmul.mubr.bf16.vlgmr.msra.gmra.mrb[20].mxu0 %v1186_v53  ;;  %v10834_v57 = vld [vmem:[#allocation11 + $0x20] sm:$0xff]   ;;  %v1140_v63 = vrot.slane %v1070_v33, %v12544_v23 }
 0x4b0   :  { %v1173_v10 = vmul.f32 %v1108_v3, %v977_v2  ;;  %v978_v11 = vmul.f32 %v962_v0, %v913_v9  ;;  %10019 = vmatpush3.bf16.msra.mxu0 %v10830_v59  ;;  %v1148_v59 = vrot.slane %v1086_v47, %v12544_v23  ;;  %v1152_v3 = vrot.slane %v1088_v52, %v12544_v23 }
 0x4b1   :  { %v1176_v16 = vmul.f32 %v1120_v8, %v980_v7  ;;  %10020 = vmatprep.subr.bf16.mxu0 %v14880_v1  ;;  %v1144_v7 = vrot.slane %v1084_v37, %v12544_v23  ;;  %v10835_v8 = vld [vmem:[#allocation11 + $0x28] sm:$0xff]   ;;  %9987 = vmatpush3.bf16.msra.mxu1 %v10838_v17 }
 0x4b2   :  { %v1174_v19 = vmul.f32 %v1112_v13, %v978_v11  ;;  %9988 = vmatprep.subr.bf16.mxu1 %v10839_v18 }
 0x4b3   :  { %v1188_v24 = vpack.c.bf16 %v1176_v16, %v1175_v6  ;;  %v10837_v16 = vld [vmem:[#allocation11 + $0x38] sm:$0xff]  }
 0x4b4   :  { %v9916_v25 = vpop.f32.mrb[12].mxu0  ;;  %10021 = vmatpush3.bf16.msra.mxu0 %v10831_v15  ;;  %v1187_v27 = vpack.c.bf16 %v1174_v19, %v1173_v10  ;;  %v10836_v15 = vld [vmem:[#allocation11 + $0x30] sm:$0xff]  }
 0x4b5   :  { %v983_v29 = vmul.f32 %v9916_v25, %v967_v20  ;;  %v926_v31 = vpop.f32.mrb[13].mxu0  ;;  %10022 = vmatprep.subr.bf16.mxu0 %v14880_v1  ;;  %9989 = vmatpush3.bf16.msra.mxu1 %v10839_v18  ;;  %v10840_v19 = vld [vmem:[#allocation28 + $0x10] sm:$0xff]   ;;  %v10841_v20 = vld [vmem:[#allocation28 + $0x18] sm:$0xff]  }
 0x4b6   :  { %v981_v34 = vmul.f32 %v965_v21, %v926_v31  ;;  %v9917_v36 = vpop.f32.mrb[14].mxu0  ;;  %9942 = vmatprep.mubr.bf16.mxu1 %v1187_v27  ;;  %9974 = vmatprep.mubr.bf16.mxu0 %v1187_v27  ;;  %v10842_v21 = vld [vmem:[#allocation28 + $0x20] sm:$0xff]   ;;  %v10845_v25 = vld [vmem:[#allocation28 + $0x38] sm:$0xff]  }
 0x4b7   :  { %v1179_v38 = vmul.f32 %v1132_v30, %v983_v29  ;;  %v984_v39 = vmul.f32 %v9917_v36, %v968_v26  ;;  %v929_v41 = vpop.f32.mrb[15].mxu0  ;;  %9943 = vmatmul.mubr.bf16.gmra.mrb[8].mxu1 %v1188_v24  ;;  %9975 = vmatmul.mubr.bf16.gmra.mrb[24].mxu0 %v1188_v24  ;;  %v10844_v24 = vld [vmem:[#allocation28 + $0x30] sm:$0xff]   ;;  %v12587_v26 = vld [vmem:[#allocation26] ss:$0 sm:$0xff] }
 0x4b8   :  { %v1177_v42 = vmul.f32 %v1124_v35, %v981_v34  ;;  %v982_v43 = vmul.f32 %v966_v32, %v929_v41  ;;  %10023 = vmatpush3.bf16.msra.mxu0 %v10832_v28  ;;  %9990 = vmatprep.subr.bf16.mxu1 %v10840_v19  ;;  %v12601_v35 = vld [vmem:[#allocation22] ss:$0 sm:$0xff] }
 0x4b9   :  { %v1180_v46 = vmul.f32 %v1136_v40, %v984_v39  ;;  %10024 = vmatprep.subr.bf16.mxu0 %v14880_v1  ;;  %9991 = vmatpush3.bf16.msra.mxu1 %v10840_v19 }
 0x4ba   :  { %v1178_v48 = vmul.f32 %v1128_v44, %v982_v43  ;;  %9992 = vmatprep.subr.bf16.mxu1 %v10841_v20 }
 0x4bb   :  { %v1190_v53 = vpack.c.bf16 %v1180_v46, %v1179_v38 }
 0x4bc   :  { %v9920_v54 = vpop.f32.mrb[16].mxu0  ;;  %10025 = vmatpush3.bf16.msra.mxu0 %v10833_v45  ;;  %v1189_v56 = vpack.c.bf16 %v1178_v48, %v1177_v42 }
 0x4bd   :  { %v987_v58 = vmul.f32 %v9920_v54, %v971_v49  ;;  %v942_v60 = vpop.f32.mrb[17].mxu0  ;;  %10026 = vmatprep.subr.bf16.mxu0 %v14880_v1  ;;  %9993 = vmatpush3.bf16.msra.mxu1 %v10841_v20 }
 0x4be   :  { %v985_v62 = vmul.f32 %v969_v51, %v942_v60  ;;  %v9921_v50 = vpop.f32.mrb[18].mxu0  ;;  %9946 = vmatprep.mubr.bf16.mxu1 %v1189_v56  ;;  %9978 = vmatprep.mubr.bf16.mxu0 %v1189_v56 }
 0x4bf   :  { %v1183_v0 = vmul.f32 %v1148_v59, %v987_v58  ;;  %v988_v2 = vmul.f32 %v9921_v50, %v972_v55  ;;  %v945_v4 = vpop.f32.mrb[19].mxu0  ;;  %9947 = vmatmul.mubr.bf16.gmra.mrb[12].mxu1 %v1190_v53  ;;  %9979 = vmatmul.mubr.bf16.gmra.mrb[28].mxu0 %v1190_v53 }
 0x4c0   :  { %v1181_v5 = vmul.f32 %v1140_v63, %v985_v62  ;;  %v986_v6 = vmul.f32 %v970_v61, %v945_v4  ;;  %10027 = vmatpush3.bf16.msra.mxu0 %v10834_v57  ;;  %9994 = vmatprep.subr.bf16.mxu1 %v10842_v21 }
 0x4c1   :  { %v1184_v9 = vmul.f32 %v1152_v3, %v988_v2  ;;  %10028 = vmatprep.subr.bf16.mxu0 %v14880_v1  ;;  %9995 = vmatpush3.bf16.msra.mxu1 %v10842_v21 }
 0x4c2   :  { %v1182_v10 = vmul.f32 %v1144_v7, %v986_v6  ;;  %9996 = vmatprep.subr.bf16.mxu1 %v10843_v22 }
 0x4c3   :  { %v1192_v11 = vpack.c.bf16 %v1184_v9, %v1183_v0 }
 0x4c4   :  { %10029 = vmatpush3.bf16.msra.mxu0 %v10835_v8  ;;  %v1191_v13 = vpack.c.bf16 %v1182_v10, %v1181_v5 }
 0x4c5   :  { %10030 = vmatprep.subr.bf16.mxu0 %v14880_v1  ;;  %9997 = vmatpush3.bf16.msra.mxu1 %v10843_v22 }
 0x4c6   :  { %9950 = vmatprep.mubr.bf16.mxu1 %v1191_v13  ;;  %9982 = vmatprep.mubr.bf16.mxu0 %v1191_v13 }
 0x4c7   :  { %9951 = vmatmul.mubr.bf16.gmra.mrb[16].mxu1 %v1192_v11  ;;  %9983 = vmatmul.mubr.bf16.gmra.mrb[32].mxu0 %v1192_v11 }
 0x4c8   :  { %10031 = vmatpush3.bf16.msra.mxu0 %v10836_v15  ;;  %10034 = vmatprep.mubr.msk.bf16.mxu0 %vm12129_vm0, %v14880_v1 }
 0x4c9   :  { %10032 = vmatprep.subr.bf16.mxu0 %v14880_v1  ;;  %9998 = vmatprep.subr.bf16.mxu1 %v10844_v24 }
 0x4ca   :  { %9999 = vmatpush3.bf16.msra.mxu1 %v10844_v24 }
 0x4cb   :  { %10000 = vmatprep.subr.bf16.mxu1 %v10845_v25 }
 0x4cc   :  { %10033 = vmatpush3.bf16.msra.mxu0 %v10837_v16 }
 0x4cd   :  { %10058 = vmatprep.subr.bf16.mxu0 %v14880_v1 }
 0x4ce   :  { %10001 = vmatpush3.bf16.msra.mxu1 %v10845_v25 }
 0x4cf   :  { %10035 = vmatmul.mubr.bf16.vlgmr.msra.gmra.mrb[36].mxu0 %v12500_v12  ;;  %10038 = vmatprep.subr.bf16.mxu1 %v14880_v1 }
 0x4d0   :  { %10074 = vmatprep.mubr.msk.bf16.mxu0 %vm12129_vm0, %v14880_v1 }
 0x582   :  { %v12589_v27 = vpop.f32.mrb[4].mxu1  ;;  %v9972_v28 = vpop.f32.mrb[20].mxu0 }
 0x583   :  { %v12592_v29 = vadd.f32 %v9972_v28, %v12587_v26  ;;  %v12594_v30 = vpop.f32.mrb[5].mxu1  ;;  %v1672_v31 = vpop.f32.mrb[21].mxu0 }
 0x584   :  { %v12597_v32 = vadd.f32 %v12587_v26, %v1672_v31  ;;  %v12599_v33 = vpop.f32.mrb[6].mxu1  ;;  %v9973_v34 = vpop.f32.mrb[22].mxu0 }
 0x585   :  { %v8979_v36 = vmul.f32 -1.442695, %v12592_v29  ;;  %v12605_v37 = vadd.f32 %v9973_v34, %v12587_v26  ;;  %v1301_v38 = vpop.f32.mrb[7].mxu1  ;;  %v1675_v39 = vpop.f32.mrb[23].mxu0 }
 0x586   :  { %v8977_v40 = vmul.f32 -1.442695, %v12597_v32  ;;  %v12609_v41 = vadd.f32 %v12601_v35, %v1301_v38  ;;  %v12612_v42 = vadd.f32 %v12587_v26, %v1675_v39 }
 0x587   :  { %11062 = vpow2.f32 %v8979_v36  ;;  %v8980_v43 = vmul.f32 -1.442695, %v12605_v37 }
 0x588   :  { %v8951_v44 = vmul.f32 -1.442695, %v12609_v41  ;;  %11064 = vpow2.f32 %v8977_v40  ;;  %v8978_v45 = vmul.f32 -1.442695, %v12612_v42 }
 0x589   :  { %11066 = vpow2.f32 %v8980_v43 }
 0x58a   :  { %v12617_v46 = vpop.f32.mrb[8].mxu1  ;;  %v9976_v47 = vpop.f32.mrb[24].mxu0  ;;  %11068 = vpow2.f32 %v8951_v44 }
 0x58b   :  { %v12619_v48 = vpop.f32.mrb[9].mxu1  ;;  %v1688_v49 = vpop.f32.mrb[25].mxu0  ;;  %11070 = vpow2.f32 %v8978_v45  ;;  %v12626_v55 = vadd.f32 %v9976_v47, %v12587_v26 }
 0x58c   :  { %v12621_v51 = vpop.f32.mrb[10].mxu1  ;;  %v9977_v52 = vpop.f32.mrb[26].mxu0  ;;  %v12634_v50 = vadd.f32 %v12587_v26, %v1688_v49 }
 0x58d   :  { %v12623_v53 = vpop.f32.mrb[11].mxu1  ;;  %v1691_v54 = vpop.f32.mrb[27].mxu0  ;;  %v8983_v57 = vmul.f32 -1.442695, %v12626_v55  ;;  %v12642_v15 = vadd.f32 %v9977_v52, %v12587_v26 }
 0x58e   :  { %v8981_v11 = vmul.f32 -1.442695, %v12634_v50  ;;  %v12645_v17 = vadd.f32 %v12587_v26, %v1691_v54 }
 0x58f   :  { %11072 = vpow2.f32 %v8983_v57  ;;  %v8984_v24 = vmul.f32 -1.442695, %v12642_v15 }
 0x590   :  { %v8982_v36 = vmul.f32 -1.442695, %v12645_v17 }
 0x591   :  { %v11063_v56 = vpop.eup %11062 }
 0x592   :  { %v12629_v58 = vpop.f32.mrb[12].mxu1  ;;  %v9980_v59 = vpop.f32.mrb[28].mxu0  ;;  %v1785_v60 = vadd.f32 1.0, %v11063_v56 }
 0x593   :  { %v12631_v61 = vpop.f32.mrb[13].mxu1  ;;  %v1704_v62 = vpop.f32.mrb[29].mxu0  ;;  %v12658_v25 = vadd.f32 %v9980_v59, %v12587_v26 }
 0x594   :  { %v11065_v63 = vpop.eup %11064  ;;  %v12636_v0 = vpop.f32.mrb[14].mxu1  ;;  %11074 = vrcp.f32 %v1785_v60  ;;  %v12666_v38 = vadd.f32 %v12587_v26, %v1704_v62 }
 0x595   :  { %v9981_v2 = vpop.f32.mrb[30].mxu0  ;;  %v1783_v3 = vadd.f32 1.0, %v11065_v63  ;;  %v12638_v4 = vpop.f32.mrb[15].mxu1  ;;  %v8987_v45 = vmul.f32 -1.442695, %v12658_v25 }
 0x596   :  { %v11067_v5 = vpop.eup %11066  ;;  %v1707_v6 = vpop.f32.mrb[31].mxu0  ;;  %v12676_v47 = vadd.f32 %v9981_v2, %v12587_v26  ;;  %v8985_v56 = vmul.f32 -1.442695, %v12666_v38 }
 0x597   :  { %v11069_v7 = vpop.eup %11068  ;;  %v1786_v8 = vadd.f32 1.0, %v11067_v5  ;;  %11076 = vrcp.f32 %v1783_v3  ;;  %v12682_v57 = vadd.f32 %v12587_v26, %v1707_v6 }
 0x598   :  { %v11071_v9 = vpop.eup %11070  ;;  %v1410_v10 = vadd.f32 1.0, %v11069_v7  ;;  %v8988_v7 = vmul.f32 -1.442695, %v12676_v47 }
 0x599   :  { %11078 = vrcp.f32 %v1786_v8  ;;  %v1784_v13 = vadd.f32 1.0, %v11071_v9  ;;  %v11073_v40 = vpop.eup %11072 }
 0x59a   :  { %11080 = vrcp.f32 %v1410_v10  ;;  %v9952_v16 = vpop.f32.mrb[16].mxu1  ;;  %v12650_v19 = vpop.f32.mrb[32].mxu0 }
 0x59b   :  { %11082 = vrcp.f32 %v1784_v13  ;;  %v12648_v18 = vadd.f32 %v9952_v16, %v12601_v35  ;;  %v12652_v20 = vpop.f32.mrb[17].mxu1  ;;  %v12654_v21 = vpop.f32.mrb[33].mxu0  ;;  %v1789_v13 = vadd.f32 1.0, %v11073_v40  ;;  %v12692_v16 = vld [vmem:[#allocation23] ss:$0 sm:$0xff] }
 0x59c   :  { %11084 = vpow2.f32 %v8981_v11  ;;  %v9953_v22 = vpop.f32.mrb[18].mxu1  ;;  %v12660_v28 = vpop.f32.mrb[34].mxu0 }
 0x59d   :  { %v1349_v31 = vpop.f32.mrb[19].mxu1  ;;  %v12662_v34 = vpop.f32.mrb[35].mxu0  ;;  %v12669_v39 = vadd.f32 %v9953_v22, %v12601_v35  ;;  %11086 = vpow2.f32 %v8984_v24  ;;  %v10846_v24 = vld [vmem:[#allocation16] sm:$0xff]  }
 0x59e   :  { %v12672_v43 = vadd.f32 %v12601_v35, %v1349_v31  ;;  %v11075_v44 = vpop.eup %11074  ;;  %11088 = vpow2.f32 %v8982_v36  ;;  %v10847_v36 = vld [vmem:[#allocation16 + $0x8] sm:$0xff]  }
 0x59f   :  { %v1833_v62 = vmul.f32 %v11075_v44, %v12592_v29  ;;  %11090 = vpow2.f32 %v8987_v45  ;;  %v8986_v29 = vmul.f32 -1.442695, %v12682_v57 }
 0x5a0   :  { %11092 = vpow2.f32 %v8985_v56  ;;  %v10848_v56 = vld [vmem:[#allocation16 + $0x10] sm:$0xff]  }
 0x5a1   :  { %v11077_v49 = vpop.eup %11076  ;;  %11094 = vpow2.f32 %v8988_v7 }
 0x5a2   :  { %v12678_v52 = vpop.f32.mrb[36].mxu0  ;;  %v1831_v10 = vmul.f32 %v11077_v49, %v12597_v32  ;;  %11096 = vrcp.f32 %v1789_v13  ;;  %v12702_v49 = vadd.f32 %v12650_v19, %v12587_v26  ;;  %v12712_v19 = vadd.f32 %v12587_v26, %v12654_v21  ;;  %v9002_v13 = vld [vmem:[#allocation13] ss:$0 sm:$0xff] }
 0x5a3   :  { %v11079_v54 = vpop.eup %11078  ;;  %v10036_v59 = vpop.f32.mrb[37].mxu0  ;;  %11098 = vpow2.f32 %v8986_v29 }
 0x5a4   :  { %v11081_v60 = vpop.eup %11080  ;;  %v1834_v63 = vmul.f32 %v11079_v54, %v12605_v37  ;;  %v12686_v3 = vpop.f32.mrb[38].mxu0 }
 0x5a5   :  { %v11083_v2 = vpop.eup %11082  ;;  %v1458_v5 = vmul.f32 %v11081_v60, %v12609_v41  ;;  %v10037_v8 = vpop.f32.mrb[39].mxu0  ;;  %v8964_v41 = vmul.f32 -1.442695, %v12648_v18  ;;  %v12707_v60 = vadd.f32 %v12601_v35, %v12594_v30 }
 0x5a6   :  { %v11085_v9 = vpop.eup %11084  ;;  %v1848_v6 = vpack.c.bf16 %v1834_v63, %v1833_v62  ;;  %v1832_v11 = vmul.f32 %v11083_v2, %v12612_v42  ;;  %v8991_v2 = vmul.f32 -1.442695, %v12702_v49  ;;  %v10849_v8 = vld [vmem:[#allocation16 + $0x18] sm:$0xff]  }
 0x5a7   :  { %v12696_v37 = vmul.f32 %v12692_v16, %v1458_v5  ;;  %v1787_v31 = vadd.f32 1.0, %v11085_v9  ;;  %v11087_v32 = vpop.eup %11086  ;;  %11100 = vpow2.f32 %v8964_v41  ;;  %v8950_v30 = vmul.f32 -1.442695, %v12707_v60 }
 0x5a8   :  { %v1847_v22 = vpack.c.bf16 %v1832_v11, %v1831_v10  ;;  %v1790_v42 = vadd.f32 1.0, %v11087_v32  ;;  %v11089_v40 = vpop.eup %11088  ;;  %v12718_v11 = vadd.f32 %v12660_v28, %v12587_v26  ;;  %v10850_v32 = vld [vmem:[#allocation16 + $0x20] sm:$0xff]  }
 0x5a9   :  { %11102 = vrcp.f32 %v1787_v31  ;;  %v1788_v44 = vadd.f32 1.0, %v11089_v40  ;;  %v11091_v45 = vpop.eup %11090  ;;  %v12724_v31 = vadd.f32 %v12587_v26, %v12662_v34 }
 0x5aa   :  { %10002 = vmatprep.mubr.bf16.mxu1 %v1847_v22  ;;  %11104 = vrcp.f32 %v1790_v42  ;;  %v1793_v54 = vadd.f32 1.0, %v11091_v45  ;;  %v11093_v59 = vpop.eup %11092  ;;  %v8989_v22 = vmul.f32 -1.442695, %v12712_v19  ;;  %v12734_v45 = vadd.f32 %v9002_v13, %v12686_v3 }
 0x5ab   :  { %10003 = vmatmul.mubr.bf16.vlgmr.msra.gmra.mrb[20].mxu1 %v1848_v6  ;;  %11106 = vrcp.f32 %v1788_v44  ;;  %v1791_v62 = vadd.f32 1.0, %v11093_v59  ;;  %v11095_v63 = vpop.eup %11094  ;;  %v8992_v44 = vmul.f32 -1.442695, %v12718_v11 }
 0x5ac   :  { %10039 = vmatpush3.bf16.msra.mxu1 %v10846_v24  ;;  %v11097_v5 = vpop.eup %11096  ;;  %11108 = vrcp.f32 %v1793_v54  ;;  %v1794_v7 = vadd.f32 1.0, %v11095_v63  ;;  %v8965_v24 = vmul.f32 -1.442695, %v12669_v39  ;;  %v12742_v54 = vadd.f32 %v12601_v35, %v12631_v61 }
 0x5ad   :  { %10040 = vmatprep.subr.bf16.mxu1 %v14880_v1  ;;  %v11099_v9 = vpop.eup %11098  ;;  %11110 = vrcp.f32 %v1791_v62  ;;  %v1837_v42 = vmul.f32 %v11097_v5, %v12626_v55  ;;  %v8963_v55 = vmul.f32 -1.442695, %v12672_v43  ;;  %v9012_v62 = vmul.f32 -1.442695, %v12734_v45 }
 0x5ae   :  { %11112 = vrcp.f32 %v1794_v7  ;;  %v1792_v6 = vadd.f32 1.0, %v11099_v9  ;;  %v12753_v61 = vadd.f32 %v12601_v35, %v12638_v4  ;;  %v10852_v9 = vld [vmem:[#allocation16 + $0x30] sm:$0xff]  }
 0x5af   :  { %11114 = vpow2.f32 %v8991_v2 }
 0x5b0   :  { %10041 = vmatpush3.bf16.msra.mxu1 %v10847_v36  ;;  %11116 = vrcp.f32 %v1792_v6  ;;  %v12729_v36 = vadd.f32 %v9002_v13, %v12678_v52  ;;  %v8990_v52 = vmul.f32 -1.442695, %v12724_v31  ;;  %v8959_v13 = vmul.f32 -1.442695, %v12753_v61 }
 0x5b1   :  { %10042 = vmatprep.subr.bf16.mxu1 %v14880_v1  ;;  %v11101_v10 = vpop.eup %11100 }
 0x5b2   :  { %v1423_v41 = vadd.f32 1.0, %v11101_v10 }
 0x5b3   :  { %v11103_v29 = vpop.eup %11102 }
 0x5b4   :  { %10043 = vmatpush3.bf16.msra.mxu1 %v10848_v56  ;;  %v11105_v21 = vpop.eup %11104  ;;  %11118 = vrcp.f32 %v1423_v41  ;;  %v1835_v26 = vmul.f32 %v11103_v29, %v12634_v50  ;;  %v9011_v56 = vmul.f32 -1.442695, %v12729_v36  ;;  %v10851_v50 = vld [vmem:[#allocation16 + $0x28] sm:$0xff]  }
 0x5b5   :  { %10044 = vmatprep.subr.bf16.mxu1 %v14880_v1  ;;  %v1838_v28 = vmul.f32 %v11105_v21, %v12642_v15  ;;  %v11107_v40 = vpop.eup %11106  ;;  %11120 = vpow2.f32 %v8950_v30 }
 0x5b6   :  { %v1836_v34 = vmul.f32 %v11107_v40, %v12645_v17  ;;  %11122 = vpow2.f32 %v8989_v22  ;;  %v11109_v59 = vpop.eup %11108  ;;  %v12748_v17 = vadd.f32 %v12589_v27, %v12601_v35 }
 0x5b7   :  { %v1850_v15 = vpack.c.bf16 %v1838_v28, %v1837_v42  ;;  %11124 = vpow2.f32 %v8965_v24  ;;  %v11111_v63 = vpop.eup %11110  ;;  %v1841_v7 = vmul.f32 %v11109_v59, %v12658_v25  ;;  %v10853_v24 = vld [vmem:[#allocation16 + $0x38] sm:$0xff]  }
 0x5b8   :  { %10045 = vmatpush3.bf16.msra.mxu1 %v10849_v8  ;;  %v1849_v3 = vpack.c.bf16 %v1836_v34, %v1835_v26  ;;  %11126 = vpow2.f32 %v8992_v44  ;;  %v11113_v2 = vpop.eup %11112  ;;  %v8958_v8 = vmul.f32 -1.442695, %v12742_v54  ;;  %v8952_v30 = vmul.f32 -1.442695, %v12748_v17 }
 0x5b9   :  { %10046 = vmatprep.subr.bf16.mxu1 %v14880_v1  ;;  %11128 = vpow2.f32 %v8963_v55  ;;  %v11115_v5 = vpop.eup %11114  ;;  %v1842_v27 = vmul.f32 %v11113_v2, %v12676_v47  ;;  %v1839_v6 = vmul.f32 %v11111_v63, %v12666_v38  ;;  %v12770_v44 = vadd.f32 %v12629_v58, %v12601_v35 }
 0x5ba   :  { %10006 = vmatprep.mubr.bf16.mxu1 %v1849_v3  ;;  %11130 = vpow2.f32 %v8990_v52  ;;  %v11117_v10 = vpop.eup %11116  ;;  %v1797_v21 = vadd.f32 1.0, %v11115_v5 }
 0x5bb   :  { %10007 = vmatmul.mubr.bf16.gmra.mrb[24].mxu1 %v1850_v15  ;;  %11132 = vpow2.f32 %v9011_v56  ;;  %v1840_v25 = vmul.f32 %v11117_v10, %v12682_v57  ;;  %v1852_v29 = vpack.c.bf16 %v1842_v27, %v1841_v7  ;;  %v8960_v59 = vmul.f32 -1.442695, %v12770_v44 }
 0x5bc   :  { %10047 = vmatpush3.bf16.msra.mxu1 %v10850_v32  ;;  %11134 = vpow2.f32 %v9012_v62 }
 0x5bd   :  { %10048 = vmatprep.subr.bf16.mxu1 %v14880_v1  ;;  %11136 = vpow2.f32 %v8958_v8  ;;  %v1851_v22 = vpack.c.bf16 %v1840_v25, %v1839_v6  ;;  %v12780_v8 = vadd.f32 %v12636_v0, %v12601_v35 }
 0x5be   :  { %v11119_v4 = vpop.eup %11118  ;;  %11138 = vpow2.f32 %v8952_v30  ;;  %v12784_v30 = vadd.f32 %v12601_v35, %v12619_v48 }
 0x5bf   :  { %v11121_v41 = vpop.eup %11120  ;;  %v1471_v47 = vmul.f32 %v11119_v4, %v12648_v18  ;;  %11140 = vpow2.f32 %v8959_v13  ;;  %10010 = vmatprep.mubr.bf16.mxu1 %v1851_v22  ;;  %v8961_v6 = vmul.f32 -1.442695, %v12780_v8 }
 0x5c0   :  { %10049 = vmatpush3.bf16.msra.mxu1 %v10851_v50  ;;  %v11123_v32 = vpop.eup %11122  ;;  %11142 = vrcp.f32 %v1797_v21  ;;  %v12774_v50 = vadd.f32 %v12599_v33, %v12601_v35  ;;  %v1409_v62 = vadd.f32 1.0, %v11121_v41 }
 0x5c1   :  { %10050 = vmatprep.subr.bf16.mxu1 %v14880_v1  ;;  %v12766_v42 = vmul.f32 %v12692_v16, %v1471_v47  ;;  %v11125_v38 = vpop.eup %11124  ;;  %v1795_v28 = vadd.f32 1.0, %v11123_v32 }
 0x5c2   :  { %v11127_v57 = vpop.eup %11126  ;;  %v1424_v40 = vadd.f32 1.0, %v11125_v38  ;;  %v8953_v7 = vmul.f32 -1.442695, %v12774_v50 }
 0x5c3   :  { %10011 = vmatmul.mubr.bf16.gmra.mrb[28].mxu1 %v1852_v29  ;;  %v11129_v18 = vpop.eup %11128  ;;  %11144 = vrcp.f32 %v1795_v28  ;;  %v1798_v26 = vadd.f32 1.0, %v11127_v57  ;;  %v9013_v28 = vld [vmem:[#allocation14] ss:$0 sm:$0xff] }
 0x5c4   :  { %10051 = vmatpush3.bf16.msra.mxu1 %v10852_v9  ;;  %v11131_v34 = vpop.eup %11130  ;;  %11146 = vrcp.f32 %v1424_v40  ;;  %v1422_v55 = vadd.f32 1.0, %v11129_v18 }
 0x5c5   :  { %10052 = vmatprep.subr.bf16.mxu1 %v14880_v1  ;;  %v11133_v15 = vpop.eup %11132  ;;  %11148 = vrcp.f32 %v1798_v26  ;;  %v1796_v52 = vadd.f32 1.0, %v11131_v34 }
 0x5c6   :  { %v11135_v56 = vpop.eup %11134  ;;  %11150 = vrcp.f32 %v1422_v55  ;;  %v2253_v3 = vadd.f32 1.0, %v11133_v15  ;;  %v12808_v55 = vadd.f32 %v12601_v35, %v12623_v53 }
 0x5c7   :  { %11152 = vrcp.f32 %v1796_v52  ;;  %v2254_v58 = vadd.f32 1.0, %v11135_v56  ;;  %v11137_v63 = vpop.eup %11136 }
 0x5c8   :  { %10053 = vmatpush3.bf16.msra.mxu1 %v10853_v24  ;;  %11154 = vrcp.f32 %v2253_v3  ;;  %v11139_v2 = vpop.eup %11138  ;;  %v1417_v33 = vadd.f32 1.0, %v11137_v63  ;;  %v8954_v24 = vmul.f32 -1.442695, %v12784_v30  ;;  %v12816_v3 = vadd.f32 %v12617_v46, %v12601_v35 }
 0x5c9   :  { %11156 = vrcp.f32 %v2254_v58  ;;  %v11141_v5 = vpop.eup %11140  ;;  %v1411_v40 = vadd.f32 1.0, %v11139_v2  ;;  %v8955_v53 = vmul.f32 -1.442695, %v12808_v55 }
 0x5ca   :  { %11158 = vpow2.f32 %v8960_v59  ;;  %v11143_v27 = vpop.eup %11142  ;;  %v1418_v29 = vadd.f32 1.0, %v11141_v5  ;;  %v12824_v5 = vadd.f32 %v12621_v51, %v12601_v35 }
 0x5cb   :  { %11160 = vrcp.f32 %v1409_v62  ;;  %v1845_v0 = vmul.f32 %v11143_v27, %v12702_v49  ;;  %v12799_v49 = vadd.f32 %v12601_v35, %v12652_v20 }
 0x5cc   :  { %11162 = vpow2.f32 %v8953_v7  ;;  %v11550_v7 = vld [vmem:[%s15005_s9] sm:$0xff]  }
 0x5cd   :  { %v11145_v9 = vpop.eup %11144  ;;  %11164 = vrcp.f32 %v1417_v33  ;;  %v8962_v20 = vmul.f32 -1.442695, %v12799_v49 }
 0x5ce   :  { %v11147_v10 = vpop.eup %11146  ;;  %v1843_v32 = vmul.f32 %v11145_v9, %v12712_v19  ;;  %11166 = vpow2.f32 %v8961_v6 }
 0x5cf   :  { %v11149_v4 = vpop.eup %11148  ;;  %v1472_v13 = vmul.f32 %v11147_v10, %v12669_v39  ;;  %11168 = vrcp.f32 %v1418_v29  ;;  %v8957_v10 = vmul.f32 -1.442695, %v12824_v5 }
 0x5d0   :  { %v11151_v25 = vpop.eup %11150  ;;  %v1846_v41 = vmul.f32 %v11149_v4, %v12718_v11  ;;  %11170 = vpow2.f32 %v8954_v24 }
 0x5d1   :  { %v11153_v47 = vpop.eup %11152  ;;  %v1470_v21 = vmul.f32 %v11151_v25, %v12672_v43  ;;  %v12792_v22 = vmul.f32 %v12692_v16, %v1472_v13  ;;  %11172 = vrcp.f32 %v1411_v40  ;;  %v12131_v13 = vmov 0  }
 0x5d2   :  { %v11155_v48 = vpop.eup %11154  ;;  %v1844_v39 = vmul.f32 %v11153_v47, %v12724_v31  ;;  %v1854_v38 = vpack.c.bf16 %v1846_v41, %v1845_v0  ;;  %11174 = vpow2.f32 %v8962_v20  ;;  %10788 = vset.pattern.permute.xlu1 %v12131_v13  ;;  %10789 = vset.pattern.permute.xlu0 %v12131_v13 }
 0x5d3   :  { %v11157_v57 = vpop.eup %11156  ;;  %v2259_v43 = vmul.f32 %v11155_v48, %v12729_v36  ;;  %v12803_v11 = vmul.f32 %v12692_v16, %v1470_v21 }
 0x5d4   :  { %v2260_v18 = vmul.f32 %v11157_v57, %v12734_v45  ;;  %v1853_v19 = vpack.c.bf16 %v1844_v39, %v1843_v32  ;;  %v11159_v26 = vpop.eup %11158 }
 0x5d5   :  { %v2269_v31 = vmul.f32 %v9013_v28, %v2259_v43  ;;  %v11161_v34 = vpop.eup %11160  ;;  %v1419_v15 = vadd.f32 1.0, %v11159_v26 }
 0x5d6   :  { %10014 = vmatprep.mubr.bf16.mxu1 %v1853_v19  ;;  %v2270_v36 = vmul.f32 %v9013_v28, %v2260_v18  ;;  %v11163_v45 = vpop.eup %11162  ;;  %v1457_v52 = vmul.f32 %v11161_v34, %v12707_v60  ;;  %v8956_v60 = vmul.f32 -1.442695, %v12816_v3 }
 0x5d7   :  { %10015 = vmatmul.mubr.bf16.gmra.mrb[32].mxu1 %v1854_v38  ;;  %2271 = vadd.xlane.f32.xlu0 %v2269_v31  ;;  %v11165_v56 = vpop.eup %11164  ;;  %v1412_v59 = vadd.f32 1.0, %v11163_v45  ;;  %11176 = vrcp.f32 %v1419_v15 }
 0x5d8   :  { %10054 = vmatprep.mubr.msk.bf16.mxu1 %vm12129_vm0, %v14880_v1  ;;  %v11167_v58 = vpop.eup %11166  ;;  %v1465_v62 = vmul.f32 %v11165_v56, %v12742_v54  ;;  %v1481_v63 = vmul.f32 %v12692_v16, %v1457_v52  ;;  %11178 = vpow2.f32 %v8955_v53  ;;  %v10854_v56 = vld [vmem:[#allocation19] sm:$0xff]   ;;  %v10857_v53 = vld [vmem:[#allocation19 + $0x18] sm:$0xff]  }
 0x5d9   :  { %v11169_v2 = vpop.eup %11168  ;;  %11180 = vrcp.f32 %v1412_v59  ;;  %v1420_v46 = vadd.f32 1.0, %v11167_v58  ;;  %10059 = vmatpush3.bf16.msra.mxu0 %v10854_v56  ;;  %v10858_v59 = vld [vmem:[#allocation19 + $0x20] sm:$0xff]   ;;  %v10860_v58 = vld [vmem:[#allocation19 + $0x30] sm:$0xff]  }
 0x5da   :  { %v11171_v27 = vpop.eup %11170  ;;  %v1466_v54 = vmul.f32 %v11169_v2, %v12753_v61  ;;  %v1489_v33 = vmul.f32 %v12692_v16, %v1465_v62  ;;  %11182 = vpow2.f32 %v8956_v60  ;;  %10060 = vmatprep.subr.bf16.mxu0 %v14880_v1  ;;  %v10861_v62 = vld [vmem:[#allocation19 + $0x38] sm:$0xff]  }
 0x5db   :  { %2273 = vadd.xlane.f32.xlu0 %v2270_v36  ;;  %v11173_v9 = vpop.eup %11172  ;;  %v1413_v35 = vadd.f32 1.0, %v11171_v27  ;;  %11184 = vrcp.f32 %v1420_v46  ;;  %v10862_v56 = vld [vmem:[#allocation31] sm:$0xff]  }
 0x5dc   :  { %v11175_v51 = vpop.eup %11174  ;;  %v1459_v4 = vmul.f32 %v11173_v9, %v12748_v17  ;;  %v1490_v6 = vmul.f32 %v12692_v16, %v1466_v54  ;;  %11186 = vpow2.f32 %v8957_v10 }
 0x5dd   :  { %11188 = vrcp.f32 %v1413_v35  ;;  %v1421_v61 = vadd.f32 1.0, %v11175_v51 }
 0x5de   :  { %v1483_v41 = vmul.f32 %v12692_v16, %v1459_v4 }
 0x5df   :  { %10055 = vmatmul.mubr.bf16.vlgmr.msra.gmra.mrb[36].mxu1 %v12500_v12  ;;  %1497 = vadd.xlane.f32.xlu0 %v1481_v63  ;;  %11190 = vrcp.f32 %v1421_v61  ;;  %v9014_v63 = vld [vmem:[%s15008_s28] ss:$0 sm:$0xff] }
 0x5e0   :  { %10080 = vmatprep.mubr.msk.bf16.mxu1 %vm835_vm1, %v11550_v7  ;;  %v12866_v7 = vld [vmem:[%s15009_s2] ss:$0 sm:$0xff] }
 0x5e1   :  { %v11177_v25 = vpop.eup %11176 }
 0x5e2   :  { %v11179_v29 = vpop.eup %11178  ;;  %v1467_v0 = vmul.f32 %v11177_v25, %v12770_v44 }
 0x5e3   :  { %1513 = vadd.xlane.f32.xlu0 %v1489_v33  ;;  %v11181_v47 = vpop.eup %11180  ;;  %v1414_v21 = vadd.f32 1.0, %v11179_v29 }
 0x5e4   :  { %v11183_v17 = vpop.eup %11182  ;;  %v1460_v48 = vmul.f32 %v11181_v47, %v12774_v50  ;;  %v1491_v24 = vmul.f32 %v12692_v16, %v1467_v0 }
 0x5e5   :  { %v11185_v32 = vpop.eup %11184  ;;  %v1415_v39 = vadd.f32 1.0, %v11183_v17  ;;  %11192 = vrcp.f32 %v1414_v21 }
 0x5e6   :  { %v11187_v38 = vpop.eup %11186  ;;  %v1468_v28 = vmul.f32 %v11185_v32, %v12780_v8  ;;  %v1484_v44 = vmul.f32 %v12692_v16, %v1460_v48 }
 0x5e7   :  { %1515 = vadd.xlane.f32.xlu0 %v1490_v6  ;;  %v11189_v57 = vpop.eup %11188  ;;  %11194 = vrcp.f32 %v1415_v39  ;;  %v1416_v43 = vadd.f32 1.0, %v11187_v38 }
 0x5e8   :  { %v1461_v40 = vmul.f32 %v11189_v57, %v12784_v30  ;;  %v1492_v18 = vmul.f32 %v12692_v16, %v1468_v28 }
 0x5e9   :  { %v11191_v50 = vpop.eup %11190  ;;  %11196 = vrcp.f32 %v1416_v43 }
 0x5ea   :  { %v1469_v19 = vmul.f32 %v11191_v50, %v12799_v49  ;;  %v1485_v26 = vmul.f32 %v12692_v16, %v1461_v40  ;;  %v9015_v40 = vld [vmem:[#allocation17] ss:$0 sm:$0xff] }
 0x5eb   :  { %1501 = vadd.xlane.f32.xlu0 %v1483_v41 }
 0x5ec   :  { %v1493_v34 = vmul.f32 %v12692_v16, %v1469_v19 }
 0x5ef   :  { %1517 = vadd.xlane.f32.xlu0 %v1491_v24  ;;  %v11193_v31 = vpop.eup %11192  ;;  %v459_v24 = vld [vmem:[%s15013_s24 + $0x8] sm:$0xff] }
 0x5f0   :  { %v1462_v8 = vmul.f32 %v11193_v31, %v12808_v55  ;;  %v10855_v55 = vld [vmem:[#allocation19 + $0x8] sm:$0xff]  }
 0x5f1   :  { %v11195_v20 = vpop.eup %11194  ;;  %10061 = vmatpush3.bf16.msra.mxu0 %v10855_v55 }
 0x5f2   :  { %v1463_v36 = vmul.f32 %v11195_v20, %v12816_v3  ;;  %v1486_v30 = vmul.f32 %v12692_v16, %v1462_v8  ;;  %10062 = vmatprep.subr.bf16.mxu0 %v14880_v1  ;;  %v10856_v3 = vld [vmem:[#allocation19 + $0x10] sm:$0xff]  }
 0x5f3   :  { %1503 = vadd.xlane.f32.xlu0 %v1484_v44  ;;  %v11197_v15 = vpop.eup %11196 }
 0x5f4   :  { %v1464_v45 = vmul.f32 %v11197_v15, %v12824_v5  ;;  %v1487_v49 = vmul.f32 %v12692_v16, %v1463_v36 }
 0x5f5   :  { %10063 = vmatpush3.bf16.msra.mxu0 %v10856_v3  ;;  %v10863_v3 = vld [vmem:[#allocation31 + $0x8] sm:$0xff]  }
 0x5f6   :  { %v1488_v52 = vmul.f32 %v12692_v16, %v1464_v45  ;;  %10064 = vmatprep.subr.bf16.mxu0 %v14880_v1  ;;  %v10859_v16 = vld [vmem:[#allocation19 + $0x28] sm:$0xff]  }
 0x5f7   :  { %1519 = vadd.xlane.f32.xlu0 %v1492_v18 }
 0x5f9   :  { %10065 = vmatpush3.bf16.msra.mxu0 %v10857_v53  ;;  %v10864_v53 = vld [vmem:[#allocation31 + $0x10] sm:$0xff]  }
 0x5fa   :  { %10066 = vmatprep.subr.bf16.mxu0 %v14880_v1 }
 0x5fb   :  { %1505 = vadd.xlane.f32.xlu0 %v1485_v26 }
 0x5fd   :  { %10067 = vmatpush3.bf16.msra.mxu0 %v10858_v59  ;;  %v10865_v59 = vld [vmem:[#allocation31 + $0x18] sm:$0xff]  }
 0x5fe   :  { %10068 = vmatprep.subr.bf16.mxu0 %v14880_v1 }
 0x5ff   :  { %1521 = vadd.xlane.f32.xlu0 %v1493_v34 }
 0x601   :  { %10069 = vmatpush3.bf16.msra.mxu0 %v10859_v16  ;;  %v10866_v16 = vld [vmem:[#allocation31 + $0x20] sm:$0xff]  }
 0x602   :  { %10070 = vmatprep.subr.bf16.mxu0 %v14880_v1 }
 0x603   :  { %1507 = vadd.xlane.f32.xlu0 %v1486_v30 }
 0x605   :  { %10071 = vmatpush3.bf16.msra.mxu0 %v10860_v58  ;;  %v10867_v58 = vld [vmem:[#allocation31 + $0x28] sm:$0xff]  }
 0x606   :  { %10072 = vmatprep.subr.bf16.mxu0 %v14880_v1 }
 0x607   :  { %1509 = vadd.xlane.f32.xlu0 %v1487_v49 }
 0x609   :  { %10073 = vmatpush3.bf16.msra.mxu0 %v10861_v62  ;;  %v10868_v62 = vld [vmem:[#allocation31 + $0x30] sm:$0xff]  }
 0x60a   :  { %10096 = vmatprep.subr.bf16.mxu0 %v14880_v1 }
 0x60b   :  { %1511 = vadd.xlane.f32.xlu0 %v1488_v52 }
 0x664   :  { %v2272_v2 = vpop.xlane.xlu0 %2271 }
 0x665   :  { %v12860_v60 = vadd.f32 %v9014_v63, %v2272_v2 }
 0x667   :  { %15010 = vst [vmem:[#allocation67_spill] sm:$0xff] %v12860_v60  ;;  %2526 = vperm.xlu1 %10788, %v12860_v60  }
 0x668   :  { %v2274_v5 = vpop.xlane.xlu0 %2273 }
 0x669   :  { %v12863_v46 = vadd.f32 %v9014_v63, %v2274_v5  ;;  %v10869_v63 = vld [vmem:[#allocation31 + $0x38] sm:$0xff]  }
 0x66b   :  { %15011 = vst [vmem:[#allocation68_spill] sm:$0xff] %v12863_v46  ;;  %2531 = vperm.xlu1 %10788, %v12863_v46  }
 0x66c   :  { %v1498_v27 = vpop.xlane.xlu0 %1497 }
 0x66d   :  { %v12870_v54 = vadd.f32 %v12866_v7, %v1498_v27 }
 0x66f   :  { %15012 = vst [vmem:[#allocation69_spill] sm:$0xff] %v12870_v54  ;;  %2025 = vperm.xlu0 %10789, %v12870_v54  }
 0x670   :  { %v12873_v33 = vpop.xlane.xlu0 %1513 }
 0x674   :  { %v12875_v9 = vpop.xlane.xlu0 %1515 }
 0x678   :  { %v12877_v10 = vpop.xlane.xlu0 %1501 }
 0x67c   :  { %v12887_v13 = vpop.xlane.xlu0 %1517 }
 0x67e   :  { %v12879_v35 = vpop.f32.mrb[20].mxu1 }
 0x67f   :  { %v12881_v51 = vpop.f32.mrb[21].mxu1 }
 0x680   :  { %v12883_v4 = vpop.f32.mrb[22].mxu1  ;;  %v12889_v25 = vpop.xlane.xlu0 %1503 }
 0x681   :  { %v12885_v6 = vpop.f32.mrb[23].mxu1 }
 0x684   :  { %v12891_v61 = vpop.xlane.xlu0 %1519 }
 0x688   :  { %v12893_v29 = vpop.xlane.xlu0 %1505 }
 0x68c   :  { %v1522_v0 = vpop.xlane.xlu0 %1521 }
 0x68d   :  { %v12896_v41 = vadd.f32 %v12866_v7, %v1522_v0 }
 0x68e   :  { %v12898_v47 = vpop.f32.mrb[24].mxu1 }
 0x68f   :  { %15014 = vst [vmem:[#allocation70_spill] sm:$0xff] %v12896_v41  ;;  %v12900_v21 = vpop.f32.mrb[25].mxu1  ;;  %1499 = vadd.xlane.f32.xlu1 %v12696_v37  ;;  %2085 = vperm.xlu0 %10789, %v12896_v41   ;;  %v467_v37 = vld [vmem:[%s15013_s24 + $0x48] sm:$0xff] }
 0x690   :  { %v12904_v17 = vpop.f32.mrb[26].mxu1 }
 0x691   :  { %v12906_v48 = vpop.f32.mrb[27].mxu1 }
 0x693   :  { %1523 = vadd.xlane.f32.xlu1 %v12803_v11  ;;  %481 = vperm.xlu0 %10789, %v459_v24  }
 0x696   :  { %v12910_v32 = vpop.f32.mrb[28].mxu1 }
 0x697   :  { %v12912_v39 = vpop.f32.mrb[29].mxu1  ;;  %1525 = vadd.xlane.f32.xlu1 %v12766_v42  ;;  %521 = vperm.xlu0 %10789, %v467_v37   ;;  %v12952_v37 = vadd.f32 %v12866_v7, %v12873_v33  ;;  %v12967_v33 = vadd.f32 %v12866_v7, %v12877_v10  ;;  %v12982_v10 = vadd.f32 %v12866_v7, %v12889_v25  ;;  %v458_v25 = vld [vmem:[%s15013_s24] sm:$0xff] }
 0x698   :  { %v12915_v38 = vpop.f32.mrb[30].mxu1 }
 0x699   :  { %v12917_v28 = vpop.f32.mrb[31].mxu1  ;;  %15016 = vst [vmem:[#allocation72_spill] sm:$0xff] %v12952_v37  ;;  %15019 = vst [vmem:[#allocation75_spill] sm:$0xff] %v12967_v33 }
 0x69a   :  { %15022 = vst [vmem:[#allocation78_spill] sm:$0xff] %v12982_v10 }
 0x69b   :  { %1527 = vadd.xlane.f32.xlu1 %v12792_v22 }
 0x6aa   :  { %v12921_v44 = vpop.f32.mrb[32].mxu1 }
 0x6ab   :  { %v12923_v57 = vpop.f32.mrb[33].mxu1 }
 0x6ac   :  { %v12925_v11 = vpop.f32.mrb[34].mxu1 }
 0x6ad   :  { %v12927_v43 = vpop.f32.mrb[35].mxu1 }
 0x6b2   :  { %v2390_v18 = vpop.f32.mrb[36].mxu1 }
 0x6b3   :  { %v2391_v50 = vadd.f32 %v9015_v40, %v2390_v18  ;;  %v10056_v42 = vpop.f32.mrb[37].mxu1  ;;  %v12962_v18 = vadd.f32 %v12866_v7, %v12875_v9  ;;  %v12977_v9 = vadd.f32 %v12866_v7, %v12887_v13  ;;  %v12991_v13 = vadd.f32 %v12866_v7, %v12891_v61  ;;  %v460_v61 = vld [vmem:[%s15013_s24 + $0x10] sm:$0xff] }
 0x6b4   :  { %v2393_v19 = vpop.f32.mrb[38].mxu1 }
 0x6b5   :  { %v9024_v26 = vmul.f32 -1.442695, %v2391_v50  ;;  %v2394_v31 = vadd.f32 %v9015_v40, %v2393_v19  ;;  %v10057_v8 = vpop.f32.mrb[39].mxu1  ;;  %v468_v40 = vld [vmem:[%s15013_s24 + $0x50] sm:$0xff]  ;;  %15018 = vst [vmem:[#allocation74_spill] sm:$0xff] %v12962_v18  ;;  %v469_v19 = vld [vmem:[%s15013_s24 + $0x58] sm:$0xff] }
 0x6b6   :  { %15021 = vst [vmem:[#allocation77_spill] sm:$0xff] %v12977_v9  ;;  %15024 = vst [vmem:[#allocation80_spill] sm:$0xff] %v12991_v13  ;;  %v12996_v8 = vadd.f32 %v12866_v7, %v12893_v29 }
 0x6b7   :  { %11198 = vpow2.f32 %v9024_v26  ;;  %v9025_v22 = vmul.f32 -1.442695, %v2394_v31 }
 0x6b8   :  { %15025 = vst [vmem:[#allocation81_spill] sm:$0xff] %v12996_v8 }
 0x6b9   :  { %11200 = vpow2.f32 %v9025_v22  ;;  %v466_v22 = vld [vmem:[%s15013_s24 + $0x40] sm:$0xff] }
 0x6c1   :  { %v11199_v34 = vpop.eup %11198 }
 0x6c2   :  { %v2403_v20 = vadd.f32 1.0, %v11199_v34  ;;  %v1508_v34 = vpop.xlane.xlu0 %1507 }
 0x6c3   :  { %v11201_v36 = vpop.eup %11200 }
 0x6c4   :  { %11202 = vrcp.f32 %v2403_v20  ;;  %v2404_v30 = vadd.f32 1.0, %v11201_v36  ;;  %v13002_v20 = vadd.f32 %v12866_v7, %v1508_v34  ;;  %v10872_v34 = vld [vmem:[#allocation32 + $0x10] sm:$0xff]  }
 0x6c6   :  { %11204 = vrcp.f32 %v2404_v30  ;;  %15026 = vst [vmem:[#allocation82_spill] sm:$0xff] %v13002_v20  ;;  %v1510_v36 = vpop.xlane.xlu0 %1509  ;;  %v461_v30 = vld [vmem:[%s15013_s24 + $0x18] sm:$0xff] }
 0x6c7   :  { %v13007_v29 = vadd.f32 %v12866_v7, %v1510_v36  ;;  %v13050_v36 = vld [vmem:[%s15005_s9 + $0x20] sm:$0xff]  }
 0x6c9   :  { %15027 = vst [vmem:[#allocation83_spill] sm:$0xff] %v13007_v29 }
 0x6ce   :  { %v11203_v15 = vpop.eup %11202 }
 0x6cf   :  { %v2409_v49 = vmul.f32 %v11203_v15, %v2391_v50  ;;  %v1512_v15 = vpop.xlane.xlu0 %1511 }
 0x6d0   :  { %v11205_v45 = vpop.eup %11204 }
 0x6d1   :  { %v2410_v52 = vmul.f32 %v11205_v45, %v2394_v31  ;;  %v13012_v45 = vadd.f32 %v12866_v7, %v1512_v15  ;;  %v10874_v15 = vld [vmem:[#allocation32 + $0x20] sm:$0xff]  }
 0x6d3   :  { %v2411_v55 = vpack.c.bf16 %v2410_v52, %v2409_v49  ;;  %15028 = vst [vmem:[#allocation84_spill] sm:$0xff] %v13012_v45  ;;  %v462_v49 = vld [vmem:[%s15013_s24 + $0x20] sm:$0xff]  ;;  %v463_v52 = vld [vmem:[%s15013_s24 + $0x28] sm:$0xff] }
 0x6d5   :  { %10075 = vmatmul.mubr.bf16.vlgmr.msra.gmra.mrb[40].mxu0 %v2411_v55  ;;  %v465_v55 = vld [vmem:[%s15013_s24 + $0x38] sm:$0xff] }
 0x6d6   :  { %10097 = vmatpush3.bf16.msra.mxu0 %v10862_v56  ;;  %10112 = vmatprep.mubr.msk.bf16.mxu0 %vm12129_vm0, %v14880_v1  ;;  %v464_v56 = vld [vmem:[%s15013_s24 + $0x30] sm:$0xff] }
 0x6d7   :  { %10098 = vmatprep.subr.bf16.mxu0 %v14880_v1 }
 0x6da   :  { %10099 = vmatpush3.bf16.msra.mxu0 %v10863_v3  ;;  %v470_v3 = vld [vmem:[%s15013_s24 + $0x60] sm:$0xff] }
 0x6db   :  { %10100 = vmatprep.subr.bf16.mxu0 %v14880_v1 }
 0x6de   :  { %10101 = vmatpush3.bf16.msra.mxu0 %v10864_v53  ;;  %v471_v53 = vld [vmem:[%s15013_s24 + $0x68] sm:$0xff] }
 0x6df   :  { %10102 = vmatprep.subr.bf16.mxu0 %v14880_v1 }
 0x6e2   :  { %10103 = vmatpush3.bf16.msra.mxu0 %v10865_v59  ;;  %v472_v59 = vld [vmem:[%s15013_s24 + $0x70] sm:$0xff] }
 0x6e3   :  { %10104 = vmatprep.subr.bf16.mxu0 %v14880_v1 }
 0x6e6   :  { %10105 = vmatpush3.bf16.msra.mxu0 %v10866_v16  ;;  %v12942_v2 = vpop.permute.xlu1 %2526  ;;  %v473_v16 = vld [vmem:[%s15013_s24 + $0x78] sm:$0xff] }
 0x6e7   :  { %10106 = vmatprep.subr.bf16.mxu0 %v14880_v1 }
 0x6ea   :  { %10107 = vmatpush3.bf16.msra.mxu0 %v10867_v58  ;;  %v12944_v5 = vpop.permute.xlu1 %2531 }
 0x6eb   :  { %10108 = vmatprep.subr.bf16.mxu0 %v14880_v1 }
 0x6ee   :  { %10109 = vmatpush3.bf16.msra.mxu0 %v10868_v62 }
 0x6ef   :  { %10110 = vmatprep.subr.bf16.mxu0 %v14880_v1 }
 0x6f2   :  { %10111 = vmatpush3.bf16.msra.mxu0 %v10869_v63 }
 0x6f3   :  { %10136 = vmatprep.subr.bf16.mxu0 %v14880_v1 }
 0x6f5   :  { %10113 = vmatmul.mubr.bf16.vlgmr.msra.gmra.mrb[44].mxu0 %v12500_v12 }
 0x6f6   :  { %10152 = vmatprep.mubr.msk.bf16.mxu0 %vm12129_vm0, %v14880_v1 }
 0x71c   :  { %v1500_v27 = vpop.xlane.xlu1 %1499 }
 0x71d   :  { %v12947_v0 = vadd.f32 %v12866_v7, %v1500_v27 }
 0x71f   :  { %15015 = vst [vmem:[#allocation71_spill] sm:$0xff] %v12947_v0  ;;  %2030 = vperm.xlu1 %10788, %v12947_v0  }
 0x720   :  { %v1524_v24 = vpop.xlane.xlu1 %1523 }
 0x721   :  { %v12955_v12 = vadd.f32 %v12866_v7, %v1524_v24 }
 0x723   :  { %15017 = vst [vmem:[#allocation73_spill] sm:$0xff] %v12955_v12  ;;  %2065 = vperm.xlu1 %10788, %v12952_v37   ;;  %2090 = vperm.xlu0 %10789, %v12955_v12  }
 0x724   :  { %v1526_v50 = vpop.xlane.xlu1 %1525 }
 0x725   :  { %v12970_v42 = vadd.f32 %v12866_v7, %v1526_v50 }
 0x727   :  { %2070 = vperm.xlu1 %10788, %v12962_v18   ;;  %526 = vperm.xlu0 %10789, %v468_v40   ;;  %15020 = vst [vmem:[#allocation76_spill] sm:$0xff] %v12970_v42 }
 0x728   :  { %v1528_v26 = vpop.xlane.xlu1 %1527 }
 0x729   :  { %v12985_v31 = vadd.f32 %v12866_v7, %v1528_v26  ;;  %v9026_v7 = vld [vmem:[#allocation20] ss:$0 sm:$0xff] }
 0x72b   :  { %2035 = vperm.xlu1 %10788, %v12967_v33   ;;  %2095 = vperm.xlu0 %10789, %v12970_v42   ;;  %15023 = vst [vmem:[#allocation79_spill] sm:$0xff] %v12985_v31  ;;  %v8993_v42 = vld [vmem:[#allocation29] ss:$0 sm:$0xff] }
 0x72c   :  { %v1969_v41 = vadd.f32 %v12879_v35, %v8993_v42  ;;  %v13139_v18 = vadd.f32 %v12898_v47, %v8993_v42  ;;  %v13142_v33 = vadd.f32 %v8993_v42, %v12900_v21  ;;  %v1993_v21 = vadd.f32 %v8993_v42, %v12912_v39 }
 0x72d   :  { %v2004_v37 = vadd.f32 %v12915_v38, %v8993_v42  ;;  %v1996_v0 = vadd.f32 %v8993_v42, %v12917_v28 }
 0x72f   :  { %2075 = vperm.xlu1 %10788, %v12977_v9   ;;  %531 = vperm.xlu0 %10789, %v469_v19  }
 0x733   :  { %2040 = vperm.xlu1 %10788, %v12982_v10   ;;  %2100 = vperm.xlu0 %10789, %v12985_v31   ;;  %v1964_v10 = vadd.f32 %v8993_v42, %v12885_v6 }
 0x737   :  { %2080 = vperm.xlu1 %10788, %v12991_v13   ;;  %536 = vperm.xlu0 %10789, %v470_v3   ;;  %v1972_v13 = vadd.f32 %v12883_v4, %v8993_v42  ;;  %v13152_v4 = vadd.f32 %v8993_v42, %v12906_v48  ;;  %v2009_v48 = vadd.f32 %v8993_v42, %v12923_v57 }
 0x73b   :  { %2045 = vperm.xlu1 %10788, %v12996_v8   ;;  %541 = vperm.xlu0 %10789, %v471_v53  }
 0x73f   :  { %476 = vperm.xlu1 %10788, %v458_v25   ;;  %546 = vperm.xlu0 %10789, %v472_v59   ;;  %v10870_v25 = vld [vmem:[#allocation32] sm:$0xff]  }
 0x743   :  { %516 = vperm.xlu1 %10788, %v466_v22   ;;  %551 = vperm.xlu0 %10789, %v473_v16   ;;  %v13033_v22 = vld [vmem:[%s15005_s9 + $0x8] sm:$0xff]  }
 0x747   :  { %2050 = vperm.xlu1 %10788, %v13002_v20   ;;  %v1961_v20 = vadd.f32 %v8993_v42, %v12881_v51  ;;  %v13149_v51 = vadd.f32 %v12904_v17, %v8993_v42  ;;  %v2017_v17 = vadd.f32 %v12921_v44, %v8993_v42 }
 0x74b   :  { %486 = vperm.xlu1 %10788, %v460_v61   ;;  %v13045_v61 = vld [vmem:[%s15005_s9 + $0x18] sm:$0xff]  }
 0x74f   :  { %2055 = vperm.xlu1 %10788, %v13007_v29  }
 0x753   :  { %491 = vperm.xlu1 %10788, %v461_v30   ;;  %v10873_v30 = vld [vmem:[#allocation32 + $0x18] sm:$0xff]  }
 0x757   :  { %2060 = vperm.xlu1 %10788, %v13012_v45  }
 0x75b   :  { %496 = vperm.xlu1 %10788, %v462_v49   ;;  %v13057_v49 = vld [vmem:[%s15005_s9 + $0x28] sm:$0xff]  }
 0x75f   :  { %501 = vperm.xlu1 %10788, %v463_v52   ;;  %v9043_v52 = vld [vmem:[%s15031_s7] ss:$0 sm:$0xff] }
 0x763   :  { %506 = vperm.xlu1 %10788, %v464_v56   ;;  %v13063_v56 = vld [vmem:[%s15005_s9 + $0x30] sm:$0xff]  }
 0x764   :  { %15032 = vst [vmem:[#allocation87_spill] sm:$0xff] %v13063_v56 }
 0x767   :  { %511 = vperm.xlu1 %10788, %v465_v55   ;;  %v10875_v55 = vld [vmem:[#allocation32 + $0x28] sm:$0xff]  }
 0x7a8   :  { %v2517_v58 = vpop.f32.mrb[40].mxu0 }
 0x7a9   :  { %v2518_v62 = vadd.f32 %v9026_v7, %v2517_v58  ;;  %v10076_v63 = vpop.f32.mrb[41].mxu0 }
 0x7aa   :  { %v2520_v27 = vpop.f32.mrb[42].mxu0 }
 0x7ab   :  { %v2521_v24 = vadd.f32 %v9026_v7, %v2520_v27  ;;  %v10077_v40 = vpop.f32.mrb[43].mxu0  ;;  %v13024_v50 = vmul.f32 %v12942_v2, %v2518_v62  ;;  %v13038_v2 = vld [vmem:[%s15005_s9 + $0x10] sm:$0xff]  }
 0x7ac   :  { %v10876_v7 = vld [vmem:[#allocation32 + $0x30] sm:$0xff]   ;;  %v10877_v40 = vld [vmem:[#allocation32 + $0x38] sm:$0xff]  }
 0x7ad   :  { %15029 = vst [vmem:[#allocation85_spill] sm:$0xff] %v13024_v50  ;;  %v13027_v19 = vmul.f32 %v12944_v5, %v2521_v24  ;;  %v10871_v5 = vld [vmem:[#allocation32 + $0x8] sm:$0xff]   ;;  %v13070_v24 = vld [vmem:[%s15005_s9 + $0x38] sm:$0xff]   ;;  %v2645_v12 = vrot.slane %v13024_v50, %v12538_v14  ;;  %v2638_v29 = vcombine.high %v13024_v50, %v13024_v50 }
 0x7ae   :  { %15033 = vst [vmem:[#allocation88_spill] sm:$0xff] %v13070_v24 }
 0x7af   :  { %15030 = vst [vmem:[#allocation86_spill] sm:$0xff] %v13027_v19  ;;  %v2538_v26 = vpack.c.bf16 %v13027_v19, %v13024_v50  ;;  %v2653_v8 = vcombine.high %v2645_v12, %v2645_v12  ;;  %v2652_v9 = vrot.slane %v2638_v29, %v12538_v14  ;;  %v2694_v35 = vrot.slane %v13027_v19, %v12538_v14 }
 0x7b0   :  { %v2001_v29 = vadd.f32 %v12910_v32, %v8993_v42  ;;  %v2661_v47 = vrot.slane %v2645_v12, %v12538_v14  ;;  %v2687_v46 = vcombine.high %v13027_v19, %v13027_v19  ;;  %v2020_v50 = vadd.f32 %v12925_v11, %v8993_v42 }
 0x7b1   :  { %10078 = vmatprep.subr.bf16.mxu1 %v2538_v26  ;;  %v2675_v60 = vrot.slane %v2653_v8, %v12538_v14  ;;  %v2654_v32 = vcombine.high %v2652_v9, %v2652_v9  ;;  %v2012_v12 = vadd.f32 %v8993_v42, %v12927_v43  ;;  %v13169_v39 = vrot.slane %v2652_v9, %v12538_v14 }
 0x7b2   :  { %10079 = vmatpush3.bf16.msra.mxu1 %v2538_v26  ;;  %v2702_v38 = vcombine.high %v2694_v35, %v2694_v35  ;;  %v2683_v44 = vcombine.high %v2661_v47, %v2661_v47  ;;  %v13186_v43 = vrot.slane %v2694_v35, %v12538_v14  ;;  %v2701_v42 = vrot.slane %v2687_v46, %v12538_v14 }
 0x7b3   :  { %10116 = vmatprep.subr.bf16.mxu1 %v14880_v1 }
 0x7b4   :  { %v13206_v46 = vrot.slane %v2702_v38, %v12538_v14 }
 0x7b5   :  { %10081 = vmatmul.mubr.msk.bf16.vlgmr.msra.gmra.mrb[40].mxu1 %vm835_vm1, %v13033_v22 }
 0x7b6   :  { %10084 = vmatprep.mubr.msk.bf16.mxu1 %vm835_vm1, %v13038_v2  ;;  %10117 = vmatpush3.bf16.msra.mxu1 %v10870_v25  ;;  %v2734_v38 = vcombine.high %v13206_v46, %v13206_v46 }
 0x7b7   :  { %10118 = vmatprep.subr.bf16.mxu1 %v14880_v1 }
 0x7ba   :  { %10119 = vmatpush3.bf16.msra.mxu1 %v10871_v5 }
 0x7bb   :  { %10120 = vmatprep.subr.bf16.mxu1 %v14880_v1 }
 0x7bd   :  { %10085 = vmatmul.mubr.msk.bf16.gmra.mrb[44].mxu1 %vm835_vm1, %v13045_v61 }
 0x7be   :  { %10088 = vmatprep.mubr.msk.bf16.mxu1 %vm835_vm1, %v13050_v36  ;;  %10121 = vmatpush3.bf16.msra.mxu1 %v10872_v34 }
 0x7bf   :  { %10122 = vmatprep.subr.bf16.mxu1 %v14880_v1 }
 0x7c2   :  { %10123 = vmatpush3.bf16.msra.mxu1 %v10873_v30 }
 0x7c3   :  { %10124 = vmatprep.subr.bf16.mxu1 %v14880_v1 }
 0x7c5   :  { %10089 = vmatmul.mubr.msk.bf16.gmra.mrb[48].mxu1 %vm835_vm1, %v13057_v49 }
 0x7c6   :  { %10092 = vmatprep.mubr.msk.bf16.mxu1 %vm835_vm1, %v13063_v56  ;;  %10125 = vmatpush3.bf16.msra.mxu1 %v10874_v15 }
 0x7c7   :  { %10126 = vmatprep.subr.bf16.mxu1 %v14880_v1 }
 0x7c8   :  { %v3065_v3 = vpop.f32.mrb[44].mxu0 }
 0x7c9   :  { %v3066_v53 = vadd.f32 %v9043_v52, %v3065_v3  ;;  %v10114_v59 = vpop.f32.mrb[45].mxu0 }
 0x7ca   :  { %v3068_v16 = vpop.f32.mrb[46].mxu0  ;;  %10127 = vmatpush3.bf16.msra.mxu1 %v10875_v55  ;;  %v13080_v59 = vpop.permute.xlu1 %2030 }
 0x7cb   :  { %v9052_v58 = vmul.f32 -1.442695, %v3066_v53  ;;  %v3069_v62 = vadd.f32 %v9043_v52, %v3068_v16  ;;  %v10115_v63 = vpop.f32.mrb[47].mxu0  ;;  %10128 = vmatprep.subr.bf16.mxu1 %v14880_v1  ;;  %v10878_v16 = vld [vmem:[%s15004_s26 + $0x40] sm:$0xff]   ;;  %v13176_v19 = vmul.f32 %v13080_v59, %v1964_v10  ;;  %v2685_v59 = vcombine.high %v2675_v60, %v2675_v60 }
 0x7cc   :  { %10137 = vmatpush3.bf16.msra.mxu0 %v10878_v16  ;;  %v10881_v63 = vld [vmem:[%s15004_s26 + $0x58] sm:$0xff]  }
 0x7cd   :  { %11206 = vpow2.f32 %v9052_v58  ;;  %v9053_v27 = vmul.f32 -1.442695, %v3069_v62  ;;  %10093 = vmatmul.mubr.msk.bf16.gmra.mrb[52].mxu1 %vm835_vm1, %v13070_v24  ;;  %10138 = vmatprep.subr.bf16.mxu0 %v14880_v1  ;;  %v10879_v58 = vld [vmem:[%s15004_s26 + $0x48] sm:$0xff]  }
 0x7ce   :  { %10129 = vmatpush3.bf16.msra.mxu1 %v10876_v7  ;;  %10132 = vmatprep.mubr.msk.bf16.mxu1 %vm12129_vm0, %v14880_v1  ;;  %v13083_v7 = vpop.permute.xlu1 %2065 }
 0x7cf   :  { %11208 = vpow2.f32 %v9053_v27  ;;  %10130 = vmatprep.subr.bf16.mxu1 %v14880_v1  ;;  %v13179_v57 = vmul.f32 %v13083_v7, %v1993_v21  ;;  %v13196_v7 = vrot.slane %v2654_v32, %v12538_v14  ;;  %v13221_v21 = vrot.slane %v2701_v42, %v12538_v14 }
 0x7d0   :  { %10139 = vmatpush3.bf16.msra.mxu0 %v10879_v58 }
 0x7d1   :  { %10140 = vmatprep.subr.bf16.mxu0 %v14880_v1 }
 0x7d2   :  { %10131 = vmatpush3.bf16.msra.mxu1 %v10877_v40  ;;  %v10882_v40 = vld [vmem:[%s15004_s26 + $0x60] sm:$0xff]  }
 0x7d3   :  { %10156 = vmatprep.subr.bf16.mxu1 %v14880_v1 }
 0x7d7   :  { %v11207_v26 = vpop.eup %11206 }
 0x7d8   :  { %v3078_v25 = vadd.f32 1.0, %v11207_v26 }
 0x7d9   :  { %v11209_v5 = vpop.eup %11208 }
 0x7da   :  { %11210 = vrcp.f32 %v3078_v25  ;;  %v3079_v34 = vadd.f32 1.0, %v11209_v5  ;;  %v10883_v25 = vld [vmem:[%s15004_s26 + $0x68] sm:$0xff]   ;;  %v10884_v5 = vld [vmem:[%s15004_s26 + $0x70] sm:$0xff]  }
 0x7dc   :  { %11212 = vrcp.f32 %v3079_v34 }
 0x7e4   :  { %v11211_v30 = vpop.eup %11210 }
 0x7e5   :  { %v3084_v52 = vmul.f32 %v11211_v30, %v3066_v53  ;;  %v13088_v53 = vpop.permute.xlu1 %2070  ;;  %v10885_v30 = vld [vmem:[%s15004_s26 + $0x78] sm:$0xff]  }
 0x7e6   :  { %v11213_v15 = vpop.eup %11212  ;;  %v13190_v9 = vmul.f32 %v13088_v53, %v1996_v0  ;;  %v2739_v53 = vrot.slane %v2661_v47, %v12544_v23  ;;  %v2686_v47 = vcombine.high %v13196_v7, %v13196_v7 }
 0x7e7   :  { %v3085_v55 = vmul.f32 %v11213_v15, %v3069_v62  ;;  %v10880_v62 = vld [vmem:[%s15004_s26 + $0x50] sm:$0xff]  }
 0x7e8   :  { %10141 = vmatpush3.bf16.msra.mxu0 %v10880_v62 }
 0x7e9   :  { %v3086_v3 = vpack.c.bf16 %v3085_v55, %v3084_v52  ;;  %10142 = vmatprep.subr.bf16.mxu0 %v14880_v1  ;;  %v13093_v27 = vpop.permute.xlu1 %2035  ;;  %v2026_v55 = vpop.permute.xlu0 %2025 }
 0x7ea   :  { %v13171_v24 = vmul.f32 %v2026_v55, %v1961_v20  ;;  %v13193_v20 = vmul.f32 %v13093_v27, %v1969_v41  ;;  %v2747_v41 = vrot.slane %v2683_v44, %v12544_v23  ;;  %v2743_v27 = vrot.slane %v2675_v60, %v12544_v23 }
 0x7eb   :  { %10133 = vmatmul.mubr.bf16.vlgmr.msra.gmra.mrb[56].mxu1 %v3086_v3 }
 0x7ec   :  { %10172 = vmatprep.mubr.msk.bf16.mxu1 %vm12129_vm0, %v14880_v1  ;;  %10143 = vmatpush3.bf16.msra.mxu0 %v10881_v63 }
 0x7ed   :  { %10144 = vmatprep.subr.bf16.mxu0 %v14880_v1  ;;  %v13098_v26 = vpop.permute.xlu1 %2075  ;;  %v2086_v16 = vpop.permute.xlu0 %2085 }
 0x7ee   :  { %v13173_v28 = vmul.f32 %v2086_v16, %v2009_v48  ;;  %v13201_v16 = vmul.f32 %v13098_v26, %v2001_v29  ;;  %v2755_v26 = vrot.slane %v13169_v39, %v12544_v23  ;;  %v2732_v29 = vcombine.high %v13186_v43, %v13186_v43 }
 0x7f0   :  { %10145 = vmatpush3.bf16.msra.mxu0 %v10882_v40  ;;  %15042 = vst [vmem:[#allocation97_spill] sm:$0xff] %v13173_v28 }
 0x7f1   :  { %10146 = vmatprep.subr.bf16.mxu0 %v14880_v1  ;;  %v13103_v34 = vpop.permute.xlu1 %2040  ;;  %v13115_v62 = vpop.permute.xlu0 %481 }
 0x7f2   :  { %15036 = vst [vmem:[#allocation91_spill] sm:$0xff] %v13115_v62  ;;  %v13209_v0 = vmul.f32 %v13103_v34, %v1972_v13 }
 0x7f4   :  { %10147 = vmatpush3.bf16.msra.mxu0 %v10883_v25  ;;  %15046 = vst [vmem:[#allocation101_spill] sm:$0xff] %v13209_v0 }
 0x7f5   :  { %10148 = vmatprep.subr.bf16.mxu0 %v14880_v1  ;;  %v13107_v15 = vpop.permute.xlu1 %2080  ;;  %v13119_v40 = vpop.permute.xlu0 %521 }
 0x7f6   :  { %15037 = vst [vmem:[#allocation92_spill] sm:$0xff] %v13119_v40  ;;  %v13236_v44 = vmul.f32 %v13107_v15, %v2004_v37  ;;  %v2767_v37 = vrot.slane %v2686_v47, %v12544_v23 }
 0x7f8   :  { %10149 = vmatpush3.bf16.msra.mxu0 %v10884_v5 }
 0x7f9   :  { %10150 = vmatprep.subr.bf16.mxu0 %v14880_v1  ;;  %v13109_v52 = vpop.permute.xlu1 %2045  ;;  %v2091_v5 = vpop.permute.xlu0 %2090 }
 0x7fa   :  { %v13181_v8 = vmul.f32 %v2091_v5, %v2012_v12  ;;  %v2684_v5 = vcombine.high %v13169_v39, %v13169_v39  ;;  %v2759_v39 = vrot.slane %v13196_v7, %v12544_v23  ;;  %v2733_v7 = vcombine.high %v13221_v21, %v13221_v21 }
 0x7fc   :  { %10151 = vmatpush3.bf16.msra.mxu0 %v10885_v30  ;;  %15043 = vst [vmem:[#allocation98_spill] sm:$0xff] %v13181_v8  ;;  %v2763_v12 = vrot.slane %v2684_v5, %v12544_v23 }
 0x7fd   :  { %v13111_v3 = vpop.permute.xlu1 %476  ;;  %v13125_v1 = vpop.permute.xlu0 %526 }
 0x7fe   :  { %15034 = vst [vmem:[#allocation89_spill] sm:$0xff] %v13111_v3  ;;  %15039 = vst [vmem:[#allocation94_spill] sm:$0xff] %v13125_v1 }
 0x801   :  { %v13113_v58 = vpop.permute.xlu1 %516  ;;  %v2096_v45 = vpop.permute.xlu0 %2095 }
 0x802   :  { %15035 = vst [vmem:[#allocation90_spill] sm:$0xff] %v13113_v58  ;;  %v13198_v55 = vmul.f32 %v2096_v45, %v2017_v17  ;;  %v2751_v17 = vrot.slane %v2685_v59, %v12544_v23 }
 0x804   :  { %15045 = vst [vmem:[#allocation100_spill] sm:$0xff] %v13198_v55 }
 0x805   :  { %v13117_v63 = vpop.permute.xlu1 %2050  ;;  %v13155_v6 = vpop.permute.xlu0 %531 }
 0x806   :  { %15041 = vst [vmem:[#allocation96_spill] sm:$0xff] %v13155_v6 }
 0x809   :  { %v13121_v25 = vpop.permute.xlu1 %486  ;;  %v2101_v10 = vpop.permute.xlu0 %2100 }
 0x80a   :  { %15038 = vst [vmem:[#allocation93_spill] sm:$0xff] %v13121_v25  ;;  %v13214_v45 = vmul.f32 %v2101_v10, %v2020_v50 }
 0x80c   :  { %15047 = vst [vmem:[#allocation102_spill] sm:$0xff] %v13214_v45 }
 0x80d   :  { %v13123_v30 = vpop.permute.xlu1 %2055 }
 0x811   :  { %v13127_v31 = vpop.permute.xlu1 %491 }
 0x812   :  { %15040 = vst [vmem:[#allocation95_spill] sm:$0xff] %v13127_v31 }
 0x815   :  { %v13144_v54 = vpop.permute.xlu1 %2060 }
 0x819   :  { %v13183_v11 = vpop.permute.xlu1 %496 }
 0x81a   :  { %15044 = vst [vmem:[#allocation99_spill] sm:$0xff] %v13183_v11 }
 0x81d   :  { %v13228_v50 = vpop.permute.xlu1 %501 }
 0x81e   :  { %15048 = vst [vmem:[#allocation103_spill] sm:$0xff] %v13228_v50 }
 0x888   :  { %v10082_v35 = vpop.f32.mrb[40].mxu1 }
 0x889   :  { %v2818_v13 = vmul.f32 %v10082_v35, %v2747_v41  ;;  %v2573_v34 = vpop.f32.mrb[41].mxu1  ;;  %v2703_v35 = vcombine.high %v2701_v42, %v2701_v42  ;;  %v13252_v42 = vmul.f32 %v13109_v52, %v13142_v33  ;;  %v13267_v33 = vmul.f32 %v13117_v63, %v13152_v4  ;;  %v13269_v52 = vpop.permute.xlu1 %506 }
 0x88a   :  { %v2816_v48 = vmul.f32 %v2739_v53, %v2573_v34  ;;  %v10083_v32 = vpop.f32.mrb[42].mxu1  ;;  %v13241_v34 = vrot.slane %v2732_v29, %v12544_v23  ;;  %15049 = vst [vmem:[#allocation104_spill] sm:$0xff] %v13269_v52  ;;  %v13281_v63 = vmul.f32 %v13144_v54, %v13149_v51 }
 0x88b   :  { %v2834_v10 = vsub.f32 %v2818_v13, %v13193_v20  ;;  %v2819_v59 = vmul.f32 %v10083_v32, %v2751_v17  ;;  %v2576_v41 = vpop.f32.mrb[43].mxu1  ;;  %v13257_v13 = vrot.slane %v2734_v38, %v12544_v23  ;;  %v13263_v32 = vrot.slane %v2703_v35, %v12538_v14 }
 0x88c   :  { %v2832_v60 = vsub.f32 %v2816_v48, %v13171_v24  ;;  %v2817_v53 = vmul.f32 %v2743_v27, %v2576_v41  ;;  %15051 = vst [vmem:[#allocation106_spill] sm:$0xff] %v13281_v63 }
 0x88d   :  { %v2850_v5 = vmul.f32 %v2834_v10, %v13121_v25  ;;  %v2835_v56 = vsub.f32 %v2819_v59, %v13209_v0  ;;  %v13273_v59 = vrot.slane %v2733_v7, %v12544_v23 }
 0x88e   :  { %v2848_v27 = vmul.f32 %v2832_v60, %v13111_v3  ;;  %v2833_v29 = vsub.f32 %v2817_v53, %v13176_v19 }
 0x88f   :  { %v2876_v17 = vrot.slane %v2850_v5, 4  ;;  %v2851_v48 = vmul.f32 %v2835_v56, %v13127_v31  ;;  %v13277_v56 = vmul.f32 %v13123_v30, %v13139_v18 }
 0x890   :  { %v2864_v60 = vrot.slane %v2848_v27, 4  ;;  %v2849_v10 = vmul.f32 %v2833_v29, %v13115_v62  ;;  %v10086_v38 = vpop.f32.mrb[44].mxu1 }
 0x891   :  { %15050 = vst [vmem:[#allocation105_spill] sm:$0xff] %v13277_v56  ;;  %v2877_v41 = vadd.f32 %v2876_v17, %v2850_v5  ;;  %v2882_v35 = vrot.slane %v2851_v48, 4  ;;  %v2822_v53 = vmul.f32 %v10086_v38, %v2763_v12  ;;  %v2589_v47 = vpop.f32.mrb[45].mxu1  ;;  %v13285_v17 = vpop.permute.xlu0 %536 }
 0x892   :  { %v2865_v4 = vadd.f32 %v2864_v60, %v2848_v27  ;;  %v2870_v15 = vrot.slane %v2849_v10, 4  ;;  %v2820_v31 = vmul.f32 %v2755_v26, %v2589_v47  ;;  %v10087_v29 = vpop.f32.mrb[46].mxu1  ;;  %15052 = vst [vmem:[#allocation107_spill] sm:$0xff] %v13285_v17  ;;  %v13289_v27 = vpop.permute.xlu1 %511 }
 0x893   :  { %v2878_v62 = vrot.slane %v2877_v41, 2  ;;  %v2883_v3 = vadd.f32 %v2882_v35, %v2851_v48  ;;  %v2838_v7 = vsub.f32 %v2822_v53, %v13277_v56  ;;  %v2823_v25 = vmul.f32 %v10087_v29, %v2767_v37  ;;  %v2592_v0 = vpop.f32.mrb[47].mxu1  ;;  %15053 = vst [vmem:[#allocation108_spill] sm:$0xff] %v13289_v27 }
 0x894   :  { %v2866_v18 = vrot.slane %v2865_v4, 2  ;;  %v2871_v30 = vadd.f32 %v2870_v15, %v2849_v10  ;;  %v2836_v5 = vsub.f32 %v2820_v31, %v13252_v42  ;;  %v2821_v12 = vmul.f32 %v2759_v39, %v2592_v0 }
 0x895   :  { %v2879_v38 = vadd.f32 %v2878_v62, %v2877_v41  ;;  %v2884_v54 = vrot.slane %v2883_v3, 2  ;;  %v2854_v51 = vmul.f32 %v2838_v7, %v13269_v52  ;;  %v2839_v26 = vsub.f32 %v2823_v25, %v13281_v63 }
 0x896   :  { %v2867_v48 = vadd.f32 %v2866_v18, %v2865_v4  ;;  %v2872_v47 = vrot.slane %v2871_v30, 2  ;;  %v2852_v37 = vmul.f32 %v2836_v5, %v13183_v11  ;;  %v2837_v60 = vsub.f32 %v2821_v12, %v13267_v33 }
 0x897   :  { %v2885_v15 = vadd.f32 %v2884_v54, %v2883_v3  ;;  %v2900_v10 = vrot.slane %v2854_v51, 4  ;;  %v2855_v31 = vmul.f32 %v2839_v26, %v13289_v27  ;;  %v2735_v62 = vcombine.high %v13263_v32, %v13263_v32  ;;  %v13297_v26 = vpop.permute.xlu0 %541 }
 0x898   :  { %v2868_v0 = vrot.slane %v2867_v48, 1  ;;  %v2873_v39 = vadd.f32 %v2872_v47, %v2871_v30  ;;  %v2888_v41 = vrot.slane %v2852_v37, 4  ;;  %v2853_v25 = vmul.f32 %v2837_v60, %v13228_v50  ;;  %v10090_v35 = vpop.f32.mrb[48].mxu1  ;;  %15054 = vst [vmem:[#allocation109_spill] sm:$0xff] %v13297_v26 }
 0x899   :  { %v2880_v53 = vrot.slane %v2879_v38, 1  ;;  %v2901_v4 = vadd.f32 %v2900_v10, %v2854_v51  ;;  %v2906_v29 = vrot.slane %v2855_v31, 4  ;;  %v2605_v7 = vpop.f32.mrb[49].mxu1  ;;  %v2886_v18 = vrot.slane %v2885_v15, 1 }
 0x89a   :  { %v2874_v5 = vrot.slane %v2873_v39, 1  ;;  %v2889_v3 = vadd.f32 %v2888_v41, %v2852_v37  ;;  %v2894_v12 = vrot.slane %v2853_v25, 4  ;;  %v10091_v54 = vpop.f32.mrb[50].mxu1  ;;  %v2869_v27 = vadd.f32 %v2868_v0, %v2867_v48 }
 0x89b   :  { %v2902_v11 = vrot.slane %v2901_v4, 2  ;;  %v2907_v52 = vadd.f32 %v2906_v29, %v2855_v31  ;;  %v2826_v30 = vmul.f32 %v10090_v35, %v13241_v34  ;;  %v2608_v47 = vpop.f32.mrb[51].mxu1  ;;  %v15055_v51 = vrot.slane %v13186_v43, %v12544_v23 }
 0x89c   :  { %v2875_v60 = vadd.f32 %v2874_v5, %v2873_v39  ;;  %v2890_v50 = vrot.slane %v2889_v3, 2  ;;  %v2895_v63 = vadd.f32 %v2894_v12, %v2853_v25  ;;  %v2827_v41 = vmul.f32 %v10091_v54, %v13257_v13  ;;  %v13324_v5 = vpop.permute.xlu0 %546 }
 0x89d   :  { %v2824_v10 = vmul.f32 %v15055_v51, %v2605_v7  ;;  %v13303_v56 = vadd.f32 %v2902_v11, %v2901_v4  ;;  %v2842_v37 = vsub.f32 %v2826_v30, %v13201_v16  ;;  %v2791_v48 = vrot.slane %v13263_v32, %v12544_v23  ;;  %15057 = vst [vmem:[#allocation110_spill] sm:$0xff] %v13324_v5 }
 0x89e   :  { %v13310_v31 = vsel %vm3215_vm2, %v2875_v60, %v2869_v27  ;;  %v2908_v34 = vrot.slane %v2907_v52, 2  ;;  %v2896_v0 = vrot.slane %v2895_v63, 2  ;;  %v13313_v25 = vadd.f32 %v2880_v53, %v2879_v38 }
 0x89f   :  { %v2840_v39 = vsub.f32 %v2824_v10, %v13179_v57  ;;  %v2858_v43 = vmul.f32 %v2842_v37, %v13125_v1  ;;  %v2843_v11 = vsub.f32 %v2827_v41, %v13236_v44  ;;  %v2799_v35 = vrot.slane %v2735_v62, %v12544_v23 }
 0x8a0   :  { %v13318_v4 = vadd.f32 %v2886_v18, %v2885_v15  ;;  %v2891_v13 = vadd.f32 %v2890_v50, %v2889_v3  ;;  %v15056_v27 = vrot.slane %v13206_v46, %v12544_v23  ;;  %v10094_v7 = vpop.f32.mrb[52].mxu1  ;;  %v2904_v38 = vrot.slane %v13303_v56, 1 }
 0x8a1   :  { %v2856_v32 = vmul.f32 %v2840_v39, %v13113_v58  ;;  %v2924_v53 = vrot.slane %v2858_v43, 4  ;;  %v2859_v12 = vmul.f32 %v2843_v11, %v13155_v6  ;;  %v2830_v54 = vmul.f32 %v10094_v7, %v13273_v59  ;;  %v2621_v62 = vpop.f32.mrb[53].mxu1  ;;  %v13340_v7 = vpop.permute.xlu0 %551 }
 0x8a2   :  { %v2825_v29 = vmul.f32 %v15056_v27, %v2608_v47  ;;  %v13329_v15 = vadd.f32 %v2908_v34, %v2907_v52  ;;  %v2897_v50 = vadd.f32 %v2896_v0, %v2895_v63  ;;  %v10095_v30 = vpop.f32.mrb[54].mxu1  ;;  %v15058_v51 = vrot.slane %v13221_v21, %v12544_v23  ;;  %15059 = vst [vmem:[#allocation111_spill] sm:$0xff] %v13340_v7 }
 0x8a3   :  { %v2912_v18 = vrot.slane %v2856_v32, 4  ;;  %v2925_v46 = vadd.f32 %v2924_v53, %v2858_v43  ;;  %v2930_v47 = vrot.slane %v2859_v12, 4  ;;  %v2846_v60 = vsub.f32 %v2830_v54, %v13198_v55  ;;  %v2624_v37 = vpop.f32.mrb[55].mxu1 }
 0x8a4   :  { %v2841_v3 = vsub.f32 %v2825_v29, %v13190_v9  ;;  %v2828_v10 = vmul.f32 %v15058_v51, %v2621_v62  ;;  %v2892_v41 = vrot.slane %v2891_v13, 1  ;;  %v2831_v34 = vmul.f32 %v10095_v30, %v2799_v35 }
 0x8a5   :  { %v2913_v59 = vadd.f32 %v2912_v18, %v2856_v32  ;;  %v2926_v63 = vrot.slane %v2925_v46, 2  ;;  %v2931_v0 = vadd.f32 %v2930_v47, %v2859_v12  ;;  %v2862_v39 = vmul.f32 %v2846_v60, %v13324_v5 }
 0x8a6   :  { %v2857_v52 = vmul.f32 %v2841_v3, %v13119_v40  ;;  %v2844_v43 = vsub.f32 %v2828_v10, %v13173_v28  ;;  %v2847_v21 = vsub.f32 %v2831_v34, %v13214_v45  ;;  %v2829_v29 = vmul.f32 %v2791_v48, %v2624_v37 }
 0x8a7   :  { %v2914_v11 = vrot.slane %v2913_v59, 2  ;;  %v2898_v32 = vrot.slane %v2897_v50, 1  ;;  %v2932_v53 = vrot.slane %v2931_v0, 2  ;;  %v2948_v54 = vrot.slane %v2862_v39, 4 }
 0x8a8   :  { %v2918_v27 = vrot.slane %v2857_v52, 4  ;;  %v2860_v35 = vmul.f32 %v2844_v43, %v13285_v17  ;;  %v2863_v18 = vmul.f32 %v2847_v21, %v13340_v7  ;;  %v2845_v3 = vsub.f32 %v2829_v29, %v13181_v8 }
 0x8a9   :  { %v2915_v12 = vadd.f32 %v2914_v11, %v2913_v59  ;;  %v2927_v30 = vadd.f32 %v2926_v63, %v2925_v46  ;;  %v2933_v47 = vadd.f32 %v2932_v53, %v2931_v0  ;;  %v2949_v60 = vadd.f32 %v2948_v54, %v2862_v39 }
 0x8aa   :  { %v2919_v62 = vadd.f32 %v2918_v27, %v2857_v52  ;;  %v2936_v48 = vrot.slane %v2860_v35, 4  ;;  %v2954_v10 = vrot.slane %v2863_v18, 4  ;;  %v2861_v37 = vmul.f32 %v2845_v3, %v13297_v26 }
 0x8ab   :  { %v2905_v34 = vadd.f32 %v2904_v38, %v13303_v56  ;;  %v2893_v5 = vadd.f32 %v2892_v41, %v2891_v13  ;;  %v2916_v43 = vrot.slane %v2915_v12, 1  ;;  %v2950_v17 = vrot.slane %v2949_v60, 2 }
 0x8ac   :  { %v2920_v51 = vrot.slane %v2919_v62, 2  ;;  %v2937_v59 = vadd.f32 %v2936_v48, %v2860_v35  ;;  %v2899_v52 = vadd.f32 %v2898_v32, %v2897_v50  ;;  %v2955_v27 = vadd.f32 %v2954_v10, %v2863_v18 }
 0x8ad   :  { %v2942_v21 = vrot.slane %v2861_v37, 4  ;;  %v2928_v29 = vrot.slane %v2927_v30, 1  ;;  %v2934_v7 = vrot.slane %v2933_v47, 1  ;;  %v2910_v63 = vrot.slane %v13329_v15, 1 }
 0x8ae   :  { %v2921_v11 = vadd.f32 %v2920_v51, %v2919_v62  ;;  %v2938_v46 = vrot.slane %v2937_v59, 2  ;;  %v2956_v39 = vrot.slane %v2955_v27, 2  ;;  %v3218_v56 = vsel %vm3217_vm3, %v13313_v25, %v13310_v31 }
 0x8af   :  { %v2943_v53 = vadd.f32 %v2942_v21, %v2861_v37  ;;  %v2917_v13 = vadd.f32 %v2916_v43, %v2915_v12  ;;  %v2951_v38 = vadd.f32 %v2950_v17, %v2949_v60  ;;  %v3220_v50 = vsel %vm3219_vm4, %v13318_v4, %v3218_v56 }
 0x8b0   :  { %v2922_v0 = vrot.slane %v2921_v11, 1  ;;  %v2939_v41 = vadd.f32 %v2938_v46, %v2937_v59  ;;  %v2957_v54 = vadd.f32 %v2956_v39, %v2955_v27  ;;  %v3222_v62 = vsel %vm3221_vm5, %v2893_v5, %v3220_v50  ;;  %v9054_v27 = vld [vmem:[%s15060_s3] ss:$0 sm:$0xff] }
 0x8b1   :  { %v2944_v35 = vrot.slane %v2943_v53, 2  ;;  %v2929_v18 = vadd.f32 %v2928_v29, %v2927_v30  ;;  %v2911_v48 = vadd.f32 %v2910_v63, %v13329_v15  ;;  %v3224_v51 = vsel %vm3223_vm6, %v2899_v52, %v3222_v62 }
 0x8b2   :  { %v2923_v32 = vadd.f32 %v2922_v0, %v2921_v11  ;;  %v2940_v3 = vrot.slane %v2939_v41, 1  ;;  %v2935_v10 = vadd.f32 %v2934_v7, %v2933_v47  ;;  %v3226_v17 = vsel %vm3225_vm7, %v2905_v34, %v3224_v51  ;;  %v10890_v51 = vld [vmem:[#allocation8 + $0x60] sm:$0xff]  }
 0x8b3   :  { %v2945_v25 = vadd.f32 %v2944_v35, %v2943_v53  ;;  %v2952_v12 = vrot.slane %v2951_v38, 1  ;;  %v3228_v60 = vsel %vm3227_vm8, %v2911_v48, %v3226_v17  ;;  %v2958_v30 = vrot.slane %v2957_v54, 1  ;;  %v10886_v35 = vld [vmem:[#allocation8 + $0x40] sm:$0xff]   ;;  %v10889_v48 = vld [vmem:[#allocation8 + $0x58] sm:$0xff]  }
 0x8b4   :  { %v3229_v31 = vsel %vm3215_vm2, %v2923_v32, %v2917_v13  ;;  %v2941_v4 = vadd.f32 %v2940_v3, %v2939_v41  ;;  %v11558_v13 = vld [vmem:[#allocation3] sm:$0xff]  ;;  %10157 = vmatpush3.bf16.msra.mxu1 %v10886_v35  ;;  %v15063_v62 = vmov 0.0   ;;  %v9079_v17 = vld [vmem:[#allocation7 + $0x1] ss:$0 sm:$0xff] }
 0x8b5   :  { %v3230_v37 = vsel %vm3217_vm3, %v2929_v18, %v3229_v31  ;;  %v2946_v5 = vrot.slane %v2945_v25, 1  ;;  %v2953_v7 = vadd.f32 %v2952_v12, %v2951_v38  ;;  %v2959_v47 = vadd.f32 %v2958_v30, %v2957_v54  ;;  %v11559_v38 = vld [vmem:[#allocation3 + $0x8] sm:$0xff]  ;;  %v11560_v54 = vld [vmem:[%s15005_s9] sm:$0xff]   ;;  %10158 = vmatprep.subr.bf16.mxu1 %v15063_v62 }
 0x8b6   :  { %v3231_v43 = vsel %vm3219_vm4, %v2935_v10, %v3230_v37  ;;  %v10887_v18 = vld [vmem:[#allocation8 + $0x48] sm:$0xff]   ;;  %v10888_v3 = vld [vmem:[#allocation8 + $0x50] sm:$0xff]  }
 0x8b7   :  { %v3232_v15 = vsel %vm3221_vm5, %v2941_v4, %v3231_v43  ;;  %v2947_v59 = vadd.f32 %v2946_v5, %v2945_v25  ;;  %v10891_v10 = vld [vmem:[#allocation8 + $0x68] sm:$0xff]   ;;  %v10892_v31 = vld [vmem:[#allocation8 + $0x70] sm:$0xff]   ;;  %v10893_v25 = vld [vmem:[#allocation8 + $0x78] sm:$0xff]  }
 0x8b8   :  { %10159 = vmatpush3.bf16.msra.mxu1 %v10887_v18 }
 0x8b9   :  { %v3233_v52 = vsel %vm3223_vm6, %v2947_v59, %v3232_v15  ;;  %10160 = vmatprep.subr.bf16.mxu1 %v15063_v62 }
 0x8ba   :  { %v3234_v11 = vsel %vm3225_vm7, %v2953_v7, %v3233_v52 }
 0x8bb   :  { %v3235_v34 = vsel %vm3227_vm8, %v2959_v47, %v3234_v11 }
 0x8bc   :  { %10161 = vmatpush3.bf16.msra.mxu1 %v10888_v3 }
 0x8bd   :  { %10162 = vmatprep.subr.bf16.mxu1 %v15063_v62 }
 0x8be   :  { %v3192_v21 = vpop.f32.mrb[56].mxu1 }
 0x8bf   :  { %v3193_v29 = vadd.f32 %v9054_v27, %v3192_v21  ;;  %v10134_v46 = vpop.f32.mrb[57].mxu1 }
 0x8c0   :  { %v3195_v63 = vpop.f32.mrb[58].mxu1  ;;  %10163 = vmatpush3.bf16.msra.mxu1 %v10889_v48  ;;  %v10894_v46 = vld [vmem:[%s15006_s1 + $0x40] sm:$0xff]  }
 0x8c1   :  { %v3238_v0 = vmul.f32 %v3228_v60, %v3193_v29  ;;  %v3196_v39 = vadd.f32 %v9054_v27, %v3195_v63  ;;  %v10135_v53 = vpop.f32.mrb[59].mxu1  ;;  %10164 = vmatprep.subr.bf16.mxu1 %v15063_v62  ;;  %v10896_v63 = vld [vmem:[%s15006_s1 + $0x48] sm:$0xff]  }
 0x8c2   :  { %v10902_v53 = vld [vmem:[%s15006_s1 + $0x60] sm:$0xff]  }
 0x8c3   :  { %v3239_v56 = vmul.f32 %v3235_v34, %v3196_v39  ;;  %v13366_v41 = vadd.f32 %v11558_v13, %v3238_v0  ;;  %v10898_v0 = vld [vmem:[%s15006_s1 + $0x50] sm:$0xff]   ;;  %v10900_v39 = vld [vmem:[%s15006_s1 + $0x58] sm:$0xff]  }
 0x8c4   :  { %10165 = vmatpush3.bf16.msra.mxu1 %v10890_v51 }
 0x8c5   :  { %15061 = vst [vmem:[#allocation112_spill] sm:$0xff] %v13366_v41  ;;  %v13368_v50 = vadd.f32 %v11559_v38, %v3239_v56  ;;  %10166 = vmatprep.subr.bf16.mxu1 %v15063_v62  ;;  %v10904_v56 = vld [vmem:[%s15006_s1 + $0x68] sm:$0xff]   ;;  %v9090_v38 = vld [vmem:[#allocation10 + $0x1] ss:$0 sm:$0xff] }
 0x8c7   :  { %15062 = vst [vmem:[#allocation113_spill] sm:$0xff] %v13368_v50  ;;  %v13372_v32 = vpack.c.bf16 %v13368_v50, %v13366_v41 }
 0x8c8   :  { %10167 = vmatpush3.bf16.msra.mxu1 %v10891_v10  ;;  %v10895_v10 = vld [vmem:[#allocation25 + $0x40] sm:$0xff]  }
 0x8c9   :  { %10153 = vmatmul.mubr.bf16.vlgmr.msra.gmra.mrb[48].mxu0 %v13372_v32  ;;  %10168 = vmatprep.subr.bf16.mxu1 %v15063_v62 }
 0x8ca   :  { %10178 = vmatprep.mubr.msk.bf16.mxu0 %vm835_vm1, %v11560_v54 }
 0x8cc   :  { %10169 = vmatpush3.bf16.msra.mxu1 %v10892_v31  ;;  %v10897_v31 = vld [vmem:[#allocation25 + $0x48] sm:$0xff]  }
 0x8cd   :  { %10170 = vmatprep.subr.bf16.mxu1 %v15063_v62 }
 0x8d0   :  { %10171 = vmatpush3.bf16.msra.mxu1 %v10893_v25  ;;  %v10899_v25 = vld [vmem:[#allocation25 + $0x50] sm:$0xff]  }
 0x8d1   :  { %10194 = vmatprep.subr.bf16.mxu1 %v10894_v46 }
 0x99c   :  { %v3350_v12 = vpop.f32.mrb[48].mxu0 }
 0x99d   :  { %v3351_v4 = vadd.f32 %v9079_v17, %v3350_v12  ;;  %v10154_v60 = vpop.f32.mrb[49].mxu0  ;;  %v15064_v12 = vld [vmem:[#allocation87_spill] sm:$0xff] }
 0x99e   :  { %v3353_v37 = vpop.f32.mrb[50].mxu0  ;;  %v10908_v60 = vld [vmem:[%s15006_s1 + $0x78] sm:$0xff]  }
 0x99f   :  { %v9088_v5 = vmul.f32 -1.442695, %v3351_v4  ;;  %v3354_v30 = vadd.f32 %v9079_v17, %v3353_v37  ;;  %v10155_v43 = vpop.f32.mrb[51].mxu0  ;;  %v10901_v17 = vld [vmem:[#allocation25 + $0x58] sm:$0xff]  }
 0x9a0   :  { %v10909_v37 = vld [vmem:[#allocation25 + $0x78] sm:$0xff]  }
 0x9a1   :  { %11214 = vpow2.f32 %v9088_v5  ;;  %v9089_v15 = vmul.f32 -1.442695, %v3354_v30 }
 0x9a3   :  { %11216 = vpow2.f32 %v9089_v15 }
 0x9ab   :  { %v11215_v59 = vpop.eup %11214 }
 0x9ac   :  { %v3363_v7 = vadd.f32 1.0, %v11215_v59 }
 0x9ad   :  { %v11217_v47 = vpop.eup %11216 }
 0x9ae   :  { %11218 = vrcp.f32 %v3363_v7  ;;  %v3364_v52 = vadd.f32 1.0, %v11217_v47  ;;  %v3587_v47 = vld [vmem:[#allocation5 + $0x90] sm:$0xff] }
 0x9b0   :  { %11220 = vrcp.f32 %v3364_v52 }
 0x9b8   :  { %v11219_v11 = vpop.eup %11218 }
 0x9b9   :  { %v3369_v27 = vmul.f32 %v11219_v11, %v3351_v4  ;;  %v10906_v4 = vld [vmem:[%s15006_s1 + $0x70] sm:$0xff]  }
 0x9ba   :  { %v11221_v34 = vpop.eup %11220  ;;  %v3585_v11 = vld [vmem:[#allocation5 + $0x80] sm:$0xff] }
 0x9bb   :  { %v3370_v21 = vmul.f32 %v11221_v34, %v3354_v30 }
 0x9bd   :  { %v3371_v29 = vpack.c.bf16 %v3370_v21, %v3369_v27  ;;  %v3588_v21 = vld [vmem:[#allocation5 + $0x98] sm:$0xff] }
 0x9bf   :  { %10173 = vmatmul.mubr.bf16.vlgmr.msra.gmra.mrb[60].mxu1 %v3371_v29 }
 0x9c0   :  { %10195 = vmatpush3.bf16.msra.mxu1 %v10894_v46 }
 0x9c1   :  { %10196 = vmatprep.subr.bf16.mxu1 %v10896_v63 }
 0x9c4   :  { %10197 = vmatpush3.bf16.msra.mxu1 %v10896_v63 }
 0x9c5   :  { %10198 = vmatprep.subr.bf16.mxu1 %v10898_v0 }
 0x9c8   :  { %10199 = vmatpush3.bf16.msra.mxu1 %v10898_v0  ;;  %v3586_v0 = vld [vmem:[#allocation5 + $0x88] sm:$0xff] }
 0x9c9   :  { %10200 = vmatprep.subr.bf16.mxu1 %v10900_v39 }
 0x9cc   :  { %10201 = vmatpush3.bf16.msra.mxu1 %v10900_v39 }
 0x9cd   :  { %10202 = vmatprep.subr.bf16.mxu1 %v10902_v53 }
 0x9d0   :  { %10203 = vmatpush3.bf16.msra.mxu1 %v10902_v53 }
 0x9d1   :  { %10204 = vmatprep.subr.bf16.mxu1 %v10904_v56 }
 0x9d4   :  { %10205 = vmatpush3.bf16.msra.mxu1 %v10904_v56 }
 0x9d5   :  { %10206 = vmatprep.subr.bf16.mxu1 %v10906_v4 }
 0x9d8   :  { %10207 = vmatpush3.bf16.msra.mxu1 %v10906_v4  ;;  %v3591_v4 = vld [vmem:[#allocation5 + $0xb0] sm:$0xff] }
 0x9d9   :  { %10208 = vmatprep.subr.bf16.mxu1 %v10908_v60 }
 0x9dc   :  { %10209 = vmatpush3.bf16.msra.mxu1 %v10908_v60  ;;  %v3589_v60 = vld [vmem:[#allocation5 + $0xa0] sm:$0xff] }
 0xa92   :  { %v3479_v13 = vpop.f32.mrb[60].mxu1 }
 0xa93   :  { %v10174_v54 = vpop.f32.mrb[61].mxu1  ;;  %v3480_v48 = vadd.f32 %v9090_v38, %v3479_v13 }
 0xa94   :  { %v3482_v35 = vpop.f32.mrb[62].mxu1 }
 0xa95   :  { %v13390_v18 = vadd.f32 %v9090_v38, %v3482_v35  ;;  %v10175_v3 = vpop.f32.mrb[63].mxu1  ;;  %v3619_v5 = vcombine.high %v3480_v48, %v3480_v48 }
 0xa97   :  { %v3486_v51 = vpack.c.bf16 %v13390_v18, %v3480_v48  ;;  %v3633_v15 = vrot.slane %v3619_v5, %v12538_v14  ;;  %v3675_v53 = vrot.slane %v13390_v18, %v12538_v14  ;;  %v3592_v5 = vld [vmem:[#allocation5 + $0xb8] sm:$0xff] }
 0xa99   :  { %10176 = vmatprep.subr.bf16.mxu0 %v3486_v51  ;;  %v3635_v52 = vcombine.high %v3633_v15, %v3633_v15  ;;  %v3649_v39 = vrot.slane %v3633_v15, %v12538_v14 }
 0xa9a   :  { %10177 = vmatpush3.bf16.msra.mxu0 %v3486_v51 }
 0xa9b   :  { %10226 = vmatprep.subr.bf16.mxu0 %v10895_v10  ;;  %v3663_v51 = vrot.slane %v3635_v52, %v12538_v14  ;;  %v3590_v52 = vld [vmem:[#allocation5 + $0xa8] sm:$0xff] }
 0xa9d   :  { %10179 = vmatmul.mubr.msk.bf16.vlgmr.msra.gmra.mrb[52].mxu0 %vm835_vm1, %v13033_v22  ;;  %v10903_v22 = vld [vmem:[#allocation25 + $0x60] sm:$0xff]  }
 0xa9e   :  { %10182 = vmatprep.mubr.msk.bf16.mxu0 %vm835_vm1, %v13038_v2  ;;  %10227 = vmatpush3.bf16.msra.mxu0 %v10895_v10  ;;  %v10905_v2 = vld [vmem:[#allocation25 + $0x68] sm:$0xff]  }
 0xa9f   :  { %10228 = vmatprep.subr.bf16.mxu0 %v10897_v31 }
 0xaa2   :  { %10229 = vmatpush3.bf16.msra.mxu0 %v10897_v31 }
 0xaa3   :  { %10230 = vmatprep.subr.bf16.mxu0 %v10899_v25 }
 0xaa5   :  { %10183 = vmatmul.mubr.msk.bf16.gmra.mrb[56].mxu0 %vm835_vm1, %v13045_v61  ;;  %v15065_v61 = vld [vmem:[#allocation88_spill] sm:$0xff] }
 0xaa6   :  { %10186 = vmatprep.mubr.msk.bf16.mxu0 %vm835_vm1, %v13050_v36  ;;  %10231 = vmatpush3.bf16.msra.mxu0 %v10899_v25  ;;  %v10907_v36 = vld [vmem:[#allocation25 + $0x70] sm:$0xff]  }
 0xaa7   :  { %10232 = vmatprep.subr.bf16.mxu0 %v10901_v17 }
 0xaaa   :  { %10233 = vmatpush3.bf16.msra.mxu0 %v10901_v17  ;;  %v3668_v17 = vcombine.high %v13390_v18, %v13390_v18 }
 0xaab   :  { %10234 = vmatprep.subr.bf16.mxu0 %v10903_v22 }
 0xaac   :  { %v3682_v15 = vrot.slane %v3668_v17, %v12538_v14 }
 0xaad   :  { %10187 = vmatmul.mubr.msk.bf16.gmra.mrb[60].mxu0 %vm835_vm1, %v13057_v49  ;;  %v3626_v49 = vrot.slane %v3480_v48, %v12538_v14 }
 0xaae   :  { %10190 = vmatprep.mubr.msk.bf16.mxu0 %vm835_vm1, %v15064_v12  ;;  %10235 = vmatpush3.bf16.msra.mxu0 %v10903_v22  ;;  %v3683_v12 = vcombine.high %v3675_v53, %v3675_v53 }
 0xaaf   :  { %10236 = vmatprep.subr.bf16.mxu0 %v10905_v2  ;;  %v3634_v30 = vcombine.high %v3626_v49, %v3626_v49  ;;  %v3642_v43 = vrot.slane %v3626_v49, %v12538_v14 }
 0xab1   :  { %v3656_v59 = vrot.slane %v3634_v30, %v12538_v14  ;;  %v3664_v7 = vcombine.high %v3642_v43, %v3642_v43  ;;  %v3720_v13 = vrot.slane %v3642_v43, %v12544_v23  ;;  %v10910_v43 = vld [vmem:[#allocation11 + $0x40] sm:$0xff]  }
 0xab2   :  { %10237 = vmatpush3.bf16.msra.mxu0 %v10905_v2  ;;  %v3665_v2 = vcombine.high %v3649_v39, %v3649_v39 }
 0xab3   :  { %10238 = vmatprep.subr.bf16.mxu0 %v10907_v36  ;;  %v3666_v34 = vcombine.high %v3656_v59, %v3656_v59  ;;  %v3728_v46 = vrot.slane %v3664_v7, %v12544_v23  ;;  %v3724_v25 = vrot.slane %v3656_v59, %v12544_v23  ;;  %v3691_v7 = vrot.slane %v3675_v53, %v12538_v14 }
 0xab5   :  { %10191 = vmatmul.mubr.msk.bf16.gmra.mrb[64].mxu0 %vm835_vm1, %v15065_v61  ;;  %v3732_v3 = vrot.slane %v3666_v34, %v12544_v23  ;;  %v3736_v34 = vrot.slane %v3649_v39, %v12544_v23  ;;  %v3713_v39 = vcombine.high %v3691_v7, %v3691_v7 }
 0xab6   :  { %10239 = vmatpush3.bf16.msra.mxu0 %v10907_v36 }
 0xab7   :  { %10240 = vmatprep.subr.bf16.mxu0 %v10909_v37 }
 0xaba   :  { %10241 = vmatpush3.bf16.msra.mxu0 %v10909_v37  ;;  %v3667_v37 = vcombine.high %v3663_v51, %v3663_v51 }
 0xabb   :  { %10290 = vmatprep.subr.bf16.mxu0 %v15063_v62 }
 0xb70   :  { %v10180_v27 = vpop.f32.mrb[52].mxu0 }
 0xb71   :  { %v3603_v29 = vmul.f32 %v10180_v27, %v3587_v47  ;;  %v3521_v63 = vpop.f32.mrb[53].mxu0  ;;  %v3744_v47 = vrot.slane %v3665_v2, %v12544_v23 }
 0xb72   :  { %v3601_v56 = vmul.f32 %v3585_v11, %v3521_v63  ;;  %v10181_v38 = vpop.f32.mrb[54].mxu0  ;;  %v3748_v63 = vrot.slane %v3667_v37, %v12544_v23 }
 0xb73   :  { %v3799_v54 = vmul.f32 %v3728_v46, %v3603_v29  ;;  %v3604_v35 = vmul.f32 %v10181_v38, %v3588_v21  ;;  %v3524_v48 = vpop.f32.mrb[55].mxu0  ;;  %v3705_v21 = vrot.slane %v3683_v12, %v12538_v14  ;;  %v10911_v38 = vld [vmem:[#allocation11 + $0x48] sm:$0xff]   ;;  %v10912_v12 = vld [vmem:[#allocation11 + $0x50] sm:$0xff]  }
 0xb74   :  { %v3797_v10 = vmul.f32 %v3720_v13, %v3601_v56  ;;  %v3602_v31 = vmul.f32 %v3586_v0, %v3524_v48  ;;  %v3740_v13 = vrot.slane %v3663_v51, %v12544_v23  ;;  %v3595_v48 = vld [vmem:[#allocation5 + $0xd0] sm:$0xff]  ;;  %v3760_v51 = vrot.slane %v3713_v39, %v12544_v23 }
 0xb75   :  { %v3800_v22 = vmul.f32 %v3732_v3, %v3604_v35  ;;  %v3684_v35 = vcombine.high %v3682_v15, %v3682_v15 }
 0xb76   :  { %v3798_v61 = vmul.f32 %v3724_v25, %v3602_v31  ;;  %v3715_v31 = vcombine.high %v3705_v21, %v3705_v21 }
 0xb77   :  { %v3814_v36 = vpack.c.bf16 %v3800_v22, %v3799_v54  ;;  %v3596_v22 = vld [vmem:[#allocation5 + $0xd8] sm:$0xff] }
 0xb78   :  { %v10184_v49 = vpop.f32.mrb[56].mxu0  ;;  %v3813_v30 = vpack.c.bf16 %v3798_v61, %v3797_v10  ;;  %v3593_v10 = vld [vmem:[#allocation5 + $0xc0] sm:$0xff] }
 0xb79   :  { %v3607_v59 = vmul.f32 %v10184_v49, %v3591_v4  ;;  %v3537_v18 = vpop.f32.mrb[57].mxu0  ;;  %v3752_v49 = vrot.slane %v3691_v7, %v12544_v23 }
 0xb7a   :  { %v3605_v11 = vmul.f32 %v3589_v60, %v3537_v18  ;;  %v10185_v27 = vpop.f32.mrb[58].mxu0  ;;  %10210 = vmatprep.mubr.bf16.mxu1 %v3813_v30  ;;  %10242 = vmatprep.mubr.bf16.mxu0 %v3813_v30  ;;  %v3698_v60 = vrot.slane %v3682_v15, %v12538_v14  ;;  %v3712_v30 = vrot.slane %v3684_v35, %v12538_v14  ;;  %v10913_v15 = vld [vmem:[#allocation11 + $0x58] sm:$0xff]  }
 0xb7b   :  { %v3803_v29 = vmul.f32 %v3744_v47, %v3607_v59  ;;  %v3608_v46 = vmul.f32 %v10185_v27, %v3592_v5  ;;  %v3540_v0 = vpop.f32.mrb[59].mxu0  ;;  %10211 = vmatmul.mubr.bf16.vlgmr.msra.gmra.mrb[64].mxu1 %v3814_v36  ;;  %10243 = vmatmul.mubr.bf16.vlgmr.msra.gmra.mrb[68].mxu0 %v3814_v36  ;;  %v3594_v36 = vld [vmem:[#allocation5 + $0xc8] sm:$0xff]  ;;  %v3764_v47 = vrot.slane %v3715_v31, %v12544_v23 }
 0xb7c   :  { %v3801_v53 = vmul.f32 %v3736_v34, %v3605_v11  ;;  %v3606_v56 = vmul.f32 %v3590_v52, %v3540_v0  ;;  %10291 = vmatpush3.bf16.msra.mxu0 %v10910_v43  ;;  %v3756_v34 = vrot.slane %v3705_v21, %v12544_v23  ;;  %v3714_v7 = vcombine.high %v3698_v60, %v3698_v60 }
 0xb7d   :  { %v3804_v54 = vmul.f32 %v3748_v63, %v3608_v46  ;;  %10292 = vmatprep.subr.bf16.mxu0 %v15063_v62  ;;  %v3599_v46 = vld [vmem:[#allocation5 + $0xf0] sm:$0xff]  ;;  %v3597_v63 = vld [vmem:[#allocation5 + $0xe0] sm:$0xff]  ;;  %v3716_v0 = vcombine.high %v3712_v30, %v3712_v30 }
 0xb7e   :  { %v3802_v3 = vmul.f32 %v3740_v13, %v3606_v56  ;;  %v3600_v13 = vld [vmem:[#allocation5 + $0xf8] sm:$0xff]  ;;  %v3776_v35 = vrot.slane %v3714_v7, %v12544_v23 }
 0xb7f   :  { %v3816_v25 = vpack.c.bf16 %v3804_v54, %v3803_v29  ;;  %v10914_v54 = vld [vmem:[#allocation11 + $0x60] sm:$0xff]  }
 0xb80   :  { %v10188_v17 = vpop.f32.mrb[60].mxu0  ;;  %10293 = vmatpush3.bf16.msra.mxu0 %v10911_v38  ;;  %v3815_v2 = vpack.c.bf16 %v3802_v3, %v3801_v53  ;;  %v3598_v3 = vld [vmem:[#allocation5 + $0xe8] sm:$0xff] }
 0xb81   :  { %v3611_v61 = vmul.f32 %v10188_v17, %v3595_v48  ;;  %v3553_v4 = vpop.f32.mrb[61].mxu0  ;;  %10294 = vmatprep.subr.bf16.mxu0 %v15063_v62 }
 0xb82   :  { %v3609_v37 = vmul.f32 %v3593_v10, %v3553_v4  ;;  %v10189_v5 = vpop.f32.mrb[62].mxu0  ;;  %10214 = vmatprep.mubr.bf16.mxu1 %v3815_v2  ;;  %10246 = vmatprep.mubr.bf16.mxu0 %v3815_v2  ;;  %v3768_v10 = vrot.slane %v3698_v60, %v12544_v23  ;;  %v10915_v4 = vld [vmem:[#allocation11 + $0x68] sm:$0xff]  }
 0xb83   :  { %v3807_v43 = vmul.f32 %v3760_v51, %v3611_v61  ;;  %v3612_v59 = vmul.f32 %v10189_v5, %v3596_v22  ;;  %v3556_v18 = vpop.f32.mrb[63].mxu0  ;;  %10215 = vmatmul.mubr.bf16.gmra.mrb[68].mxu1 %v3816_v25  ;;  %10247 = vmatmul.mubr.bf16.gmra.mrb[72].mxu0 %v3816_v25  ;;  %v3780_v22 = vrot.slane %v3716_v0, %v12544_v23  ;;  %v10916_v5 = vld [vmem:[#allocation11 + $0x70] sm:$0xff]  }
 0xb84   :  { %v3805_v52 = vmul.f32 %v3752_v49, %v3609_v37  ;;  %v3610_v11 = vmul.f32 %v3594_v36, %v3556_v18  ;;  %10295 = vmatpush3.bf16.msra.mxu0 %v10912_v12  ;;  %v3772_v51 = vrot.slane %v3712_v30, %v12544_v23  ;;  %v10918_v30 = vld [vmem:[#allocation28 + $0x40] sm:$0xff]   ;;  %v10921_v18 = vld [vmem:[#allocation28 + $0x58] sm:$0xff]  }
 0xb85   :  { %v3808_v27 = vmul.f32 %v3764_v47, %v3612_v59  ;;  %10296 = vmatprep.subr.bf16.mxu0 %v15063_v62  ;;  %10258 = vmatprep.subr.bf16.mxu1 %v10918_v30  ;;  %v10919_v59 = vld [vmem:[#allocation28 + $0x48] sm:$0xff]   ;;  %v10920_v47 = vld [vmem:[#allocation28 + $0x50] sm:$0xff]  }
 0xb86   :  { %v3806_v29 = vmul.f32 %v3756_v34, %v3610_v11  ;;  %10259 = vmatpush3.bf16.msra.mxu1 %v10918_v30  ;;  %v10923_v11 = vld [vmem:[#allocation28 + $0x68] sm:$0xff]   ;;  %v10924_v34 = vld [vmem:[#allocation28 + $0x70] sm:$0xff]  }
 0xb87   :  { %v3818_v53 = vpack.c.bf16 %v3808_v27, %v3807_v43  ;;  %v10917_v43 = vld [vmem:[#allocation11 + $0x78] sm:$0xff]   ;;  %10260 = vmatprep.subr.bf16.mxu1 %v10919_v59 }
 0xb88   :  { %v10192_v56 = vpop.f32.mrb[64].mxu0  ;;  %10297 = vmatpush3.bf16.msra.mxu0 %v10913_v15  ;;  %v3817_v38 = vpack.c.bf16 %v3806_v29, %v3805_v52  ;;  %v10922_v52 = vld [vmem:[#allocation28 + $0x60] sm:$0xff]   ;;  %v10925_v15 = vld [vmem:[#allocation28 + $0x78] sm:$0xff]  }
 0xb89   :  { %v3615_v39 = vmul.f32 %v10192_v56, %v3599_v46  ;;  %v3569_v21 = vpop.f32.mrb[65].mxu0  ;;  %10298 = vmatprep.subr.bf16.mxu0 %v15063_v62  ;;  %v13455_v27 = vld [vmem:[#allocation26 + $0x1] ss:$0 sm:$0xff] }
 0xb8a   :  { %v3613_v48 = vmul.f32 %v3597_v63, %v3569_v21  ;;  %v10193_v31 = vpop.f32.mrb[66].mxu0  ;;  %10218 = vmatprep.mubr.bf16.mxu1 %v3817_v38  ;;  %10250 = vmatprep.mubr.bf16.mxu0 %v3817_v38 }
 0xb8b   :  { %v3811_v25 = vmul.f32 %v3776_v35, %v3615_v39  ;;  %v3616_v17 = vmul.f32 %v10193_v31, %v3600_v13  ;;  %v3572_v2 = vpop.f32.mrb[67].mxu0  ;;  %10219 = vmatmul.mubr.bf16.gmra.mrb[72].mxu1 %v3818_v53  ;;  %10251 = vmatmul.mubr.bf16.gmra.mrb[76].mxu0 %v3818_v53 }
 0xb8c   :  { %v3809_v12 = vmul.f32 %v3768_v10, %v3613_v48  ;;  %v3614_v61 = vmul.f32 %v3598_v3, %v3572_v2  ;;  %10299 = vmatpush3.bf16.msra.mxu0 %v10914_v54  ;;  %10261 = vmatpush3.bf16.msra.mxu1 %v10919_v59 }
 0xb8d   :  { %v3812_v36 = vmul.f32 %v3780_v22, %v3616_v17  ;;  %10300 = vmatprep.subr.bf16.mxu0 %v15063_v62  ;;  %10262 = vmatprep.subr.bf16.mxu1 %v10920_v47 }
 0xb8e   :  { %v3810_v60 = vmul.f32 %v3772_v51, %v3614_v61 }
 0xb8f   :  { %v3820_v37 = vpack.c.bf16 %v3812_v36, %v3811_v25 }
 0xb90   :  { %10301 = vmatpush3.bf16.msra.mxu0 %v10915_v4  ;;  %v3819_v49 = vpack.c.bf16 %v3810_v60, %v3809_v12  ;;  %10263 = vmatpush3.bf16.msra.mxu1 %v10920_v47 }
 0xb91   :  { %10302 = vmatprep.subr.bf16.mxu0 %v15063_v62  ;;  %10264 = vmatprep.subr.bf16.mxu1 %v10921_v18 }
 0xb92   :  { %10222 = vmatprep.mubr.bf16.mxu1 %v3819_v49  ;;  %10254 = vmatprep.mubr.bf16.mxu0 %v3819_v49 }
 0xb93   :  { %10223 = vmatmul.mubr.bf16.gmra.mrb[76].mxu1 %v3820_v37  ;;  %10255 = vmatmul.mubr.bf16.gmra.mrb[80].mxu0 %v3820_v37 }
 0xb94   :  { %10303 = vmatpush3.bf16.msra.mxu0 %v10916_v5  ;;  %10306 = vmatprep.mubr.msk.bf16.mxu0 %vm12129_vm0, %v15063_v62 }
 0xb95   :  { %10304 = vmatprep.subr.bf16.mxu0 %v15063_v62  ;;  %10265 = vmatpush3.bf16.msra.mxu1 %v10921_v18 }
 0xb96   :  { %10266 = vmatprep.subr.bf16.mxu1 %v10922_v52 }
 0xb98   :  { %10305 = vmatpush3.bf16.msra.mxu0 %v10917_v43 }
 0xb99   :  { %10330 = vmatprep.subr.bf16.mxu0 %v15063_v62  ;;  %10267 = vmatpush3.bf16.msra.mxu1 %v10922_v52 }
 0xb9a   :  { %10268 = vmatprep.subr.bf16.mxu1 %v10923_v11 }
 0xb9b   :  { %10307 = vmatmul.mubr.bf16.vlgmr.msra.gmra.mrb[84].mxu0 %v13372_v32 }
 0xb9c   :  { %10346 = vmatprep.mubr.msk.bf16.mxu0 %vm12129_vm0, %v15063_v62 }
 0xb9d   :  { %10269 = vmatpush3.bf16.msra.mxu1 %v10923_v11 }
 0xb9e   :  { %10270 = vmatprep.subr.bf16.mxu1 %v10924_v34 }
 0xba1   :  { %10271 = vmatpush3.bf16.msra.mxu1 %v10924_v34 }
 0xba2   :  { %10272 = vmatprep.subr.bf16.mxu1 %v10925_v15 }
 0xba5   :  { %10273 = vmatpush3.bf16.msra.mxu1 %v10925_v15 }
 0xba6   :  { %10310 = vmatprep.subr.bf16.mxu1 %v15063_v62 }
 0xc4e   :  { %v13457_v7 = vpop.f32.mrb[64].mxu1  ;;  %v10244_v29 = vpop.f32.mrb[68].mxu0 }
 0xc4f   :  { %v13460_v46 = vadd.f32 %v10244_v29, %v13455_v27  ;;  %v13462_v63 = vpop.f32.mrb[65].mxu1  ;;  %v4306_v0 = vpop.f32.mrb[69].mxu0 }
 0xc50   :  { %v13465_v53 = vadd.f32 %v13455_v27, %v4306_v0  ;;  %v13467_v56 = vpop.f32.mrb[66].mxu1  ;;  %v10245_v13 = vpop.f32.mrb[70].mxu0 }
 0xc51   :  { %v9162_v38 = vmul.f32 -1.442695, %v13460_v46  ;;  %v13471_v54 = vadd.f32 %v10245_v13, %v13455_v27  ;;  %v13473_v39 = vpop.f32.mrb[67].mxu1  ;;  %v4309_v35 = vpop.f32.mrb[71].mxu0 }
 0xc52   :  { %v9160_v21 = vmul.f32 -1.442695, %v13465_v53  ;;  %v13477_v3 = vadd.f32 %v13455_v27, %v4309_v35 }
 0xc53   :  { %11222 = vpow2.f32 %v9162_v38  ;;  %v9163_v48 = vmul.f32 -1.442695, %v13471_v54 }
 0xc54   :  { %11224 = vpow2.f32 %v9160_v21  ;;  %v9161_v10 = vmul.f32 -1.442695, %v13477_v3 }
 0xc55   :  { %11226 = vpow2.f32 %v9163_v48 }
 0xc56   :  { %v13481_v31 = vpop.f32.mrb[68].mxu1  ;;  %v10248_v25 = vpop.f32.mrb[72].mxu0  ;;  %11228 = vpow2.f32 %v9161_v10 }
 0xc57   :  { %v13483_v17 = vpop.f32.mrb[69].mxu1  ;;  %v4322_v22 = vpop.f32.mrb[73].mxu0  ;;  %v13490_v36 = vadd.f32 %v10248_v25, %v13455_v27 }
 0xc58   :  { %v13485_v2 = vpop.f32.mrb[70].mxu1  ;;  %v10249_v12 = vpop.f32.mrb[74].mxu0  ;;  %v13497_v59 = vadd.f32 %v13455_v27, %v4322_v22 }
 0xc59   :  { %v13487_v61 = vpop.f32.mrb[71].mxu1  ;;  %v4325_v51 = vpop.f32.mrb[75].mxu0  ;;  %v9166_v15 = vmul.f32 -1.442695, %v13490_v36  ;;  %v13506_v21 = vadd.f32 %v10249_v12, %v13455_v27 }
 0xc5a   :  { %v9164_v38 = vmul.f32 -1.442695, %v13497_v59  ;;  %v13511_v10 = vadd.f32 %v13455_v27, %v4325_v51 }
 0xc5c   :  { %v9165_v51 = vmul.f32 -1.442695, %v13511_v10 }
 0xc5d   :  { %v11223_v4 = vpop.eup %11222 }
 0xc5e   :  { %v13492_v60 = vpop.f32.mrb[72].mxu1  ;;  %v10252_v37 = vpop.f32.mrb[76].mxu0  ;;  %v4419_v49 = vadd.f32 1.0, %v11223_v4 }
 0xc5f   :  { %v13494_v5 = vpop.f32.mrb[73].mxu1  ;;  %v4338_v43 = vpop.f32.mrb[77].mxu0  ;;  %v13521_v12 = vadd.f32 %v10252_v37, %v13455_v27 }
 0xc60   :  { %v11225_v30 = vpop.eup %11224  ;;  %v13499_v47 = vpop.f32.mrb[74].mxu1  ;;  %11230 = vrcp.f32 %v4419_v49 }
 0xc61   :  { %v10253_v18 = vpop.f32.mrb[78].mxu0  ;;  %v4417_v52 = vadd.f32 1.0, %v11225_v30  ;;  %v13501_v11 = vpop.f32.mrb[75].mxu1  ;;  %v9167_v30 = vmul.f32 -1.442695, %v13506_v21 }
 0xc62   :  { %v11227_v34 = vpop.eup %11226  ;;  %v4341_v29 = vpop.f32.mrb[79].mxu0 }
 0xc63   :  { %v4420_v0 = vadd.f32 1.0, %v11227_v34  ;;  %v11229_v13 = vpop.eup %11228  ;;  %11232 = vrcp.f32 %v4417_v52  ;;  %v13541_v40 = vadd.f32 %v13455_v27, %v4341_v29 }
 0xc64   :  { %v4418_v35 = vadd.f32 1.0, %v11229_v13 }
 0xc65   :  { %11234 = vrcp.f32 %v4420_v0  ;;  %v13531_v0 = vadd.f32 %v13455_v27, %v4338_v43 }
 0xc66   :  { %11236 = vpow2.f32 %v9166_v15  ;;  %v13508_v48 = vpop.f32.mrb[76].mxu1  ;;  %v10256_v25 = vpop.f32.mrb[80].mxu0 }
 0xc67   :  { %11238 = vrcp.f32 %v4418_v35  ;;  %v13513_v22 = vpop.f32.mrb[77].mxu1  ;;  %v13515_v4 = vpop.f32.mrb[81].mxu0  ;;  %v13535_v35 = vadd.f32 %v10253_v18, %v13455_v27  ;;  %v9168_v26 = vmul.f32 -1.442695, %v13531_v0 }
 0xc68   :  { %11240 = vpow2.f32 %v9164_v38  ;;  %v13517_v49 = vpop.f32.mrb[78].mxu1  ;;  %v13523_v52 = vpop.f32.mrb[82].mxu0  ;;  %v9170_v38 = vmul.f32 -1.442695, %v13521_v12 }
 0xc69   :  { %v13525_v34 = vpop.f32.mrb[79].mxu1  ;;  %v13527_v15 = vpop.f32.mrb[83].mxu0  ;;  %11242 = vpow2.f32 %v9167_v30  ;;  %v9171_v45 = vmul.f32 -1.442695, %v13535_v35 }
 0xc6a   :  { %v11231_v13 = vpop.eup %11230  ;;  %11244 = vpow2.f32 %v9165_v51 }
 0xc6b   :  { %v4467_v58 = vmul.f32 %v11231_v13, %v13460_v46  ;;  %11246 = vpow2.f32 %v9170_v38  ;;  %v10926_v13 = vld [vmem:[#allocation16 + $0x40] sm:$0xff]   ;;  %v10927_v38 = vld [vmem:[#allocation16 + $0x48] sm:$0xff]  }
 0xc6c   :  { %11248 = vpow2.f32 %v9168_v26 }
 0xc6d   :  { %v11233_v37 = vpop.eup %11232  ;;  %11250 = vpow2.f32 %v9171_v45  ;;  %v10928_v45 = vld [vmem:[#allocation16 + $0x50] sm:$0xff]  }
 0xc6e   :  { %v13537_v50 = vpop.f32.mrb[84].mxu0  ;;  %v4465_v51 = vmul.f32 %v11233_v37, %v13465_v53 }
 0xc6f   :  { %v11235_v41 = vpop.eup %11234  ;;  %v10308_v6 = vpop.f32.mrb[85].mxu0 }
 0xc70   :  { %v11237_v43 = vpop.eup %11236  ;;  %v4468_v30 = vmul.f32 %v11235_v41, %v13471_v54  ;;  %v13545_v1 = vpop.f32.mrb[86].mxu0  ;;  %v9169_v6 = vmul.f32 -1.442695, %v13541_v40 }
 0xc71   :  { %v11239_v18 = vpop.eup %11238  ;;  %v10309_v55 = vpop.f32.mrb[87].mxu0  ;;  %v4423_v28 = vadd.f32 1.0, %v11237_v43 }
 0xc72   :  { %v11241_v23 = vpop.eup %11240  ;;  %v4482_v8 = vpack.c.bf16 %v4468_v30, %v4467_v58  ;;  %v4466_v29 = vmul.f32 %v11239_v18, %v13477_v3  ;;  %11252 = vpow2.f32 %v9169_v6  ;;  %v13553_v3 = vadd.f32 %v10256_v25, %v13455_v27  ;;  %v10929_v25 = vld [vmem:[#allocation16 + $0x58] sm:$0xff]  }
 0xc73   :  { %v4421_v41 = vadd.f32 1.0, %v11241_v23  ;;  %v11243_v54 = vpop.eup %11242  ;;  %11254 = vrcp.f32 %v4423_v28  ;;  %v13559_v18 = vadd.f32 %v13455_v27, %v13515_v4 }
 0xc74   :  { %v4481_v46 = vpack.c.bf16 %v4466_v29, %v4465_v51  ;;  %v4424_v55 = vadd.f32 1.0, %v11243_v54  ;;  %v11245_v53 = vpop.eup %11244  ;;  %v9174_v43 = vmul.f32 -1.442695, %v13553_v3 }
 0xc75   :  { %11256 = vrcp.f32 %v4421_v41  ;;  %v4422_v58 = vadd.f32 1.0, %v11245_v53  ;;  %v11247_v26 = vpop.eup %11246  ;;  %v9172_v4 = vmul.f32 -1.442695, %v13559_v18 }
 0xc76   :  { %10274 = vmatprep.mubr.bf16.mxu1 %v4481_v46  ;;  %11258 = vrcp.f32 %v4424_v55  ;;  %v4427_v23 = vadd.f32 1.0, %v11247_v26  ;;  %v11249_v37 = vpop.eup %11248  ;;  %v13564_v46 = vadd.f32 %v13523_v52, %v13455_v27  ;;  %v13569_v55 = vadd.f32 %v13455_v27, %v13527_v15 }
 0xc77   :  { %10275 = vmatmul.mubr.bf16.vlgmr.msra.gmra.mrb[80].mxu1 %v4482_v8  ;;  %11260 = vrcp.f32 %v4422_v58  ;;  %v4425_v28 = vadd.f32 1.0, %v11249_v37  ;;  %v11251_v8 = vpop.eup %11250 }
 0xc78   :  { %10311 = vmatpush3.bf16.msra.mxu1 %v10926_v13  ;;  %11262 = vrcp.f32 %v4427_v23  ;;  %v4428_v30 = vadd.f32 1.0, %v11251_v8  ;;  %v9185_v13 = vld [vmem:[#allocation13 + $0x1] ss:$0 sm:$0xff]  ;;  %v9175_v23 = vmul.f32 -1.442695, %v13564_v46 }
 0xc79   :  { %10312 = vmatprep.subr.bf16.mxu1 %v15063_v62  ;;  %11264 = vrcp.f32 %v4425_v28  ;;  %v13574_v52 = vadd.f32 %v9185_v13, %v13537_v50  ;;  %v10931_v28 = vld [vmem:[#allocation16 + $0x68] sm:$0xff]  }
 0xc7a   :  { %11266 = vrcp.f32 %v4428_v30 }
 0xc7b   :  { %11268 = vpow2.f32 %v9174_v43  ;;  %v9194_v50 = vmul.f32 -1.442695, %v13574_v52 }
 0xc7c   :  { %10313 = vmatpush3.bf16.msra.mxu1 %v10927_v38  ;;  %v11253_v51 = vpop.eup %11252  ;;  %v10930_v38 = vld [vmem:[#allocation16 + $0x60] sm:$0xff]  }
 0xc7d   :  { %10314 = vmatprep.subr.bf16.mxu1 %v15063_v62  ;;  %v11255_v29 = vpop.eup %11254  ;;  %v4426_v6 = vadd.f32 1.0, %v11253_v51  ;;  %v10932_v51 = vld [vmem:[#allocation16 + $0x70] sm:$0xff]  }
 0xc7e   :  { %v4471_v53 = vmul.f32 %v11255_v29, %v13490_v36  ;;  %v9173_v36 = vmul.f32 -1.442695, %v13569_v55 }
 0xc7f   :  { %v11257_v41 = vpop.eup %11256  ;;  %11270 = vrcp.f32 %v4426_v6 }
 0xc80   :  { %10315 = vmatpush3.bf16.msra.mxu1 %v10928_v45  ;;  %v11259_v54 = vpop.eup %11258  ;;  %v13579_v45 = vadd.f32 %v9185_v13, %v13545_v1  ;;  %v4469_v27 = vmul.f32 %v11257_v41, %v13497_v59  ;;  %11272 = vpow2.f32 %v9172_v4 }
 0xc81   :  { %10316 = vmatprep.subr.bf16.mxu1 %v15063_v62  ;;  %v4472_v58 = vmul.f32 %v11259_v54, %v13506_v21  ;;  %v11261_v26 = vpop.eup %11260  ;;  %11274 = vpow2.f32 %v9175_v23 }
 0xc82   :  { %v4470_v15 = vmul.f32 %v11261_v26, %v13511_v10  ;;  %v11263_v8 = vpop.eup %11262  ;;  %v9195_v1 = vmul.f32 -1.442695, %v13579_v45  ;;  %11276 = vpow2.f32 %v9173_v36 }
 0xc83   :  { %v4484_v37 = vpack.c.bf16 %v4472_v58, %v4471_v53  ;;  %v11265_v43 = vpop.eup %11264  ;;  %v4475_v30 = vmul.f32 %v11263_v8, %v13521_v12  ;;  %11278 = vpow2.f32 %v9194_v50 }
 0xc84   :  { %10317 = vmatpush3.bf16.msra.mxu1 %v10929_v25  ;;  %v4483_v21 = vpack.c.bf16 %v4470_v15, %v4469_v27  ;;  %v11267_v59 = vpop.eup %11266  ;;  %11280 = vpow2.f32 %v9195_v1  ;;  %v4473_v6 = vmul.f32 %v11265_v43, %v13531_v0 }
 0xc85   :  { %10318 = vmatprep.subr.bf16.mxu1 %v15063_v62  ;;  %v11269_v10 = vpop.eup %11268  ;;  %v4476_v25 = vmul.f32 %v11267_v59, %v13535_v35 }
 0xc86   :  { %10278 = vmatprep.mubr.bf16.mxu1 %v4483_v21  ;;  %v4431_v54 = vadd.f32 1.0, %v11269_v10 }
 0xc87   :  { %10279 = vmatmul.mubr.bf16.gmra.mrb[84].mxu1 %v4484_v37  ;;  %v4486_v41 = vpack.c.bf16 %v4476_v25, %v4475_v30  ;;  %v9197_v30 = vld [vmem:[#allocation14 + $0x1] ss:$0 sm:$0xff] }
 0xc88   :  { %10319 = vmatpush3.bf16.msra.mxu1 %v10930_v38  ;;  %v10933_v38 = vld [vmem:[#allocation16 + $0x78] sm:$0xff]   ;;  %11282 = vrcp.f32 %v4431_v54  ;;  %v10939_v54 = vld [vmem:[#allocation19 + $0x68] sm:$0xff]  }
 0xc89   :  { %10320 = vmatprep.subr.bf16.mxu1 %v15063_v62  ;;  %v11271_v29 = vpop.eup %11270 }
 0xc8a   :  { %v4474_v13 = vmul.f32 %v11271_v29, %v13541_v40  ;;  %v11273_v53 = vpop.eup %11272 }
 0xc8b   :  { %v4429_v12 = vadd.f32 1.0, %v11273_v53  ;;  %v11275_v35 = vpop.eup %11274  ;;  %v13612_v53 = vld [vmem:[#allocation22 + $0x1] ss:$0 sm:$0xff] }
 0xc8c   :  { %10321 = vmatpush3.bf16.msra.mxu1 %v10931_v28  ;;  %v4485_v4 = vpack.c.bf16 %v4474_v13, %v4473_v6  ;;  %v4432_v58 = vadd.f32 1.0, %v11275_v35  ;;  %v11277_v26 = vpop.eup %11276 }
 0xc8d   :  { %10322 = vmatprep.subr.bf16.mxu1 %v15063_v62  ;;  %11284 = vrcp.f32 %v4429_v12  ;;  %v11279_v0 = vpop.eup %11278  ;;  %v4430_v40 = vadd.f32 1.0, %v11277_v26  ;;  %v13616_v12 = vadd.f32 %v13612_v53, %v13473_v39  ;;  %v13625_v26 = vadd.f32 %v13612_v53, %v13462_v63 }
 0xc8e   :  { %10282 = vmatprep.mubr.bf16.mxu1 %v4485_v4  ;;  %11286 = vrcp.f32 %v4432_v58  ;;  %v11281_v23 = vpop.eup %11280  ;;  %v4891_v27 = vadd.f32 1.0, %v11279_v0  ;;  %v10940_v4 = vld [vmem:[#allocation19 + $0x70] sm:$0xff]   ;;  %v13621_v58 = vadd.f32 %v13612_v53, %v13494_v5  ;;  %v13629_v0 = vadd.f32 %v13457_v7, %v13612_v53 }
 0xc8f   :  { %10283 = vmatmul.mubr.bf16.gmra.mrb[88].mxu1 %v4486_v41  ;;  %11288 = vrcp.f32 %v4430_v40  ;;  %v4892_v15 = vadd.f32 1.0, %v11281_v23  ;;  %v10938_v41 = vld [vmem:[#allocation19 + $0x60] sm:$0xff]   ;;  %v9133_v35 = vmul.f32 -1.442695, %v13616_v12  ;;  %v9198_v23 = vld [vmem:[%s15008_s28 + $0x1] ss:$0 sm:$0xff]  ;;  %v13643_v7 = vadd.f32 %v13467_v56, %v13612_v53 }
 0xc90   :  { %10323 = vmatpush3.bf16.msra.mxu1 %v10932_v51  ;;  %11290 = vrcp.f32 %v4891_v27  ;;  %v9140_v40 = vmul.f32 -1.442695, %v13621_v58  ;;  %v9132_v39 = vmul.f32 -1.442695, %v13625_v26  ;;  %v13636_v27 = vadd.f32 %v13612_v53, %v13501_v11 }
 0xc91   :  { %10324 = vmatprep.subr.bf16.mxu1 %v15063_v62  ;;  %11292 = vrcp.f32 %v4892_v15  ;;  %v9134_v63 = vmul.f32 -1.442695, %v13629_v0  ;;  %v13650_v11 = vadd.f32 %v13492_v60, %v13612_v53  ;;  %v13657_v56 = vadd.f32 %v13612_v53, %v13483_v17 }
 0xc92   :  { %v11283_v37 = vpop.eup %11282  ;;  %11294 = vpow2.f32 %v9133_v35 }
 0xc93   :  { %v4479_v21 = vmul.f32 %v11283_v37, %v13553_v3  ;;  %11296 = vpow2.f32 %v9140_v40  ;;  %v9136_v60 = vmul.f32 -1.442695, %v13657_v56 }
 0xc94   :  { %10325 = vmatpush3.bf16.msra.mxu1 %v10933_v38  ;;  %v10941_v38 = vld [vmem:[#allocation19 + $0x78] sm:$0xff]   ;;  %11298 = vpow2.f32 %v9132_v39  ;;  %v13706_v39 = vadd.f32 %v13517_v49, %v13612_v53 }
 0xc95   :  { %11300 = vpow2.f32 %v9134_v63 }
 0xc97   :  { %v11285_v36 = vpop.eup %11284 }
 0xc98   :  { %v11287_v50 = vpop.eup %11286  ;;  %v4477_v43 = vmul.f32 %v11285_v36, %v13559_v18  ;;  %v11561_v18 = vld [vmem:[%s15005_s9] sm:$0xff]  }
 0xc99   :  { %v4480_v28 = vmul.f32 %v11287_v50, %v13564_v46  ;;  %v11289_v8 = vpop.eup %11288  ;;  %v10934_v46 = vld [vmem:[#allocation19 + $0x40] sm:$0xff]   ;;  %v9141_v50 = vmul.f32 -1.442695, %v13636_v27 }
 0xc9a   :  { %v11291_v1 = vpop.eup %11290  ;;  %v4478_v59 = vmul.f32 %v11289_v8, %v13569_v55  ;;  %10331 = vmatpush3.bf16.msra.mxu0 %v10934_v46  ;;  %v10935_v55 = vld [vmem:[#allocation19 + $0x48] sm:$0xff]   ;;  %v9142_v8 = vmul.f32 -1.442695, %v13650_v11 }
 0xc9b   :  { %v4488_v10 = vpack.c.bf16 %v4480_v28, %v4479_v21  ;;  %v11293_v25 = vpop.eup %11292  ;;  %v4897_v51 = vmul.f32 %v11291_v1, %v13574_v52  ;;  %10332 = vmatprep.subr.bf16.mxu0 %v15063_v62  ;;  %v10936_v52 = vld [vmem:[#allocation19 + $0x50] sm:$0xff]   ;;  %v9135_v21 = vmul.f32 -1.442695, %v13643_v7  ;;  %v13662_v1 = vadd.f32 %v13499_v47, %v13612_v53 }
 0xc9c   :  { %v4898_v29 = vmul.f32 %v11293_v25, %v13579_v45  ;;  %v4487_v6 = vpack.c.bf16 %v4478_v59, %v4477_v43  ;;  %v10937_v45 = vld [vmem:[#allocation19 + $0x58] sm:$0xff]   ;;  %v11295_v28 = vpop.eup %11294  ;;  %11302 = vpow2.f32 %v9141_v50  ;;  %v13667_v43 = vadd.f32 %v13612_v53, %v13487_v61 }
 0xc9d   :  { %v4909_v13 = vmul.f32 %v9197_v30, %v4897_v51  ;;  %11304 = vpow2.f32 %v9135_v21  ;;  %v4040_v59 = vadd.f32 1.0, %v11295_v28  ;;  %v9143_v17 = vmul.f32 -1.442695, %v13662_v1 }
 0xc9e   :  { %10286 = vmatprep.mubr.bf16.mxu1 %v4487_v6  ;;  %v4910_v3 = vmul.f32 %v9197_v30, %v4898_v29  ;;  %10333 = vmatpush3.bf16.msra.mxu0 %v10935_v55  ;;  %11306 = vpow2.f32 %v9142_v8  ;;  %v13672_v30 = vadd.f32 %v13612_v53, %v13513_v22  ;;  %v13676_v47 = vadd.f32 %v13481_v31, %v13612_v53 }
 0xc9f   :  { %10287 = vmatmul.mubr.bf16.gmra.mrb[92].mxu1 %v4488_v10  ;;  %4911 = vadd.xlane.f32.xlu1 %v4909_v13  ;;  %v11297_v10 = vpop.eup %11296  ;;  %11308 = vpow2.f32 %v9136_v60  ;;  %v9137_v51 = vmul.f32 -1.442695, %v13667_v43  ;;  %v13682_v13 = vadd.f32 %v13612_v53, %v13525_v34  ;;  %v13687_v31 = vadd.f32 %v13485_v2, %v13612_v53 }
 0xca0   :  { %4913 = vadd.xlane.f32.xlu0 %v4910_v3  ;;  %10326 = vmatprep.mubr.msk.bf16.mxu1 %vm12129_vm0, %v15063_v62  ;;  %v11299_v25 = vpop.eup %11298  ;;  %11310 = vrcp.f32 %v4040_v59  ;;  %v4047_v61 = vadd.f32 1.0, %v11297_v10  ;;  %v9144_v6 = vmul.f32 -1.442695, %v13672_v30  ;;  %v9147_v8 = vmul.f32 -1.442695, %v13706_v39 }
 0xca1   :  { %10334 = vmatprep.subr.bf16.mxu0 %v15063_v62  ;;  %v11301_v29 = vpop.eup %11300  ;;  %11312 = vpow2.f32 %v9143_v17  ;;  %v4039_v22 = vadd.f32 1.0, %v11299_v25  ;;  %v9145_v34 = vmul.f32 -1.442695, %v13682_v13  ;;  %v9139_v2 = vmul.f32 -1.442695, %v13687_v31 }
 0xca2   :  { %10335 = vmatpush3.bf16.msra.mxu0 %v10936_v52  ;;  %11314 = vpow2.f32 %v9137_v51  ;;  %v4041_v46 = vadd.f32 1.0, %v11301_v29  ;;  %v13691_v52 = vadd.f32 %v13508_v48, %v13612_v53  ;;  %v13710_v17 = vld [vmem:[#allocation23 + $0x1] ss:$0 sm:$0xff] }
 0xca3   :  { %10336 = vmatprep.subr.bf16.mxu0 %v15063_v62  ;;  %11316 = vrcp.f32 %v4047_v61 }
 0xca4   :  { %11318 = vpow2.f32 %v9144_v6 }
 0xca5   :  { %11320 = vrcp.f32 %v4039_v22 }
 0xca6   :  { %10337 = vmatpush3.bf16.msra.mxu0 %v10937_v45  ;;  %v11303_v3 = vpop.eup %11302 }
 0xca7   :  { %10327 = vmatmul.mubr.bf16.vlgmr.msra.gmra.mrb[96].mxu1 %v13372_v32  ;;  %10338 = vmatprep.subr.bf16.mxu0 %v15063_v62  ;;  %v11305_v55 = vpop.eup %11304 }
 0xca8   :  { %10352 = vmatprep.mubr.msk.bf16.mxu1 %vm835_vm1, %v11561_v18  ;;  %v9138_v18 = vmul.f32 -1.442695, %v13676_v47  ;;  %v4042_v35 = vadd.f32 1.0, %v11305_v55 }
 0xcaa   :  { %10339 = vmatpush3.bf16.msra.mxu0 %v10938_v41  ;;  %v4048_v41 = vadd.f32 1.0, %v11303_v3  ;;  %11322 = vpow2.f32 %v9138_v18 }
 0xcab   :  { %10340 = vmatprep.subr.bf16.mxu0 %v15063_v62  ;;  %11324 = vrcp.f32 %v4041_v46 }
 0xcac   :  { %11326 = vpow2.f32 %v9145_v34 }
 0xcad   :  { %11328 = vrcp.f32 %v4048_v41 }
 0xcae   :  { %10341 = vmatpush3.bf16.msra.mxu0 %v10939_v54  ;;  %11330 = vpow2.f32 %v9139_v2 }
 0xcaf   :  { %10342 = vmatprep.subr.bf16.mxu0 %v15063_v62  ;;  %11332 = vrcp.f32 %v4042_v35 }
 0xcb2   :  { %10343 = vmatpush3.bf16.msra.mxu0 %v10940_v4  ;;  %v11307_v4 = vpop.eup %11306 }
 0xcb3   :  { %10344 = vmatprep.subr.bf16.mxu0 %v15063_v62  ;;  %v11309_v48 = vpop.eup %11308 }
 0xcb4   :  { %v4043_v50 = vadd.f32 1.0, %v11309_v48 }
 0xcb6   :  { %10345 = vmatpush3.bf16.msra.mxu0 %v10941_v38 }
 0xcb7   :  { %10368 = vmatprep.subr.bf16.mxu0 %v15063_v62 }
 0xd2c   :  { %v4912_v5 = vpop.xlane.xlu1 %4911 }
 0xd2d   :  { %v13638_v15 = vadd.f32 %v9198_v23, %v4912_v5  ;;  %v4914_v37 = vpop.xlane.xlu0 %4913  ;;  %v11311_v5 = vpop.eup %11310 }
 0xd2e   :  { %v13645_v36 = vadd.f32 %v9198_v23, %v4914_v37  ;;  %v9146_v23 = vmul.f32 -1.442695, %v13691_v52  ;;  %v4049_v37 = vadd.f32 1.0, %v11307_v4  ;;  %v11313_v63 = vpop.eup %11312  ;;  %v4088_v28 = vmul.f32 %v11311_v5, %v13616_v12 }
 0xd2f   :  { %15066 = vst [vmem:[#allocation87_spill] sm:$0xff] %v13638_v15  ;;  %5170 = vperm.xlu0 %10789, %v13638_v15   ;;  %v11315_v21 = vpop.eup %11314  ;;  %v4050_v59 = vadd.f32 1.0, %v11313_v63 }
 0xd30   :  { %15067 = vst [vmem:[#allocation88_spill] sm:$0xff] %v13645_v36  ;;  %5175 = vperm.xlu1 %10788, %v13645_v36   ;;  %11334 = vpow2.f32 %v9146_v23  ;;  %v11317_v60 = vpop.eup %11316  ;;  %v4044_v53 = vadd.f32 1.0, %v11315_v21  ;;  %v4114_v61 = vmul.f32 %v13710_v17, %v4088_v28 }
 0xd31   :  { %11336 = vrcp.f32 %v4049_v37  ;;  %v11319_v10 = vpop.eup %11318  ;;  %v4095_v51 = vmul.f32 %v11317_v60, %v13621_v58 }
 0xd32   :  { %v11321_v49 = vpop.eup %11320  ;;  %11338 = vrcp.f32 %v4043_v50  ;;  %v4051_v12 = vadd.f32 1.0, %v11319_v10 }
 0xd33   :  { %v11323_v25 = vpop.eup %11322  ;;  %11340 = vpow2.f32 %v9147_v8  ;;  %v4087_v22 = vmul.f32 %v11321_v49, %v13625_v26  ;;  %v4121_v34 = vmul.f32 %v13710_v17, %v4095_v51 }
 0xd34   :  { %v11325_v29 = vpop.eup %11324  ;;  %11342 = vrcp.f32 %v4050_v59  ;;  %v4045_v18 = vadd.f32 1.0, %v11323_v25 }
 0xd35   :  { %v11327_v6 = vpop.eup %11326  ;;  %11344 = vrcp.f32 %v4044_v53  ;;  %v4089_v55 = vmul.f32 %v11325_v29, %v13629_v0  ;;  %v4113_v35 = vmul.f32 %v13710_v17, %v4087_v22 }
 0xd36   :  { %v11329_v3 = vpop.eup %11328  ;;  %11346 = vrcp.f32 %v4051_v12  ;;  %v4052_v58 = vadd.f32 1.0, %v11327_v6 }
 0xd37   :  { %v11331_v46 = vpop.eup %11330  ;;  %v4096_v2 = vmul.f32 %v11329_v3, %v13636_v27  ;;  %11348 = vrcp.f32 %v4045_v18  ;;  %v4115_v5 = vmul.f32 %v13710_v17, %v4089_v55 }
 0xd38   :  { %v11333_v41 = vpop.eup %11332  ;;  %v4046_v26 = vadd.f32 1.0, %v11331_v46  ;;  %11350 = vrcp.f32 %v4052_v58 }
 0xd39   :  { %v4090_v23 = vmul.f32 %v11333_v41, %v13643_v7  ;;  %v4122_v27 = vmul.f32 %v13710_v17, %v4096_v2 }
 0xd3a   :  { %v11335_v4 = vpop.eup %11334  ;;  %11352 = vrcp.f32 %v4046_v26 }
 0xd3b   :  { %v11337_v48 = vpop.eup %11336  ;;  %v4053_v37 = vadd.f32 1.0, %v11335_v4  ;;  %v4116_v59 = vmul.f32 %v13710_v17, %v4090_v23 }
 0xd3c   :  { %v11339_v0 = vpop.eup %11338  ;;  %v4097_v21 = vmul.f32 %v11337_v48, %v13650_v11 }
 0xd3d   :  { %v11341_v50 = vpop.eup %11340  ;;  %v4091_v7 = vmul.f32 %v11339_v0, %v13657_v56  ;;  %11354 = vrcp.f32 %v4053_v37 }
 0xd3e   :  { %v11343_v8 = vpop.eup %11342  ;;  %v4054_v53 = vadd.f32 1.0, %v11341_v50  ;;  %v4123_v25 = vmul.f32 %v13710_v17, %v4097_v21  ;;  %v9199_v50 = vld [vmem:[#allocation17 + $0x1] ss:$0 sm:$0xff] }
 0xd3f   :  { %v11345_v49 = vpop.eup %11344  ;;  %v4098_v11 = vmul.f32 %v11343_v8, %v13662_v1  ;;  %v4117_v29 = vmul.f32 %v13710_v17, %v4091_v7 }
 0xd40   :  { %v11347_v51 = vpop.eup %11346  ;;  %11356 = vrcp.f32 %v4054_v53 }
 0xd41   :  { %v11349_v56 = vpop.eup %11348  ;;  %v4099_v6 = vmul.f32 %v11347_v51, %v13672_v30  ;;  %v4124_v22 = vmul.f32 %v13710_v17, %v4098_v11 }
 0xd42   :  { %v11351_v1 = vpop.eup %11350  ;;  %v4093_v46 = vmul.f32 %v11349_v56, %v13676_v47 }
 0xd43   :  { %v4100_v41 = vmul.f32 %v11351_v1, %v13682_v13  ;;  %v4125_v30 = vmul.f32 %v13710_v17, %v4099_v6 }
 0xd44   :  { %v4119_v2 = vmul.f32 %v13710_v17, %v4093_v46  ;;  %v10943_v46 = vld [vmem:[#allocation31 + $0x48] sm:$0xff]  }
 0xd45   :  { %v4126_v47 = vmul.f32 %v13710_v17, %v4100_v41  ;;  %v10946_v41 = vld [vmem:[#allocation31 + $0x60] sm:$0xff]  }
 0xd4a   :  { %v13694_v45 = vpop.f32.mrb[80].mxu1 }
 0xd4b   :  { %v13696_v54 = vpop.f32.mrb[81].mxu1 }
 0xd4c   :  { %v13699_v38 = vpop.f32.mrb[82].mxu1 }
 0xd4d   :  { %v13701_v40 = vpop.f32.mrb[83].mxu1 }
 0xd4e   :  { %4131 = vadd.xlane.f32.xlu0 %v4114_v61  ;;  %v4092_v61 = vmul.f32 %v11345_v49, %v13667_v43 }
 0xd50   :  { %v4118_v43 = vmul.f32 %v13710_v17, %v4092_v61 }
 0xd52   :  { %4145 = vadd.xlane.f32.xlu0 %v4121_v34  ;;  %v11353_v34 = vpop.eup %11352 }
 0xd53   :  { %v11355_v58 = vpop.eup %11354  ;;  %v4094_v4 = vmul.f32 %v11353_v34, %v13687_v31  ;;  %v10945_v34 = vld [vmem:[#allocation31 + $0x58] sm:$0xff]  }
 0xd54   :  { %4129 = vadd.xlane.f32.xlu1 %v4113_v35  ;;  %v4101_v35 = vmul.f32 %v11355_v58, %v13691_v52  ;;  %v11357_v48 = vpop.eup %11356  ;;  %v10948_v58 = vld [vmem:[#allocation31 + $0x70] sm:$0xff]  }
 0xd55   :  { %v4120_v26 = vmul.f32 %v13710_v17, %v4094_v4  ;;  %v4102_v13 = vmul.f32 %v11357_v48, %v13706_v39  ;;  %v10949_v4 = vld [vmem:[#allocation31 + $0x78] sm:$0xff]  }
 0xd56   :  { %4133 = vadd.xlane.f32.xlu0 %v4115_v5  ;;  %v4127_v23 = vmul.f32 %v13710_v17, %v4101_v35  ;;  %v9150_v35 = vld [vmem:[%s15009_s2 + $0x1] ss:$0 sm:$0xff] }
 0xd57   :  { %v4128_v31 = vmul.f32 %v13710_v17, %v4102_v13 }
 0xd58   :  { %4147 = vadd.xlane.f32.xlu1 %v4122_v27 }
 0xd5a   :  { %v13721_v63 = vpop.f32.mrb[84].mxu1  ;;  %4135 = vadd.xlane.f32.xlu0 %v4116_v59 }
 0xd5b   :  { %v13725_v28 = vpop.f32.mrb[85].mxu1 }
 0xd5c   :  { %v13727_v60 = vpop.f32.mrb[86].mxu1  ;;  %4149 = vadd.xlane.f32.xlu1 %v4123_v25 }
 0xd5d   :  { %v13731_v10 = vpop.f32.mrb[87].mxu1 }
 0xd5e   :  { %4137 = vadd.xlane.f32.xlu0 %v4117_v29 }
 0xd60   :  { %4151 = vadd.xlane.f32.xlu1 %v4124_v22  ;;  %v10942_v22 = vld [vmem:[#allocation31 + $0x40] sm:$0xff]  }
 0xd62   :  { %v13737_v12 = vpop.f32.mrb[88].mxu1  ;;  %4139 = vadd.xlane.f32.xlu0 %v4118_v43  ;;  %v10944_v43 = vld [vmem:[#allocation31 + $0x50] sm:$0xff]  }
 0xd63   :  { %v13741_v3 = vpop.f32.mrb[89].mxu1 }
 0xd64   :  { %v13743_v18 = vpop.f32.mrb[90].mxu1  ;;  %4153 = vadd.xlane.f32.xlu1 %v4125_v30  ;;  %v10947_v30 = vld [vmem:[#allocation31 + $0x68] sm:$0xff]  }
 0xd65   :  { %v13747_v55 = vpop.f32.mrb[91].mxu1 }
 0xd66   :  { %4141 = vadd.xlane.f32.xlu0 %v4119_v2 }
 0xd68   :  { %4155 = vadd.xlane.f32.xlu1 %v4126_v47 }
 0xd6a   :  { %4143 = vadd.xlane.f32.xlu0 %v4120_v26 }
 0xd6c   :  { %4157 = vadd.xlane.f32.xlu1 %v4127_v23 }
 0xd70   :  { %4159 = vadd.xlane.f32.xlu1 %v4128_v31 }
 0xd72   :  { %v13759_v5 = vpop.f32.mrb[92].mxu1 }
 0xd73   :  { %v13761_v0 = vpop.f32.mrb[93].mxu1 }
 0xd74   :  { %v13763_v52 = vpop.f32.mrb[94].mxu1 }
 0xd75   :  { %v13765_v37 = vpop.f32.mrb[95].mxu1 }
 0xd7a   :  { %v5032_v21 = vpop.f32.mrb[96].mxu1 }
 0xd7b   :  { %v5033_v27 = vadd.f32 %v9199_v50, %v5032_v21  ;;  %v10328_v8 = vpop.f32.mrb[97].mxu1 }
 0xd7c   :  { %v5035_v39 = vpop.f32.mrb[98].mxu1 }
 0xd7d   :  { %v9208_v7 = vmul.f32 -1.442695, %v5033_v27  ;;  %v5036_v59 = vadd.f32 %v9199_v50, %v5035_v39  ;;  %v10329_v49 = vpop.f32.mrb[99].mxu1 }
 0xd7f   :  { %11358 = vpow2.f32 %v9208_v7  ;;  %v9209_v53 = vmul.f32 -1.442695, %v5036_v59 }
 0xd81   :  { %11360 = vpow2.f32 %v9209_v53 }
 0xd89   :  { %v11359_v17 = vpop.eup %11358 }
 0xd8a   :  { %v5045_v11 = vadd.f32 1.0, %v11359_v17 }
 0xd8b   :  { %v11361_v25 = vpop.eup %11360 }
 0xd8c   :  { %11362 = vrcp.f32 %v5045_v11  ;;  %v5046_v51 = vadd.f32 1.0, %v11361_v25 }
 0xd8e   :  { %11364 = vrcp.f32 %v5046_v51 }
 0xd96   :  { %v11363_v61 = vpop.eup %11362 }
 0xd97   :  { %v5051_v56 = vmul.f32 %v11363_v61, %v5033_v27 }
 0xd98   :  { %v11365_v29 = vpop.eup %11364 }
 0xd99   :  { %v5052_v6 = vmul.f32 %v11365_v29, %v5036_v59 }
 0xd9b   :  { %v5053_v1 = vpack.c.bf16 %v5052_v6, %v5051_v56 }
 0xd9d   :  { %10347 = vmatmul.mubr.bf16.vlgmr.msra.gmra.mrb[88].mxu0 %v5053_v1 }
 0xd9e   :  { %10369 = vmatpush3.bf16.msra.mxu0 %v10942_v22  ;;  %10384 = vmatprep.mubr.msk.bf16.mxu0 %vm12129_vm0, %v15063_v62 }
 0xd9f   :  { %10370 = vmatprep.subr.bf16.mxu0 %v15063_v62 }
 0xda2   :  { %10371 = vmatpush3.bf16.msra.mxu0 %v10943_v46 }
 0xda3   :  { %10372 = vmatprep.subr.bf16.mxu0 %v15063_v62 }
 0xda6   :  { %10373 = vmatpush3.bf16.msra.mxu0 %v10944_v43 }
 0xda7   :  { %10374 = vmatprep.subr.bf16.mxu0 %v15063_v62 }
 0xdaa   :  { %10375 = vmatpush3.bf16.msra.mxu0 %v10945_v34 }
 0xdab   :  { %10376 = vmatprep.subr.bf16.mxu0 %v15063_v62 }
 0xdae   :  { %10377 = vmatpush3.bf16.msra.mxu0 %v10946_v41  ;;  %v5171_v2 = vpop.permute.xlu0 %5170 }
 0xdaf   :  { %10378 = vmatprep.subr.bf16.mxu0 %v15063_v62  ;;  %v5176_v26 = vpop.permute.xlu1 %5175 }
 0xdb2   :  { %10379 = vmatpush3.bf16.msra.mxu0 %v10947_v30 }
 0xdb3   :  { %10380 = vmatprep.subr.bf16.mxu0 %v15063_v62 }
 0xdb6   :  { %10381 = vmatpush3.bf16.msra.mxu0 %v10948_v58 }
 0xdb7   :  { %10382 = vmatprep.subr.bf16.mxu0 %v15063_v62 }
 0xdba   :  { %10383 = vmatpush3.bf16.msra.mxu0 %v10949_v4 }
 0xdbb   :  { %10408 = vmatprep.subr.bf16.mxu0 %v15063_v62 }
 0xdbd   :  { %10385 = vmatmul.mubr.bf16.vlgmr.msra.gmra.mrb[92].mxu0 %v13372_v32 }
 0xdbe   :  { %10424 = vmatprep.mubr.msk.bf16.mxu0 %vm12129_vm0, %v15063_v62 }
 0xddb   :  { %v4132_v47 = vpop.xlane.xlu0 %4131 }
 0xddc   :  { %v13781_v48 = vadd.f32 %v9150_v35, %v4132_v47  ;;  %v9210_v47 = vld [vmem:[#allocation20 + $0x1] ss:$0 sm:$0xff] }
 0xdde   :  { %15068 = vst [vmem:[#allocation114_spill] sm:$0xff] %v13781_v48  ;;  %4666 = vperm.xlu1 %10788, %v13781_v48  }
 0xddf   :  { %v4146_v13 = vpop.xlane.xlu0 %4145 }
 0xde0   :  { %v13784_v23 = vadd.f32 %v9150_v35, %v4146_v13 }
 0xde1   :  { %v4130_v31 = vpop.xlane.xlu1 %4129 }
 0xde2   :  { %15069 = vst [vmem:[#allocation115_spill] sm:$0xff] %v13784_v23  ;;  %v13786_v50 = vadd.f32 %v9150_v35, %v4130_v31  ;;  %4701 = vperm.xlu1 %10788, %v13784_v23  }
 0xde3   :  { %v4134_v32 = vpop.xlane.xlu0 %4133 }
 0xde4   :  { %15070 = vst [vmem:[#allocation116_spill] sm:$0xff] %v13786_v50  ;;  %v13789_v21 = vadd.f32 %v9150_v35, %v4134_v32  ;;  %4661 = vperm.xlu0 %10789, %v13786_v50  }
 0xde5   :  { %v4148_v27 = vpop.xlane.xlu1 %4147 }
 0xde6   :  { %15071 = vst [vmem:[#allocation117_spill] sm:$0xff] %v13789_v21  ;;  %v13792_v8 = vadd.f32 %v9150_v35, %v4148_v27  ;;  %4671 = vperm.xlu1 %10788, %v13789_v21  }
 0xde7   :  { %v4136_v39 = vpop.xlane.xlu0 %4135 }
 0xde8   :  { %15072 = vst [vmem:[#allocation118_spill] sm:$0xff] %v13792_v8  ;;  %v13795_v7 = vadd.f32 %v9150_v35, %v4136_v39  ;;  %4706 = vperm.xlu0 %10789, %v13792_v8  }
 0xde9   :  { %v4150_v59 = vpop.xlane.xlu1 %4149 }
 0xdea   :  { %15073 = vst [vmem:[#allocation119_spill] sm:$0xff] %v13795_v7  ;;  %v13798_v49 = vadd.f32 %v9150_v35, %v4150_v59  ;;  %4676 = vperm.xlu1 %10788, %v13795_v7  }
 0xdeb   :  { %v4138_v53 = vpop.xlane.xlu0 %4137 }
 0xdec   :  { %15074 = vst [vmem:[#allocation120_spill] sm:$0xff] %v13798_v49  ;;  %v13801_v17 = vadd.f32 %v9150_v35, %v4138_v53  ;;  %4711 = vperm.xlu0 %10789, %v13798_v49  }
 0xded   :  { %v4152_v11 = vpop.xlane.xlu1 %4151 }
 0xdee   :  { %15075 = vst [vmem:[#allocation121_spill] sm:$0xff] %v13801_v17  ;;  %v13804_v25 = vadd.f32 %v9150_v35, %v4152_v11  ;;  %4681 = vperm.xlu1 %10788, %v13801_v17  }
 0xdef   :  { %v4140_v51 = vpop.xlane.xlu0 %4139 }
 0xdf0   :  { %15076 = vst [vmem:[#allocation122_spill] sm:$0xff] %v13804_v25  ;;  %v13807_v61 = vadd.f32 %v9150_v35, %v4140_v51  ;;  %4716 = vperm.xlu0 %10789, %v13804_v25   ;;  %v15084_v51 = vld [vmem:[#allocation85_spill] sm:$0xff] }
 0xdf1   :  { %v4154_v29 = vpop.xlane.xlu1 %4153 }
 0xdf2   :  { %15077 = vst [vmem:[#allocation123_spill] sm:$0xff] %v13807_v61  ;;  %4686 = vperm.xlu1 %10788, %v13807_v61   ;;  %v13811_v56 = vadd.f32 %v9150_v35, %v4154_v29 }
 0xdf3   :  { %v4142_v6 = vpop.xlane.xlu0 %4141 }
 0xdf4   :  { %15078 = vst [vmem:[#allocation124_spill] sm:$0xff] %v13811_v56  ;;  %v13813_v22 = vadd.f32 %v9150_v35, %v4142_v6  ;;  %4721 = vperm.xlu0 %10789, %v13811_v56   ;;  %v15086_v6 = vld [vmem:[#allocation86_spill] sm:$0xff] }
 0xdf5   :  { %v4156_v1 = vpop.xlane.xlu1 %4155 }
 0xdf6   :  { %15079 = vst [vmem:[#allocation125_spill] sm:$0xff] %v13813_v22  ;;  %4691 = vperm.xlu1 %10788, %v13813_v22   ;;  %v13817_v46 = vadd.f32 %v9150_v35, %v4156_v1 }
 0xdf7   :  { %v4144_v43 = vpop.xlane.xlu0 %4143 }
 0xdf8   :  { %15080 = vst [vmem:[#allocation126_spill] sm:$0xff] %v13817_v46  ;;  %v13819_v34 = vadd.f32 %v9150_v35, %v4144_v43  ;;  %4726 = vperm.xlu0 %10789, %v13817_v46   ;;  %v10950_v43 = vld [vmem:[#allocation32 + $0x40] sm:$0xff]  }
 0xdf9   :  { %v4158_v41 = vpop.xlane.xlu1 %4157 }
 0xdfa   :  { %15081 = vst [vmem:[#allocation127_spill] sm:$0xff] %v13819_v34  ;;  %4696 = vperm.xlu1 %10788, %v13819_v34   ;;  %v13823_v30 = vadd.f32 %v9150_v35, %v4158_v41  ;;  %v10951_v41 = vld [vmem:[#allocation32 + $0x48] sm:$0xff]   ;;  %v9176_v34 = vld [vmem:[#allocation29 + $0x1] ss:$0 sm:$0xff] }
 0xdfb   :  { %v4605_v22 = vadd.f32 %v13694_v45, %v9176_v34  ;;  %v4608_v56 = vadd.f32 %v13699_v38, %v9176_v34  ;;  %v4629_v61 = vadd.f32 %v9176_v34, %v13741_v3  ;;  %v4621_v17 = vadd.f32 %v13721_v63, %v9176_v34 }
 0xdfc   :  { %15082 = vst [vmem:[#allocation128_spill] sm:$0xff] %v13823_v30  ;;  %4731 = vperm.xlu0 %10789, %v13823_v30   ;;  %v13876_v30 = vld [vmem:[%s15005_s9 + $0x38] sm:$0xff]   ;;  %v4613_v49 = vadd.f32 %v9176_v34, %v13725_v28  ;;  %v4624_v7 = vadd.f32 %v13727_v60, %v9176_v34  ;;  %v4632_v38 = vadd.f32 %v9176_v34, %v13747_v55 }
 0xdfd   :  { %v4160_v58 = vpop.xlane.xlu1 %4159  ;;  %v4637_v50 = vadd.f32 %v13737_v12, %v9176_v34  ;;  %v4640_v23 = vadd.f32 %v13743_v18, %v9176_v34  ;;  %v4653_v28 = vadd.f32 %v13759_v5, %v9176_v34  ;;  %v4648_v55 = vadd.f32 %v9176_v34, %v13765_v37 }
 0xdfe   :  { %v13826_v4 = vadd.f32 %v9150_v35, %v4160_v58  ;;  %v10952_v58 = vld [vmem:[#allocation32 + $0x50] sm:$0xff]  }
 0xe00   :  { %15083 = vst [vmem:[#allocation129_spill] sm:$0xff] %v13826_v4  ;;  %4736 = vperm.xlu0 %10789, %v13826_v4  }
 0xe70   :  { %v5161_v13 = vpop.f32.mrb[88].mxu0 }
 0xe71   :  { %v5162_v31 = vadd.f32 %v9210_v47, %v5161_v13  ;;  %v10348_v32 = vpop.f32.mrb[89].mxu0  ;;  %v13856_v13 = vld [vmem:[%s15005_s9 + $0x20] sm:$0xff]  }
 0xe72   :  { %v5164_v27 = vpop.f32.mrb[90].mxu0  ;;  %v10954_v32 = vld [vmem:[#allocation32 + $0x60] sm:$0xff]  }
 0xe73   :  { %v5178_v39 = vmul.f32 %v5171_v2, %v5162_v31  ;;  %v5165_v59 = vadd.f32 %v9210_v47, %v5164_v27  ;;  %v10349_v53 = vpop.f32.mrb[91].mxu0  ;;  %v13839_v2 = vld [vmem:[%s15005_s9 + $0x8] sm:$0xff]   ;;  %v13851_v47 = vld [vmem:[%s15005_s9 + $0x18] sm:$0xff]   ;;  %v9228_v27 = vld [vmem:[%s15031_s7 + $0x1] ss:$0 sm:$0xff] }
 0xe74   :  { %v10953_v31 = vld [vmem:[#allocation32 + $0x58] sm:$0xff]  }
 0xe75   :  { %v5179_v11 = vmul.f32 %v5176_v26, %v5165_v59  ;;  %v13830_v29 = vadd.f32 %v5178_v39, %v15084_v51  ;;  %v13844_v26 = vld [vmem:[%s15005_s9 + $0x10] sm:$0xff]   ;;  %v13864_v39 = vld [vmem:[%s15005_s9 + $0x28] sm:$0xff]  }
 0xe76   :  { %v13869_v53 = vld [vmem:[%s15005_s9 + $0x30] sm:$0xff]  }
 0xe77   :  { %15085 = vst [vmem:[#allocation85_spill] sm:$0xff] %v13830_v29  ;;  %v13833_v1 = vadd.f32 %v5179_v11, %v15086_v6  ;;  %v10955_v11 = vld [vmem:[#allocation32 + $0x68] sm:$0xff]   ;;  %v5289_v25 = vrot.slane %v13830_v29, %v12538_v14  ;;  %v5282_v45 = vcombine.high %v13830_v29, %v13830_v29 }
 0xe79   :  { %v5182_v35 = vpack.c.bf16 %v13833_v1, %v13830_v29  ;;  %v5297_v15 = vcombine.high %v5289_v25, %v5289_v25  ;;  %v4645_v29 = vadd.f32 %v9176_v34, %v13761_v0  ;;  %v5305_v5 = vrot.slane %v5289_v25, %v12538_v14 }
 0xe7a   :  { %v5338_v37 = vrot.slane %v13833_v1, %v12538_v14 }
 0xe7b   :  { %10350 = vmatprep.subr.bf16.mxu1 %v5182_v35  ;;  %v5319_v25 = vrot.slane %v5297_v15, %v12538_v14  ;;  %v5331_v15 = vcombine.high %v13833_v1, %v13833_v1 }
 0xe7c   :  { %10351 = vmatpush3.bf16.msra.mxu1 %v5182_v35 }
 0xe7d   :  { %10388 = vmatprep.subr.bf16.mxu1 %v15063_v62 }
 0xe7f   :  { %10353 = vmatmul.mubr.msk.bf16.vlgmr.msra.gmra.mrb[100].mxu1 %vm835_vm1, %v13839_v2 }
 0xe80   :  { %10356 = vmatprep.mubr.msk.bf16.mxu1 %vm835_vm1, %v13844_v26  ;;  %10389 = vmatpush3.bf16.msra.mxu1 %v10950_v43 }
 0xe81   :  { %10390 = vmatprep.subr.bf16.mxu1 %v15063_v62 }
 0xe84   :  { %10391 = vmatpush3.bf16.msra.mxu1 %v10951_v41 }
 0xe85   :  { %10392 = vmatprep.subr.bf16.mxu1 %v15063_v62 }
 0xe87   :  { %10357 = vmatmul.mubr.msk.bf16.gmra.mrb[104].mxu1 %vm835_vm1, %v13851_v47 }
 0xe88   :  { %10360 = vmatprep.mubr.msk.bf16.mxu1 %vm835_vm1, %v13856_v13  ;;  %10393 = vmatpush3.bf16.msra.mxu1 %v10952_v58 }
 0xe89   :  { %10394 = vmatprep.subr.bf16.mxu1 %v15063_v62 }
 0xe8c   :  { %10395 = vmatpush3.bf16.msra.mxu1 %v10953_v31  ;;  %v10956_v31 = vld [vmem:[#allocation32 + $0x70] sm:$0xff]  }
 0xe8d   :  { %10396 = vmatprep.subr.bf16.mxu1 %v15063_v62 }
 0xe8f   :  { %10361 = vmatmul.mubr.msk.bf16.gmra.mrb[108].mxu1 %vm835_vm1, %v13864_v39 }
 0xe90   :  { %v5711_v59 = vpop.f32.mrb[92].mxu0  ;;  %10364 = vmatprep.mubr.msk.bf16.mxu1 %vm835_vm1, %v13869_v53  ;;  %10397 = vmatpush3.bf16.msra.mxu1 %v10954_v32  ;;  %v10957_v32 = vld [vmem:[#allocation32 + $0x78] sm:$0xff]  }
 0xe91   :  { %v5712_v51 = vadd.f32 %v9228_v27, %v5711_v59  ;;  %v10386_v6 = vpop.f32.mrb[93].mxu0  ;;  %10398 = vmatprep.subr.bf16.mxu1 %v15063_v62 }
 0xe92   :  { %v5714_v35 = vpop.f32.mrb[94].mxu0 }
 0xe93   :  { %v9237_v43 = vmul.f32 -1.442695, %v5712_v51  ;;  %v5715_v41 = vadd.f32 %v9228_v27, %v5714_v35  ;;  %v10387_v58 = vpop.f32.mrb[95].mxu0 }
 0xe94   :  { %10399 = vmatpush3.bf16.msra.mxu1 %v10955_v11 }
 0xe95   :  { %11366 = vpow2.f32 %v9237_v43  ;;  %v9238_v4 = vmul.f32 -1.442695, %v5715_v41  ;;  %10400 = vmatprep.subr.bf16.mxu1 %v15063_v62 }
 0xe97   :  { %11368 = vpow2.f32 %v9238_v4  ;;  %10365 = vmatmul.mubr.msk.bf16.gmra.mrb[112].mxu1 %vm835_vm1, %v13876_v30 }
 0xe98   :  { %10401 = vmatpush3.bf16.msra.mxu1 %v10956_v31  ;;  %10404 = vmatprep.mubr.msk.bf16.mxu1 %vm12129_vm0, %v15063_v62 }
 0xe99   :  { %10402 = vmatprep.subr.bf16.mxu1 %v15063_v62 }
 0xe9c   :  { %10403 = vmatpush3.bf16.msra.mxu1 %v10957_v32  ;;  %v10958_v32 = vld [vmem:[%s15004_s26 + $0x80] sm:$0xff]  }
 0xe9d   :  { %10428 = vmatprep.subr.bf16.mxu1 %v15063_v62  ;;  %10409 = vmatpush3.bf16.msra.mxu0 %v10958_v32 }
 0xe9e   :  { %10410 = vmatprep.subr.bf16.mxu0 %v15063_v62 }
 0xe9f   :  { %v11367_v27 = vpop.eup %11366 }
 0xea0   :  { %v5724_v59 = vadd.f32 1.0, %v11367_v27  ;;  %v10959_v27 = vld [vmem:[%s15004_s26 + $0x88] sm:$0xff]  }
 0xea1   :  { %v11369_v4 = vpop.eup %11368  ;;  %10411 = vmatpush3.bf16.msra.mxu0 %v10959_v27 }
 0xea2   :  { %11370 = vrcp.f32 %v5724_v59  ;;  %v5725_v11 = vadd.f32 1.0, %v11369_v4  ;;  %10412 = vmatprep.subr.bf16.mxu0 %v15063_v62  ;;  %v10960_v59 = vld [vmem:[%s15004_s26 + $0x90] sm:$0xff]   ;;  %v10963_v4 = vld [vmem:[%s15004_s26 + $0xa8] sm:$0xff]  }
 0xea4   :  { %11372 = vrcp.f32 %v5725_v11  ;;  %v10964_v11 = vld [vmem:[%s15004_s26 + $0xb0] sm:$0xff]  }
 0xea5   :  { %10413 = vmatpush3.bf16.msra.mxu0 %v10960_v59 }
 0xea6   :  { %10414 = vmatprep.subr.bf16.mxu0 %v15063_v62 }
 0xeac   :  { %v11371_v6 = vpop.eup %11370 }
 0xead   :  { %v5730_v43 = vmul.f32 %v11371_v6, %v5712_v51  ;;  %v10961_v51 = vld [vmem:[%s15004_s26 + $0x98] sm:$0xff]  }
 0xeae   :  { %v11373_v35 = vpop.eup %11372  ;;  %10415 = vmatpush3.bf16.msra.mxu0 %v10961_v51  ;;  %v10965_v6 = vld [vmem:[%s15004_s26 + $0xb8] sm:$0xff]  }
 0xeaf   :  { %v5731_v58 = vmul.f32 %v11373_v35, %v5715_v41  ;;  %v10962_v41 = vld [vmem:[%s15004_s26 + $0xa0] sm:$0xff]   ;;  %10416 = vmatprep.subr.bf16.mxu0 %v15063_v62  ;;  %v4667_v35 = vpop.permute.xlu1 %4666 }
 0xeb1   :  { %v5732_v31 = vpack.c.bf16 %v5731_v58, %v5730_v43  ;;  %v4662_v58 = vpop.permute.xlu0 %4661 }
 0xeb2   :  { %10417 = vmatpush3.bf16.msra.mxu0 %v10962_v41 }
 0xeb3   :  { %10405 = vmatmul.mubr.bf16.vlgmr.msra.gmra.mrb[116].mxu1 %v5732_v31  ;;  %10418 = vmatprep.subr.bf16.mxu0 %v15063_v62  ;;  %v4702_v43 = vpop.permute.xlu1 %4701 }
 0xeb4   :  { %10444 = vmatprep.mubr.msk.bf16.mxu1 %vm12129_vm0, %v15063_v62 }
 0xeb5   :  { %v4707_v32 = vpop.permute.xlu0 %4706 }
 0xeb6   :  { %10419 = vmatpush3.bf16.msra.mxu0 %v10963_v4  ;;  %v4748_v60 = vmul.f32 %v4707_v32, %v4632_v38  ;;  %v5346_v32 = vcombine.high %v5338_v37, %v5338_v37 }
 0xeb7   :  { %10420 = vmatprep.subr.bf16.mxu0 %v15063_v62  ;;  %v4672_v31 = vpop.permute.xlu1 %4671 }
 0xeb8   :  { %v4741_v48 = vmul.f32 %v4672_v31, %v4605_v22  ;;  %v13938_v22 = vadd.f32 %v4748_v60, %v13190_v9  ;;  %v5327_v9 = vcombine.high %v5305_v5, %v5305_v5  ;;  %v15099_v60 = vld [vmem:[#allocation100_spill] sm:$0xff] }
 0xeb9   :  { %v4712_v59 = vpop.permute.xlu0 %4711 }
 0xeba   :  { %10421 = vmatpush3.bf16.msra.mxu0 %v10964_v11  ;;  %v4597_v11 = vadd.f32 %v9176_v34, %v13696_v54  ;;  %v4616_v54 = vadd.f32 %v9176_v34, %v13731_v10  ;;  %v4656_v10 = vadd.f32 %v13763_v52, %v9176_v34  ;;  %v4749_v18 = vmul.f32 %v4712_v59, %v4637_v50 }
 0xebb   :  { %10422 = vmatprep.subr.bf16.mxu0 %v15063_v62  ;;  %v4677_v27 = vpop.permute.xlu1 %4676  ;;  %v13933_v0 = vadd.f32 %v4741_v48, %v13193_v20 }
 0xebc   :  { %v4739_v63 = vmul.f32 %v4662_v58, %v4597_v11  ;;  %v4742_v36 = vmul.f32 %v4677_v27, %v4608_v56  ;;  %v13948_v48 = vadd.f32 %v4749_v18, %v13201_v16  ;;  %v15090_v27 = vld [vmem:[#allocation97_spill] sm:$0xff]  ;;  %v15096_v11 = vld [vmem:[#allocation66_spill] sm:$0xff] }
 0xebd   :  { %v4717_v41 = vpop.permute.xlu0 %4716 }
 0xebe   :  { %10423 = vmatpush3.bf16.msra.mxu0 %v10965_v6  ;;  %v4600_v6 = vadd.f32 %v9176_v34, %v13701_v40  ;;  %v4747_v40 = vmul.f32 %v4702_v43, %v4629_v61  ;;  %v5296_v61 = vrot.slane %v5282_v45, %v12538_v14  ;;  %v13930_v56 = vadd.f32 %v4739_v63, %v13171_v24 }
 0xebf   :  { %v4682_v51 = vpop.permute.xlu1 %4681  ;;  %v5383_v45 = vrot.slane %v5305_v5, %v15096_v11  ;;  %v13983_v63 = vrot.slane %v5346_v32, %v12538_v14  ;;  %v15101_v32 = vld [vmem:[#allocation93_spill] sm:$0xff] }
 0xec0   :  { %v4740_v8 = vmul.f32 %v4667_v35, %v4600_v6  ;;  %v13926_v12 = vadd.f32 %v4747_v40, %v13179_v57  ;;  %v4743_v52 = vmul.f32 %v4682_v51, %v4613_v49  ;;  %v4750_v57 = vmul.f32 %v4717_v41, %v4640_v23  ;;  %v15094_v41 = vld [vmem:[#allocation98_spill] sm:$0xff] }
 0xec1   :  { %v4722_v4 = vpop.permute.xlu0 %4721  ;;  %v13945_v20 = vrot.slane %v5296_v61, %v12538_v14  ;;  %v5298_v31 = vcombine.high %v5296_v61, %v5296_v61  ;;  %v5391_v6 = vrot.slane %v5327_v9, %v15096_v11 }
 0xec2   :  { %v13923_v35 = vadd.f32 %v4740_v8, %v13176_v19  ;;  %v15087_v19 = vld [vmem:[#allocation101_spill] sm:$0xff]  ;;  %v4751_v43 = vmul.f32 %v4722_v4, %v4645_v29  ;;  %v13959_v29 = vrot.slane %v5338_v37, %v12538_v14 }
 0xec3   :  { %v4687_v46 = vpop.permute.xlu1 %4686  ;;  %v13941_v8 = vadd.f32 %v4742_v36, %v15087_v19  ;;  %v13951_v36 = vadd.f32 %v4743_v52, %v13252_v42  ;;  %v15092_v42 = vld [vmem:[#allocation105_spill] sm:$0xff]  ;;  %v5328_v51 = vcombine.high %v13945_v20, %v13945_v20 }
 0xec4   :  { %v4744_v24 = vmul.f32 %v4687_v46, %v4616_v54  ;;  %v13956_v46 = vadd.f32 %v4750_v57, %v13236_v44  ;;  %v13965_v59 = vadd.f32 %v4751_v43, %v15090_v27  ;;  %v15097_v54 = vld [vmem:[#allocation106_spill] sm:$0xff]  ;;  %v5376_v52 = vcombine.high %v13959_v29, %v13959_v29 }
 0xec5   :  { %v4727_v3 = vpop.permute.xlu0 %4726  ;;  %v15102_v27 = vld [vmem:[#allocation102_spill] sm:$0xff] }
 0xec6   :  { %v4752_v49 = vmul.f32 %v4727_v3, %v4648_v55  ;;  %15088 = vst [vmem:[#allocation86_spill] sm:$0xff] %v13956_v46  ;;  %v13962_v16 = vadd.f32 %v4744_v24, %v13267_v33  ;;  %15091 = vst [vmem:[#allocation97_spill] sm:$0xff] %v13965_v59  ;;  %v5326_v33 = vrot.slane %v5298_v31, %v12538_v14 }
 0xec7   :  { %v4692_v21 = vpop.permute.xlu1 %4691  ;;  %v5387_v3 = vrot.slane %v5319_v25, %v15096_v11 }
 0xec8   :  { %v4745_v58 = vmul.f32 %v4692_v21, %v4621_v17  ;;  %v5329_v17 = vcombine.high %v5319_v25, %v5319_v25  ;;  %15089 = vst [vmem:[#allocation101_spill] sm:$0xff] %v13962_v16  ;;  %v13973_v44 = vadd.f32 %v4752_v49, %v15094_v41 }
 0xec9   :  { %v4732_v34 = vpop.permute.xlu0 %4731 }
 0xeca   :  { %v4753_v21 = vmul.f32 %v4732_v34, %v4653_v28  ;;  %15095 = vst [vmem:[#allocation98_spill] sm:$0xff] %v13973_v44  ;;  %v5345_v28 = vrot.slane %v5331_v15, %v12538_v14  ;;  %v5395_v5 = vrot.slane %v5329_v17, %v15096_v11  ;;  %v5399_v34 = vrot.slane %v13945_v20, %v15096_v11 }
 0xecb   :  { %v4697_v50 = vpop.permute.xlu1 %4696  ;;  %v14008_v17 = vrot.slane %v5376_v52, %v15096_v11 }
 0xecc   :  { %v4746_v23 = vmul.f32 %v4697_v50, %v4624_v7  ;;  %v13968_v7 = vadd.f32 %v4745_v58, %v15092_v42  ;;  %v13987_v55 = vadd.f32 %v4753_v21, %v15099_v60  ;;  %v5407_v50 = vrot.slane %v5328_v51, %v15096_v11  ;;  %v15104_v51 = vld [vmem:[#allocation89_spill] sm:$0xff] }
 0xecd   :  { %v4737_v4 = vpop.permute.xlu0 %4736  ;;  %v5330_v58 = vcombine.high %v5326_v33, %v5326_v33  ;;  %v5403_v21 = vrot.slane %v5326_v33, %v15096_v11 }
 0xece   :  { %15093 = vst [vmem:[#allocation105_spill] sm:$0xff] %v13968_v7  ;;  %v13979_v38 = vadd.f32 %v4746_v23, %v15097_v54  ;;  %15100 = vst [vmem:[#allocation100_spill] sm:$0xff] %v13987_v55  ;;  %v4754_v37 = vmul.f32 %v4737_v4, %v4656_v10  ;;  %v5378_v10 = vcombine.high %v13983_v63, %v13983_v63  ;;  %v15105_v54 = vld [vmem:[#allocation95_spill] sm:$0xff] }
 0xecf   :  { %v14002_v23 = vrot.slane %v5345_v28, %v12538_v14 }
 0xed0   :  { %15098 = vst [vmem:[#allocation106_spill] sm:$0xff] %v13979_v38  ;;  %v14011_v42 = vadd.f32 %v4754_v37, %v15102_v27  ;;  %v5427_v52 = vrot.slane %v5378_v10, %v15096_v11 }
 0xed1   :  { %v5377_v37 = vcombine.high %v14002_v23, %v14002_v23 }
 0xed2   :  { %15103 = vst [vmem:[#allocation102_spill] sm:$0xff] %v14011_v42 }
 0xf52   :  { %v10354_v40 = vpop.f32.mrb[100].mxu1 }
 0xf53   :  { %v5462_v61 = vmul.f32 %v10354_v40, %v5391_v6  ;;  %v5217_v18 = vpop.f32.mrb[101].mxu1  ;;  %v5347_v6 = vcombine.high %v5345_v28, %v5345_v28 }
 0xf54   :  { %v5460_v19 = vmul.f32 %v5383_v45, %v5217_v18  ;;  %v10355_v57 = vpop.f32.mrb[102].mxu1 }
 0xf55   :  { %v5478_v25 = vsub.f32 %v5462_v61, %v13933_v0  ;;  %v5463_v24 = vmul.f32 %v10355_v57, %v5395_v5  ;;  %v5220_v43 = vpop.f32.mrb[103].mxu1  ;;  %v15106_v61 = vld [vmem:[#allocation91_spill] sm:$0xff] }
 0xf56   :  { %v5476_v9 = vsub.f32 %v5460_v19, %v13930_v56  ;;  %v5461_v31 = vmul.f32 %v5387_v3, %v5220_v43  ;;  %v5411_v3 = vrot.slane %v5330_v58, %v15096_v11 }
 0xf57   :  { %v5494_v15 = vmul.f32 %v5478_v25, %v15101_v32  ;;  %v5479_v20 = vsub.f32 %v5463_v24, %v13941_v8 }
 0xf58   :  { %v5492_v41 = vmul.f32 %v5476_v9, %v15104_v51  ;;  %v5477_v4 = vsub.f32 %v5461_v31, %v13923_v35 }
 0xf59   :  { %v5520_v45 = vrot.slane %v5494_v15, 4  ;;  %v5495_v40 = vmul.f32 %v5479_v20, %v15105_v54  ;;  %v14026_v20 = vrot.slane %v5347_v6, %v12538_v14  ;;  %v15108_v54 = vld [vmem:[#allocation99_spill] sm:$0xff] }
 0xf5a   :  { %v5508_v33 = vrot.slane %v5492_v41, 4  ;;  %v5493_v18 = vmul.f32 %v5477_v4, %v15106_v61  ;;  %v10358_v5 = vpop.f32.mrb[104].mxu1 }
 0xf5b   :  { %v5521_v19 = vadd.f32 %v5520_v45, %v5494_v15  ;;  %v5526_v57 = vrot.slane %v5495_v40, 4  ;;  %v5466_v28 = vmul.f32 %v10358_v5, %v5407_v50  ;;  %v5233_v25 = vpop.f32.mrb[105].mxu1 }
 0xf5c   :  { %v5509_v43 = vadd.f32 %v5508_v33, %v5492_v41  ;;  %v5514_v58 = vrot.slane %v5493_v18, 4  ;;  %v5464_v9 = vmul.f32 %v5399_v34, %v5233_v25  ;;  %v10359_v31 = vpop.f32.mrb[106].mxu1  ;;  %v15107_v41 = vld [vmem:[#allocation104_spill] sm:$0xff] }
 0xf5d   :  { %v5522_v27 = vrot.slane %v5521_v19, 2  ;;  %v5527_v4 = vadd.f32 %v5526_v57, %v5495_v40  ;;  %v5482_v10 = vsub.f32 %v5466_v28, %v13968_v7  ;;  %v5467_v60 = vmul.f32 %v10359_v31, %v5411_v3  ;;  %v5236_v49 = vpop.f32.mrb[107].mxu1  ;;  %v15109_v28 = vld [vmem:[#allocation108_spill] sm:$0xff] }
 0xf5e   :  { %v5510_v15 = vrot.slane %v5509_v43, 2  ;;  %v5515_v45 = vadd.f32 %v5514_v58, %v5493_v18  ;;  %v5480_v50 = vsub.f32 %v5464_v9, %v13951_v36  ;;  %v5465_v5 = vmul.f32 %v5403_v21, %v5236_v49 }
 0xf5f   :  { %v5523_v61 = vadd.f32 %v5522_v27, %v5521_v19  ;;  %v5528_v24 = vrot.slane %v5527_v4, 2  ;;  %v5498_v33 = vmul.f32 %v5482_v10, %v15107_v41  ;;  %v5483_v34 = vsub.f32 %v5467_v60, %v13979_v38  ;;  %v15110_v19 = vld [vmem:[#allocation103_spill] sm:$0xff] }
 0xf60   :  { %v5511_v25 = vadd.f32 %v5510_v15, %v5509_v43  ;;  %v5516_v6 = vrot.slane %v5515_v45, 2  ;;  %v5496_v51 = vmul.f32 %v5480_v50, %v15108_v54  ;;  %v5481_v40 = vsub.f32 %v5465_v5, %v13962_v16 }
 0xf61   :  { %v5529_v57 = vadd.f32 %v5528_v24, %v5527_v4  ;;  %v5544_v3 = vrot.slane %v5498_v33, 4  ;;  %v5499_v31 = vmul.f32 %v5483_v34, %v15109_v28  ;;  %v5439_v18 = vrot.slane %v5377_v37, %v15096_v11 }
 0xf62   :  { %v5512_v58 = vrot.slane %v5511_v25, 1  ;;  %v5517_v49 = vadd.f32 %v5516_v6, %v5515_v45  ;;  %v5532_v21 = vrot.slane %v5496_v51, 4  ;;  %v5497_v9 = vmul.f32 %v5481_v40, %v15110_v19  ;;  %v10362_v27 = vpop.f32.mrb[108].mxu1 }
 0xf63   :  { %v5524_v10 = vrot.slane %v5523_v61, 1  ;;  %v5545_v60 = vadd.f32 %v5544_v3, %v5498_v33  ;;  %v5550_v43 = vrot.slane %v5499_v31, 4  ;;  %v5249_v15 = vpop.f32.mrb[109].mxu1  ;;  %v5379_v50 = vcombine.high %v14026_v20, %v14026_v20 }
 0xf64   :  { %v5530_v5 = vrot.slane %v5529_v57, 1  ;;  %v5518_v24 = vrot.slane %v5517_v49, 1  ;;  %v5533_v4 = vadd.f32 %v5532_v21, %v5496_v51  ;;  %v5538_v54 = vrot.slane %v5497_v9, 4  ;;  %v10363_v34 = vpop.f32.mrb[110].mxu1 }
 0xf65   :  { %v5513_v28 = vadd.f32 %v5512_v58, %v5511_v25  ;;  %v5546_v37 = vrot.slane %v5545_v60, 2  ;;  %v5551_v41 = vadd.f32 %v5550_v43, %v5499_v31  ;;  %v5470_v45 = vmul.f32 %v10362_v27, %v14008_v17  ;;  %v5252_v6 = vpop.f32.mrb[111].mxu1 }
 0xf66   :  { %v5519_v40 = vadd.f32 %v5518_v24, %v5517_v49  ;;  %v5534_v19 = vrot.slane %v5533_v4, 2  ;;  %v5539_v32 = vadd.f32 %v5538_v54, %v5497_v9  ;;  %v15111_v33 = vrot.slane %v13959_v29, %v15096_v11  ;;  %v15112_v54 = vld [vmem:[#allocation94_spill] sm:$0xff] }
 0xf67   :  { %v5547_v38 = vadd.f32 %v5546_v37, %v5545_v60  ;;  %v5486_v7 = vsub.f32 %v5470_v45, %v13948_v48  ;;  %v5471_v16 = vmul.f32 %v10363_v34, %v5427_v52  ;;  %v5435_v51 = vrot.slane %v14026_v20, %v15096_v11  ;;  %v15113_v60 = vld [vmem:[#allocation90_spill] sm:$0xff] }
 0xf68   :  { %v5468_v3 = vmul.f32 %v15111_v33, %v5249_v15  ;;  %v14047_v25 = vsel %vm3215_vm2, %v5519_v40, %v5513_v28  ;;  %v5552_v31 = vrot.slane %v5551_v41, 2  ;;  %v5540_v17 = vrot.slane %v5539_v32, 2 }
 0xf69   :  { %v14050_v49 = vadd.f32 %v5524_v10, %v5523_v61  ;;  %v5502_v21 = vmul.f32 %v5486_v7, %v15112_v54  ;;  %v5487_v29 = vsub.f32 %v5471_v16, %v13956_v46  ;;  %v5443_v9 = vrot.slane %v5379_v50, %v15096_v11  ;;  %v15115_v61 = vld [vmem:[#allocation96_spill] sm:$0xff]  ;;  %v15121_v54 = vld [vmem:[#allocation109_spill] sm:$0xff] }
 0xf6a   :  { %v5484_v58 = vsub.f32 %v5468_v3, %v13926_v12  ;;  %v14055_v27 = vadd.f32 %v5530_v5, %v5529_v57  ;;  %v5535_v52 = vadd.f32 %v5534_v19, %v5533_v4  ;;  %v15114_v28 = vrot.slane %v13983_v63, %v15096_v11  ;;  %v10366_v15 = vpop.f32.mrb[112].mxu1 }
 0xf6b   :  { %v5548_v24 = vrot.slane %v5547_v38, 1  ;;  %v5568_v34 = vrot.slane %v5502_v21, 4  ;;  %v5503_v10 = vmul.f32 %v5487_v29, %v15115_v61  ;;  %v5474_v37 = vmul.f32 %v10366_v15, %v5439_v18  ;;  %v5265_v7 = vpop.f32.mrb[113].mxu1  ;;  %v15117_v18 = vld [vmem:[#allocation92_spill] sm:$0xff] }
 0xf6c   :  { %v5500_v20 = vmul.f32 %v5484_v58, %v15113_v60  ;;  %v5469_v43 = vmul.f32 %v15114_v28, %v5252_v6  ;;  %v14062_v45 = vadd.f32 %v5552_v31, %v5551_v41  ;;  %v5541_v16 = vadd.f32 %v5540_v17, %v5539_v32  ;;  %v10367_v19 = vpop.f32.mrb[114].mxu1  ;;  %v15118_v17 = vld [vmem:[#allocation110_spill] sm:$0xff] }
 0xf6d   :  { %v5569_v5 = vadd.f32 %v5568_v34, %v5502_v21  ;;  %v5574_v4 = vrot.slane %v5503_v10, 4  ;;  %v5490_v40 = vsub.f32 %v5474_v37, %v13987_v55  ;;  %v15116_v63 = vrot.slane %v14002_v23, %v15096_v11  ;;  %v5268_v33 = vpop.f32.mrb[115].mxu1 }
 0xf6e   :  { %v5556_v50 = vrot.slane %v5500_v20, 4  ;;  %v5485_v57 = vsub.f32 %v5469_v43, %v13938_v22  ;;  %v5536_v3 = vrot.slane %v5535_v52, 1  ;;  %v5475_v41 = vmul.f32 %v10367_v19, %v5443_v9 }
 0xf6f   :  { %v5472_v6 = vmul.f32 %v15116_v63, %v5265_v7  ;;  %v5570_v31 = vrot.slane %v5569_v5, 2  ;;  %v5575_v32 = vadd.f32 %v5574_v4, %v5503_v10  ;;  %v5506_v28 = vmul.f32 %v5490_v40, %v15118_v17  ;;  %v15119_v63 = vld [vmem:[#allocation107_spill] sm:$0xff] }
 0xf70   :  { %v5557_v58 = vadd.f32 %v5556_v50, %v5500_v20  ;;  %v5501_v29 = vmul.f32 %v5485_v57, %v15117_v18  ;;  %v5491_v34 = vsub.f32 %v5475_v41, %v14011_v42  ;;  %v5473_v37 = vmul.f32 %v5435_v51, %v5268_v33  ;;  %v15120_v57 = vld [vmem:[#allocation111_spill] sm:$0xff] }
 0xf71   :  { %v5488_v43 = vsub.f32 %v5472_v6, %v13965_v59  ;;  %v5542_v61 = vrot.slane %v5541_v16, 1  ;;  %v5576_v23 = vrot.slane %v5575_v32, 2  ;;  %v5592_v7 = vrot.slane %v5506_v28, 4 }
 0xf72   :  { %v5558_v21 = vrot.slane %v5557_v58, 2  ;;  %v5562_v15 = vrot.slane %v5501_v29, 4  ;;  %v5507_v9 = vmul.f32 %v5491_v34, %v15120_v57  ;;  %v5489_v10 = vsub.f32 %v5473_v37, %v13973_v44 }
 0xf73   :  { %v5504_v60 = vmul.f32 %v5488_v43, %v15119_v63  ;;  %v5571_v19 = vadd.f32 %v5570_v31, %v5569_v5  ;;  %v5577_v4 = vadd.f32 %v5576_v23, %v5575_v32  ;;  %v5593_v40 = vadd.f32 %v5592_v7, %v5506_v28 }
 0xf74   :  { %v5559_v20 = vadd.f32 %v5558_v21, %v5557_v58  ;;  %v5563_v50 = vadd.f32 %v5562_v15, %v5501_v29  ;;  %v5598_v18 = vrot.slane %v5507_v9, 4  ;;  %v5505_v41 = vmul.f32 %v5489_v10, %v15121_v54 }
 0xf75   :  { %v5580_v6 = vrot.slane %v5504_v60, 4  ;;  %v5549_v51 = vadd.f32 %v5548_v24, %v5547_v38  ;;  %v5537_v33 = vadd.f32 %v5536_v3, %v5535_v52  ;;  %v5594_v55 = vrot.slane %v5593_v40, 2 }
 0xf76   :  { %v5564_v17 = vrot.slane %v5563_v50, 2  ;;  %v5560_v42 = vrot.slane %v5559_v20, 1  ;;  %v5543_v43 = vadd.f32 %v5542_v61, %v5541_v16  ;;  %v5599_v29 = vadd.f32 %v5598_v18, %v5507_v9 }
 0xf77   :  { %v5581_v59 = vadd.f32 %v5580_v6, %v5504_v60  ;;  %v5586_v21 = vrot.slane %v5505_v41, 4  ;;  %v5572_v15 = vrot.slane %v5571_v19, 1  ;;  %v5578_v34 = vrot.slane %v5577_v4, 1 }
 0xf78   :  { %v5565_v58 = vadd.f32 %v5564_v17, %v5563_v50  ;;  %v5554_v5 = vrot.slane %v14062_v45, 1  ;;  %v5600_v32 = vrot.slane %v5599_v29, 2  ;;  %v5864_v38 = vsel %vm3217_vm3, %v14050_v49, %v14047_v25 }
 0xf79   :  { %v5582_v37 = vrot.slane %v5581_v59, 2  ;;  %v5587_v28 = vadd.f32 %v5586_v21, %v5505_v41  ;;  %v5561_v52 = vadd.f32 %v5560_v42, %v5559_v20  ;;  %v5595_v24 = vadd.f32 %v5594_v55, %v5593_v40 }
 0xf7a   :  { %v5566_v31 = vrot.slane %v5565_v58, 1  ;;  %v5865_v60 = vsel %vm3219_vm4, %v14055_v27, %v5864_v38  ;;  %v5601_v16 = vadd.f32 %v5600_v32, %v5599_v29  ;;  %v5573_v23 = vadd.f32 %v5572_v15, %v5571_v19  ;;  %v15122_v38 = vld [vmem:[#allocation112_spill] sm:$0xff] }
 0xf7b   :  { %v5583_v3 = vadd.f32 %v5582_v37, %v5581_v59  ;;  %v5588_v18 = vrot.slane %v5587_v28, 2  ;;  %v5866_v17 = vsel %vm3221_vm5, %v5537_v33, %v5865_v60  ;;  %v5555_v50 = vadd.f32 %v5554_v5, %v14062_v45 }
 0xf7c   :  { %v5567_v61 = vadd.f32 %v5566_v31, %v5565_v58  ;;  %v5867_v9 = vsel %vm3223_vm6, %v5543_v43, %v5866_v17  ;;  %v5579_v10 = vadd.f32 %v5578_v34, %v5577_v4  ;;  %v5596_v42 = vrot.slane %v5595_v24, 1  ;;  %v9240_v58 = vld [vmem:[%s15060_s3 + $0x1] ss:$0 sm:$0xff]  ;;  %v10968_v17 = vld [vmem:[#allocation8 + $0x90] sm:$0xff]  }
 0xf7d   :  { %v5584_v7 = vrot.slane %v5583_v3, 1  ;;  %v5589_v55 = vadd.f32 %v5588_v18, %v5587_v28  ;;  %v5868_v59 = vsel %vm3225_vm7, %v5549_v51, %v5867_v9  ;;  %v5602_v19 = vrot.slane %v5601_v16, 1  ;;  %v10967_v18 = vld [vmem:[#allocation8 + $0x88] sm:$0xff]   ;;  %v10972_v9 = vld [vmem:[#allocation8 + $0xb0] sm:$0xff]  }
 0xf7e   :  { %v5870_v25 = vsel %vm3215_vm2, %v5567_v61, %v5561_v52  ;;  %v5869_v27 = vsel %vm3227_vm8, %v5555_v50, %v5868_v59  ;;  %v5597_v4 = vadd.f32 %v5596_v42, %v5595_v24  ;;  %v15124_v24 = vld [vmem:[#allocation113_spill] sm:$0xff]  ;;  %v11569_v61 = vld [vmem:[%s15005_s9] sm:$0xff]  }
 0xf7f   :  { %v5585_v49 = vadd.f32 %v5584_v7, %v5583_v3  ;;  %v5871_v20 = vsel %vm3217_vm3, %v5573_v23, %v5870_v25  ;;  %v5590_v40 = vrot.slane %v5589_v55, 1  ;;  %v5603_v33 = vadd.f32 %v5602_v19, %v5601_v16  ;;  %v10966_v16 = vld [vmem:[#allocation8 + $0x80] sm:$0xff]   ;;  %v10969_v23 = vld [vmem:[#allocation8 + $0x98] sm:$0xff]   ;;  %v10971_v50 = vld [vmem:[#allocation8 + $0xa8] sm:$0xff]  }
 0xf80   :  { %v5872_v6 = vsel %vm3219_vm4, %v5579_v10, %v5871_v20  ;;  %10429 = vmatpush3.bf16.msra.mxu1 %v10966_v16  ;;  %v10970_v7 = vld [vmem:[#allocation8 + $0xa0] sm:$0xff]   ;;  %v10973_v10 = vld [vmem:[#allocation8 + $0xb8] sm:$0xff]  }
 0xf81   :  { %v5873_v45 = vsel %vm3221_vm5, %v5585_v49, %v5872_v6  ;;  %v5591_v41 = vadd.f32 %v5590_v40, %v5589_v55  ;;  %10430 = vmatprep.subr.bf16.mxu1 %v15063_v62  ;;  %v9265_v25 = vld [vmem:[#allocation7 + $0x2] ss:$0 sm:$0xff] }
 0xf83   :  { %v5874_v43 = vsel %vm3223_vm6, %v5591_v41, %v5873_v45 }
 0xf84   :  { %v5875_v51 = vsel %vm3225_vm7, %v5597_v4, %v5874_v43  ;;  %10431 = vmatpush3.bf16.msra.mxu1 %v10967_v18 }
 0xf85   :  { %v5876_v29 = vsel %vm3227_vm8, %v5603_v33, %v5875_v51  ;;  %10432 = vmatprep.subr.bf16.mxu1 %v15063_v62 }
 0xf86   :  { %v5840_v21 = vpop.f32.mrb[116].mxu1 }
 0xf87   :  { %v5841_v15 = vadd.f32 %v9240_v58, %v5840_v21  ;;  %v10406_v34 = vpop.f32.mrb[117].mxu1  ;;  %v10974_v21 = vld [vmem:[%s15006_s1 + $0x80] sm:$0xff]  }
 0xf88   :  { %v5843_v37 = vpop.f32.mrb[118].mxu1  ;;  %10433 = vmatpush3.bf16.msra.mxu1 %v10968_v17  ;;  %v10978_v34 = vld [vmem:[%s15006_s1 + $0x90] sm:$0xff]  }
 0xf89   :  { %v5879_v5 = vmul.f32 %v5869_v27, %v5841_v15  ;;  %v5844_v31 = vadd.f32 %v9240_v58, %v5843_v37  ;;  %v10407_v32 = vpop.f32.mrb[119].mxu1  ;;  %10434 = vmatprep.subr.bf16.mxu1 %v15063_v62  ;;  %v10976_v15 = vld [vmem:[%s15006_s1 + $0x88] sm:$0xff]   ;;  %v10980_v37 = vld [vmem:[%s15006_s1 + $0x98] sm:$0xff]  }
 0xf8b   :  { %v5880_v28 = vmul.f32 %v5876_v29, %v5844_v31  ;;  %v14097_v52 = vadd.f32 %v5879_v5, %v15122_v38  ;;  %v10982_v5 = vld [vmem:[%s15006_s1 + $0xa0] sm:$0xff]   ;;  %v10984_v31 = vld [vmem:[%s15006_s1 + $0xa8] sm:$0xff]  }
 0xf8c   :  { %10435 = vmatpush3.bf16.msra.mxu1 %v10969_v23  ;;  %v10975_v23 = vld [vmem:[#allocation25 + $0x80] sm:$0xff]  }
 0xf8d   :  { %15123 = vst [vmem:[#allocation112_spill] sm:$0xff] %v14097_v52  ;;  %v14100_v3 = vadd.f32 %v5880_v28, %v15124_v24  ;;  %10436 = vmatprep.subr.bf16.mxu1 %v15063_v62  ;;  %v9276_v28 = vld [vmem:[#allocation10 + $0x2] ss:$0 sm:$0xff] }
 0xf8f   :  { %15125 = vst [vmem:[#allocation113_spill] sm:$0xff] %v14100_v3  ;;  %v14104_v60 = vpack.c.bf16 %v14100_v3, %v14097_v52 }
 0xf90   :  { %10437 = vmatpush3.bf16.msra.mxu1 %v10970_v7  ;;  %v10977_v7 = vld [vmem:[#allocation25 + $0x88] sm:$0xff]  }
 0xf91   :  { %10425 = vmatmul.mubr.bf16.vlgmr.msra.gmra.mrb[96].mxu0 %v14104_v60  ;;  %10438 = vmatprep.subr.bf16.mxu1 %v15063_v62 }
 0xf92   :  { %10450 = vmatprep.mubr.msk.bf16.mxu0 %vm835_vm1, %v11569_v61 }
 0xf94   :  { %10439 = vmatpush3.bf16.msra.mxu1 %v10971_v50  ;;  %v10979_v50 = vld [vmem:[#allocation25 + $0x90] sm:$0xff]  }
 0xf95   :  { %10440 = vmatprep.subr.bf16.mxu1 %v15063_v62 }
 0xf98   :  { %10441 = vmatpush3.bf16.msra.mxu1 %v10972_v9  ;;  %v10981_v9 = vld [vmem:[#allocation25 + $0x98] sm:$0xff]  }
 0xf99   :  { %10442 = vmatprep.subr.bf16.mxu1 %v15063_v62 }
 0xf9c   :  { %10443 = vmatpush3.bf16.msra.mxu1 %v10973_v10  ;;  %v10988_v10 = vld [vmem:[%s15006_s1 + $0xb8] sm:$0xff]  }
 0xf9d   :  { %10466 = vmatprep.subr.bf16.mxu1 %v10974_v21 }
0x1064   :  { %v5991_v55 = vpop.f32.mrb[96].mxu0 }
0x1065   :  { %v5992_v59 = vadd.f32 %v9265_v25, %v5991_v55  ;;  %v10426_v42 = vpop.f32.mrb[97].mxu0 }
0x1066   :  { %v5994_v49 = vpop.f32.mrb[98].mxu0 }
0x1067   :  { %v9274_v27 = vmul.f32 -1.442695, %v5992_v59  ;;  %v5995_v20 = vadd.f32 %v9265_v25, %v5994_v49  ;;  %v10427_v40 = vpop.f32.mrb[99].mxu0  ;;  %v10989_v25 = vld [vmem:[#allocation25 + $0xb8] sm:$0xff]  }
0x1068   :  { %v6226_v40 = vld [vmem:[#allocation5 + $0x100] sm:$0xff] }
0x1069   :  { %11374 = vpow2.f32 %v9274_v27  ;;  %v9275_v19 = vmul.f32 -1.442695, %v5995_v20  ;;  %v6228_v27 = vld [vmem:[#allocation5 + $0x110] sm:$0xff] }
0x106b   :  { %11376 = vpow2.f32 %v9275_v19 }
0x1073   :  { %v11375_v6 = vpop.eup %11374 }
0x1074   :  { %v6004_v45 = vadd.f32 1.0, %v11375_v6 }
0x1075   :  { %v11377_v41 = vpop.eup %11376 }
0x1076   :  { %11378 = vrcp.f32 %v6004_v45  ;;  %v6005_v4 = vadd.f32 1.0, %v11377_v41  ;;  %v6229_v45 = vld [vmem:[#allocation5 + $0x118] sm:$0xff] }
0x1078   :  { %11380 = vrcp.f32 %v6005_v4 }
0x1080   :  { %v11379_v33 = vpop.eup %11378 }
0x1081   :  { %v6010_v51 = vmul.f32 %v11379_v33, %v5992_v59 }
0x1082   :  { %v11381_v43 = vpop.eup %11380 }
0x1083   :  { %v6011_v58 = vmul.f32 %v11381_v43, %v5995_v20  ;;  %v6227_v43 = vld [vmem:[#allocation5 + $0x108] sm:$0xff] }
0x1085   :  { %v6012_v29 = vpack.c.bf16 %v6011_v58, %v6010_v51 }
0x1087   :  { %10445 = vmatmul.mubr.bf16.vlgmr.msra.gmra.mrb[120].mxu1 %v6012_v29 }
0x1088   :  { %10467 = vmatpush3.bf16.msra.mxu1 %v10974_v21 }
0x1089   :  { %10468 = vmatprep.subr.bf16.mxu1 %v10976_v15 }
0x108c   :  { %10469 = vmatpush3.bf16.msra.mxu1 %v10976_v15 }
0x108d   :  { %10470 = vmatprep.subr.bf16.mxu1 %v10978_v34 }
0x1090   :  { %10471 = vmatpush3.bf16.msra.mxu1 %v10978_v34 }
0x1091   :  { %10472 = vmatprep.subr.bf16.mxu1 %v10980_v37 }
0x1094   :  { %10473 = vmatpush3.bf16.msra.mxu1 %v10980_v37 }
0x1095   :  { %10474 = vmatprep.subr.bf16.mxu1 %v10982_v5 }
0x1098   :  { %10475 = vmatpush3.bf16.msra.mxu1 %v10982_v5 }
0x1099   :  { %10476 = vmatprep.subr.bf16.mxu1 %v10984_v31 }
0x109c   :  { %10477 = vmatpush3.bf16.msra.mxu1 %v10984_v31 }
0x115a   :  { %v6120_v32 = vpop.f32.mrb[120].mxu1 }
0x115b   :  { %v10446_v38 = vpop.f32.mrb[121].mxu1  ;;  %v6121_v18 = vadd.f32 %v9276_v28, %v6120_v32 }
0x115c   :  { %v6123_v24 = vpop.f32.mrb[122].mxu1 }
0x115d   :  { %v14122_v61 = vadd.f32 %v9276_v28, %v6123_v24  ;;  %v10447_v16 = vpop.f32.mrb[123].mxu1 }
0x115f   :  { %v6127_v17 = vpack.c.bf16 %v14122_v61, %v6121_v18  ;;  %v6316_v58 = vrot.slane %v14122_v61, %v12538_v14  ;;  %v6309_v16 = vcombine.high %v14122_v61, %v14122_v61 }
0x1161   :  { %10448 = vmatprep.subr.bf16.mxu0 %v6127_v17 }
0x1162   :  { %10449 = vmatpush3.bf16.msra.mxu0 %v6127_v17 }
0x1163   :  { %10498 = vmatprep.subr.bf16.mxu0 %v10975_v23 }
0x1165   :  { %10451 = vmatmul.mubr.msk.bf16.vlgmr.msra.gmra.mrb[100].mxu0 %vm835_vm1, %v13839_v2  ;;  %v10983_v2 = vld [vmem:[#allocation25 + $0xa0] sm:$0xff]  }
0x1166   :  { %10454 = vmatprep.mubr.msk.bf16.mxu0 %vm835_vm1, %v13844_v26  ;;  %10499 = vmatpush3.bf16.msra.mxu0 %v10975_v23  ;;  %v10985_v26 = vld [vmem:[#allocation25 + $0xa8] sm:$0xff]   ;;  %v6324_v23 = vcombine.high %v6316_v58, %v6316_v58 }
0x1167   :  { %10500 = vmatprep.subr.bf16.mxu0 %v10977_v7 }
0x116a   :  { %10501 = vmatpush3.bf16.msra.mxu0 %v10977_v7 }
0x116b   :  { %10502 = vmatprep.subr.bf16.mxu0 %v10979_v50 }
0x116d   :  { %10455 = vmatmul.mubr.msk.bf16.gmra.mrb[104].mxu0 %vm835_vm1, %v13851_v47  ;;  %v10986_v47 = vld [vmem:[%s15006_s1 + $0xb0] sm:$0xff]  }
0x116e   :  { %10458 = vmatprep.mubr.msk.bf16.mxu0 %vm835_vm1, %v13856_v13  ;;  %10503 = vmatpush3.bf16.msra.mxu0 %v10979_v50  ;;  %v10987_v13 = vld [vmem:[#allocation25 + $0xb0] sm:$0xff]  }
0x116f   :  { %10504 = vmatprep.subr.bf16.mxu0 %v10981_v9  ;;  %10478 = vmatprep.subr.bf16.mxu1 %v10986_v47  ;;  %v6232_v50 = vld [vmem:[#allocation5 + $0x130] sm:$0xff] }
0x1170   :  { %10479 = vmatpush3.bf16.msra.mxu1 %v10986_v47 }
0x1171   :  { %10480 = vmatprep.subr.bf16.mxu1 %v10988_v10 }
0x1172   :  { %10505 = vmatpush3.bf16.msra.mxu0 %v10981_v9 }
0x1173   :  { %10506 = vmatprep.subr.bf16.mxu0 %v10983_v2 }
0x1174   :  { %10481 = vmatpush3.bf16.msra.mxu1 %v10988_v10 }
0x1175   :  { %10459 = vmatmul.mubr.msk.bf16.gmra.mrb[108].mxu0 %vm835_vm1, %v13864_v39  ;;  %v6267_v39 = vrot.slane %v6121_v18, %v12538_v14 }
0x1176   :  { %10462 = vmatprep.mubr.msk.bf16.mxu0 %vm835_vm1, %v13869_v53  ;;  %10507 = vmatpush3.bf16.msra.mxu0 %v10983_v2  ;;  %v6260_v53 = vcombine.high %v6121_v18, %v6121_v18  ;;  %v6230_v2 = vld [vmem:[#allocation5 + $0x120] sm:$0xff] }
0x1177   :  { %10508 = vmatprep.subr.bf16.mxu0 %v10985_v26  ;;  %v6275_v55 = vcombine.high %v6267_v39, %v6267_v39 }
0x1178   :  { %v6274_v59 = vrot.slane %v6260_v53, %v12538_v14  ;;  %v6332_v53 = vrot.slane %v6316_v58, %v12538_v14 }
0x1179   :  { %v6297_v42 = vrot.slane %v6275_v55, %v12538_v14 }
0x117a   :  { %10509 = vmatpush3.bf16.msra.mxu0 %v10985_v26  ;;  %v6276_v20 = vcombine.high %v6274_v59, %v6274_v59  ;;  %v6290_v51 = vrot.slane %v6274_v59, %v12538_v14  ;;  %v6231_v59 = vld [vmem:[#allocation5 + $0x128] sm:$0xff] }
0x117b   :  { %10510 = vmatprep.subr.bf16.mxu0 %v10987_v13  ;;  %v6307_v19 = vcombine.high %v6297_v42, %v6297_v42  ;;  %v6365_v24 = vrot.slane %v6297_v42, %v15096_v11 }
0x117c   :  { %v6304_v32 = vrot.slane %v6276_v20, %v12538_v14  ;;  %v6306_v17 = vcombine.high %v6290_v51, %v6290_v51  ;;  %v6346_v20 = vrot.slane %v6324_v23, %v12538_v14 }
0x117d   :  { %10463 = vmatmul.mubr.msk.bf16.gmra.mrb[112].mxu0 %vm835_vm1, %v13876_v30  ;;  %v6283_v30 = vrot.slane %v6267_v39, %v12538_v14  ;;  %v6373_v5 = vrot.slane %v6307_v19, %v15096_v11  ;;  %v6323_v39 = vrot.slane %v6309_v16, %v12538_v14 }
0x117e   :  { %10511 = vmatpush3.bf16.msra.mxu0 %v10987_v13  ;;  %v6308_v26 = vcombine.high %v6304_v32, %v6304_v32  ;;  %v6233_v13 = vld [vmem:[#allocation5 + $0x138] sm:$0xff] }
0x117f   :  { %10512 = vmatprep.subr.bf16.mxu0 %v10989_v25  ;;  %v6305_v49 = vcombine.high %v6283_v30, %v6283_v30  ;;  %v6361_v21 = vrot.slane %v6283_v30, %v15096_v11  ;;  %v6385_v30 = vrot.slane %v6306_v17, %v15096_v11  ;;  %v6235_v17 = vld [vmem:[#allocation5 + $0x148] sm:$0xff]  ;;  %v6339_v23 = vrot.slane %v6323_v39, %v12538_v14 }
0x1181   :  { %v6369_v4 = vrot.slane %v6305_v49, %v15096_v11  ;;  %v6377_v49 = vrot.slane %v6290_v51, %v15096_v11  ;;  %v6354_v51 = vcombine.high %v6332_v53, %v6332_v53 }
0x1182   :  { %10513 = vmatpush3.bf16.msra.mxu0 %v10989_v25  ;;  %v10990_v25 = vld [vmem:[#allocation11 + $0x80] sm:$0xff]  }
0x1183   :  { %10562 = vmatprep.subr.bf16.mxu0 %v15063_v62 }
0x1238   :  { %v10452_v6 = vpop.f32.mrb[100].mxu0 }
0x1239   :  { %v6244_v41 = vmul.f32 %v10452_v6, %v6228_v27  ;;  %v6162_v33 = vpop.f32.mrb[101].mxu0  ;;  %v6389_v6 = vrot.slane %v6308_v26, %v15096_v11 }
0x123a   :  { %v6242_v29 = vmul.f32 %v6226_v40, %v6162_v33  ;;  %v10453_v15 = vpop.f32.mrb[102].mxu0  ;;  %v6381_v33 = vrot.slane %v6304_v32, %v15096_v11  ;;  %v6401_v32 = vrot.slane %v6354_v51, %v15096_v11  ;;  %v6409_v51 = vrot.slane %v6339_v23, %v15096_v11 }
0x123b   :  { %v6440_v34 = vmul.f32 %v6369_v4, %v6244_v41  ;;  %v6245_v37 = vmul.f32 %v10453_v15, %v6229_v45  ;;  %v6165_v31 = vpop.f32.mrb[103].mxu0  ;;  %v6236_v15 = vld [vmem:[#allocation5 + $0x150] sm:$0xff] }
0x123c   :  { %v6438_v28 = vmul.f32 %v6361_v21, %v6242_v29  ;;  %v6243_v38 = vmul.f32 %v6227_v43, %v6165_v31  ;;  %v10991_v43 = vld [vmem:[#allocation11 + $0x88] sm:$0xff]   ;;  %v6325_v29 = vcombine.high %v6323_v39, %v6323_v39  ;;  %v10993_v39 = vld [vmem:[#allocation11 + $0x98] sm:$0xff]  }
0x123d   :  { %v6441_v18 = vmul.f32 %v6373_v5, %v6245_v37  ;;  %v6356_v37 = vcombine.high %v6346_v20, %v6346_v20 }
0x123e   :  { %v6439_v7 = vmul.f32 %v6365_v24, %v6243_v38  ;;  %v10992_v24 = vld [vmem:[#allocation11 + $0x90] sm:$0xff]  }
0x123f   :  { %v6455_v9 = vpack.c.bf16 %v6441_v18, %v6440_v34  ;;  %v6234_v34 = vld [vmem:[#allocation5 + $0x140] sm:$0xff] }
0x1240   :  { %v10456_v47 = vpop.f32.mrb[104].mxu0  ;;  %v6454_v10 = vpack.c.bf16 %v6439_v7, %v6438_v28  ;;  %v6237_v28 = vld [vmem:[#allocation5 + $0x158] sm:$0xff] }
0x1241   :  { %v6248_v55 = vmul.f32 %v10456_v47, %v6232_v50  ;;  %v6178_v61 = vpop.f32.mrb[105].mxu0  ;;  %v6393_v50 = vrot.slane %v6332_v53, %v15096_v11  ;;  %v6355_v53 = vcombine.high %v6339_v23, %v6339_v23  ;;  %v10997_v23 = vld [vmem:[#allocation11 + $0xb8] sm:$0xff]  }
0x1242   :  { %v6246_v42 = vmul.f32 %v6230_v2, %v6178_v61  ;;  %v10457_v27 = vpop.f32.mrb[106].mxu0  ;;  %10482 = vmatprep.mubr.bf16.mxu1 %v6454_v10  ;;  %10514 = vmatprep.mubr.bf16.mxu0 %v6454_v10  ;;  %v6353_v2 = vrot.slane %v6325_v29, %v12538_v14 }
0x1243   :  { %v6444_v40 = vmul.f32 %v6385_v30, %v6248_v55  ;;  %v6249_v19 = vmul.f32 %v10457_v27, %v6233_v13  ;;  %v6181_v45 = vpop.f32.mrb[107].mxu0  ;;  %10483 = vmatmul.mubr.bf16.vlgmr.msra.gmra.mrb[124].mxu1 %v6455_v9  ;;  %10515 = vmatmul.mubr.bf16.vlgmr.msra.gmra.mrb[116].mxu0 %v6455_v9  ;;  %v6405_v13 = vrot.slane %v6356_v37, %v15096_v11 }
0x1244   :  { %v6442_v41 = vmul.f32 %v6377_v49, %v6246_v42  ;;  %v6247_v4 = vmul.f32 %v6231_v59, %v6181_v45  ;;  %10563 = vmatpush3.bf16.msra.mxu0 %v10990_v25  ;;  %v6397_v30 = vrot.slane %v6346_v20, %v15096_v11  ;;  %v6240_v42 = vld [vmem:[#allocation5 + $0x170] sm:$0xff]  ;;  %v6238_v49 = vld [vmem:[#allocation5 + $0x160] sm:$0xff]  ;;  %v6357_v27 = vcombine.high %v6353_v2, %v6353_v2 }
0x1245   :  { %v6445_v58 = vmul.f32 %v6389_v6, %v6249_v19  ;;  %10564 = vmatprep.subr.bf16.mxu0 %v15063_v62  ;;  %v6241_v6 = vld [vmem:[#allocation5 + $0x178] sm:$0xff] }
0x1246   :  { %v6443_v21 = vmul.f32 %v6381_v33, %v6247_v4  ;;  %v6417_v33 = vrot.slane %v6355_v53, %v15096_v11 }
0x1247   :  { %v6457_v5 = vpack.c.bf16 %v6445_v58, %v6444_v40 }
0x1248   :  { %v10460_v31 = vpop.f32.mrb[108].mxu0  ;;  %10565 = vmatpush3.bf16.msra.mxu0 %v10991_v43  ;;  %v6456_v38 = vpack.c.bf16 %v6443_v21, %v6442_v41  ;;  %v10994_v41 = vld [vmem:[#allocation11 + $0xa0] sm:$0xff]  }
0x1249   :  { %v6252_v16 = vmul.f32 %v10460_v31, %v6236_v15  ;;  %v6194_v18 = vpop.f32.mrb[109].mxu0  ;;  %10566 = vmatprep.subr.bf16.mxu0 %v15063_v62  ;;  %v6239_v43 = vld [vmem:[#allocation5 + $0x168] sm:$0xff] }
0x124a   :  { %v6250_v7 = vmul.f32 %v6234_v34, %v6194_v18  ;;  %v10461_v9 = vpop.f32.mrb[110].mxu0  ;;  %10486 = vmatprep.mubr.bf16.mxu1 %v6456_v38  ;;  %10518 = vmatprep.mubr.bf16.mxu0 %v6456_v38  ;;  %v6421_v34 = vrot.slane %v6357_v27, %v15096_v11  ;;  %v10995_v38 = vld [vmem:[#allocation11 + $0xa8] sm:$0xff]  }
0x124b   :  { %v6448_v26 = vmul.f32 %v6401_v32, %v6252_v16  ;;  %v6253_v47 = vmul.f32 %v10461_v9, %v6237_v28  ;;  %v6197_v10 = vpop.f32.mrb[111].mxu0  ;;  %10487 = vmatmul.mubr.bf16.gmra.mrb[128].mxu1 %v6457_v5  ;;  %10519 = vmatmul.mubr.bf16.gmra.mrb[120].mxu0 %v6457_v5  ;;  %v6413_v28 = vrot.slane %v6353_v2, %v15096_v11  ;;  %v11000_v9 = vld [vmem:[#allocation28 + $0x90] sm:$0xff]   ;;  %v11001_v2 = vld [vmem:[#allocation28 + $0x98] sm:$0xff]  }
0x124c   :  { %v6446_v25 = vmul.f32 %v6393_v50, %v6250_v7  ;;  %v6251_v55 = vmul.f32 %v6235_v17, %v6197_v10  ;;  %10567 = vmatpush3.bf16.msra.mxu0 %v10992_v24  ;;  %v10996_v17 = vld [vmem:[#allocation11 + $0xb0] sm:$0xff]   ;;  %v10998_v7 = vld [vmem:[#allocation28 + $0x80] sm:$0xff]   ;;  %v10999_v50 = vld [vmem:[#allocation28 + $0x88] sm:$0xff]  }
0x124d   :  { %v6449_v61 = vmul.f32 %v6405_v13, %v6253_v47  ;;  %10568 = vmatprep.subr.bf16.mxu0 %v15063_v62  ;;  %10530 = vmatprep.subr.bf16.mxu1 %v10998_v7  ;;  %v11003_v47 = vld [vmem:[#allocation28 + $0xa8] sm:$0xff]   ;;  %v11004_v13 = vld [vmem:[#allocation28 + $0xb0] sm:$0xff]   ;;  %v11005_v10 = vld [vmem:[#allocation28 + $0xb8] sm:$0xff]  }
0x124e   :  { %v6447_v59 = vmul.f32 %v6397_v30, %v6251_v55  ;;  %10531 = vmatpush3.bf16.msra.mxu1 %v10998_v7 }
0x124f   :  { %v6459_v40 = vpack.c.bf16 %v6449_v61, %v6448_v26  ;;  %10532 = vmatprep.subr.bf16.mxu1 %v10999_v50  ;;  %v11002_v26 = vld [vmem:[#allocation28 + $0xa0] sm:$0xff]  }
0x1250   :  { %v10464_v19 = vpop.f32.mrb[112].mxu0  ;;  %10569 = vmatpush3.bf16.msra.mxu0 %v10993_v39  ;;  %v6458_v45 = vpack.c.bf16 %v6447_v59, %v6446_v25  ;;  %v14187_v25 = vld [vmem:[#allocation26 + $0x2] ss:$0 sm:$0xff] }
0x1251   :  { %v6256_v4 = vmul.f32 %v10464_v19, %v6240_v42  ;;  %v6210_v20 = vpop.f32.mrb[113].mxu0  ;;  %10570 = vmatprep.subr.bf16.mxu0 %v15063_v62 }
0x1252   :  { %v6254_v58 = vmul.f32 %v6238_v49, %v6210_v20  ;;  %v10465_v29 = vpop.f32.mrb[114].mxu0  ;;  %10490 = vmatprep.mubr.bf16.mxu1 %v6458_v45  ;;  %10522 = vmatprep.mubr.bf16.mxu0 %v6458_v45 }
0x1253   :  { %v6452_v21 = vmul.f32 %v6417_v33, %v6256_v4  ;;  %v6257_v15 = vmul.f32 %v10465_v29, %v6241_v6  ;;  %v6213_v37 = vpop.f32.mrb[115].mxu0  ;;  %10491 = vmatmul.mubr.bf16.gmra.mrb[132].mxu1 %v6459_v40  ;;  %10523 = vmatmul.mubr.bf16.gmra.mrb[124].mxu0 %v6459_v40 }
0x1254   :  { %v6450_v5 = vmul.f32 %v6409_v51, %v6254_v58  ;;  %v6255_v31 = vmul.f32 %v6239_v43, %v6213_v37  ;;  %10571 = vmatpush3.bf16.msra.mxu0 %v10994_v41  ;;  %10533 = vmatpush3.bf16.msra.mxu1 %v10999_v50 }
0x1255   :  { %v6453_v24 = vmul.f32 %v6421_v34, %v6257_v15  ;;  %10572 = vmatprep.subr.bf16.mxu0 %v15063_v62  ;;  %10534 = vmatprep.subr.bf16.mxu1 %v11000_v9 }
0x1256   :  { %v6451_v16 = vmul.f32 %v6413_v28, %v6255_v31 }
0x1257   :  { %v6461_v32 = vpack.c.bf16 %v6453_v24, %v6452_v21 }
0x1258   :  { %10573 = vmatpush3.bf16.msra.mxu0 %v10995_v38  ;;  %v6460_v18 = vpack.c.bf16 %v6451_v16, %v6450_v5  ;;  %10535 = vmatpush3.bf16.msra.mxu1 %v11000_v9 }
0x1259   :  { %10574 = vmatprep.subr.bf16.mxu0 %v15063_v62  ;;  %10536 = vmatprep.subr.bf16.mxu1 %v11001_v2 }
0x125a   :  { %10494 = vmatprep.mubr.bf16.mxu1 %v6460_v18  ;;  %10526 = vmatprep.mubr.bf16.mxu0 %v6460_v18 }
0x125b   :  { %10495 = vmatmul.mubr.bf16.gmra.mrb[136].mxu1 %v6461_v32  ;;  %10527 = vmatmul.mubr.bf16.gmra.mrb[128].mxu0 %v6461_v32 }
0x125c   :  { %10575 = vmatpush3.bf16.msra.mxu0 %v10996_v17  ;;  %10578 = vmatprep.mubr.msk.bf16.mxu0 %vm12129_vm0, %v15063_v62 }
0x125d   :  { %10576 = vmatprep.subr.bf16.mxu0 %v15063_v62  ;;  %10537 = vmatpush3.bf16.msra.mxu1 %v11001_v2 }
0x125e   :  { %10538 = vmatprep.subr.bf16.mxu1 %v11002_v26 }
0x1260   :  { %10577 = vmatpush3.bf16.msra.mxu0 %v10997_v23 }
0x1261   :  { %10602 = vmatprep.subr.bf16.mxu0 %v15063_v62  ;;  %10539 = vmatpush3.bf16.msra.mxu1 %v11002_v26 }
0x1262   :  { %10540 = vmatprep.subr.bf16.mxu1 %v11003_v47 }
0x1263   :  { %10579 = vmatmul.mubr.bf16.vlgmr.msra.gmra.mrb[132].mxu0 %v14104_v60 }
0x1264   :  { %10618 = vmatprep.mubr.msk.bf16.mxu0 %vm12129_vm0, %v15063_v62 }
0x1265   :  { %10541 = vmatpush3.bf16.msra.mxu1 %v11003_v47 }
0x1266   :  { %10542 = vmatprep.subr.bf16.mxu1 %v11004_v13 }
0x1269   :  { %10543 = vmatpush3.bf16.msra.mxu1 %v11004_v13 }
0x126a   :  { %10544 = vmatprep.subr.bf16.mxu1 %v11005_v10 }
0x126d   :  { %10545 = vmatpush3.bf16.msra.mxu1 %v11005_v10 }
0x126e   :  { %10582 = vmatprep.subr.bf16.mxu1 %v15063_v62 }
0x1316   :  { %v14189_v55 = vpop.f32.mrb[124].mxu1  ;;  %v10516_v30 = vpop.f32.mrb[116].mxu0 }
0x1317   :  { %v14192_v39 = vadd.f32 %v10516_v30, %v14187_v25  ;;  %v14194_v61 = vpop.f32.mrb[125].mxu1  ;;  %v6947_v53 = vpop.f32.mrb[117].mxu0 }
0x1318   :  { %v14197_v59 = vadd.f32 %v14187_v25, %v6947_v53  ;;  %v14199_v42 = vpop.f32.mrb[126].mxu1  ;;  %v10517_v49 = vpop.f32.mrb[118].mxu0 }
0x1319   :  { %v9348_v27 = vmul.f32 -1.442695, %v14192_v39  ;;  %v14203_v40 = vadd.f32 %v10517_v49, %v14187_v25  ;;  %v14205_v19 = vpop.f32.mrb[127].mxu1  ;;  %v6950_v6 = vpop.f32.mrb[119].mxu0 }
0x131a   :  { %v9346_v45 = vmul.f32 -1.442695, %v14197_v59  ;;  %v14209_v41 = vadd.f32 %v14187_v25, %v6950_v6 }
0x131b   :  { %11382 = vpow2.f32 %v9348_v27  ;;  %v9349_v4 = vmul.f32 -1.442695, %v14203_v40 }
0x131c   :  { %11384 = vpow2.f32 %v9346_v45  ;;  %v9347_v33 = vmul.f32 -1.442695, %v14209_v41 }
0x131d   :  { %11386 = vpow2.f32 %v9349_v4 }
0x131e   :  { %v14213_v20 = vpop.f32.mrb[128].mxu1  ;;  %v10520_v43 = vpop.f32.mrb[120].mxu0  ;;  %11388 = vpow2.f32 %v9347_v33 }
0x131f   :  { %v14215_v58 = vpop.f32.mrb[129].mxu1  ;;  %v6963_v51 = vpop.f32.mrb[121].mxu0  ;;  %v14222_v5 = vadd.f32 %v10520_v43, %v14187_v25 }
0x1320   :  { %v14217_v29 = vpop.f32.mrb[130].mxu1  ;;  %v10521_v21 = vpop.f32.mrb[122].mxu0  ;;  %v14229_v18 = vadd.f32 %v14187_v25, %v6963_v51 }
0x1321   :  { %v14219_v15 = vpop.f32.mrb[131].mxu1  ;;  %v6966_v34 = vpop.f32.mrb[123].mxu0  ;;  %v9352_v2 = vmul.f32 -1.442695, %v14222_v5  ;;  %v14238_v53 = vadd.f32 %v10521_v21, %v14187_v25 }
0x1322   :  { %v9350_v10 = vmul.f32 -1.442695, %v14229_v18  ;;  %v14243_v27 = vadd.f32 %v14187_v25, %v6966_v34 }
0x1323   :  { %v9353_v43 = vmul.f32 -1.442695, %v14238_v53 }
0x1324   :  { %v9351_v34 = vmul.f32 -1.442695, %v14243_v27 }
0x1325   :  { %v11383_v37 = vpop.eup %11382 }
0x1326   :  { %v14224_v31 = vpop.f32.mrb[132].mxu1  ;;  %v10524_v28 = vpop.f32.mrb[124].mxu0  ;;  %v7060_v38 = vadd.f32 1.0, %v11383_v37 }
0x1327   :  { %v14226_v24 = vpop.f32.mrb[133].mxu1  ;;  %v6979_v16 = vpop.f32.mrb[125].mxu0  ;;  %v14253_v51 = vadd.f32 %v10524_v28, %v14187_v25 }
0x1328   :  { %v11385_v32 = vpop.eup %11384  ;;  %v14231_v17 = vpop.f32.mrb[134].mxu1  ;;  %11390 = vrcp.f32 %v7060_v38 }
0x1329   :  { %v10525_v23 = vpop.f32.mrb[126].mxu0  ;;  %v7058_v7 = vadd.f32 1.0, %v11385_v32  ;;  %v14233_v50 = vpop.f32.mrb[135].mxu1  ;;  %v14263_v32 = vadd.f32 %v14187_v25, %v6979_v16 }
0x132a   :  { %v11387_v9 = vpop.eup %11386  ;;  %v6982_v26 = vpop.f32.mrb[127].mxu0 }
0x132b   :  { %v7061_v47 = vadd.f32 1.0, %v11387_v9  ;;  %v11389_v13 = vpop.eup %11388  ;;  %11392 = vrcp.f32 %v7058_v7  ;;  %v9356_v9 = vmul.f32 -1.442695, %v14253_v51 }
0x132c   :  { %v7059_v30 = vadd.f32 1.0, %v11389_v13 }
0x132d   :  { %11394 = vrcp.f32 %v7061_v47 }
0x132e   :  { %11396 = vpow2.f32 %v9352_v2  ;;  %v14240_v49 = vpop.f32.mrb[136].mxu1  ;;  %v10528_v6 = vpop.f32.mrb[128].mxu0  ;;  %v14267_v2 = vadd.f32 %v10525_v23, %v14187_v25 }
0x132f   :  { %11398 = vrcp.f32 %v7059_v30  ;;  %v14245_v45 = vpop.f32.mrb[137].mxu1  ;;  %v14247_v4 = vpop.f32.mrb[129].mxu0  ;;  %v14273_v30 = vadd.f32 %v14187_v25, %v6982_v26 }
0x1330   :  { %11400 = vpow2.f32 %v9350_v10  ;;  %v14249_v33 = vpop.f32.mrb[138].mxu1  ;;  %v14255_v21 = vpop.f32.mrb[130].mxu0  ;;  %v9354_v10 = vmul.f32 -1.442695, %v14263_v32  ;;  %v9357_v57 = vmul.f32 -1.442695, %v14267_v2 }
0x1331   :  { %v14257_v37 = vpop.f32.mrb[139].mxu1  ;;  %v14259_v38 = vpop.f32.mrb[131].mxu0  ;;  %11402 = vpow2.f32 %v9353_v43 }
0x1332   :  { %v11391_v7 = vpop.eup %11390  ;;  %11404 = vpow2.f32 %v9351_v34 }
0x1333   :  { %v7108_v52 = vmul.f32 %v11391_v7, %v14192_v39  ;;  %11406 = vpow2.f32 %v9356_v9  ;;  %v11006_v7 = vld [vmem:[#allocation16 + $0x80] sm:$0xff]   ;;  %v11007_v9 = vld [vmem:[#allocation16 + $0x88] sm:$0xff]  }
0x1334   :  { %11408 = vpow2.f32 %v9354_v10 }
0x1335   :  { %v11393_v28 = vpop.eup %11392  ;;  %11410 = vpow2.f32 %v9357_v57  ;;  %v11008_v57 = vld [vmem:[#allocation16 + $0x90] sm:$0xff]  }
0x1336   :  { %v14269_v47 = vpop.f32.mrb[132].mxu0  ;;  %v7106_v34 = vmul.f32 %v11393_v28, %v14197_v59  ;;  %v14285_v28 = vadd.f32 %v10528_v6, %v14187_v25  ;;  %v11009_v6 = vld [vmem:[#allocation16 + $0x98] sm:$0xff]  }
0x1337   :  { %v11395_v13 = vpop.eup %11394  ;;  %v10580_v3 = vpop.f32.mrb[133].mxu0 }
0x1338   :  { %v11397_v16 = vpop.eup %11396  ;;  %v7109_v43 = vmul.f32 %v11395_v13, %v14203_v40  ;;  %v14277_v54 = vpop.f32.mrb[134].mxu0  ;;  %v9355_v3 = vmul.f32 -1.442695, %v14273_v30 }
0x1339   :  { %v11399_v23 = vpop.eup %11398  ;;  %v10581_v63 = vpop.f32.mrb[135].mxu0  ;;  %v7064_v46 = vadd.f32 1.0, %v11397_v16  ;;  %v9360_v16 = vmul.f32 -1.442695, %v14285_v28 }
0x133a   :  { %v11401_v11 = vpop.eup %11400  ;;  %v7123_v44 = vpack.c.bf16 %v7109_v43, %v7108_v52  ;;  %v7107_v26 = vmul.f32 %v11399_v23, %v14209_v41  ;;  %11412 = vpow2.f32 %v9355_v3  ;;  %v14291_v23 = vadd.f32 %v14187_v25, %v14247_v4 }
0x133b   :  { %v7062_v40 = vadd.f32 1.0, %v11401_v11  ;;  %v11403_v13 = vpop.eup %11402  ;;  %11414 = vrcp.f32 %v7064_v46 }
0x133c   :  { %v7122_v39 = vpack.c.bf16 %v7107_v26, %v7106_v34  ;;  %v7065_v63 = vadd.f32 1.0, %v11403_v13  ;;  %v11405_v59 = vpop.eup %11404  ;;  %v9358_v4 = vmul.f32 -1.442695, %v14291_v23 }
0x133d   :  { %11416 = vrcp.f32 %v7062_v40  ;;  %v7063_v52 = vadd.f32 1.0, %v11405_v59  ;;  %v11407_v41 = vpop.eup %11406 }
0x133e   :  { %10546 = vmatprep.mubr.bf16.mxu1 %v7122_v39  ;;  %11418 = vrcp.f32 %v7065_v63  ;;  %v7068_v11 = vadd.f32 1.0, %v11407_v41  ;;  %v11409_v10 = vpop.eup %11408  ;;  %v14296_v39 = vadd.f32 %v14255_v21, %v14187_v25  ;;  %v14301_v63 = vadd.f32 %v14187_v25, %v14259_v38 }
0x133f   :  { %10547 = vmatmul.mubr.bf16.vlgmr.msra.gmra.mrb[140].mxu1 %v7123_v44  ;;  %11420 = vrcp.f32 %v7063_v52  ;;  %v7066_v46 = vadd.f32 1.0, %v11409_v10  ;;  %v11411_v44 = vpop.eup %11410 }
0x1340   :  { %10583 = vmatpush3.bf16.msra.mxu1 %v11006_v7  ;;  %11422 = vrcp.f32 %v7068_v11  ;;  %v7069_v43 = vadd.f32 1.0, %v11411_v44  ;;  %v9371_v7 = vld [vmem:[#allocation13 + $0x2] ss:$0 sm:$0xff]  ;;  %v9361_v11 = vmul.f32 -1.442695, %v14296_v39 }
0x1341   :  { %10584 = vmatprep.subr.bf16.mxu1 %v15063_v62  ;;  %11424 = vrcp.f32 %v7066_v46  ;;  %v14306_v21 = vadd.f32 %v9371_v7, %v14269_v47  ;;  %v11011_v46 = vld [vmem:[#allocation16 + $0xa8] sm:$0xff]  }
0x1342   :  { %11426 = vrcp.f32 %v7069_v43 }
0x1343   :  { %11428 = vpow2.f32 %v9360_v16 }
0x1344   :  { %10585 = vmatpush3.bf16.msra.mxu1 %v11007_v9  ;;  %v11413_v34 = vpop.eup %11412  ;;  %v11010_v9 = vld [vmem:[#allocation16 + $0xa0] sm:$0xff]  }
0x1345   :  { %10586 = vmatprep.subr.bf16.mxu1 %v15063_v62  ;;  %v11415_v26 = vpop.eup %11414  ;;  %v7067_v3 = vadd.f32 1.0, %v11413_v34  ;;  %v11012_v34 = vld [vmem:[#allocation16 + $0xb0] sm:$0xff]  }
0x1346   :  { %v7112_v59 = vmul.f32 %v11415_v26, %v14222_v5  ;;  %v9359_v5 = vmul.f32 -1.442695, %v14301_v63 }
0x1347   :  { %v11417_v40 = vpop.eup %11416  ;;  %11430 = vrcp.f32 %v7067_v3 }
0x1348   :  { %10587 = vmatpush3.bf16.msra.mxu1 %v11008_v57  ;;  %v11419_v13 = vpop.eup %11418  ;;  %v14311_v57 = vadd.f32 %v9371_v7, %v14277_v54  ;;  %v7110_v25 = vmul.f32 %v11417_v40, %v14229_v18  ;;  %11432 = vpow2.f32 %v9358_v4 }
0x1349   :  { %10588 = vmatprep.subr.bf16.mxu1 %v15063_v62  ;;  %v7113_v52 = vmul.f32 %v11419_v13, %v14238_v53  ;;  %v11421_v41 = vpop.eup %11420  ;;  %v9380_v53 = vmul.f32 -1.442695, %v14306_v21  ;;  %11434 = vpow2.f32 %v9361_v11 }
0x134a   :  { %v7111_v38 = vmul.f32 %v11421_v41, %v14243_v27  ;;  %v11423_v44 = vpop.eup %11422  ;;  %v9381_v54 = vmul.f32 -1.442695, %v14311_v57  ;;  %11436 = vpow2.f32 %v9359_v5 }
0x134b   :  { %v7125_v10 = vpack.c.bf16 %v7113_v52, %v7112_v59  ;;  %v11425_v16 = vpop.eup %11424  ;;  %v7116_v43 = vmul.f32 %v11423_v44, %v14253_v51  ;;  %11438 = vpow2.f32 %v9380_v53 }
0x134c   :  { %10589 = vmatpush3.bf16.msra.mxu1 %v11009_v6  ;;  %v7124_v47 = vpack.c.bf16 %v7111_v38, %v7110_v25  ;;  %v11427_v18 = vpop.eup %11426  ;;  %11440 = vpow2.f32 %v9381_v54  ;;  %v7114_v3 = vmul.f32 %v11425_v16, %v14263_v32 }
0x134d   :  { %10590 = vmatprep.subr.bf16.mxu1 %v15063_v62  ;;  %v11429_v27 = vpop.eup %11428  ;;  %v7117_v6 = vmul.f32 %v11427_v18, %v14267_v2 }
0x134e   :  { %10550 = vmatprep.mubr.bf16.mxu1 %v7124_v47  ;;  %v7072_v13 = vadd.f32 1.0, %v11429_v27 }
0x134f   :  { %10551 = vmatmul.mubr.bf16.gmra.mrb[144].mxu1 %v7125_v10  ;;  %v7127_v40 = vpack.c.bf16 %v7117_v6, %v7116_v43  ;;  %v9383_v43 = vld [vmem:[#allocation14 + $0x2] ss:$0 sm:$0xff] }
0x1350   :  { %10591 = vmatpush3.bf16.msra.mxu1 %v11010_v9  ;;  %v11013_v9 = vld [vmem:[#allocation16 + $0xb8] sm:$0xff]   ;;  %11442 = vrcp.f32 %v7072_v13  ;;  %v11019_v13 = vld [vmem:[#allocation19 + $0xa8] sm:$0xff]  }
0x1351   :  { %10592 = vmatprep.subr.bf16.mxu1 %v15063_v62  ;;  %v11431_v26 = vpop.eup %11430 }
0x1352   :  { %v7115_v7 = vmul.f32 %v11431_v26, %v14273_v30  ;;  %v11433_v59 = vpop.eup %11432 }
0x1353   :  { %v7070_v51 = vadd.f32 1.0, %v11433_v59  ;;  %v11435_v2 = vpop.eup %11434  ;;  %v14344_v59 = vld [vmem:[#allocation22 + $0x2] ss:$0 sm:$0xff] }
0x1354   :  { %10593 = vmatpush3.bf16.msra.mxu1 %v11011_v46  ;;  %v7126_v4 = vpack.c.bf16 %v7115_v7, %v7114_v3  ;;  %v7073_v52 = vadd.f32 1.0, %v11435_v2  ;;  %v11437_v41 = vpop.eup %11436 }
0x1355   :  { %10594 = vmatprep.subr.bf16.mxu1 %v15063_v62  ;;  %11444 = vrcp.f32 %v7070_v51  ;;  %v11439_v32 = vpop.eup %11438  ;;  %v7071_v30 = vadd.f32 1.0, %v11437_v41  ;;  %v14348_v51 = vadd.f32 %v14344_v59, %v14205_v19  ;;  %v14357_v41 = vadd.f32 %v14344_v59, %v14194_v61  ;;  %v9384_v19 = vld [vmem:[%s15008_s28 + $0x2] ss:$0 sm:$0xff] }
0x1356   :  { %10554 = vmatprep.mubr.bf16.mxu1 %v7126_v4  ;;  %11446 = vrcp.f32 %v7073_v52  ;;  %v11441_v11 = vpop.eup %11440  ;;  %v7532_v25 = vadd.f32 1.0, %v11439_v32  ;;  %v11020_v4 = vld [vmem:[#allocation19 + $0xb0] sm:$0xff]   ;;  %v14353_v52 = vadd.f32 %v14344_v59, %v14226_v24  ;;  %v14361_v32 = vadd.f32 %v14189_v55, %v14344_v59  ;;  %v15128_v61 = vld [vmem:[#allocation87_spill] sm:$0xff] }
0x1357   :  { %10555 = vmatmul.mubr.bf16.gmra.mrb[148].mxu1 %v7127_v40  ;;  %11448 = vrcp.f32 %v7071_v30  ;;  %v7533_v38 = vadd.f32 1.0, %v11441_v11  ;;  %v11018_v40 = vld [vmem:[#allocation19 + $0xa0] sm:$0xff]   ;;  %v9319_v2 = vmul.f32 -1.442695, %v14348_v51  ;;  %v9318_v11 = vmul.f32 -1.442695, %v14357_v41 }
0x1358   :  { %10595 = vmatpush3.bf16.msra.mxu1 %v11012_v34  ;;  %11450 = vrcp.f32 %v7532_v25  ;;  %v9326_v30 = vmul.f32 -1.442695, %v14353_v52  ;;  %v14368_v24 = vadd.f32 %v14344_v59, %v14233_v50  ;;  %v456_v50 = vld [vmem:[%s15126_s5] sm:$0xff] }
0x1359   :  { %10596 = vmatprep.subr.bf16.mxu1 %v15063_v62  ;;  %11452 = vrcp.f32 %v7533_v38  ;;  %v15127_v38 = vld [vmem:[#allocation67_spill] sm:$0xff] }
0x135a   :  { %v11443_v10 = vpop.eup %11442  ;;  %11454 = vpow2.f32 %v9319_v2 }
0x135b   :  { %v7120_v47 = vmul.f32 %v11443_v10, %v14285_v28  ;;  %v4923_v10 = vadd.f32 %v15128_v61, %v15127_v38  ;;  %11456 = vpow2.f32 %v9326_v30  ;;  %v14418_v30 = vadd.f32 %v14344_v59, %v14257_v37 }
0x135c   :  { %10597 = vmatpush3.bf16.msra.mxu1 %v11013_v9  ;;  %v11021_v9 = vld [vmem:[#allocation19 + $0xb8] sm:$0xff]   ;;  %11458 = vpow2.f32 %v9318_v11  ;;  %v14427_v61 = vadd.f32 %v14240_v49, %v14344_v59 }
0x135d   :  { %v9331_v37 = vmul.f32 -1.442695, %v14418_v30 }
0x135f   :  { %v11445_v5 = vpop.eup %11444 }
0x1360   :  { %v11447_v53 = vpop.eup %11446  ;;  %v7118_v16 = vmul.f32 %v11445_v5, %v14291_v23  ;;  %v11570_v23 = vld [vmem:[%s15005_s9] sm:$0xff]   ;;  %v15129_v5 = vld [vmem:[#allocation68_spill] sm:$0xff] }
0x1361   :  { %v7121_v46 = vmul.f32 %v11447_v53, %v14296_v39  ;;  %v11449_v44 = vpop.eup %11448  ;;  %v11014_v39 = vld [vmem:[#allocation19 + $0x80] sm:$0xff]  }
0x1362   :  { %v11451_v54 = vpop.eup %11450  ;;  %v7119_v18 = vmul.f32 %v11449_v44, %v14301_v63  ;;  %10603 = vmatpush3.bf16.msra.mxu0 %v11014_v39  ;;  %v11015_v63 = vld [vmem:[#allocation19 + $0x88] sm:$0xff]   ;;  %v9320_v44 = vmul.f32 -1.442695, %v14361_v32 }
0x1363   :  { %v7129_v27 = vpack.c.bf16 %v7121_v46, %v7120_v47  ;;  %v11453_v6 = vpop.eup %11452  ;;  %v7538_v34 = vmul.f32 %v11451_v54, %v14306_v21  ;;  %10604 = vmatprep.subr.bf16.mxu0 %v15063_v62  ;;  %v11016_v21 = vld [vmem:[#allocation19 + $0x90] sm:$0xff]   ;;  %v15130_v53 = vld [vmem:[#allocation88_spill] sm:$0xff]  ;;  %v14377_v54 = vadd.f32 %v14199_v42, %v14344_v59 }
0x1364   :  { %v7539_v26 = vmul.f32 %v11453_v6, %v14311_v57  ;;  %v7128_v3 = vpack.c.bf16 %v7119_v18, %v7118_v16  ;;  %v11017_v57 = vld [vmem:[#allocation19 + $0x98] sm:$0xff]   ;;  %v4924_v47 = vadd.f32 %v15130_v53, %v15129_v5  ;;  %v9327_v6 = vmul.f32 -1.442695, %v14368_v24 }
0x1365   :  { %v7550_v7 = vmul.f32 %v9383_v43, %v7538_v34  ;;  %11460 = vpow2.f32 %v9320_v44 }
0x1366   :  { %10558 = vmatprep.mubr.bf16.mxu1 %v7128_v3  ;;  %v7551_v28 = vmul.f32 %v9383_v43, %v7539_v26  ;;  %10605 = vmatpush3.bf16.msra.mxu0 %v11015_v63  ;;  %v14383_v43 = vadd.f32 %v14224_v31, %v14344_v59  ;;  %v9321_v26 = vmul.f32 -1.442695, %v14377_v54  ;;  %v14389_v3 = vadd.f32 %v14344_v59, %v14215_v58 }
0x1367   :  { %10559 = vmatmul.mubr.bf16.gmra.mrb[152].mxu1 %v7129_v27  ;;  %7552 = vadd.xlane.f32.xlu1 %v7550_v7  ;;  %v457_v27 = vld [vmem:[%s15126_s5 + $0x8] sm:$0xff]  ;;  %11462 = vpow2.f32 %v9327_v6  ;;  %v14403_v58 = vadd.f32 %v14344_v59, %v14219_v15 }
0x1368   :  { %7554 = vadd.xlane.f32.xlu0 %v7551_v28  ;;  %10598 = vmatprep.mubr.msk.bf16.mxu1 %vm12129_vm0, %v15063_v62  ;;  %v11455_v28 = vpop.eup %11454  ;;  %v9328_v31 = vmul.f32 -1.442695, %v14383_v43  ;;  %11464 = vpow2.f32 %v9321_v26  ;;  %v9322_v39 = vmul.f32 -1.442695, %v14389_v3 }
0x1369   :  { %10606 = vmatprep.subr.bf16.mxu0 %v15063_v62  ;;  %v6681_v63 = vadd.f32 1.0, %v11455_v28 }
0x136a   :  { %10607 = vmatpush3.bf16.msra.mxu0 %v11016_v21  ;;  %v11457_v21 = vpop.eup %11456  ;;  %11466 = vpow2.f32 %v9328_v31 }
0x136b   :  { %10608 = vmatprep.subr.bf16.mxu0 %v15063_v62  ;;  %11468 = vpow2.f32 %v9322_v39  ;;  %v6688_v15 = vadd.f32 1.0, %v11457_v21 }
0x136c   :  { %11470 = vrcp.f32 %v6681_v63  ;;  %v14446_v63 = vld [vmem:[#allocation23 + $0x2] ss:$0 sm:$0xff] }
0x136e   :  { %10609 = vmatpush3.bf16.msra.mxu0 %v11017_v57 }
0x136f   :  { %10599 = vmatmul.mubr.bf16.vlgmr.msra.gmra.mrb[156].mxu1 %v14104_v60  ;;  %10610 = vmatprep.subr.bf16.mxu0 %v15063_v62 }
0x1370   :  { %10624 = vmatprep.mubr.msk.bf16.mxu1 %vm835_vm1, %v11570_v23  ;;  %v14396_v23 = vadd.f32 %v14231_v17, %v14344_v59  ;;  %v11459_v17 = vpop.eup %11458 }
0x1372   :  { %10611 = vmatpush3.bf16.msra.mxu0 %v11018_v40  ;;  %v9329_v57 = vmul.f32 -1.442695, %v14396_v23  ;;  %v14408_v40 = vadd.f32 %v14344_v59, %v14245_v45  ;;  %v6680_v45 = vadd.f32 1.0, %v11459_v17 }
0x1373   :  { %10612 = vmatprep.subr.bf16.mxu0 %v15063_v62 }
0x1374   :  { %11472 = vpow2.f32 %v9329_v57  ;;  %v9330_v2 = vmul.f32 -1.442695, %v14408_v40 }
0x1376   :  { %10613 = vmatpush3.bf16.msra.mxu0 %v11019_v13  ;;  %v14412_v13 = vadd.f32 %v14213_v20, %v14344_v59  ;;  %v14423_v20 = vadd.f32 %v14217_v29, %v14344_v59 }
0x1377   :  { %10614 = vmatprep.subr.bf16.mxu0 %v15063_v62 }
0x1378   :  { %v9324_v11 = vmul.f32 -1.442695, %v14412_v13  ;;  %v9325_v29 = vmul.f32 -1.442695, %v14423_v20 }
0x137a   :  { %10615 = vmatpush3.bf16.msra.mxu0 %v11020_v4  ;;  %v9323_v4 = vmul.f32 -1.442695, %v14403_v58 }
0x137b   :  { %10616 = vmatprep.subr.bf16.mxu0 %v15063_v62 }
0x137c   :  { %11474 = vpow2.f32 %v9323_v4 }
0x137d   :  { %11476 = vrcp.f32 %v6688_v15 }
0x137e   :  { %10617 = vmatpush3.bf16.msra.mxu0 %v11021_v9  ;;  %v11461_v9 = vpop.eup %11460  ;;  %11478 = vpow2.f32 %v9330_v2 }
0x137f   :  { %10640 = vmatprep.subr.bf16.mxu0 %v15063_v62  ;;  %11480 = vrcp.f32 %v6680_v45 }
0x1380   :  { %11482 = vpow2.f32 %v9324_v11 }
0x13f4   :  { %v7553_v25 = vpop.xlane.xlu1 %7552 }
0x13f5   :  { %v7562_v55 = vadd.f32 %v9384_v19, %v7553_v25  ;;  %v7555_v46 = vpop.xlane.xlu0 %7554  ;;  %v6682_v25 = vadd.f32 1.0, %v11461_v9 }
0x13f6   :  { %v7563_v16 = vadd.f32 %v9384_v19, %v7555_v46  ;;  %v11463_v19 = vpop.eup %11462 }
0x13f7   :  { %v7564_v18 = vadd.f32 %v7562_v55, %v4923_v10  ;;  %7811 = vperm.xlu0 %10789, %v7562_v55   ;;  %v11465_v38 = vpop.eup %11464  ;;  %v6689_v5 = vadd.f32 1.0, %v11463_v19  ;;  %11484 = vrcp.f32 %v6682_v25 }
0x13f8   :  { %v7565_v34 = vadd.f32 %v7563_v16, %v4924_v47  ;;  %7816 = vperm.xlu1 %10788, %v7563_v16   ;;  %v11467_v47 = vpop.eup %11466  ;;  %v6683_v46 = vadd.f32 1.0, %v11465_v38  ;;  %v9332_v16 = vmul.f32 -1.442695, %v14427_v61  ;;  %11486 = vpow2.f32 %v9331_v37 }
0x13f9   :  { %v8822_v42 = vmul.f32 %v7564_v18, %v456_v50  ;;  %v11469_v49 = vpop.eup %11468  ;;  %v14442_v50 = vadd.f32 %v14249_v33, %v14344_v59  ;;  %11488 = vrcp.f32 %v6689_v5 }
0x13fa   :  { %v8823_v7 = vmul.f32 %v7565_v34, %v457_v27  ;;  %v11471_v18 = vpop.eup %11470  ;;  %v6690_v27 = vadd.f32 1.0, %v11467_v47  ;;  %11490 = vpow2.f32 %v9325_v29  ;;  %v6684_v34 = vadd.f32 1.0, %v11469_v49 }
0x13fb   :  { %8824 = vst.msk [vmem:[%s12313_s6] sm:$0xff] %vm8805_vm9, %v8822_v42  ;;  %v11473_v6 = vpop.eup %11472  ;;  %11492 = vrcp.f32 %v6683_v46  ;;  %v6729_v26 = vmul.f32 %v11471_v18, %v14348_v51 }
0x13fc   :  { %8825 = vst.msk [vmem:[%s12313_s6 + $0x8] sm:$0xff] %vm8805_vm9, %v8823_v7  ;;  %v11475_v42 = vpop.eup %11474  ;;  %11494 = vpow2.f32 %v9332_v16  ;;  %v9333_v7 = vmul.f32 -1.442695, %v14442_v50  ;;  %v6691_v31 = vadd.f32 1.0, %v11473_v6  ;;  %s15189_s6 = sld [smem:[#allocation63_spill]] }
0x13fd   :  { %v11477_v28 = vpop.eup %11476  ;;  %11496 = vrcp.f32 %v6690_v27  ;;  %v6685_v59 = vadd.f32 1.0, %v11475_v42  ;;  %v6755_v17 = vmul.f32 %v14446_v63, %v6729_v26 }
0x13fe   :  { %v11479_v39 = vpop.eup %11478  ;;  %11498 = vrcp.f32 %v6684_v34  ;;  %v6736_v57 = vmul.f32 %v11477_v28, %v14353_v52 }
0x13ff   :  { %v11481_v33 = vpop.eup %11480  ;;  %11500 = vpow2.f32 %v9333_v7  ;;  %v6692_v51 = vadd.f32 1.0, %v11479_v39 }
0x1400   :  { %v11483_v21 = vpop.eup %11482  ;;  %11502 = vrcp.f32 %v6691_v31  ;;  %v6728_v9 = vmul.f32 %v11481_v33, %v14357_v41  ;;  %v6762_v25 = vmul.f32 %v14446_v63, %v6736_v57 }
0x1401   :  { %v11485_v4 = vpop.eup %11484  ;;  %v6686_v45 = vadd.f32 1.0, %v11483_v21  ;;  %11504 = vrcp.f32 %v6685_v59 }
0x1402   :  { %v11487_v15 = vpop.eup %11486  ;;  %v6730_v11 = vmul.f32 %v11485_v4, %v14361_v32  ;;  %11506 = vrcp.f32 %v6692_v51  ;;  %v6754_v47 = vmul.f32 %v14446_v63, %v6728_v9 }
0x1403   :  { %v11489_v2 = vpop.eup %11488  ;;  %v6693_v52 = vadd.f32 1.0, %v11487_v15  ;;  %11508 = vrcp.f32 %v6686_v45 }
0x1404   :  { %v11491_v19 = vpop.eup %11490  ;;  %v6737_v5 = vmul.f32 %v11489_v2, %v14368_v24  ;;  %v6756_v49 = vmul.f32 %v14446_v63, %v6730_v11 }
0x1405   :  { %v11493_v38 = vpop.eup %11492  ;;  %v6687_v41 = vadd.f32 1.0, %v11491_v19  ;;  %11510 = vrcp.f32 %v6693_v52 }
0x1406   :  { %v11495_v37 = vpop.eup %11494  ;;  %v6731_v46 = vmul.f32 %v11493_v38, %v14377_v54  ;;  %v6763_v24 = vmul.f32 %v14446_v63, %v6737_v5 }
0x1407   :  { %v11497_v29 = vpop.eup %11496  ;;  %v6694_v16 = vadd.f32 1.0, %v11495_v37  ;;  %11512 = vrcp.f32 %v6687_v41 }
0x1408   :  { %v11499_v32 = vpop.eup %11498  ;;  %v6738_v6 = vmul.f32 %v11497_v29, %v14383_v43  ;;  %v6757_v7 = vmul.f32 %v14446_v63, %v6731_v46 }
0x1409   :  { %v11501_v27 = vpop.eup %11500  ;;  %v6732_v54 = vmul.f32 %v11499_v32, %v14389_v3  ;;  %11514 = vrcp.f32 %v6694_v16  ;;  %v9385_v32 = vld [vmem:[#allocation17 + $0x2] ss:$0 sm:$0xff] }
0x140a   :  { %v11503_v42 = vpop.eup %11502  ;;  %v6695_v39 = vadd.f32 1.0, %v11501_v27  ;;  %v6764_v33 = vmul.f32 %v14446_v63, %v6738_v6 }
0x140b   :  { %v11505_v31 = vpop.eup %11504  ;;  %v6739_v43 = vmul.f32 %v11503_v42, %v14396_v23  ;;  %v6758_v57 = vmul.f32 %v14446_v63, %v6732_v54 }
0x140c   :  { %v11507_v59 = vpop.eup %11506  ;;  %v6733_v21 = vmul.f32 %v11505_v31, %v14403_v58  ;;  %11516 = vrcp.f32 %v6695_v39 }
0x140d   :  { %v11509_v3 = vpop.eup %11508  ;;  %v6740_v4 = vmul.f32 %v11507_v59, %v14408_v40  ;;  %v6765_v51 = vmul.f32 %v14446_v63, %v6739_v43 }
0x140e   :  { %v6734_v2 = vmul.f32 %v11509_v3, %v14412_v13  ;;  %v6759_v58 = vmul.f32 %v14446_v63, %v6733_v21  ;;  %v11022_v3 = vld [vmem:[#allocation31 + $0x80] sm:$0xff]  }
0x140f   :  { %v11511_v23 = vpop.eup %11510  ;;  %v6766_v40 = vmul.f32 %v14446_v63, %v6740_v4 }
0x1410   :  { %v6741_v11 = vmul.f32 %v11511_v23, %v14418_v30  ;;  %v6760_v52 = vmul.f32 %v14446_v63, %v6734_v2  ;;  %v11024_v23 = vld [vmem:[#allocation31 + $0x90] sm:$0xff]   ;;  %v11025_v2 = vld [vmem:[#allocation31 + $0x98] sm:$0xff]  }
0x1411   :  { %v11513_v19 = vpop.eup %11512 }
0x1412   :  { %v14430_v10 = vpop.f32.mrb[140].mxu1  ;;  %v6735_v38 = vmul.f32 %v11513_v19, %v14423_v20  ;;  %v6767_v13 = vmul.f32 %v14446_v63, %v6741_v11  ;;  %v11027_v19 = vld [vmem:[#allocation31 + $0xa8] sm:$0xff]   ;;  %v11028_v11 = vld [vmem:[#allocation31 + $0xb0] sm:$0xff]  }
0x1413   :  { %v14432_v53 = vpop.f32.mrb[141].mxu1 }
0x1414   :  { %v14435_v55 = vpop.f32.mrb[142].mxu1 }
0x1415   :  { %v14437_v44 = vpop.f32.mrb[143].mxu1 }
0x1416   :  { %6772 = vadd.xlane.f32.xlu0 %v6755_v17 }
0x141a   :  { %6786 = vadd.xlane.f32.xlu0 %v6762_v25  ;;  %v11515_v25 = vpop.eup %11514 }
0x141b   :  { %v6742_v37 = vmul.f32 %v11515_v25, %v14427_v61  ;;  %v11517_v5 = vpop.eup %11516 }
0x141c   :  { %6770 = vadd.xlane.f32.xlu1 %v6754_v47  ;;  %v6761_v47 = vmul.f32 %v14446_v63, %v6735_v38  ;;  %v6743_v30 = vmul.f32 %v11517_v5, %v14442_v50  ;;  %v14519_v38 = vld [vmem:[%s15009_s2 + $0x2] ss:$0 sm:$0xff] }
0x141d   :  { %v6768_v29 = vmul.f32 %v14446_v63, %v6742_v37  ;;  %v15131_v37 = vld [vmem:[#allocation71_spill] sm:$0xff] }
0x141e   :  { %6774 = vadd.xlane.f32.xlu0 %v6756_v49  ;;  %v6769_v20 = vmul.f32 %v14446_v63, %v6743_v30 }
0x1420   :  { %6788 = vadd.xlane.f32.xlu1 %v6763_v24 }
0x1422   :  { %v14457_v18 = vpop.f32.mrb[144].mxu1  ;;  %6776 = vadd.xlane.f32.xlu0 %v6757_v7 }
0x1423   :  { %v14461_v34 = vpop.f32.mrb[145].mxu1 }
0x1424   :  { %v14463_v26 = vpop.f32.mrb[146].mxu1  ;;  %6790 = vadd.xlane.f32.xlu1 %v6764_v33 }
0x1425   :  { %v14467_v28 = vpop.f32.mrb[147].mxu1 }
0x1426   :  { %6778 = vadd.xlane.f32.xlu0 %v6758_v57 }
0x1428   :  { %6792 = vadd.xlane.f32.xlu1 %v6765_v51  ;;  %v11023_v51 = vld [vmem:[#allocation31 + $0x88] sm:$0xff]  }
0x142a   :  { %v14473_v17 = vpop.f32.mrb[148].mxu1  ;;  %6780 = vadd.xlane.f32.xlu0 %v6759_v58  ;;  %v11026_v58 = vld [vmem:[#allocation31 + $0xa0] sm:$0xff]  }
0x142b   :  { %v14477_v15 = vpop.f32.mrb[149].mxu1 }
0x142c   :  { %v14479_v9 = vpop.f32.mrb[150].mxu1  ;;  %6794 = vadd.xlane.f32.xlu1 %v6766_v40  ;;  %v11029_v40 = vld [vmem:[#allocation31 + $0xb8] sm:$0xff]  }
0x142d   :  { %v14483_v45 = vpop.f32.mrb[151].mxu1 }
0x142e   :  { %6782 = vadd.xlane.f32.xlu0 %v6760_v52 }
0x1430   :  { %6796 = vadd.xlane.f32.xlu1 %v6767_v13  ;;  %v15132_v13 = vld [vmem:[#allocation114_spill] sm:$0xff] }
0x1431   :  { %v4184_v5 = vadd.f32 %v15132_v13, %v15131_v37  ;;  %v15143_v13 = vld [vmem:[#allocation77_spill] sm:$0xff] }
0x1432   :  { %6784 = vadd.xlane.f32.xlu0 %v6761_v47 }
0x1434   :  { %6798 = vadd.xlane.f32.xlu1 %v6768_v29 }
0x1438   :  { %6800 = vadd.xlane.f32.xlu1 %v6769_v20 }
0x143a   :  { %v14495_v41 = vpop.f32.mrb[152].mxu1 }
0x143b   :  { %v14497_v46 = vpop.f32.mrb[153].mxu1 }
0x143c   :  { %v14499_v61 = vpop.f32.mrb[154].mxu1 }
0x143d   :  { %v14501_v49 = vpop.f32.mrb[155].mxu1 }
0x1442   :  { %v7673_v16 = vpop.f32.mrb[156].mxu1 }
0x1443   :  { %v7674_v27 = vadd.f32 %v9385_v32, %v7673_v16  ;;  %v10600_v6 = vpop.f32.mrb[157].mxu1 }
0x1444   :  { %v7676_v50 = vpop.f32.mrb[158].mxu1 }
0x1445   :  { %v9394_v24 = vmul.f32 -1.442695, %v7674_v27  ;;  %v7677_v42 = vadd.f32 %v9385_v32, %v7676_v50  ;;  %v10601_v54 = vpop.f32.mrb[159].mxu1  ;;  %v15134_v32 = vld [vmem:[#allocation115_spill] sm:$0xff]  ;;  %v15135_v50 = vld [vmem:[#allocation69_spill] sm:$0xff] }
0x1447   :  { %11518 = vpow2.f32 %v9394_v24  ;;  %v9395_v7 = vmul.f32 -1.442695, %v7677_v42  ;;  %v15136_v24 = vld [vmem:[#allocation116_spill] sm:$0xff] }
0x1449   :  { %11520 = vpow2.f32 %v9395_v7 }
0x1451   :  { %v11519_v63 = vpop.eup %11518 }
0x1452   :  { %v7686_v31 = vadd.f32 1.0, %v11519_v63 }
0x1453   :  { %v11521_v39 = vpop.eup %11520 }
0x1454   :  { %11522 = vrcp.f32 %v7686_v31  ;;  %v7687_v43 = vadd.f32 1.0, %v11521_v39  ;;  %v15137_v31 = vld [vmem:[#allocation75_spill] sm:$0xff]  ;;  %v15138_v39 = vld [vmem:[#allocation117_spill] sm:$0xff] }
0x1456   :  { %11524 = vrcp.f32 %v7687_v43  ;;  %v4185_v43 = vadd.f32 %v15138_v39, %v15137_v31 }
0x145e   :  { %v11523_v33 = vpop.eup %11522 }
0x145f   :  { %v7692_v21 = vmul.f32 %v11523_v33, %v7674_v27 }
0x1460   :  { %v11525_v59 = vpop.eup %11524 }
0x1461   :  { %v7693_v57 = vmul.f32 %v11525_v59, %v7677_v42  ;;  %v4183_v42 = vadd.f32 %v15136_v24, %v15135_v50 }
0x1463   :  { %v7694_v4 = vpack.c.bf16 %v7693_v57, %v7692_v21  ;;  %v15139_v57 = vld [vmem:[#allocation74_spill] sm:$0xff] }
0x1465   :  { %10619 = vmatmul.mubr.bf16.vlgmr.msra.gmra.mrb[136].mxu0 %v7694_v4 }
0x1466   :  { %10641 = vmatpush3.bf16.msra.mxu0 %v11022_v3  ;;  %10656 = vmatprep.mubr.msk.bf16.mxu0 %vm12129_vm0, %v15063_v62  ;;  %v15140_v3 = vld [vmem:[#allocation118_spill] sm:$0xff] }
0x1467   :  { %10642 = vmatprep.subr.bf16.mxu0 %v15063_v62  ;;  %v4192_v4 = vadd.f32 %v15140_v3, %v15139_v57 }
0x146a   :  { %10643 = vmatpush3.bf16.msra.mxu0 %v11023_v51 }
0x146b   :  { %10644 = vmatprep.subr.bf16.mxu0 %v15063_v62 }
0x146e   :  { %10645 = vmatpush3.bf16.msra.mxu0 %v11024_v23 }
0x146f   :  { %10646 = vmatprep.subr.bf16.mxu0 %v15063_v62 }
0x1472   :  { %10647 = vmatpush3.bf16.msra.mxu0 %v11025_v2 }
0x1473   :  { %10648 = vmatprep.subr.bf16.mxu0 %v15063_v62 }
0x1476   :  { %10649 = vmatpush3.bf16.msra.mxu0 %v11026_v58  ;;  %v14516_v25 = vpop.permute.xlu0 %7811  ;;  %v15141_v58 = vld [vmem:[#allocation78_spill] sm:$0xff] }
0x1477   :  { %10650 = vmatprep.subr.bf16.mxu0 %v15063_v62  ;;  %v14524_v30 = vpop.permute.xlu1 %7816 }
0x147a   :  { %10651 = vmatpush3.bf16.msra.mxu0 %v11027_v19  ;;  %v15142_v19 = vld [vmem:[#allocation119_spill] sm:$0xff] }
0x147b   :  { %10652 = vmatprep.subr.bf16.mxu0 %v15063_v62 }
0x147e   :  { %10653 = vmatpush3.bf16.msra.mxu0 %v11028_v11  ;;  %v4186_v11 = vadd.f32 %v15142_v19, %v15141_v58 }
0x147f   :  { %10654 = vmatprep.subr.bf16.mxu0 %v15063_v62 }
0x1482   :  { %10655 = vmatpush3.bf16.msra.mxu0 %v11029_v40 }
0x1483   :  { %10680 = vmatprep.subr.bf16.mxu0 %v15063_v62 }
0x1485   :  { %10657 = vmatmul.mubr.bf16.vlgmr.msra.gmra.mrb[140].mxu0 %v14104_v60  ;;  %v15133_v60 = vld [vmem:[#allocation72_spill] sm:$0xff] }
0x1486   :  { %10696 = vmatprep.mubr.msk.bf16.mxu0 %vm12129_vm0, %v15063_v62  ;;  %v4191_v16 = vadd.f32 %v15134_v32, %v15133_v60  ;;  %v15145_v32 = vld [vmem:[#allocation81_spill] sm:$0xff] }
0x14a3   :  { %v6773_v52 = vpop.xlane.xlu0 %6772 }
0x14a4   :  { %v6809_v47 = vadd.f32 %v14519_v38, %v6773_v52 }
0x14a6   :  { %v6825_v29 = vadd.f32 %v6809_v47, %v4184_v5  ;;  %7307 = vperm.xlu1 %10788, %v6809_v47   ;;  %v15144_v5 = vld [vmem:[#allocation120_spill] sm:$0xff] }
0x14a7   :  { %v6787_v20 = vpop.xlane.xlu0 %6786  ;;  %v4193_v47 = vadd.f32 %v15144_v5, %v15143_v13 }
0x14a8   :  { %8827 = vst.msk [vmem:[%s12318_s20 + $0x8] sm:$0xff] %vm8805_vm9, %v6825_v29  ;;  %v6816_v27 = vadd.f32 %v14519_v38, %v6787_v20 }
0x14a9   :  { %v6771_v6 = vpop.xlane.xlu1 %6770 }
0x14aa   :  { %v6832_v54 = vadd.f32 %v6816_v27, %v4191_v16  ;;  %v6808_v7 = vadd.f32 %v14519_v38, %v6771_v6  ;;  %7342 = vperm.xlu1 %10788, %v6816_v27   ;;  %v15146_v16 = vld [vmem:[#allocation121_spill] sm:$0xff] }
0x14ab   :  { %v6775_v63 = vpop.xlane.xlu0 %6774  ;;  %v4187_v27 = vadd.f32 %v15146_v16, %v15145_v32 }
0x14ac   :  { %8834 = vst.msk [vmem:[%s12318_s20 + $0x40] sm:$0xff] %vm8805_vm9, %v6832_v54  ;;  %v6824_v33 = vadd.f32 %v6808_v7, %v4183_v42  ;;  %v6810_v59 = vadd.f32 %v14519_v38, %v6775_v63  ;;  %7302 = vperm.xlu0 %10789, %v6808_v7   ;;  %v15147_v42 = vld [vmem:[#allocation80_spill] sm:$0xff]  ;;  %v15148_v54 = vld [vmem:[#allocation122_spill] sm:$0xff] }
0x14ad   :  { %v6789_v21 = vpop.xlane.xlu1 %6788  ;;  %v4194_v7 = vadd.f32 %v15148_v54, %v15147_v42 }
0x14ae   :  { %8826 = vst.msk [vmem:[%s12318_s20] sm:$0xff] %vm8805_vm9, %v6824_v33  ;;  %v6826_v51 = vadd.f32 %v6810_v59, %v4185_v43  ;;  %v6817_v23 = vadd.f32 %v14519_v38, %v6789_v21  ;;  %7312 = vperm.xlu1 %10788, %v6810_v59   ;;  %v15149_v43 = vld [vmem:[#allocation82_spill] sm:$0xff]  ;;  %v15150_v33 = vld [vmem:[#allocation123_spill] sm:$0xff] }
0x14af   :  { %v6777_v2 = vpop.xlane.xlu0 %6776  ;;  %v4188_v59 = vadd.f32 %v15150_v33, %v15149_v43 }
0x14b0   :  { %8828 = vst.msk [vmem:[%s12318_s20 + $0x10] sm:$0xff] %vm8805_vm9, %v6826_v51  ;;  %v6833_v40 = vadd.f32 %v6817_v23, %v4192_v4  ;;  %v6811_v52 = vadd.f32 %v14519_v38, %v6777_v2  ;;  %7347 = vperm.xlu0 %10789, %v6817_v23   ;;  %v15151_v4 = vld [vmem:[#allocation70_spill] sm:$0xff]  ;;  %v15152_v51 = vld [vmem:[#allocation124_spill] sm:$0xff] }
0x14b1   :  { %v6791_v37 = vpop.xlane.xlu1 %6790  ;;  %v4195_v23 = vadd.f32 %v15152_v51, %v15151_v4 }
0x14b2   :  { %8835 = vst.msk [vmem:[%s12318_s20 + $0x48] sm:$0xff] %vm8805_vm9, %v6833_v40  ;;  %v6827_v29 = vadd.f32 %v6811_v52, %v4186_v11  ;;  %v6818_v20 = vadd.f32 %v14519_v38, %v6791_v37  ;;  %7317 = vperm.xlu1 %10788, %v6811_v52   ;;  %v15153_v11 = vld [vmem:[#allocation83_spill] sm:$0xff]  ;;  %v15154_v40 = vld [vmem:[#allocation125_spill] sm:$0xff] }
0x14b3   :  { %v6779_v60 = vpop.xlane.xlu0 %6778  ;;  %v4189_v52 = vadd.f32 %v15154_v40, %v15153_v11 }
0x14b4   :  { %8829 = vst.msk [vmem:[%s12318_s20 + $0x18] sm:$0xff] %vm8805_vm9, %v6827_v29  ;;  %v6834_v6 = vadd.f32 %v6818_v20, %v4193_v47  ;;  %v6812_v50 = vadd.f32 %v14519_v38, %v6779_v60  ;;  %7352 = vperm.xlu0 %10789, %v6818_v20   ;;  %v15155_v47 = vld [vmem:[#allocation73_spill] sm:$0xff]  ;;  %v15156_v29 = vld [vmem:[#allocation126_spill] sm:$0xff] }
0x14b5   :  { %v6793_v24 = vpop.xlane.xlu1 %6792  ;;  %v4196_v20 = vadd.f32 %v15156_v29, %v15155_v47 }
0x14b6   :  { %8836 = vst.msk [vmem:[%s12318_s20 + $0x50] sm:$0xff] %vm8805_vm9, %v6834_v6  ;;  %v6828_v63 = vadd.f32 %v6812_v50, %v4187_v27  ;;  %v6819_v31 = vadd.f32 %v14519_v38, %v6793_v24  ;;  %7322 = vperm.xlu1 %10788, %v6812_v50   ;;  %v15157_v27 = vld [vmem:[#allocation84_spill] sm:$0xff]  ;;  %v15158_v6 = vld [vmem:[#allocation127_spill] sm:$0xff] }
0x14b7   :  { %v6781_v39 = vpop.xlane.xlu0 %6780  ;;  %v4190_v50 = vadd.f32 %v15158_v6, %v15157_v27  ;;  %v11033_v27 = vld [vmem:[#allocation32 + $0x98] sm:$0xff]   ;;  %v11034_v6 = vld [vmem:[#allocation32 + $0xa0] sm:$0xff]  }
0x14b8   :  { %8830 = vst.msk [vmem:[%s12318_s20 + $0x20] sm:$0xff] %vm8805_vm9, %v6828_v63  ;;  %v6835_v21 = vadd.f32 %v6819_v31, %v4194_v7  ;;  %v6813_v57 = vadd.f32 %v14519_v38, %v6781_v39  ;;  %7357 = vperm.xlu0 %10789, %v6819_v31   ;;  %v15159_v7 = vld [vmem:[#allocation76_spill] sm:$0xff] }
0x14b9   :  { %v6795_v3 = vpop.xlane.xlu1 %6794  ;;  %v15160_v63 = vld [vmem:[#allocation128_spill] sm:$0xff] }
0x14ba   :  { %8837 = vst.msk [vmem:[%s12318_s20 + $0x58] sm:$0xff] %vm8805_vm9, %v6835_v21  ;;  %v6829_v2 = vadd.f32 %v6813_v57, %v4188_v59  ;;  %7327 = vperm.xlu1 %10788, %v6813_v57   ;;  %v6820_v58 = vadd.f32 %v14519_v38, %v6795_v3  ;;  %v4197_v31 = vadd.f32 %v15160_v63, %v15159_v7  ;;  %v15161_v21 = vld [vmem:[#allocation79_spill] sm:$0xff]  ;;  %v15162_v57 = vld [vmem:[#allocation129_spill] sm:$0xff] }
0x14bb   :  { %v6783_v19 = vpop.xlane.xlu0 %6782  ;;  %v4198_v3 = vadd.f32 %v15162_v57, %v15161_v21  ;;  %v11035_v7 = vld [vmem:[#allocation32 + $0xa8] sm:$0xff]   ;;  %v11036_v21 = vld [vmem:[#allocation32 + $0xb0] sm:$0xff]  }
0x14bc   :  { %8831 = vst.msk [vmem:[%s12318_s20 + $0x28] sm:$0xff] %vm8805_vm9, %v6829_v2  ;;  %v6836_v37 = vadd.f32 %v6820_v58, %v4195_v23  ;;  %v6814_v13 = vadd.f32 %v14519_v38, %v6783_v19  ;;  %7362 = vperm.xlu0 %10789, %v6820_v58   ;;  %v9396_v23 = vld [vmem:[#allocation20 + $0x2] ss:$0 sm:$0xff] }
0x14bd   :  { %v6797_v5 = vpop.xlane.xlu1 %6796 }
0x14be   :  { %8838 = vst.msk [vmem:[%s12318_s20 + $0x60] sm:$0xff] %vm8805_vm9, %v6836_v37  ;;  %v6830_v60 = vadd.f32 %v6814_v13, %v4189_v52  ;;  %7332 = vperm.xlu1 %10788, %v6814_v13   ;;  %v6821_v32 = vadd.f32 %v14519_v38, %v6797_v5  ;;  %v15163_v5 = vld [vmem:[#allocation85_spill] sm:$0xff] }
0x14bf   :  { %v6785_v16 = vpop.xlane.xlu0 %6784 }
0x14c0   :  { %8832 = vst.msk [vmem:[%s12318_s20 + $0x30] sm:$0xff] %vm8805_vm9, %v6830_v60  ;;  %v6837_v24 = vadd.f32 %v6821_v32, %v4196_v20  ;;  %v6815_v42 = vadd.f32 %v14519_v38, %v6785_v16  ;;  %7367 = vperm.xlu0 %10789, %v6821_v32   ;;  %v11030_v20 = vld [vmem:[#allocation32 + $0x80] sm:$0xff]   ;;  %v11032_v60 = vld [vmem:[#allocation32 + $0x90] sm:$0xff]  }
0x14c1   :  { %v6799_v54 = vpop.xlane.xlu1 %6798  ;;  %v11573_v32 = vld [vmem:[%s15005_s9 + $0x18] sm:$0xff]   ;;  %v11574_v16 = vld [vmem:[%s15005_s9 + $0x20] sm:$0xff]  }
0x14c2   :  { %8839 = vst.msk [vmem:[%s12318_s20 + $0x68] sm:$0xff] %vm8805_vm9, %v6837_v24  ;;  %v6831_v39 = vadd.f32 %v6815_v42, %v4190_v50  ;;  %7337 = vperm.xlu1 %10788, %v6815_v42   ;;  %v6822_v43 = vadd.f32 %v14519_v38, %v6799_v54  ;;  %v9414_v50 = vld [vmem:[%s15031_s7 + $0x2] ss:$0 sm:$0xff]  ;;  %v11575_v24 = vld [vmem:[%s15005_s9 + $0x28] sm:$0xff]   ;;  %v11576_v54 = vld [vmem:[%s15005_s9 + $0x30] sm:$0xff]  }
0x14c4   :  { %8833 = vst.msk [vmem:[%s12318_s20 + $0x38] sm:$0xff] %vm8805_vm9, %v6831_v39  ;;  %v6838_v33 = vadd.f32 %v6822_v43, %v4197_v31  ;;  %7372 = vperm.xlu0 %10789, %v6822_v43  }
0x14c5   :  { %v6801_v59 = vpop.xlane.xlu1 %6800 }
0x14c6   :  { %8840 = vst.msk [vmem:[%s12318_s20 + $0x70] sm:$0xff] %vm8805_vm9, %v6838_v33  ;;  %v6823_v4 = vadd.f32 %v14519_v38, %v6801_v59 }
0x14c8   :  { %v6839_v51 = vadd.f32 %v6823_v4, %v4198_v3  ;;  %7377 = vperm.xlu0 %10789, %v6823_v4   ;;  %v11577_v3 = vld [vmem:[%s15005_s9 + $0x38] sm:$0xff]  }
0x14c9   :  { %v11037_v4 = vld [vmem:[#allocation32 + $0xb8] sm:$0xff]  }
0x14ca   :  { %8841 = vst.msk [vmem:[%s12318_s20 + $0x78] sm:$0xff] %vm8805_vm9, %v6839_v51  ;;  %s15192_s20 = sld [smem:[#allocation62_spill]] }
0x1538   :  { %v7802_v2 = vpop.f32.mrb[136].mxu0 }
0x1539   :  { %v7803_v58 = vadd.f32 %v9396_v23, %v7802_v2  ;;  %v10620_v19 = vpop.f32.mrb[137].mxu0 }
0x153a   :  { %v7805_v11 = vpop.f32.mrb[138].mxu0 }
0x153b   :  { %v7819_v40 = vmul.f32 %v14516_v25, %v7803_v58  ;;  %v7806_v52 = vadd.f32 %v9396_v23, %v7805_v11  ;;  %v10621_v37 = vpop.f32.mrb[139].mxu0  ;;  %v11571_v25 = vld [vmem:[%s15005_s9 + $0x8] sm:$0xff]  }
0x153d   :  { %v7820_v13 = vmul.f32 %v14524_v30, %v7806_v52  ;;  %v14606_v47 = vadd.f32 %v7819_v40, %v15163_v5  ;;  %v11572_v30 = vld [vmem:[%s15005_s9 + $0x10] sm:$0xff]   ;;  %v11039_v5 = vld [vmem:[#allocation34 + $0x8] sm:$0xff]  }
0x153f   :  { %v14609_v38 = vadd.f32 %v7820_v13, %v13833_v1  ;;  %v11031_v1 = vld [vmem:[#allocation32 + $0x88] sm:$0xff]   ;;  %v11038_v13 = vld [vmem:[#allocation34] sm:$0xff]  }
0x1540   :  { %10681 = vmatpush3.bf16.msra.mxu0 %v11038_v13 }
0x1541   :  { %v7823_v29 = vpack.c.bf16 %v14609_v38, %v14606_v47  ;;  %10682 = vmatprep.subr.bf16.mxu0 %v15063_v62 }
0x1543   :  { %10622 = vmatprep.subr.bf16.mxu1 %v7823_v29 }
0x1544   :  { %10623 = vmatpush3.bf16.msra.mxu1 %v7823_v29  ;;  %10683 = vmatpush3.bf16.msra.mxu0 %v11039_v5  ;;  %v11040_v29 = vld [vmem:[#allocation34 + $0x10] sm:$0xff]  }
0x1545   :  { %10660 = vmatprep.subr.bf16.mxu1 %v15063_v62  ;;  %10684 = vmatprep.subr.bf16.mxu0 %v15063_v62 }
0x1547   :  { %10625 = vmatmul.mubr.msk.bf16.vlgmr.msra.gmra.mrb[160].mxu1 %vm835_vm1, %v11571_v25  ;;  %v11042_v25 = vld [vmem:[#allocation34 + $0x20] sm:$0xff]  }
0x1548   :  { %10628 = vmatprep.mubr.msk.bf16.mxu1 %vm835_vm1, %v11572_v30  ;;  %10661 = vmatpush3.bf16.msra.mxu1 %v11030_v20  ;;  %v11041_v20 = vld [vmem:[#allocation34 + $0x18] sm:$0xff]   ;;  %v11043_v30 = vld [vmem:[#allocation34 + $0x28] sm:$0xff]  }
0x1549   :  { %10662 = vmatprep.subr.bf16.mxu1 %v15063_v62  ;;  %10685 = vmatpush3.bf16.msra.mxu0 %v11040_v29 }
0x154a   :  { %10686 = vmatprep.subr.bf16.mxu0 %v15063_v62 }
0x154c   :  { %10663 = vmatpush3.bf16.msra.mxu1 %v11031_v1  ;;  %v11044_v1 = vld [vmem:[#allocation34 + $0x30] sm:$0xff]  }
0x154d   :  { %10664 = vmatprep.subr.bf16.mxu1 %v15063_v62  ;;  %10687 = vmatpush3.bf16.msra.mxu0 %v11041_v20 }
0x154e   :  { %10688 = vmatprep.subr.bf16.mxu0 %v15063_v62 }
0x154f   :  { %10629 = vmatmul.mubr.msk.bf16.gmra.mrb[164].mxu1 %vm835_vm1, %v11573_v32  ;;  %v7308_v32 = vpop.permute.xlu1 %7307 }
0x1550   :  { %10632 = vmatprep.mubr.msk.bf16.mxu1 %vm835_vm1, %v11574_v16  ;;  %10665 = vmatpush3.bf16.msra.mxu1 %v11032_v60  ;;  %v11045_v60 = vld [vmem:[#allocation34 + $0x38] sm:$0xff]  }
0x1551   :  { %10666 = vmatprep.subr.bf16.mxu1 %v15063_v62  ;;  %10689 = vmatpush3.bf16.msra.mxu0 %v11042_v25 }
0x1552   :  { %10690 = vmatprep.subr.bf16.mxu0 %v15063_v62 }
0x1553   :  { %v7343_v16 = vpop.permute.xlu1 %7342 }
0x1554   :  { %10667 = vmatpush3.bf16.msra.mxu1 %v11033_v27  ;;  %v7303_v27 = vpop.permute.xlu0 %7302 }
0x1555   :  { %10668 = vmatprep.subr.bf16.mxu1 %v15063_v62  ;;  %10691 = vmatpush3.bf16.msra.mxu0 %v11043_v30 }
0x1556   :  { %10692 = vmatprep.subr.bf16.mxu0 %v15063_v62 }
0x1557   :  { %10633 = vmatmul.mubr.msk.bf16.gmra.mrb[168].mxu1 %vm835_vm1, %v11575_v24 }
0x1558   :  { %v8352_v42 = vpop.f32.mrb[140].mxu0  ;;  %10636 = vmatprep.mubr.msk.bf16.mxu1 %vm835_vm1, %v11576_v54  ;;  %10669 = vmatpush3.bf16.msra.mxu1 %v11034_v6  ;;  %v7313_v6 = vpop.permute.xlu1 %7312 }
0x1559   :  { %v8353_v63 = vadd.f32 %v9414_v50, %v8352_v42  ;;  %v10658_v31 = vpop.f32.mrb[141].mxu0  ;;  %10670 = vmatprep.subr.bf16.mxu1 %v15063_v62  ;;  %10693 = vmatpush3.bf16.msra.mxu0 %v11044_v1  ;;  %v7979_v1 = vrot.slane %v14609_v38, %v12538_v14 }
0x155a   :  { %v8355_v39 = vpop.f32.mrb[142].mxu0  ;;  %10694 = vmatprep.subr.bf16.mxu0 %v15063_v62 }
0x155b   :  { %v9423_v43 = vmul.f32 -1.442695, %v8353_v63  ;;  %v8356_v33 = vadd.f32 %v9414_v50, %v8355_v39  ;;  %v10659_v59 = vpop.f32.mrb[143].mxu0  ;;  %v7348_v50 = vpop.permute.xlu0 %7347 }
0x155c   :  { %10671 = vmatpush3.bf16.msra.mxu1 %v11035_v7  ;;  %v7318_v24 = vpop.permute.xlu1 %7317 }
0x155d   :  { %11526 = vpow2.f32 %v9423_v43  ;;  %v9424_v57 = vmul.f32 -1.442695, %v8356_v33  ;;  %10672 = vmatprep.subr.bf16.mxu1 %v15063_v62  ;;  %10695 = vmatpush3.bf16.msra.mxu0 %v11045_v60 }
0x155f   :  { %11528 = vpow2.f32 %v9424_v57  ;;  %10637 = vmatmul.mubr.msk.bf16.gmra.mrb[172].mxu1 %vm835_vm1, %v11577_v3  ;;  %v7353_v42 = vpop.permute.xlu0 %7352  ;;  %v7930_v3 = vrot.slane %v14606_v47, %v12538_v14 }
0x1560   :  { %10673 = vmatpush3.bf16.msra.mxu1 %v11036_v21  ;;  %10676 = vmatprep.mubr.msk.bf16.mxu1 %vm12129_vm0, %v15063_v62  ;;  %v7323_v54 = vpop.permute.xlu1 %7322 }
0x1561   :  { %10674 = vmatprep.subr.bf16.mxu1 %v15063_v62  ;;  %v7946_v29 = vrot.slane %v7930_v3, %v12538_v14 }
0x1563   :  { %v7358_v7 = vpop.permute.xlu0 %7357 }
0x1564   :  { %10675 = vmatpush3.bf16.msra.mxu1 %v11037_v4  ;;  %v7328_v31 = vpop.permute.xlu1 %7327 }
0x1565   :  { %10700 = vmatprep.subr.bf16.mxu1 %v15063_v62 }
0x1567   :  { %v11527_v51 = vpop.eup %11526  ;;  %v7363_v39 = vpop.permute.xlu0 %7362 }
0x1568   :  { %v8365_v23 = vadd.f32 1.0, %v11527_v51 }
0x1569   :  { %v11529_v2 = vpop.eup %11528 }
0x156a   :  { %11530 = vrcp.f32 %v8365_v23  ;;  %v8366_v58 = vadd.f32 1.0, %v11529_v2 }
0x156c   :  { %11532 = vrcp.f32 %v8366_v58 }
0x1574   :  { %v11531_v19 = vpop.eup %11530 }
0x1575   :  { %v8371_v40 = vmul.f32 %v11531_v19, %v8353_v63  ;;  %v9362_v63 = vld [vmem:[#allocation29 + $0x2] ss:$0 sm:$0xff] }
0x1576   :  { %v11533_v11 = vpop.eup %11532  ;;  %v7246_v43 = vadd.f32 %v14430_v10, %v9362_v63  ;;  %v7238_v59 = vadd.f32 %v9362_v63, %v14432_v53  ;;  %v7249_v21 = vadd.f32 %v14435_v55, %v9362_v63  ;;  %v7270_v57 = vadd.f32 %v9362_v63, %v14477_v15  ;;  %v7333_v55 = vpop.permute.xlu1 %7332 }
0x1577   :  { %v8372_v52 = vmul.f32 %v11533_v11, %v8356_v33  ;;  %v7241_v33 = vadd.f32 %v9362_v63, %v14437_v44  ;;  %v7262_v4 = vadd.f32 %v14457_v18, %v9362_v63  ;;  %v7254_v51 = vadd.f32 %v9362_v63, %v14461_v34  ;;  %v7368_v15 = vpop.permute.xlu0 %7367 }
0x1578   :  { %v7273_v23 = vadd.f32 %v9362_v63, %v14483_v45  ;;  %v7265_v10 = vadd.f32 %v14463_v26, %v9362_v63  ;;  %v7257_v44 = vadd.f32 %v9362_v63, %v14467_v28  ;;  %v7388_v58 = vmul.f32 %v7343_v16, %v7270_v57 }
0x1579   :  { %v8373_v37 = vpack.c.bf16 %v8372_v52, %v8371_v40  ;;  %v7381_v2 = vmul.f32 %v7308_v32, %v7241_v33  ;;  %v7923_v53 = vcombine.high %v14606_v47, %v14606_v47  ;;  %v7278_v19 = vadd.f32 %v14473_v17, %v9362_v63 }
0x157a   :  { %v7380_v11 = vmul.f32 %v7303_v27, %v7238_v59  ;;  %v7382_v40 = vmul.f32 %v7313_v6, %v7246_v43  ;;  %v7389_v18 = vmul.f32 %v7348_v50, %v7273_v23  ;;  %v7281_v34 = vadd.f32 %v14479_v9, %v9362_v63  ;;  %v7338_v25 = vpop.permute.xlu1 %7337  ;;  %v15166_v43 = vld [vmem:[#allocation97_spill] sm:$0xff] }
0x157b   :  { %10677 = vmatmul.mubr.bf16.vlgmr.msra.gmra.mrb[176].mxu1 %v8373_v37  ;;  %v7294_v45 = vadd.f32 %v14495_v41, %v9362_v63  ;;  %v7286_v52 = vadd.f32 %v9362_v63, %v14497_v46  ;;  %v7938_v26 = vcombine.high %v7930_v3, %v7930_v3  ;;  %v7297_v28 = vadd.f32 %v14499_v61, %v9362_v63  ;;  %v7373_v30 = vpop.permute.xlu0 %7372 }
0x157c   :  { %10716 = vmatprep.mubr.msk.bf16.mxu1 %vm12129_vm0, %v15063_v62  ;;  %v7289_v37 = vadd.f32 %v9362_v63, %v14501_v49  ;;  %v14669_v47 = vadd.f32 %v7381_v2, %v13923_v35  ;;  %v7383_v13 = vmul.f32 %v7318_v24, %v7249_v21  ;;  %v14672_v17 = vadd.f32 %v7388_v58, %v13926_v12  ;;  %v15165_v63 = vld [vmem:[#allocation101_spill] sm:$0xff]  ;;  %v15168_v21 = vld [vmem:[#allocation98_spill] sm:$0xff] }
0x157d   :  { %v7390_v5 = vmul.f32 %v7353_v42, %v7278_v19  ;;  %v7937_v9 = vrot.slane %v7923_v53, %v12538_v14  ;;  %v14677_v41 = vadd.f32 %v7380_v11, %v13930_v56  ;;  %v7398_v46 = vadd.f32 %v7382_v40, %v13933_v0  ;;  %v15171_v53 = vld [vmem:[#allocation100_spill] sm:$0xff] }
0x157e   :  { %v14681_v61 = vadd.f32 %v7389_v18, %v13938_v22  ;;  %v7384_v49 = vmul.f32 %v7323_v54, %v7254_v51  ;;  %v7391_v35 = vmul.f32 %v7358_v7, %v7281_v34  ;;  %v7385_v20 = vmul.f32 %v7328_v31, %v7257_v44  ;;  %v15170_v44 = vld [vmem:[#allocation106_spill] sm:$0xff] }
0x157f   :  { %v7960_v12 = vrot.slane %v7938_v26, %v12538_v14  ;;  %v7399_v60 = vadd.f32 %v7383_v13, %v13941_v8  ;;  %v7392_v32 = vmul.f32 %v7363_v39, %v7286_v52  ;;  %v7386_v56 = vmul.f32 %v7333_v55, %v7262_v4  ;;  %v15164_v8 = vld [vmem:[#allocation86_spill] sm:$0xff]  ;;  %v7378_v3 = vpop.permute.xlu0 %7377 }
0x1580   :  { %v7393_v16 = vmul.f32 %v7368_v15, %v7289_v37  ;;  %v14688_v0 = vadd.f32 %v7390_v5, %v13948_v48  ;;  %v7968_v22 = vcombine.high %v7946_v29, %v7946_v29  ;;  %v14691_v27 = vrot.slane %v7937_v9, %v12538_v14  ;;  %v15169_v4 = vld [vmem:[#allocation66_spill] sm:$0xff] }
0x1581   :  { %v7939_v6 = vcombine.high %v7937_v9, %v7937_v9  ;;  %v14694_v50 = vadd.f32 %v7384_v49, %v13951_v36  ;;  %v7972_v24 = vcombine.high %v14609_v38, %v14609_v38  ;;  %v7387_v42 = vmul.f32 %v7338_v25, %v7265_v10  ;;  %v15167_v36 = vld [vmem:[#allocation105_spill] sm:$0xff] }
0x1582   :  { %v7394_v54 = vmul.f32 %v7373_v30, %v7294_v45  ;;  %v14699_v7 = vadd.f32 %v7391_v35, %v15164_v8  ;;  %v14702_v31 = vadd.f32 %v7385_v20, %v15165_v63  ;;  %v7970_v48 = vcombine.high %v7960_v12, %v7960_v12  ;;  %v15175_v63 = vld [vmem:[#allocation95_spill] sm:$0xff] }
0x1583   :  { %v14705_v39 = vrot.slane %v7979_v1, %v12538_v14  ;;  %v14708_v33 = vadd.f32 %v7392_v32, %v15166_v43  ;;  %v14711_v59 = vadd.f32 %v7386_v56, %v15167_v36  ;;  %v14714_v38 = vadd.f32 %v7393_v16, %v15168_v21  ;;  %v15172_v32 = vld [vmem:[#allocation93_spill] sm:$0xff]  ;;  %v15176_v21 = vld [vmem:[#allocation91_spill] sm:$0xff] }
0x1584   :  { %v7987_v57 = vcombine.high %v7979_v1, %v7979_v1  ;;  %v8032_v51 = vrot.slane %v7968_v22, %v15169_v4  ;;  %v8024_v23 = vrot.slane %v7946_v29, %v15169_v4  ;;  %v7969_v2 = vcombine.high %v14691_v27, %v14691_v27 }
0x1585   :  { %v7967_v10 = vrot.slane %v7939_v6, %v12538_v14  ;;  %v14722_v58 = vadd.f32 %v7387_v42, %v15170_v44  ;;  %v14725_v55 = vadd.f32 %v7394_v54, %v15171_v53  ;;  %v8028_v19 = vrot.slane %v7960_v12, %v15169_v4 }
0x1586   :  { %v7986_v11 = vrot.slane %v7972_v24, %v12538_v14  ;;  %v8036_v34 = vrot.slane %v7970_v48, %v15169_v4  ;;  %v8040_v45 = vrot.slane %v14691_v27, %v15169_v4  ;;  %v8017_v52 = vcombine.high %v14705_v39, %v14705_v39  ;;  %v15173_v27 = vld [vmem:[#allocation102_spill] sm:$0xff]  ;;  %v15174_v24 = vld [vmem:[#allocation89_spill] sm:$0xff] }
0x1587   :  { %v7395_v26 = vmul.f32 %v7378_v3, %v7297_v28  ;;  %v8056_v5 = vrot.slane %v14705_v39, %v15169_v4  ;;  %v14737_v29 = vrot.slane %v7987_v57, %v12538_v14  ;;  %v8048_v20 = vrot.slane %v7969_v2, %v15169_v4 }
0x1588   :  { %v7971_v25 = vcombine.high %v7967_v10, %v7967_v10  ;;  %v8044_v1 = vrot.slane %v7967_v10, %v15169_v4  ;;  %v14743_v28 = vrot.slane %v7986_v11, %v12538_v14  ;;  %v14747_v22 = vrot.slane %v8017_v52, %v15169_v4 }
0x1589   :  { %v14750_v6 = vadd.f32 %v7395_v26, %v15173_v27  ;;  %v8019_v54 = vcombine.high %v14737_v29, %v14737_v29 }
0x158a   :  { %v8052_v43 = vrot.slane %v7971_v25, %v15169_v4 }
0x161a   :  { %v10626_v15 = vpop.f32.mrb[160].mxu1 }
0x161b   :  { %v8103_v40 = vmul.f32 %v10626_v15, %v8032_v51  ;;  %v7858_v18 = vpop.f32.mrb[161].mxu1  ;;  %v8018_v51 = vcombine.high %v14743_v28, %v14743_v28 }
0x161c   :  { %v8101_v37 = vmul.f32 %v8024_v23, %v7858_v18  ;;  %v10627_v13 = vpop.f32.mrb[162].mxu1  ;;  %v8068_v18 = vrot.slane %v8019_v54, %v15169_v4 }
0x161d   :  { %v8119_v9 = vsub.f32 %v8103_v40, %v7398_v46  ;;  %v8104_v49 = vmul.f32 %v10627_v13, %v8036_v34  ;;  %v7861_v35 = vpop.f32.mrb[163].mxu1  ;;  %v7988_v46 = vcombine.high %v7986_v11, %v7986_v11  ;;  %v8080_v54 = vrot.slane %v8018_v51, %v15169_v4 }
0x161e   :  { %v8117_v30 = vsub.f32 %v8101_v37, %v14677_v41  ;;  %v8102_v12 = vmul.f32 %v8028_v19, %v7861_v35 }
0x161f   :  { %v8135_v56 = vmul.f32 %v8119_v9, %v15172_v32  ;;  %v8120_v16 = vsub.f32 %v8104_v49, %v7399_v60  ;;  %v8060_v60 = vrot.slane %v14737_v29, %v15169_v4  ;;  %v14766_v53 = vrot.slane %v7988_v46, %v12538_v14 }
0x1620   :  { %v8133_v42 = vmul.f32 %v8117_v30, %v15174_v24  ;;  %v8118_v41 = vsub.f32 %v8102_v12, %v14669_v47  ;;  %v8072_v47 = vrot.slane %v14743_v28, %v15169_v4  ;;  %v15177_v30 = vld [vmem:[#allocation104_spill] sm:$0xff] }
0x1621   :  { %v8161_v8 = vrot.slane %v8135_v56, 4  ;;  %v8136_v48 = vmul.f32 %v8120_v16, %v15175_v63  ;;  %v15178_v16 = vld [vmem:[#allocation99_spill] sm:$0xff] }
0x1622   :  { %v8149_v36 = vrot.slane %v8133_v42, 4  ;;  %v8134_v57 = vmul.f32 %v8118_v41, %v15176_v21  ;;  %v10630_v3 = vpop.f32.mrb[164].mxu1  ;;  %v15180_v63 = vld [vmem:[#allocation103_spill] sm:$0xff] }
0x1623   :  { %v8162_v23 = vadd.f32 %v8161_v8, %v8135_v56  ;;  %v8167_v2 = vrot.slane %v8136_v48, 4  ;;  %v8107_v10 = vmul.f32 %v10630_v3, %v8048_v20  ;;  %v7874_v44 = vpop.f32.mrb[165].mxu1  ;;  %v8020_v3 = vcombine.high %v14766_v53, %v14766_v53 }
0x1624   :  { %v8150_v15 = vadd.f32 %v8149_v36, %v8133_v42  ;;  %v8155_v19 = vrot.slane %v8134_v57, 4  ;;  %v8105_v11 = vmul.f32 %v8040_v45, %v7874_v44  ;;  %v10631_v40 = vpop.f32.mrb[166].mxu1  ;;  %v15179_v42 = vld [vmem:[#allocation108_spill] sm:$0xff] }
0x1625   :  { %v8163_v34 = vrot.slane %v8162_v23, 2  ;;  %v8168_v52 = vadd.f32 %v8167_v2, %v8136_v48  ;;  %v8123_v26 = vsub.f32 %v8107_v10, %v14711_v59  ;;  %v8108_v37 = vmul.f32 %v10631_v40, %v8052_v43  ;;  %v7877_v13 = vpop.f32.mrb[167].mxu1 }
0x1626   :  { %v8151_v9 = vrot.slane %v8150_v15, 2  ;;  %v8156_v49 = vadd.f32 %v8155_v19, %v8134_v57  ;;  %v8121_v35 = vsub.f32 %v8105_v11, %v14694_v50  ;;  %v8106_v20 = vmul.f32 %v8044_v1, %v7877_v13 }
0x1627   :  { %v8164_v25 = vadd.f32 %v8163_v34, %v8162_v23  ;;  %v8169_v14 = vrot.slane %v8168_v52, 2  ;;  %v8139_v12 = vmul.f32 %v8123_v26, %v15177_v30  ;;  %v8124_v45 = vsub.f32 %v8108_v37, %v14722_v58 }
0x1628   :  { %v8152_v32 = vadd.f32 %v8151_v9, %v8150_v15  ;;  %v8157_v56 = vrot.slane %v8156_v49, 2  ;;  %v8137_v46 = vmul.f32 %v8121_v35, %v15178_v16  ;;  %v8122_v27 = vsub.f32 %v8106_v20, %v14702_v31 }
0x1629   :  { %v8170_v59 = vadd.f32 %v8169_v14, %v8168_v52  ;;  %v8185_v24 = vrot.slane %v8139_v12, 4  ;;  %v8140_v41 = vmul.f32 %v8124_v45, %v15179_v42  ;;  %v8165_v36 = vrot.slane %v8164_v25, 1  ;;  %v15181_v45 = vld [vmem:[#allocation94_spill] sm:$0xff] }
0x162a   :  { %v8153_v50 = vrot.slane %v8152_v32, 1  ;;  %v8158_v1 = vadd.f32 %v8157_v56, %v8156_v49  ;;  %v8173_v8 = vrot.slane %v8137_v46, 4  ;;  %v8138_v48 = vmul.f32 %v8122_v27, %v15180_v63  ;;  %v10634_v43 = vpop.f32.mrb[168].mxu1  ;;  %v15182_v56 = vld [vmem:[#allocation90_spill] sm:$0xff] }
0x162b   :  { %v8186_v58 = vadd.f32 %v8185_v24, %v8139_v12  ;;  %v8191_v21 = vrot.slane %v8140_v41, 4  ;;  %v7890_v57 = vpop.f32.mrb[169].mxu1  ;;  %v8171_v31 = vrot.slane %v8170_v59, 1  ;;  %v8111_v11 = vmul.f32 %v10634_v43, %v14747_v22 }
0x162c   :  { %v8159_v23 = vrot.slane %v8158_v1, 1  ;;  %v8174_v2 = vadd.f32 %v8173_v8, %v8137_v46  ;;  %v8179_v10 = vrot.slane %v8138_v48, 4  ;;  %v10635_v44 = vpop.f32.mrb[170].mxu1  ;;  %v8154_v15 = vadd.f32 %v8153_v50, %v8152_v32 }
0x162d   :  { %v8187_v51 = vrot.slane %v8186_v58, 2  ;;  %v8192_v19 = vadd.f32 %v8191_v21, %v8140_v41  ;;  %v7893_v40 = vpop.f32.mrb[171].mxu1  ;;  %v8109_v37 = vmul.f32 %v8056_v5, %v7890_v57  ;;  %v8127_v9 = vsub.f32 %v8111_v11, %v14688_v0 }
0x162e   :  { %v8160_v34 = vadd.f32 %v8159_v23, %v8158_v1  ;;  %v8175_v52 = vrot.slane %v8174_v2, 2  ;;  %v8180_v26 = vadd.f32 %v8179_v10, %v8138_v48  ;;  %v8112_v49 = vmul.f32 %v10635_v44, %v8068_v18  ;;  %v15185_v23 = vld [vmem:[#allocation110_spill] sm:$0xff] }
0x162f   :  { %v8188_v13 = vadd.f32 %v8187_v51, %v8186_v58  ;;  %v8076_v35 = vrot.slane %v14766_v53, %v15169_v4  ;;  %v8193_v14 = vrot.slane %v8192_v19, 2  ;;  %v8125_v30 = vsub.f32 %v8109_v37, %v14672_v17 }
0x1630   :  { %v14788_v20 = vsel %vm3215_vm2, %v8160_v34, %v8154_v15  ;;  %v8181_v22 = vrot.slane %v8180_v26, 2  ;;  %v14791_v12 = vadd.f32 %v8165_v36, %v8164_v25  ;;  %v8143_v32 = vmul.f32 %v8127_v9, %v15181_v45  ;;  %v15183_v25 = vld [vmem:[#allocation96_spill] sm:$0xff]  ;;  %v15187_v34 = vld [vmem:[#allocation111_spill] sm:$0xff] }
0x1631   :  { %v8128_v39 = vsub.f32 %v8112_v49, %v14699_v7  ;;  %v8084_v5 = vrot.slane %v8020_v3, %v15169_v4  ;;  %v14796_v0 = vadd.f32 %v8171_v31, %v8170_v59  ;;  %v8176_v18 = vadd.f32 %v8175_v52, %v8174_v2 }
0x1632   :  { %v8141_v53 = vmul.f32 %v8125_v30, %v15182_v56  ;;  %v8110_v16 = vmul.f32 %v8060_v60, %v7893_v40  ;;  %v10638_v46 = vpop.f32.mrb[172].mxu1  ;;  %v8189_v27 = vrot.slane %v8188_v13, 1  ;;  %v8209_v17 = vrot.slane %v8143_v32, 4  ;;  %v15188_v30 = vld [vmem:[#allocation109_spill] sm:$0xff] }
0x1633   :  { %v8144_v24 = vmul.f32 %v8128_v39, %v15183_v25  ;;  %v8115_v42 = vmul.f32 %v10638_v46, %v8080_v54  ;;  %v7906_v41 = vpop.f32.mrb[173].mxu1  ;;  %v14803_v50 = vadd.f32 %v8193_v14, %v8192_v19  ;;  %v8182_v7 = vadd.f32 %v8181_v22, %v8180_v26  ;;  %v15184_v54 = vld [vmem:[#allocation92_spill] sm:$0xff] }
0x1634   :  { %v8197_v1 = vrot.slane %v8141_v53, 4  ;;  %v8126_v59 = vsub.f32 %v8110_v16, %v14681_v61  ;;  %v10639_v8 = vpop.f32.mrb[174].mxu1  ;;  %v8210_v63 = vadd.f32 %v8209_v17, %v8143_v32  ;;  %v8113_v29 = vmul.f32 %v8072_v47, %v7906_v41  ;;  %v15186_v47 = vld [vmem:[#allocation107_spill] sm:$0xff] }
0x1635   :  { %v8215_v48 = vrot.slane %v8144_v24, 4  ;;  %v8131_v43 = vsub.f32 %v8115_v42, %v14725_v55  ;;  %v7909_v60 = vpop.f32.mrb[175].mxu1  ;;  %v8177_v36 = vrot.slane %v8176_v18, 1  ;;  %v8116_v57 = vmul.f32 %v10639_v8, %v8084_v5 }
0x1636   :  { %v8198_v58 = vadd.f32 %v8197_v1, %v8141_v53  ;;  %v8142_v21 = vmul.f32 %v8126_v59, %v15184_v54  ;;  %v8211_v3 = vrot.slane %v8210_v63, 2  ;;  %v8129_v61 = vsub.f32 %v8113_v29, %v14708_v33 }
0x1637   :  { %v8216_v31 = vadd.f32 %v8215_v48, %v8144_v24  ;;  %v8147_v2 = vmul.f32 %v8131_v43, %v15185_v23  ;;  %v8132_v55 = vsub.f32 %v8116_v57, %v14750_v6  ;;  %v8114_v15 = vmul.f32 %v8076_v35, %v7909_v60 }
0x1638   :  { %v8199_v10 = vrot.slane %v8198_v58, 2  ;;  %v8203_v44 = vrot.slane %v8142_v21, 4  ;;  %v8183_v51 = vrot.slane %v8182_v7, 1  ;;  %v8145_v19 = vmul.f32 %v8129_v61, %v15186_v47 }
0x1639   :  { %v8217_v4 = vrot.slane %v8216_v31, 2  ;;  %v8233_v28 = vrot.slane %v8147_v2, 4  ;;  %v8148_v52 = vmul.f32 %v8132_v55, %v15187_v34  ;;  %v8130_v26 = vsub.f32 %v8114_v15, %v14714_v38 }
0x163a   :  { %v8200_v11 = vadd.f32 %v8199_v10, %v8198_v58  ;;  %v8204_v40 = vadd.f32 %v8203_v44, %v8142_v21  ;;  %v8212_v37 = vadd.f32 %v8211_v3, %v8210_v63  ;;  %v8221_v33 = vrot.slane %v8145_v19, 4 }
0x163b   :  { %v8218_v9 = vadd.f32 %v8217_v4, %v8216_v31  ;;  %v8234_v49 = vadd.f32 %v8233_v28, %v8147_v2  ;;  %v8239_v22 = vrot.slane %v8148_v52, 4  ;;  %v8146_v6 = vmul.f32 %v8130_v26, %v15188_v30  ;;  %v9426_v4 = vld [vmem:[%s15060_s3 + $0x2] ss:$0 sm:$0xff] }
0x163c   :  { %v8205_v14 = vrot.slane %v8204_v40, 2  ;;  %v8190_v35 = vadd.f32 %v8189_v27, %v8188_v13  ;;  %v8178_v45 = vadd.f32 %v8177_v36, %v8176_v18  ;;  %v8201_v32 = vrot.slane %v8200_v11, 1  ;;  %v11046_v30 = vld [vmem:[%s15189_s6] sm:$0xff]  }
0x163d   :  { %v8235_v39 = vrot.slane %v8234_v49, 2  ;;  %v8222_v5 = vadd.f32 %v8221_v33, %v8145_v19  ;;  %v8184_v56 = vadd.f32 %v8183_v51, %v8182_v7  ;;  %v8240_v16 = vadd.f32 %v8239_v22, %v8148_v52  ;;  %v15191_v33 = vld [vmem:[#allocation113_spill] sm:$0xff]  ;;  %10701 = vmatpush3.bf16.msra.mxu1 %v11046_v30 }
0x163e   :  { %v8206_v53 = vadd.f32 %v8205_v14, %v8204_v40  ;;  %v8227_v46 = vrot.slane %v8146_v6, 4  ;;  %v8213_v17 = vrot.slane %v8212_v37, 1  ;;  %v8219_v25 = vrot.slane %v8218_v9, 1  ;;  %10702 = vmatprep.subr.bf16.mxu1 %v15063_v62 }
0x163f   :  { %v8223_v38 = vrot.slane %v8222_v5, 2  ;;  %v8195_v24 = vrot.slane %v14803_v50, 1  ;;  %v8241_v41 = vrot.slane %v8240_v16, 2  ;;  %v8505_v13 = vsel %vm3217_vm3, %v14791_v12, %v14788_v20 }
0x1640   :  { %v8207_v42 = vrot.slane %v8206_v53, 1  ;;  %v8228_v1 = vadd.f32 %v8227_v46, %v8146_v6  ;;  %v8202_v18 = vadd.f32 %v8201_v32, %v8200_v11  ;;  %v8236_v27 = vadd.f32 %v8235_v39, %v8234_v49  ;;  %v11047_v6 = vld [vmem:[%s15189_s6 + $0x8] sm:$0xff]   ;;  %v11050_v32 = vld [vmem:[%s15189_s6 + $0x20] sm:$0xff]  }
0x1641   :  { %v8224_v59 = vadd.f32 %v8223_v38, %v8222_v5  ;;  %v8506_v7 = vsel %vm3219_vm4, %v14796_v0, %v8505_v13  ;;  %v8242_v63 = vadd.f32 %v8241_v41, %v8240_v16  ;;  %v8214_v29 = vadd.f32 %v8213_v17, %v8212_v37  ;;  %10703 = vmatpush3.bf16.msra.mxu1 %v11047_v6  ;;  %v11051_v39 = vld [vmem:[%s15189_s6 + $0x28] sm:$0xff]   ;;  %v11052_v5 = vld [vmem:[%s15189_s6 + $0x30] sm:$0xff]  }
0x1642   :  { %v8208_v8 = vadd.f32 %v8207_v42, %v8206_v53  ;;  %v8229_v48 = vrot.slane %v8228_v1, 2  ;;  %v8507_v43 = vsel %vm3221_vm5, %v8178_v45, %v8506_v7  ;;  %v8196_v36 = vadd.f32 %v8195_v24, %v14803_v50  ;;  %10704 = vmatprep.subr.bf16.mxu1 %v15063_v62  ;;  %v11049_v45 = vld [vmem:[%s15189_s6 + $0x18] sm:$0xff]   ;;  %v9435_v53 = vld [vmem:[%s15192_s20] ss:$0 sm:$0xff] }
0x1643   :  { %v8225_v60 = vrot.slane %v8224_v59, 1  ;;  %v8508_v58 = vsel %vm3223_vm6, %v8184_v56, %v8507_v43  ;;  %v8220_v54 = vadd.f32 %v8219_v25, %v8218_v9  ;;  %v8237_v57 = vrot.slane %v8236_v27, 1  ;;  %v15190_v9 = vld [vmem:[#allocation112_spill] sm:$0xff]  ;;  %v11053_v56 = vld [vmem:[%s15189_s6 + $0x38] sm:$0xff]  }
0x1644   :  { %v8511_v20 = vsel %vm3215_vm2, %v8208_v8, %v8202_v18  ;;  %v8230_v12 = vadd.f32 %v8229_v48, %v8228_v1  ;;  %v8509_v21 = vsel %vm3225_vm7, %v8190_v35, %v8508_v58  ;;  %v8243_v2 = vrot.slane %v8242_v63, 1  ;;  %v11048_v35 = vld [vmem:[%s15189_s6 + $0x10] sm:$0xff]   ;;  %v9446_v48 = vld [vmem:[%s15193_s15] ss:$0 sm:$0xff] }
0x1645   :  { %v8226_v0 = vadd.f32 %v8225_v60, %v8224_v59  ;;  %v8510_v3 = vsel %vm3227_vm8, %v8196_v36, %v8509_v21  ;;  %v8512_v31 = vsel %vm3217_vm3, %v8214_v29, %v8511_v20  ;;  %v8238_v44 = vadd.f32 %v8237_v57, %v8236_v27  ;;  %10705 = vmatpush3.bf16.msra.mxu1 %v11048_v35 }
0x1646   :  { %v8231_v23 = vrot.slane %v8230_v12, 1  ;;  %v8513_v61 = vsel %vm3219_vm4, %v8220_v54, %v8512_v31  ;;  %v8244_v55 = vadd.f32 %v8243_v2, %v8242_v63  ;;  %10706 = vmatprep.subr.bf16.mxu1 %v15063_v62 }
0x1647   :  { %v8514_v50 = vsel %vm3221_vm5, %v8226_v0, %v8513_v61 }
0x1648   :  { %v8232_v10 = vadd.f32 %v8231_v23, %v8230_v12  ;;  %v9457_v23 = vld [vmem:[%s15194_s18] ss:$0 sm:$0xff] }
0x1649   :  { %10707 = vmatpush3.bf16.msra.mxu1 %v11049_v45 }
0x164a   :  { %v8515_v15 = vsel %vm3223_vm6, %v8232_v10, %v8514_v50  ;;  %10708 = vmatprep.subr.bf16.mxu1 %v15063_v62 }
0x164b   :  { %v8516_v51 = vsel %vm3225_vm7, %v8238_v44, %v8515_v15 }
0x164c   :  { %v8517_v28 = vsel %vm3227_vm8, %v8244_v55, %v8516_v51  ;;  %v9458_v51 = vld [vmem:[#allocation2] ss:$0 sm:$0xff] }
0x164d   :  { %10709 = vmatpush3.bf16.msra.mxu1 %v11050_v32 }
0x164e   :  { %v8481_v47 = vpop.f32.mrb[176].mxu1  ;;  %10710 = vmatprep.subr.bf16.mxu1 %v15063_v62 }
0x164f   :  { %v8482_v19 = vadd.f32 %v9426_v4, %v8481_v47  ;;  %v10678_v11 = vpop.f32.mrb[177].mxu1 }
0x1650   :  { %v8484_v40 = vpop.f32.mrb[178].mxu1 }
0x1651   :  { %v8520_v34 = vmul.f32 %v8510_v3, %v8482_v19  ;;  %v8485_v52 = vadd.f32 %v9426_v4, %v8484_v40  ;;  %v10679_v26 = vpop.f32.mrb[179].mxu1  ;;  %10711 = vmatpush3.bf16.msra.mxu1 %v11051_v39  ;;  %v11578_v19 = vld [vmem:[%s15126_s5] sm:$0xff] }
0x1652   :  { %10712 = vmatprep.subr.bf16.mxu1 %v15063_v62 }
0x1653   :  { %v8521_v37 = vmul.f32 %v8517_v28, %v8485_v52  ;;  %v8522_v49 = vadd.f32 %v8520_v34, %v15190_v9  ;;  %v11579_v52 = vld [vmem:[%s15126_s5 + $0x8] sm:$0xff] }
0x1655   :  { %v8523_v14 = vadd.f32 %v8521_v37, %v15191_v33  ;;  %10713 = vmatpush3.bf16.msra.mxu1 %v11052_v5 }
0x1656   :  { %10714 = vmatprep.subr.bf16.mxu1 %v15063_v62 }
0x1657   :  { %v8524_v22 = vpack.c.bf16 %v8523_v14, %v8522_v49 }
0x1659   :  { %10697 = vmatmul.mubr.bf16.vlgmr.msra.gmra.mrb[144].mxu0 %v8524_v22  ;;  %10715 = vmatpush3.bf16.msra.mxu1 %v11053_v56 }
0x172c   :  { %v8630_v16 = vpop.f32.mrb[144].mxu0 }
0x172d   :  { %v8631_v46 = vadd.f32 %v9435_v53, %v8630_v16  ;;  %v10698_v17 = vpop.f32.mrb[145].mxu0 }
0x172e   :  { %v8633_v25 = vpop.f32.mrb[146].mxu0 }
0x172f   :  { %v9444_v38 = vmul.f32 -1.442695, %v8631_v46  ;;  %v8634_v24 = vadd.f32 %v9435_v53, %v8633_v25  ;;  %v10699_v42 = vpop.f32.mrb[147].mxu0 }
0x1731   :  { %11534 = vpow2.f32 %v9444_v38  ;;  %v9445_v41 = vmul.f32 -1.442695, %v8634_v24 }
0x1733   :  { %11536 = vpow2.f32 %v9445_v41 }
0x173b   :  { %v11535_v1 = vpop.eup %11534 }
0x173c   :  { %v8643_v13 = vadd.f32 1.0, %v11535_v1 }
0x173d   :  { %v11537_v18 = vpop.eup %11536 }
0x173e   :  { %11538 = vrcp.f32 %v8643_v13  ;;  %v8644_v27 = vadd.f32 1.0, %v11537_v18 }
0x1740   :  { %11540 = vrcp.f32 %v8644_v27 }
0x1748   :  { %v11539_v62 = vpop.eup %11538 }
0x1749   :  { %v8649_v7 = vmul.f32 %v11539_v62, %v8631_v46 }
0x174a   :  { %v11541_v59 = vpop.eup %11540 }
0x174b   :  { %v8650_v8 = vmul.f32 %v11541_v59, %v8634_v24 }
0x174d   :  { %v8651_v63 = vpack.c.bf16 %v8650_v8, %v8649_v7 }
0x174f   :  { %10717 = vmatmul.mubr.bf16.vlgmr.msra.gmra.mrb[180].mxu1 %v8651_v63 }
0x1822   :  { %v8757_v43 = vpop.f32.mrb[180].mxu1 }
0x1823   :  { %v8758_v29 = vadd.f32 %v9446_v48, %v8757_v43  ;;  %v10718_v60 = vpop.f32.mrb[181].mxu1 }
0x1824   :  { %v8760_v36 = vpop.f32.mrb[182].mxu1 }
0x1825   :  { %v9455_v58 = vmul.f32 -1.442695, %v8758_v29  ;;  %v8761_v54 = vadd.f32 %v9446_v48, %v8760_v36  ;;  %v10719_v20 = vpop.f32.mrb[183].mxu1 }
0x1827   :  { %11542 = vpow2.f32 %v9455_v58  ;;  %v9456_v12 = vmul.f32 -1.442695, %v8761_v54 }
0x1829   :  { %11544 = vpow2.f32 %v9456_v12 }
0x1831   :  { %v11543_v21 = vpop.eup %11542 }
0x1832   :  { %v8770_v57 = vadd.f32 1.0, %v11543_v21 }
0x1833   :  { %v11545_v0 = vpop.eup %11544 }
0x1834   :  { %11546 = vrcp.f32 %v8770_v57  ;;  %v8771_v3 = vadd.f32 1.0, %v11545_v0 }
0x1836   :  { %11548 = vrcp.f32 %v8771_v3 }
0x183e   :  { %v11547_v31 = vpop.eup %11546 }
0x183f   :  { %v8776_v2 = vmul.f32 %v11547_v31, %v8758_v29 }
0x1840   :  { %v11549_v61 = vpop.eup %11548 }
0x1841   :  { %v8777_v50 = vmul.f32 %v11549_v61, %v8761_v54  ;;  %v8785_v10 = vmul.f32 %v9457_v23, %v8776_v2 }
0x1843   :  { %v8788_v44 = vsel %vm8787_vm10, %v8785_v10, 0.0  ;;  %v8786_v55 = vmul.f32 %v9457_v23, %v8777_v50 }
0x1844   :  { %8789 = vadd.xlane.f32.xlu1 %v8788_v44 }
0x1845   :  { %v8791_v15 = vsel %vm8787_vm10, %v8786_v55, 0.0 }
0x1846   :  { %8792 = vadd.xlane.f32.xlu0 %v8791_v15 }
0x18d1   :  { %v8790_v4 = vpop.xlane.xlu1 %8789 }
0x18d2   :  { %v8801_v28 = vadd.f32 %v9458_v51, %v8790_v4 }
0x18d3   :  { %v8793_v47 = vpop.xlane.xlu0 %8792 }
0x18d4   :  { %v8803_v11 = vmul.f32 %v11578_v19, %v8801_v28  ;;  %v8802_v40 = vadd.f32 %v9458_v51, %v8793_v47 }
0x18d6   :  { %v8806_v34 = vsel %vm8805_vm9, %v8803_v11, 0.0  ;;  %v8804_v26 = vmul.f32 %v11579_v52, %v8802_v40 }
0x18d7   :  { %v8807_v37 = vrot.slane %v8806_v34, 4 }
0x18d8   :  { %v8813_v9 = vsel %vm8805_vm9, %v8804_v26, 0.0 }
0x18d9   :  { %v8808_v49 = vadd.f32 %v8807_v37, %v8806_v34  ;;  %v8814_v33 = vrot.slane %v8813_v9, 4 }
0x18db   :  { %v8809_v14 = vrot.slane %v8808_v49, 2  ;;  %v8815_v22 = vadd.f32 %v8814_v33, %v8813_v9 }
0x18dd   :  { %v8810_v30 = vadd.f32 %v8809_v14, %v8808_v49  ;;  %v8816_v6 = vrot.slane %v8815_v22, 2 }
0x18df   :  { %v8811_v35 = vrot.slane %v8810_v30, 1  ;;  %v8817_v45 = vadd.f32 %v8816_v6, %v8815_v22 }
0x18e1   :  { %v8818_v32 = vrot.slane %v8817_v45, 1  ;;  %v8812_v39 = vadd.f32 %v8811_v35, %v8810_v30 }
0x18e3   :  { %v8819_v5 = vadd.f32 %v8818_v32, %v8817_v45 }
0x18e5   :  { %v8821_v56 = vsel %vm8820_vm11, %v8812_v39, %v8819_v5 }
0x18e6   :  { %8844 = vst.msk [vmem:[%s12323_s4] sm:$0x3] %vm8843_vm12, %v8821_v56 }
0x18e7   :  { %8857 = vsyncpa [#allocation4], 1 }
0x18e8   :  { %8858 = vsyncpa [#allocation6], 1 }
0x18e9   :  { %8859 = vsyncpa [#allocation9], 1 }
0x18ea   :  { %8860 = vsyncpa [#allocation12], 1 }
0x18eb   :  { %8861 = vsyncpa [#allocation15], 1 }
0x18ec   :  { %8862 = vsyncpa [#allocation18], 1 }
0x18ed   :  { %8863 = vsyncpa [#allocation21], 1 }
0x18ee   :  { %8864 = vsyncpa [#allocation24], 1 }
0x18ef   :  { %8865 = vsyncpa [#allocation27], 1 }
0x18f0   :  { %8866 = vsyncpa [#allocation30], 1 }
0x18f1   :  { %8867 = vsyncpa [#allocation33], 1 }

</bundles_post_ra>
